<compile_context>
chip_gen: v5e
topology: v5e:2x2
jax: 0.10.0
libtpu: 0.0.40
codegen_flags: <defaults>
</compile_context>

<pallas_src>
import functools

import jax
import jax.numpy as jnp
from jax.experimental import pallas as pl
from jax.experimental.pallas import tpu as pltpu

MATMUL_DTYPE = jnp.bfloat16  # MXU input dtype; accumulation / bias / ReLU stay f32.


# ---------------------------------------------------------------------------
# Single fused kernel.
#   xp_ref   : (N, H+2, W+2, Cin) f32   zero-padded NHWC input
#   w1_ref   : (9*Cin, 64)        bf16  conv1 weight, rows ordered (kh, kw, ci)
#   b1_ref   : (1, 64)            f32
#   w2_ref   : (3, 3*64, 64)      bf16  conv2 weight, per-kh rows ordered (kw, ci)
#   b2_ref   : (1, 64)            f32
#   bf1_ref  : (1, 256)           f32
#   wf2_ref  : (256, A)           bf16
#   bf2_ref  : (1, A)             f32
#   wf1_hbm  : (H, W*64, 256)     bf16  fc1 weight, left in HBM (pl.ANY)
#   o_ref    : (N, A)             f32
#   scratch  : pad_ref (N,H+2,W+2,64) f32, act_ref (N*H*W,64) f32,
#              wf1_vmem (H,W*64,256) bf16, dma_sem (DMA semaphore)
# ---------------------------------------------------------------------------
def dqn_kernel(xp_ref, w1_ref, b1_ref, w2_ref, b2_ref, bf1_ref, wf2_ref, bf2_ref,
               wf1_hbm_ref, o_ref, pad_ref, act_ref, wf1_vmem_ref, dma_sem,
               *, N, H, W, Cin, Cmid):
    NHW = N * H * W
    F1 = wf1_vmem_ref.shape[-1]

    # Kick off the big fc1-weight DMA immediately so it overlaps the conv work.
    wf1_copy = pltpu.make_async_copy(wf1_hbm_ref, wf1_vmem_ref, dma_sem)
    wf1_copy.start()

    # ---- conv1: im2col built in-kernel, single K = 9*Cin matmul --------------
    taps1 = jnp.concatenate(
        [xp_ref[:, kh:kh + H, kw:kw + W, :] for kh in range(3) for kw in range(3)],
        axis=-1).reshape(NHW, 9 * Cin).astype(MATMUL_DTYPE)
    a1 = jnp.dot(taps1, w1_ref[...], preferred_element_type=jnp.float32)
    a1 = jnp.maximum(a1 + b1_ref[...], 0.0)                      # bias + ReLU in f32

    # ---- padded conv1 activation: write interior, zero only 4 halo strips ----
    pad_ref[:, 1:H + 1, 1:W + 1, :] = a1.reshape(N, H, W, Cmid)
    pad_ref[:, 0:1, :, :] = jnp.zeros((N, 1, W + 2, Cmid), jnp.float32)
    pad_ref[:, H + 1:H + 2, :, :] = jnp.zeros((N, 1, W + 2, Cmid), jnp.float32)
    pad_ref[:, 1:H + 1, 0:1, :] = jnp.zeros((N, H, 1, Cmid), jnp.float32)
    pad_ref[:, 1:H + 1, W + 1:W + 2, :] = jnp.zeros((N, H, 1, Cmid), jnp.float32)

    # ---- conv2: kw taps merged -> 3 per-kh slab matmuls with K = 3*Cmid ------
    acc2 = jnp.zeros((NHW, Cmid), jnp.float32)
    for kh in range(3):
        slab = jnp.concatenate(
            [pad_ref[:, kh:kh + H, kw:kw + W, :] for kw in range(3)],
            axis=-1).reshape(NHW, 3 * Cmid).astype(MATMUL_DTYPE)
        acc2 = acc2 + jnp.dot(slab, w2_ref[kh], preferred_element_type=jnp.float32)
    act_ref[...] = jnp.maximum(acc2 + b2_ref[...], 0.0)          # f32, rows (n, h, w)

    # ---- fc1: wait for the weight DMA, accumulate over the H spatial rows ----
    # h1[n] = sum_h act[n, h, :, :].flatten() @ w_fc1_3d[h]  (no in-kernel
    # sublane->lane flatten of the whole activation is ever needed).
    wf1_copy.wait()
    acc_fc1 = jnp.zeros((N, F1), jnp.float32)
    for h in range(H):
        cols = []
        for w in range(W):
            s = h * W + w
            cols.append(jnp.concatenate(
                [act_ref[n * H * W + s:n * H * W + s + 1, :] for n in range(N)],
                axis=0))                                          # (N, Cmid), rows = n
        lhs = jnp.concatenate(cols, axis=-1).astype(MATMUL_DTYPE)  # (N, W*Cmid)
        acc_fc1 = acc_fc1 + jnp.dot(lhs, wf1_vmem_ref[h],
                                    preferred_element_type=jnp.float32)
    h1 = jnp.maximum(acc_fc1 + bf1_ref[...], 0.0)

    # ---- fc2 ------------------------------------------------------------------
    out = jnp.dot(h1.astype(MATMUL_DTYPE), wf2_ref[...],
                  preferred_element_type=jnp.float32)
    o_ref[...] = out + bf2_ref[...]


def fused_dqn(xp, prep, *, N, H, W, Cin, Cmid, action_size):
    F1 = prep["w_fc1"].shape[-1]
    kernel = functools.partial(dqn_kernel, N=N, H=H, W=W, Cin=Cin, Cmid=Cmid)

    flops = 2 * (N * H * W * (9 * Cin) * Cmid          # conv1
                 + N * H * W * (9 * Cmid) * Cmid       # conv2
                 + N * (H * W * Cmid) * F1             # fc1
                 + N * F1 * action_size)               # fc2
    bytes_accessed = int(
        xp.size * xp.dtype.itemsize
        + sum(v.size * v.dtype.itemsize for v in prep.values())
        + N * action_size * 4)

    return pl.pallas_call(
        kernel,
        out_shape=jax.ShapeDtypeStruct((N, action_size), jnp.float32),
        in_specs=[pl.BlockSpec(memory_space=pltpu.MemorySpace.VMEM)] * 8
                 + [pl.BlockSpec(memory_space=pl.ANY)],           # w_fc1 stays in HBM
        out_specs=pl.BlockSpec(memory_space=pltpu.MemorySpace.VMEM),
        scratch_shapes=[
            pltpu.VMEM((N, H + 2, W + 2, Cmid), jnp.float32),     # padded conv1 act
            pltpu.VMEM((N * H * W, Cmid), jnp.float32),           # conv2 act (f32)
            pltpu.VMEM((H, W * Cmid, F1), MATMUL_DTYPE),          # fc1 weight landing
            pltpu.SemaphoreType.DMA(()),                          # fc1 weight DMA sem
        ],
        cost_estimate=pl.CostEstimate(flops=flops, transcendentals=0,
                                      bytes_accessed=bytes_accessed),
    )(xp, prep["w_conv1"], prep["b_conv1"], prep["w_conv2"], prep["b_conv2"],
      prep["b_fc1"], prep["w_fc2"], prep["b_fc2"], prep["w_fc1"])


# ---------------------------------------------------------------------------
# Parameters (PyTorch-equivalent layout: conv weights HWIO, fc weights (in, out)
# with fc1 rows in torch's NCHW-flatten order) + one-time repack for the kernel.
# ---------------------------------------------------------------------------
def init_params(key, board_size, action_size):
    ks = jax.random.split(key, 8)
    feat = 64 * board_size * board_size
    scale = 0.05
    return {
        "w_conv1": scale * jax.random.normal(ks[0], (3, 3, 3, 64), jnp.float32),
        "b_conv1": scale * jax.random.normal(ks[1], (1, 64), jnp.float32),
        "w_conv2": scale * jax.random.normal(ks[2], (3, 3, 64, 64), jnp.float32),
        "b_conv2": scale * jax.random.normal(ks[3], (1, 64), jnp.float32),
        "w_fc1":   scale * jax.random.normal(ks[4], (feat, 256), jnp.float32),
        "b_fc1":   scale * jax.random.normal(ks[5], (1, 256), jnp.float32),
        "w_fc2":   scale * jax.random.normal(ks[6], (256, action_size), jnp.float32),
        "b_fc2":   scale * jax.random.normal(ks[7], (1, action_size), jnp.float32),
    }


def prepare_params(params, board_size):
    """One-time weight repack: conv weights flattened for slab matmuls, fc1
    permuted from torch's NCHW-flatten row order to (h, w*C+c) and grouped by h,
    matmul operands cast to bf16 (biases stay f32)."""
    H = W = board_size
    Cmid = params["w_conv1"].shape[-1]
    F1 = params["w_fc1"].shape[-1]
    w1 = params["w_conv1"].reshape(-1, Cmid)                 # rows (kh, kw, ci)
    w2 = params["w_conv2"].reshape(3, -1, Cmid)              # per-kh rows (kw, ci)
    wf1 = (params["w_fc1"]
           .reshape(Cmid, H, W, F1)                          # rows were c*H*W + h*W + w
           .transpose(1, 2, 0, 3)                            # -> (h, w, c, out)
           .reshape(H, W * Cmid, F1))                        # (H, W*C, 256)
    return {
        "w_conv1": w1.astype(MATMUL_DTYPE),
        "b_conv1": params["b_conv1"].astype(jnp.float32),
        "w_conv2": w2.astype(MATMUL_DTYPE),
        "b_conv2": params["b_conv2"].astype(jnp.float32),
        "w_fc1": wf1.astype(MATMUL_DTYPE),
        "b_fc1": params["b_fc1"].astype(jnp.float32),
        "w_fc2": params["w_fc2"].astype(MATMUL_DTYPE),
        "b_fc2": params["b_fc2"].astype(jnp.float32),
    }


# ---------------------------------------------------------------------------
# Full forward.  x_nchw: (N, 3, board, board) f32, like the PyTorch module.
# ---------------------------------------------------------------------------
def dqn_forward(x_nchw, prep):
    N, Cin, H, W = x_nchw.shape
    Cmid = prep["w_conv1"].shape[-1]
    A = prep["w_fc2"].shape[-1]
    x = jnp.transpose(x_nchw, (0, 2, 3, 1)).astype(jnp.float32)   # tiny NCHW->NHWC
    xp = jnp.pad(x, ((0, 0), (1, 1), (1, 1), (0, 0)))             # (N, H+2, W+2, Cin)
    return fused_dqn(xp, prep, N=N, H=H, W=W, Cin=Cin, Cmid=Cmid, action_size=A)


# ---------------------------------------------------------------------------
# Pure-JAX reference (mirrors the PyTorch module, f32 throughout).
# ---------------------------------------------------------------------------
def dqn_reference(x_nchw, params):
    x = jnp.transpose(x_nchw, (0, 2, 3, 1))

    def conv3x3(x, w, b):
        N, H, W, _ = x.shape
        xp = jnp.pad(x, ((0, 0), (1, 1), (1, 1), (0, 0)))
        out = sum(jnp.einsum("nhwc,cd->nhwd",
                             xp[:, kh:kh + H, kw:kw + W, :], w[kh, kw])
                  for kh in range(3) for kw in range(3))
        return jax.nn.relu(out + b.reshape(1, 1, 1, -1))

    x = conv3x3(x, params["w_conv1"], params["b_conv1"])
    x = conv3x3(x, params["w_conv2"], params["b_conv2"])
    x = jnp.transpose(x, (0, 3, 1, 2)).reshape(x.shape[0], -1)   # torch NCHW flatten
    x = jax.nn.relu(x @ params["w_fc1"] + params["b_fc1"])
    return x @ params["w_fc2"] + params["b_fc2"]


if __name__ == "__main__":
    board_size = 8
    action_size = 4
    batch = 2

    key = jax.random.PRNGKey(0)
    k_params, k_x = jax.random.split(key)
    params = init_params(k_params, board_size, action_size)
    prepared = prepare_params(params, board_size)

    # PyTorch-style NCHW input: (N, 3, board, board)
    x = jax.random.normal(k_x, (batch, 3, board_size, board_size), jnp.float32)

    fwd = jax.jit(dqn_forward)
    out = jax.block_until_ready(fwd(x, prepared))

    assert out.shape == (batch, action_size), out.shape
    assert out.dtype == jnp.float32
    assert bool(jnp.all(jnp.isfinite(out)))

    ref = dqn_reference(x, params)
    assert bool(jnp.allclose(out, ref, rtol=5e-2, atol=5e-2)), (out, ref)

    print("KERNEL_OK")
</pallas_src>

<mosaic_0001>
module attributes {stable_mosaic.version = 11 : i64} {
  func.func @dqn_kernel(%arg0: memref<2x10x10x3xf32, #tpu.memory_space<vmem>>, %arg1: memref<27x64xbf16, #tpu.memory_space<vmem>>, %arg2: memref<1x64xf32, #tpu.memory_space<vmem>>, %arg3: memref<3x192x64xbf16, #tpu.memory_space<vmem>>, %arg4: memref<1x64xf32, #tpu.memory_space<vmem>>, %arg5: memref<1x256xf32, #tpu.memory_space<vmem>>, %arg6: memref<256x4xbf16, #tpu.memory_space<vmem>>, %arg7: memref<1x4xf32, #tpu.memory_space<vmem>>, %arg8: memref<8x512x256xbf16, #tpu.memory_space<any>>, %arg9: memref<2x4xf32, #tpu.memory_space<vmem>>, %arg10: memref<2x10x10x64xf32, #tpu.memory_space<vmem>>, %arg11: memref<128x64xf32, #tpu.memory_space<vmem>>, %arg12: memref<8x512x256xbf16, #tpu.memory_space<vmem>>, %arg13: memref<!tpu.dma_semaphore, #tpu.memory_space<semaphore_mem>>) attributes {dimension_semantics = [], scalar_prefetch = 0 : i64, scratch_operands = 4 : i64, tpu.core_type = #tpu.core_type<tc>} {
    tpu.enqueue_dma source(%arg8 : memref<8x512x256xbf16, #tpu.memory_space<any>>) target(%arg12 : memref<8x512x256xbf16, #tpu.memory_space<vmem>>) target_semaphore(%arg13 : memref<!tpu.dma_semaphore, #tpu.memory_space<semaphore_mem>>)
    %c0 = arith.constant 0 : index
    %c0_0 = arith.constant 0 : index
    %c0_1 = arith.constant 0 : index
    %c0_2 = arith.constant 0 : index
    %0 = vector.load %arg0[%c0, %c0_0, %c0_1, %c0_2] : memref<2x10x10x3xf32, #tpu.memory_space<vmem>>, vector<2x8x8x3xf32>
    %c0_3 = arith.constant 0 : index
    %c0_4 = arith.constant 0 : index
    %c1 = arith.constant 1 : index
    %c0_5 = arith.constant 0 : index
    %1 = vector.load %arg0[%c0_3, %c0_4, %c1, %c0_5] : memref<2x10x10x3xf32, #tpu.memory_space<vmem>>, vector<2x8x8x3xf32>
    %c0_6 = arith.constant 0 : index
    %c0_7 = arith.constant 0 : index
    %c2 = arith.constant 2 : index
    %c0_8 = arith.constant 0 : index
    %2 = vector.load %arg0[%c0_6, %c0_7, %c2, %c0_8] : memref<2x10x10x3xf32, #tpu.memory_space<vmem>>, vector<2x8x8x3xf32>
    %c0_9 = arith.constant 0 : index
    %c1_10 = arith.constant 1 : index
    %c0_11 = arith.constant 0 : index
    %c0_12 = arith.constant 0 : index
    %3 = vector.load %arg0[%c0_9, %c1_10, %c0_11, %c0_12] : memref<2x10x10x3xf32, #tpu.memory_space<vmem>>, vector<2x8x8x3xf32>
    %c0_13 = arith.constant 0 : index
    %c1_14 = arith.constant 1 : index
    %c1_15 = arith.constant 1 : index
    %c0_16 = arith.constant 0 : index
    %4 = vector.load %arg0[%c0_13, %c1_14, %c1_15, %c0_16] : memref<2x10x10x3xf32, #tpu.memory_space<vmem>>, vector<2x8x8x3xf32>
    %c0_17 = arith.constant 0 : index
    %c1_18 = arith.constant 1 : index
    %c2_19 = arith.constant 2 : index
    %c0_20 = arith.constant 0 : index
    %5 = vector.load %arg0[%c0_17, %c1_18, %c2_19, %c0_20] : memref<2x10x10x3xf32, #tpu.memory_space<vmem>>, vector<2x8x8x3xf32>
    %c0_21 = arith.constant 0 : index
    %c2_22 = arith.constant 2 : index
    %c0_23 = arith.constant 0 : index
    %c0_24 = arith.constant 0 : index
    %6 = vector.load %arg0[%c0_21, %c2_22, %c0_23, %c0_24] : memref<2x10x10x3xf32, #tpu.memory_space<vmem>>, vector<2x8x8x3xf32>
    %c0_25 = arith.constant 0 : index
    %c2_26 = arith.constant 2 : index
    %c1_27 = arith.constant 1 : index
    %c0_28 = arith.constant 0 : index
    %7 = vector.load %arg0[%c0_25, %c2_26, %c1_27, %c0_28] : memref<2x10x10x3xf32, #tpu.memory_space<vmem>>, vector<2x8x8x3xf32>
    %c0_29 = arith.constant 0 : index
    %c2_30 = arith.constant 2 : index
    %c2_31 = arith.constant 2 : index
    %c0_32 = arith.constant 0 : index
    %8 = vector.load %arg0[%c0_29, %c2_30, %c2_31, %c0_32] : memref<2x10x10x3xf32, #tpu.memory_space<vmem>>, vector<2x8x8x3xf32>
    %9 = tpu.concatenate %0, %1, %2, %3, %4, %5, %6, %7, %8 in 3 : vector<2x8x8x3xf32>, vector<2x8x8x3xf32>, vector<2x8x8x3xf32>, vector<2x8x8x3xf32>, vector<2x8x8x3xf32>, vector<2x8x8x3xf32>, vector<2x8x8x3xf32>, vector<2x8x8x3xf32>, vector<2x8x8x3xf32> -> vector<2x8x8x27xf32>
    %10 = vector.shape_cast %9 : vector<2x8x8x27xf32> to vector<128x27xf32>
    %11 = arith.truncf %10 : vector<128x27xf32> to vector<128x27xbf16>
    %c0_33 = arith.constant 0 : index
    %c0_34 = arith.constant 0 : index
    %12 = vector.load %arg1[%c0_33, %c0_34] : memref<27x64xbf16, #tpu.memory_space<vmem>>, vector<27x64xbf16>
    %cst = arith.constant dense<0.000000e+00> : vector<128x64xf32>
    %13 = tpu.matmul %11, %12, %cst {dimension_numbers = #tpu.dot_dimension_numbers<[1], [0], [0], [1], [0, 0, 1, 1], [], []>} : vector<128x27xbf16>, vector<27x64xbf16>, vector<128x64xf32> -> vector<128x64xf32>
    %c0_35 = arith.constant 0 : index
    %c0_36 = arith.constant 0 : index
    %14 = vector.load %arg2[%c0_35, %c0_36] : memref<1x64xf32, #tpu.memory_space<vmem>>, vector<1x64xf32>
    %15 = vector.broadcast %14 : vector<1x64xf32> to vector<128x64xf32>
    %16 = arith.addf %13, %15 : vector<128x64xf32>
    %cst_37 = arith.constant 0.000000e+00 : f32
    %17 = vector.broadcast %cst_37 : f32 to vector<128x64xf32>
    %18 = arith.maximumf %16, %17 : vector<128x64xf32>
    %19 = vector.shape_cast %18 : vector<128x64xf32> to vector<2x8x8x64xf32>
    %c0_38 = arith.constant 0 : index
    %c1_39 = arith.constant 1 : index
    %c1_40 = arith.constant 1 : index
    %c0_41 = arith.constant 0 : index
    %20 = vector.load %arg10[%c0_38, %c1_39, %c1_40, %c0_41] : memref<2x10x10x64xf32, #tpu.memory_space<vmem>>, vector<2x8x8x64xf32>
    tpu.vector_store %arg10[%c0_38, %c1_39, %c1_40, %c0_41], %19 {strides = array<i32>} : memref<2x10x10x64xf32, #tpu.memory_space<vmem>>, vector<2x8x8x64xf32>,
    %cst_42 = arith.constant 0.000000e+00 : f32
    %21 = vector.broadcast %cst_42 : f32 to vector<2x1x10x64xf32>
    %c0_43 = arith.constant 0 : index
    %c0_44 = arith.constant 0 : index
    %c0_45 = arith.constant 0 : index
    %c0_46 = arith.constant 0 : index
    %22 = vector.load %arg10[%c0_43, %c0_44, %c0_45, %c0_46] : memref<2x10x10x64xf32, #tpu.memory_space<vmem>>, vector<2x1x10x64xf32>
    tpu.vector_store %arg10[%c0_43, %c0_44, %c0_45, %c0_46], %21 {strides = array<i32>} : memref<2x10x10x64xf32, #tpu.memory_space<vmem>>, vector<2x1x10x64xf32>,
    %cst_47 = arith.constant 0.000000e+00 : f32
    %23 = vector.broadcast %cst_47 : f32 to vector<2x1x10x64xf32>
    %c0_48 = arith.constant 0 : index
    %c9 = arith.constant 9 : index
    %c0_49 = arith.constant 0 : index
    %c0_50 = arith.constant 0 : index
    %24 = vector.load %arg10[%c0_48, %c9, %c0_49, %c0_50] : memref<2x10x10x64xf32, #tpu.memory_space<vmem>>, vector<2x1x10x64xf32>
    tpu.vector_store %arg10[%c0_48, %c9, %c0_49, %c0_50], %23 {strides = array<i32>} : memref<2x10x10x64xf32, #tpu.memory_space<vmem>>, vector<2x1x10x64xf32>,
    %cst_51 = arith.constant 0.000000e+00 : f32
    %25 = vector.broadcast %cst_51 : f32 to vector<2x8x1x64xf32>
    %c0_52 = arith.constant 0 : index
    %c1_53 = arith.constant 1 : index
    %c0_54 = arith.constant 0 : index
    %c0_55 = arith.constant 0 : index
    %26 = vector.load %arg10[%c0_52, %c1_53, %c0_54, %c0_55] : memref<2x10x10x64xf32, #tpu.memory_space<vmem>>, vector<2x8x1x64xf32>
    tpu.vector_store %arg10[%c0_52, %c1_53, %c0_54, %c0_55], %25 {strides = array<i32>} : memref<2x10x10x64xf32, #tpu.memory_space<vmem>>, vector<2x8x1x64xf32>,
    %cst_56 = arith.constant 0.000000e+00 : f32
    %27 = vector.broadcast %cst_56 : f32 to vector<2x8x1x64xf32>
    %c0_57 = arith.constant 0 : index
    %c1_58 = arith.constant 1 : index
    %c9_59 = arith.constant 9 : index
    %c0_60 = arith.constant 0 : index
    %28 = vector.load %arg10[%c0_57, %c1_58, %c9_59, %c0_60] : memref<2x10x10x64xf32, #tpu.memory_space<vmem>>, vector<2x8x1x64xf32>
    tpu.vector_store %arg10[%c0_57, %c1_58, %c9_59, %c0_60], %27 {strides = array<i32>} : memref<2x10x10x64xf32, #tpu.memory_space<vmem>>, vector<2x8x1x64xf32>,
    %cst_61 = arith.constant 0.000000e+00 : f32
    %29 = vector.broadcast %cst_61 : f32 to vector<128x64xf32>
    %c0_62 = arith.constant 0 : index
    %c0_63 = arith.constant 0 : index
    %c0_64 = arith.constant 0 : index
    %c0_65 = arith.constant 0 : index
    %30 = vector.load %arg10[%c0_62, %c0_63, %c0_64, %c0_65] : memref<2x10x10x64xf32, #tpu.memory_space<vmem>>, vector<2x8x8x64xf32>
    %c0_66 = arith.constant 0 : index
    %c0_67 = arith.constant 0 : index
    %c1_68 = arith.constant 1 : index
    %c0_69 = arith.constant 0 : index
    %31 = vector.load %arg10[%c0_66, %c0_67, %c1_68, %c0_69] : memref<2x10x10x64xf32, #tpu.memory_space<vmem>>, vector<2x8x8x64xf32>
    %c0_70 = arith.constant 0 : index
    %c0_71 = arith.constant 0 : index
    %c2_72 = arith.constant 2 : index
    %c0_73 = arith.constant 0 : index
    %32 = vector.load %arg10[%c0_70, %c0_71, %c2_72, %c0_73] : memref<2x10x10x64xf32, #tpu.memory_space<vmem>>, vector<2x8x8x64xf32>
    %33 = tpu.concatenate %30, %31, %32 in 3 : vector<2x8x8x64xf32>, vector<2x8x8x64xf32>, vector<2x8x8x64xf32> -> vector<2x8x8x192xf32>
    %34 = vector.shape_cast %33 : vector<2x8x8x192xf32> to vector<128x192xf32>
    %35 = arith.truncf %34 : vector<128x192xf32> to vector<128x192xbf16>
    %c0_74 = arith.constant 0 : index
    %c0_75 = arith.constant 0 : index
    %c0_76 = arith.constant 0 : index
    %36 = vector.load %arg3[%c0_74, %c0_75, %c0_76] : memref<3x192x64xbf16, #tpu.memory_space<vmem>>, vector<1x192x64xbf16>
    %37 = vector.shape_cast %36 : vector<1x192x64xbf16> to vector<192x64xbf16>
    %cst_77 = arith.constant dense<0.000000e+00> : vector<128x64xf32>
    %38 = tpu.matmul %35, %37, %cst_77 {dimension_numbers = #tpu.dot_dimension_numbers<[1], [0], [0], [1], [0, 0, 1, 1], [], []>} : vector<128x192xbf16>, vector<192x64xbf16>, vector<128x64xf32> -> vector<128x64xf32>
    %39 = arith.addf %29, %38 : vector<128x64xf32>
    %c0_78 = arith.constant 0 : index
    %c1_79 = arith.constant 1 : index
    %c0_80 = arith.constant 0 : index
    %c0_81 = arith.constant 0 : index
    %40 = vector.load %arg10[%c0_78, %c1_79, %c0_80, %c0_81] : memref<2x10x10x64xf32, #tpu.memory_space<vmem>>, vector<2x8x8x64xf32>
    %c0_82 = arith.constant 0 : index
    %c1_83 = arith.constant 1 : index
    %c1_84 = arith.constant 1 : index
    %c0_85 = arith.constant 0 : index
    %41 = vector.load %arg10[%c0_82, %c1_83, %c1_84, %c0_85] : memref<2x10x10x64xf32, #tpu.memory_space<vmem>>, vector<2x8x8x64xf32>
    %c0_86 = arith.constant 0 : index
    %c1_87 = arith.constant 1 : index
    %c2_88 = arith.constant 2 : index
    %c0_89 = arith.constant 0 : index
    %42 = vector.load %arg10[%c0_86, %c1_87, %c2_88, %c0_89] : memref<2x10x10x64xf32, #tpu.memory_space<vmem>>, vector<2x8x8x64xf32>
    %43 = tpu.concatenate %40, %41, %42 in 3 : vector<2x8x8x64xf32>, vector<2x8x8x64xf32>, vector<2x8x8x64xf32> -> vector<2x8x8x192xf32>
    %44 = vector.shape_cast %43 : vector<2x8x8x192xf32> to vector<128x192xf32>
    %45 = arith.truncf %44 : vector<128x192xf32> to vector<128x192xbf16>
    %c1_90 = arith.constant 1 : index
    %c0_91 = arith.constant 0 : index
    %c0_92 = arith.constant 0 : index
    %46 = vector.load %arg3[%c1_90, %c0_91, %c0_92] : memref<3x192x64xbf16, #tpu.memory_space<vmem>>, vector<1x192x64xbf16>
    %47 = vector.shape_cast %46 : vector<1x192x64xbf16> to vector<192x64xbf16>
    %cst_93 = arith.constant dense<0.000000e+00> : vector<128x64xf32>
    %48 = tpu.matmul %45, %47, %cst_93 {dimension_numbers = #tpu.dot_dimension_numbers<[1], [0], [0], [1], [0, 0, 1, 1], [], []>} : vector<128x192xbf16>, vector<192x64xbf16>, vector<128x64xf32> -> vector<128x64xf32>
    %49 = arith.addf %39, %48 : vector<128x64xf32>
    %c0_94 = arith.constant 0 : index
    %c2_95 = arith.constant 2 : index
    %c0_96 = arith.constant 0 : index
    %c0_97 = arith.constant 0 : index
    %50 = vector.load %arg10[%c0_94, %c2_95, %c0_96, %c0_97] : memref<2x10x10x64xf32, #tpu.memory_space<vmem>>, vector<2x8x8x64xf32>
    %c0_98 = arith.constant 0 : index
    %c2_99 = arith.constant 2 : index
    %c1_100 = arith.constant 1 : index
    %c0_101 = arith.constant 0 : index
    %51 = vector.load %arg10[%c0_98, %c2_99, %c1_100, %c0_101] : memref<2x10x10x64xf32, #tpu.memory_space<vmem>>, vector<2x8x8x64xf32>
    %c0_102 = arith.constant 0 : index
    %c2_103 = arith.constant 2 : index
    %c2_104 = arith.constant 2 : index
    %c0_105 = arith.constant 0 : index
    %52 = vector.load %arg10[%c0_102, %c2_103, %c2_104, %c0_105] : memref<2x10x10x64xf32, #tpu.memory_space<vmem>>, vector<2x8x8x64xf32>
    %53 = tpu.concatenate %50, %51, %52 in 3 : vector<2x8x8x64xf32>, vector<2x8x8x64xf32>, vector<2x8x8x64xf32> -> vector<2x8x8x192xf32>
    %54 = vector.shape_cast %53 : vector<2x8x8x192xf32> to vector<128x192xf32>
    %55 = arith.truncf %54 : vector<128x192xf32> to vector<128x192xbf16>
    %c2_106 = arith.constant 2 : index
    %c0_107 = arith.constant 0 : index
    %c0_108 = arith.constant 0 : index
    %56 = vector.load %arg3[%c2_106, %c0_107, %c0_108] : memref<3x192x64xbf16, #tpu.memory_space<vmem>>, vector<1x192x64xbf16>
    %57 = vector.shape_cast %56 : vector<1x192x64xbf16> to vector<192x64xbf16>
    %cst_109 = arith.constant dense<0.000000e+00> : vector<128x64xf32>
    %58 = tpu.matmul %55, %57, %cst_109 {dimension_numbers = #tpu.dot_dimension_numbers<[1], [0], [0], [1], [0, 0, 1, 1], [], []>} : vector<128x192xbf16>, vector<192x64xbf16>, vector<128x64xf32> -> vector<128x64xf32>
    %59 = arith.addf %49, %58 : vector<128x64xf32>
    %c0_110 = arith.constant 0 : index
    %c0_111 = arith.constant 0 : index
    %60 = vector.load %arg4[%c0_110, %c0_111] : memref<1x64xf32, #tpu.memory_space<vmem>>, vector<1x64xf32>
    %61 = vector.broadcast %60 : vector<1x64xf32> to vector<128x64xf32>
    %62 = arith.addf %59, %61 : vector<128x64xf32>
    %cst_112 = arith.constant 0.000000e+00 : f32
    %63 = vector.broadcast %cst_112 : f32 to vector<128x64xf32>
    %64 = arith.maximumf %62, %63 : vector<128x64xf32>
    %c0_113 = arith.constant 0 : index
    %c0_114 = arith.constant 0 : index
    %65 = vector.load %arg11[%c0_113, %c0_114] : memref<128x64xf32, #tpu.memory_space<vmem>>, vector<128x64xf32>
    tpu.vector_store %arg11[%c0_113, %c0_114], %64 {strides = array<i32>} : memref<128x64xf32, #tpu.memory_space<vmem>>, vector<128x64xf32>,
    tpu.wait_dma2 semaphore(%arg13 : memref<!tpu.dma_semaphore, #tpu.memory_space<semaphore_mem>>) src(%arg8 : memref<8x512x256xbf16, #tpu.memory_space<any>>) dst(%arg12 : memref<8x512x256xbf16, #tpu.memory_space<vmem>>)
    %cst_115 = arith.constant 0.000000e+00 : f32
    %66 = vector.broadcast %cst_115 : f32 to vector<2x256xf32>
    %c0_116 = arith.constant 0 : index
    %c0_117 = arith.constant 0 : index
    %67 = vector.load %arg11[%c0_116, %c0_117] : memref<128x64xf32, #tpu.memory_space<vmem>>, vector<1x64xf32>
    %c64 = arith.constant 64 : index
    %c0_118 = arith.constant 0 : index
    %68 = vector.load %arg11[%c64, %c0_118] : memref<128x64xf32, #tpu.memory_space<vmem>>, vector<1x64xf32>
    %69 = tpu.concatenate %67, %68 in 0 : vector<1x64xf32>, vector<1x64xf32> -> vector<2x64xf32>
    %c1_119 = arith.constant 1 : index
    %c0_120 = arith.constant 0 : index
    %70 = vector.load %arg11[%c1_119, %c0_120] : memref<128x64xf32, #tpu.memory_space<vmem>>, vector<1x64xf32>
    %c65 = arith.constant 65 : index
    %c0_121 = arith.constant 0 : index
    %71 = vector.load %arg11[%c65, %c0_121] : memref<128x64xf32, #tpu.memory_space<vmem>>, vector<1x64xf32>
    %72 = tpu.concatenate %70, %71 in 0 : vector<1x64xf32>, vector<1x64xf32> -> vector<2x64xf32>
    %c2_122 = arith.constant 2 : index
    %c0_123 = arith.constant 0 : index
    %73 = vector.load %arg11[%c2_122, %c0_123] : memref<128x64xf32, #tpu.memory_space<vmem>>, vector<1x64xf32>
    %c66 = arith.constant 66 : index
    %c0_124 = arith.constant 0 : index
    %74 = vector.load %arg11[%c66, %c0_124] : memref<128x64xf32, #tpu.memory_space<vmem>>, vector<1x64xf32>
    %75 = tpu.concatenate %73, %74 in 0 : vector<1x64xf32>, vector<1x64xf32> -> vector<2x64xf32>
    %c3 = arith.constant 3 : index
    %c0_125 = arith.constant 0 : index
    %76 = vector.load %arg11[%c3, %c0_125] : memref<128x64xf32, #tpu.memory_space<vmem>>, vector<1x64xf32>
    %c67 = arith.constant 67 : index
    %c0_126 = arith.constant 0 : index
    %77 = vector.load %arg11[%c67, %c0_126] : memref<128x64xf32, #tpu.memory_space<vmem>>, vector<1x64xf32>
    %78 = tpu.concatenate %76, %77 in 0 : vector<1x64xf32>, vector<1x64xf32> -> vector<2x64xf32>
    %c4 = arith.constant 4 : index
    %c0_127 = arith.constant 0 : index
    %79 = vector.load %arg11[%c4, %c0_127] : memref<128x64xf32, #tpu.memory_space<vmem>>, vector<1x64xf32>
    %c68 = arith.constant 68 : index
    %c0_128 = arith.constant 0 : index
    %80 = vector.load %arg11[%c68, %c0_128] : memref<128x64xf32, #tpu.memory_space<vmem>>, vector<1x64xf32>
    %81 = tpu.concatenate %79, %80 in 0 : vector<1x64xf32>, vector<1x64xf32> -> vector<2x64xf32>
    %c5 = arith.constant 5 : index
    %c0_129 = arith.constant 0 : index
    %82 = vector.load %arg11[%c5, %c0_129] : memref<128x64xf32, #tpu.memory_space<vmem>>, vector<1x64xf32>
    %c69 = arith.constant 69 : index
    %c0_130 = arith.constant 0 : index
    %83 = vector.load %arg11[%c69, %c0_130] : memref<128x64xf32, #tpu.memory_space<vmem>>, vector<1x64xf32>
    %84 = tpu.concatenate %82, %83 in 0 : vector<1x64xf32>, vector<1x64xf32> -> vector<2x64xf32>
    %c6 = arith.constant 6 : index
    %c0_131 = arith.constant 0 : index
    %85 = vector.load %arg11[%c6, %c0_131] : memref<128x64xf32, #tpu.memory_space<vmem>>, vector<1x64xf32>
    %c70 = arith.constant 70 : index
    %c0_132 = arith.constant 0 : index
    %86 = vector.load %arg11[%c70, %c0_132] : memref<128x64xf32, #tpu.memory_space<vmem>>, vector<1x64xf32>
    %87 = tpu.concatenate %85, %86 in 0 : vector<1x64xf32>, vector<1x64xf32> -> vector<2x64xf32>
    %c7 = arith.constant 7 : index
    %c0_133 = arith.constant 0 : index
    %88 = vector.load %arg11[%c7, %c0_133] : memref<128x64xf32, #tpu.memory_space<vmem>>, vector<1x64xf32>
    %c71 = arith.constant 71 : index
    %c0_134 = arith.constant 0 : index
    %89 = vector.load %arg11[%c71, %c0_134] : memref<128x64xf32, #tpu.memory_space<vmem>>, vector<1x64xf32>
    %90 = tpu.concatenate %88, %89 in 0 : vector<1x64xf32>, vector<1x64xf32> -> vector<2x64xf32>
    %91 = tpu.concatenate %69, %72, %75, %78, %81, %84, %87, %90 in 1 : vector<2x64xf32>, vector<2x64xf32>, vector<2x64xf32>, vector<2x64xf32>, vector<2x64xf32>, vector<2x64xf32>, vector<2x64xf32>, vector<2x64xf32> -> vector<2x512xf32>
    %92 = arith.truncf %91 : vector<2x512xf32> to vector<2x512xbf16>
    %c0_135 = arith.constant 0 : index
    %c0_136 = arith.constant 0 : index
    %c0_137 = arith.constant 0 : index
    %93 = vector.load %arg12[%c0_135, %c0_136, %c0_137] : memref<8x512x256xbf16, #tpu.memory_space<vmem>>, vector<1x512x256xbf16>
    %94 = vector.shape_cast %93 : vector<1x512x256xbf16> to vector<512x256xbf16>
    %cst_138 = arith.constant dense<0.000000e+00> : vector<2x256xf32>
    %95 = tpu.matmul %92, %94, %cst_138 {dimension_numbers = #tpu.dot_dimension_numbers<[1], [0], [0], [1], [0, 0, 1, 1], [], []>} : vector<2x512xbf16>, vector<512x256xbf16>, vector<2x256xf32> -> vector<2x256xf32>
    %96 = arith.addf %66, %95 : vector<2x256xf32>
    %c8 = arith.constant 8 : index
    %c0_139 = arith.constant 0 : index
    %97 = vector.load %arg11[%c8, %c0_139] : memref<128x64xf32, #tpu.memory_space<vmem>>, vector<1x64xf32>
    %c72 = arith.constant 72 : index
    %c0_140 = arith.constant 0 : index
    %98 = vector.load %arg11[%c72, %c0_140] : memref<128x64xf32, #tpu.memory_space<vmem>>, vector<1x64xf32>
    %99 = tpu.concatenate %97, %98 in 0 : vector<1x64xf32>, vector<1x64xf32> -> vector<2x64xf32>
    %c9_141 = arith.constant 9 : index
    %c0_142 = arith.constant 0 : index
    %100 = vector.load %arg11[%c9_141, %c0_142] : memref<128x64xf32, #tpu.memory_space<vmem>>, vector<1x64xf32>
    %c73 = arith.constant 73 : index
    %c0_143 = arith.constant 0 : index
    %101 = vector.load %arg11[%c73, %c0_143] : memref<128x64xf32, #tpu.memory_space<vmem>>, vector<1x64xf32>
    %102 = tpu.concatenate %100, %101 in 0 : vector<1x64xf32>, vector<1x64xf32> -> vector<2x64xf32>
    %c10 = arith.constant 10 : index
    %c0_144 = arith.constant 0 : index
    %103 = vector.load %arg11[%c10, %c0_144] : memref<128x64xf32, #tpu.memory_space<vmem>>, vector<1x64xf32>
    %c74 = arith.constant 74 : index
    %c0_145 = arith.constant 0 : index
    %104 = vector.load %arg11[%c74, %c0_145] : memref<128x64xf32, #tpu.memory_space<vmem>>, vector<1x64xf32>
    %105 = tpu.concatenate %103, %104 in 0 : vector<1x64xf32>, vector<1x64xf32> -> vector<2x64xf32>
    %c11 = arith.constant 11 : index
    %c0_146 = arith.constant 0 : index
    %106 = vector.load %arg11[%c11, %c0_146] : memref<128x64xf32, #tpu.memory_space<vmem>>, vector<1x64xf32>
    %c75 = arith.constant 75 : index
    %c0_147 = arith.constant 0 : index
    %107 = vector.load %arg11[%c75, %c0_147] : memref<128x64xf32, #tpu.memory_space<vmem>>, vector<1x64xf32>
    %108 = tpu.concatenate %106, %107 in 0 : vector<1x64xf32>, vector<1x64xf32> -> vector<2x64xf32>
    %c12 = arith.constant 12 : index
    %c0_148 = arith.constant 0 : index
    %109 = vector.load %arg11[%c12, %c0_148] : memref<128x64xf32, #tpu.memory_space<vmem>>, vector<1x64xf32>
    %c76 = arith.constant 76 : index
    %c0_149 = arith.constant 0 : index
    %110 = vector.load %arg11[%c76, %c0_149] : memref<128x64xf32, #tpu.memory_space<vmem>>, vector<1x64xf32>
    %111 = tpu.concatenate %109, %110 in 0 : vector<1x64xf32>, vector<1x64xf32> -> vector<2x64xf32>
    %c13 = arith.constant 13 : index
    %c0_150 = arith.constant 0 : index
    %112 = vector.load %arg11[%c13, %c0_150] : memref<128x64xf32, #tpu.memory_space<vmem>>, vector<1x64xf32>
    %c77 = arith.constant 77 : index
    %c0_151 = arith.constant 0 : index
    %113 = vector.load %arg11[%c77, %c0_151] : memref<128x64xf32, #tpu.memory_space<vmem>>, vector<1x64xf32>
    %114 = tpu.concatenate %112, %113 in 0 : vector<1x64xf32>, vector<1x64xf32> -> vector<2x64xf32>
    %c14 = arith.constant 14 : index
    %c0_152 = arith.constant 0 : index
    %115 = vector.load %arg11[%c14, %c0_152] : memref<128x64xf32, #tpu.memory_space<vmem>>, vector<1x64xf32>
    %c78 = arith.constant 78 : index
    %c0_153 = arith.constant 0 : index
    %116 = vector.load %arg11[%c78, %c0_153] : memref<128x64xf32, #tpu.memory_space<vmem>>, vector<1x64xf32>
    %117 = tpu.concatenate %115, %116 in 0 : vector<1x64xf32>, vector<1x64xf32> -> vector<2x64xf32>
    %c15 = arith.constant 15 : index
    %c0_154 = arith.constant 0 : index
    %118 = vector.load %arg11[%c15, %c0_154] : memref<128x64xf32, #tpu.memory_space<vmem>>, vector<1x64xf32>
    %c79 = arith.constant 79 : index
    %c0_155 = arith.constant 0 : index
    %119 = vector.load %arg11[%c79, %c0_155] : memref<128x64xf32, #tpu.memory_space<vmem>>, vector<1x64xf32>
    %120 = tpu.concatenate %118, %119 in 0 : vector<1x64xf32>, vector<1x64xf32> -> vector<2x64xf32>
    %121 = tpu.concatenate %99, %102, %105, %108, %111, %114, %117, %120 in 1 : vector<2x64xf32>, vector<2x64xf32>, vector<2x64xf32>, vector<2x64xf32>, vector<2x64xf32>, vector<2x64xf32>, vector<2x64xf32>, vector<2x64xf32> -> vector<2x512xf32>
    %122 = arith.truncf %121 : vector<2x512xf32> to vector<2x512xbf16>
    %c1_156 = arith.constant 1 : index
    %c0_157 = arith.constant 0 : index
    %c0_158 = arith.constant 0 : index
    %123 = vector.load %arg12[%c1_156, %c0_157, %c0_158] : memref<8x512x256xbf16, #tpu.memory_space<vmem>>, vector<1x512x256xbf16>
    %124 = vector.shape_cast %123 : vector<1x512x256xbf16> to vector<512x256xbf16>
    %cst_159 = arith.constant dense<0.000000e+00> : vector<2x256xf32>
    %125 = tpu.matmul %122, %124, %cst_159 {dimension_numbers = #tpu.dot_dimension_numbers<[1], [0], [0], [1], [0, 0, 1, 1], [], []>} : vector<2x512xbf16>, vector<512x256xbf16>, vector<2x256xf32> -> vector<2x256xf32>
    %126 = arith.addf %96, %125 : vector<2x256xf32>
    %c16 = arith.constant 16 : index
    %c0_160 = arith.constant 0 : index
    %127 = vector.load %arg11[%c16, %c0_160] : memref<128x64xf32, #tpu.memory_space<vmem>>, vector<1x64xf32>
    %c80 = arith.constant 80 : index
    %c0_161 = arith.constant 0 : index
    %128 = vector.load %arg11[%c80, %c0_161] : memref<128x64xf32, #tpu.memory_space<vmem>>, vector<1x64xf32>
    %129 = tpu.concatenate %127, %128 in 0 : vector<1x64xf32>, vector<1x64xf32> -> vector<2x64xf32>
    %c17 = arith.constant 17 : index
    %c0_162 = arith.constant 0 : index
    %130 = vector.load %arg11[%c17, %c0_162] : memref<128x64xf32, #tpu.memory_space<vmem>>, vector<1x64xf32>
    %c81 = arith.constant 81 : index
    %c0_163 = arith.constant 0 : index
    %131 = vector.load %arg11[%c81, %c0_163] : memref<128x64xf32, #tpu.memory_space<vmem>>, vector<1x64xf32>
    %132 = tpu.concatenate %130, %131 in 0 : vector<1x64xf32>, vector<1x64xf32> -> vector<2x64xf32>
    %c18 = arith.constant 18 : index
    %c0_164 = arith.constant 0 : index
    %133 = vector.load %arg11[%c18, %c0_164] : memref<128x64xf32, #tpu.memory_space<vmem>>, vector<1x64xf32>
    %c82 = arith.constant 82 : index
    %c0_165 = arith.constant 0 : index
    %134 = vector.load %arg11[%c82, %c0_165] : memref<128x64xf32, #tpu.memory_space<vmem>>, vector<1x64xf32>
    %135 = tpu.concatenate %133, %134 in 0 : vector<1x64xf32>, vector<1x64xf32> -> vector<2x64xf32>
    %c19 = arith.constant 19 : index
    %c0_166 = arith.constant 0 : index
    %136 = vector.load %arg11[%c19, %c0_166] : memref<128x64xf32, #tpu.memory_space<vmem>>, vector<1x64xf32>
    %c83 = arith.constant 83 : index
    %c0_167 = arith.constant 0 : index
    %137 = vector.load %arg11[%c83, %c0_167] : memref<128x64xf32, #tpu.memory_space<vmem>>, vector<1x64xf32>
    %138 = tpu.concatenate %136, %137 in 0 : vector<1x64xf32>, vector<1x64xf32> -> vector<2x64xf32>
    %c20 = arith.constant 20 : index
    %c0_168 = arith.constant 0 : index
    %139 = vector.load %arg11[%c20, %c0_168] : memref<128x64xf32, #tpu.memory_space<vmem>>, vector<1x64xf32>
    %c84 = arith.constant 84 : index
    %c0_169 = arith.constant 0 : index
    %140 = vector.load %arg11[%c84, %c0_169] : memref<128x64xf32, #tpu.memory_space<vmem>>, vector<1x64xf32>
    %141 = tpu.concatenate %139, %140 in 0 : vector<1x64xf32>, vector<1x64xf32> -> vector<2x64xf32>
    %c21 = arith.constant 21 : index
    %c0_170 = arith.constant 0 : index
    %142 = vector.load %arg11[%c21, %c0_170] : memref<128x64xf32, #tpu.memory_space<vmem>>, vector<1x64xf32>
    %c85 = arith.constant 85 : index
    %c0_171 = arith.constant 0 : index
    %143 = vector.load %arg11[%c85, %c0_171] : memref<128x64xf32, #tpu.memory_space<vmem>>, vector<1x64xf32>
    %144 = tpu.concatenate %142, %143 in 0 : vector<1x64xf32>, vector<1x64xf32> -> vector<2x64xf32>
    %c22 = arith.constant 22 : index
    %c0_172 = arith.constant 0 : index
    %145 = vector.load %arg11[%c22, %c0_172] : memref<128x64xf32, #tpu.memory_space<vmem>>, vector<1x64xf32>
    %c86 = arith.constant 86 : index
    %c0_173 = arith.constant 0 : index
    %146 = vector.load %arg11[%c86, %c0_173] : memref<128x64xf32, #tpu.memory_space<vmem>>, vector<1x64xf32>
    %147 = tpu.concatenate %145, %146 in 0 : vector<1x64xf32>, vector<1x64xf32> -> vector<2x64xf32>
    %c23 = arith.constant 23 : index
    %c0_174 = arith.constant 0 : index
    %148 = vector.load %arg11[%c23, %c0_174] : memref<128x64xf32, #tpu.memory_space<vmem>>, vector<1x64xf32>
    %c87 = arith.constant 87 : index
    %c0_175 = arith.constant 0 : index
    %149 = vector.load %arg11[%c87, %c0_175] : memref<128x64xf32, #tpu.memory_space<vmem>>, vector<1x64xf32>
    %150 = tpu.concatenate %148, %149 in 0 : vector<1x64xf32>, vector<1x64xf32> -> vector<2x64xf32>
    %151 = tpu.concatenate %129, %132, %135, %138, %141, %144, %147, %150 in 1 : vector<2x64xf32>, vector<2x64xf32>, vector<2x64xf32>, vector<2x64xf32>, vector<2x64xf32>, vector<2x64xf32>, vector<2x64xf32>, vector<2x64xf32> -> vector<2x512xf32>
    %152 = arith.truncf %151 : vector<2x512xf32> to vector<2x512xbf16>
    %c2_176 = arith.constant 2 : index
    %c0_177 = arith.constant 0 : index
    %c0_178 = arith.constant 0 : index
    %153 = vector.load %arg12[%c2_176, %c0_177, %c0_178] : memref<8x512x256xbf16, #tpu.memory_space<vmem>>, vector<1x512x256xbf16>
    %154 = vector.shape_cast %153 : vector<1x512x256xbf16> to vector<512x256xbf16>
    %cst_179 = arith.constant dense<0.000000e+00> : vector<2x256xf32>
    %155 = tpu.matmul %152, %154, %cst_179 {dimension_numbers = #tpu.dot_dimension_numbers<[1], [0], [0], [1], [0, 0, 1, 1], [], []>} : vector<2x512xbf16>, vector<512x256xbf16>, vector<2x256xf32> -> vector<2x256xf32>
    %156 = arith.addf %126, %155 : vector<2x256xf32>
    %c24 = arith.constant 24 : index
    %c0_180 = arith.constant 0 : index
    %157 = vector.load %arg11[%c24, %c0_180] : memref<128x64xf32, #tpu.memory_space<vmem>>, vector<1x64xf32>
    %c88 = arith.constant 88 : index
    %c0_181 = arith.constant 0 : index
    %158 = vector.load %arg11[%c88, %c0_181] : memref<128x64xf32, #tpu.memory_space<vmem>>, vector<1x64xf32>
    %159 = tpu.concatenate %157, %158 in 0 : vector<1x64xf32>, vector<1x64xf32> -> vector<2x64xf32>
    %c25 = arith.constant 25 : index
    %c0_182 = arith.constant 0 : index
    %160 = vector.load %arg11[%c25, %c0_182] : memref<128x64xf32, #tpu.memory_space<vmem>>, vector<1x64xf32>
    %c89 = arith.constant 89 : index
    %c0_183 = arith.constant 0 : index
    %161 = vector.load %arg11[%c89, %c0_183] : memref<128x64xf32, #tpu.memory_space<vmem>>, vector<1x64xf32>
    %162 = tpu.concatenate %160, %161 in 0 : vector<1x64xf32>, vector<1x64xf32> -> vector<2x64xf32>
    %c26 = arith.constant 26 : index
    %c0_184 = arith.constant 0 : index
    %163 = vector.load %arg11[%c26, %c0_184] : memref<128x64xf32, #tpu.memory_space<vmem>>, vector<1x64xf32>
    %c90 = arith.constant 90 : index
    %c0_185 = arith.constant 0 : index
    %164 = vector.load %arg11[%c90, %c0_185] : memref<128x64xf32, #tpu.memory_space<vmem>>, vector<1x64xf32>
    %165 = tpu.concatenate %163, %164 in 0 : vector<1x64xf32>, vector<1x64xf32> -> vector<2x64xf32>
    %c27 = arith.constant 27 : index
    %c0_186 = arith.constant 0 : index
    %166 = vector.load %arg11[%c27, %c0_186] : memref<128x64xf32, #tpu.memory_space<vmem>>, vector<1x64xf32>
    %c91 = arith.constant 91 : index
    %c0_187 = arith.constant 0 : index
    %167 = vector.load %arg11[%c91, %c0_187] : memref<128x64xf32, #tpu.memory_space<vmem>>, vector<1x64xf32>
    %168 = tpu.concatenate %166, %167 in 0 : vector<1x64xf32>, vector<1x64xf32> -> vector<2x64xf32>
    %c28 = arith.constant 28 : index
    %c0_188 = arith.constant 0 : index
    %169 = vector.load %arg11[%c28, %c0_188] : memref<128x64xf32, #tpu.memory_space<vmem>>, vector<1x64xf32>
    %c92 = arith.constant 92 : index
    %c0_189 = arith.constant 0 : index
    %170 = vector.load %arg11[%c92, %c0_189] : memref<128x64xf32, #tpu.memory_space<vmem>>, vector<1x64xf32>
    %171 = tpu.concatenate %169, %170 in 0 : vector<1x64xf32>, vector<1x64xf32> -> vector<2x64xf32>
    %c29 = arith.constant 29 : index
    %c0_190 = arith.constant 0 : index
    %172 = vector.load %arg11[%c29, %c0_190] : memref<128x64xf32, #tpu.memory_space<vmem>>, vector<1x64xf32>
    %c93 = arith.constant 93 : index
    %c0_191 = arith.constant 0 : index
    %173 = vector.load %arg11[%c93, %c0_191] : memref<128x64xf32, #tpu.memory_space<vmem>>, vector<1x64xf32>
    %174 = tpu.concatenate %172, %173 in 0 : vector<1x64xf32>, vector<1x64xf32> -> vector<2x64xf32>
    %c30 = arith.constant 30 : index
    %c0_192 = arith.constant 0 : index
    %175 = vector.load %arg11[%c30, %c0_192] : memref<128x64xf32, #tpu.memory_space<vmem>>, vector<1x64xf32>
    %c94 = arith.constant 94 : index
    %c0_193 = arith.constant 0 : index
    %176 = vector.load %arg11[%c94, %c0_193] : memref<128x64xf32, #tpu.memory_space<vmem>>, vector<1x64xf32>
    %177 = tpu.concatenate %175, %176 in 0 : vector<1x64xf32>, vector<1x64xf32> -> vector<2x64xf32>
    %c31 = arith.constant 31 : index
    %c0_194 = arith.constant 0 : index
    %178 = vector.load %arg11[%c31, %c0_194] : memref<128x64xf32, #tpu.memory_space<vmem>>, vector<1x64xf32>
    %c95 = arith.constant 95 : index
    %c0_195 = arith.constant 0 : index
    %179 = vector.load %arg11[%c95, %c0_195] : memref<128x64xf32, #tpu.memory_space<vmem>>, vector<1x64xf32>
    %180 = tpu.concatenate %178, %179 in 0 : vector<1x64xf32>, vector<1x64xf32> -> vector<2x64xf32>
    %181 = tpu.concatenate %159, %162, %165, %168, %171, %174, %177, %180 in 1 : vector<2x64xf32>, vector<2x64xf32>, vector<2x64xf32>, vector<2x64xf32>, vector<2x64xf32>, vector<2x64xf32>, vector<2x64xf32>, vector<2x64xf32> -> vector<2x512xf32>
    %182 = arith.truncf %181 : vector<2x512xf32> to vector<2x512xbf16>
    %c3_196 = arith.constant 3 : index
    %c0_197 = arith.constant 0 : index
    %c0_198 = arith.constant 0 : index
    %183 = vector.load %arg12[%c3_196, %c0_197, %c0_198] : memref<8x512x256xbf16, #tpu.memory_space<vmem>>, vector<1x512x256xbf16>
    %184 = vector.shape_cast %183 : vector<1x512x256xbf16> to vector<512x256xbf16>
    %cst_199 = arith.constant dense<0.000000e+00> : vector<2x256xf32>
    %185 = tpu.matmul %182, %184, %cst_199 {dimension_numbers = #tpu.dot_dimension_numbers<[1], [0], [0], [1], [0, 0, 1, 1], [], []>} : vector<2x512xbf16>, vector<512x256xbf16>, vector<2x256xf32> -> vector<2x256xf32>
    %186 = arith.addf %156, %185 : vector<2x256xf32>
    %c32 = arith.constant 32 : index
    %c0_200 = arith.constant 0 : index
    %187 = vector.load %arg11[%c32, %c0_200] : memref<128x64xf32, #tpu.memory_space<vmem>>, vector<1x64xf32>
    %c96 = arith.constant 96 : index
    %c0_201 = arith.constant 0 : index
    %188 = vector.load %arg11[%c96, %c0_201] : memref<128x64xf32, #tpu.memory_space<vmem>>, vector<1x64xf32>
    %189 = tpu.concatenate %187, %188 in 0 : vector<1x64xf32>, vector<1x64xf32> -> vector<2x64xf32>
    %c33 = arith.constant 33 : index
    %c0_202 = arith.constant 0 : index
    %190 = vector.load %arg11[%c33, %c0_202] : memref<128x64xf32, #tpu.memory_space<vmem>>, vector<1x64xf32>
    %c97 = arith.constant 97 : index
    %c0_203 = arith.constant 0 : index
    %191 = vector.load %arg11[%c97, %c0_203] : memref<128x64xf32, #tpu.memory_space<vmem>>, vector<1x64xf32>
    %192 = tpu.concatenate %190, %191 in 0 : vector<1x64xf32>, vector<1x64xf32> -> vector<2x64xf32>
    %c34 = arith.constant 34 : index
    %c0_204 = arith.constant 0 : index
    %193 = vector.load %arg11[%c34, %c0_204] : memref<128x64xf32, #tpu.memory_space<vmem>>, vector<1x64xf32>
    %c98 = arith.constant 98 : index
    %c0_205 = arith.constant 0 : index
    %194 = vector.load %arg11[%c98, %c0_205] : memref<128x64xf32, #tpu.memory_space<vmem>>, vector<1x64xf32>
    %195 = tpu.concatenate %193, %194 in 0 : vector<1x64xf32>, vector<1x64xf32> -> vector<2x64xf32>
    %c35 = arith.constant 35 : index
    %c0_206 = arith.constant 0 : index
    %196 = vector.load %arg11[%c35, %c0_206] : memref<128x64xf32, #tpu.memory_space<vmem>>, vector<1x64xf32>
    %c99 = arith.constant 99 : index
    %c0_207 = arith.constant 0 : index
    %197 = vector.load %arg11[%c99, %c0_207] : memref<128x64xf32, #tpu.memory_space<vmem>>, vector<1x64xf32>
    %198 = tpu.concatenate %196, %197 in 0 : vector<1x64xf32>, vector<1x64xf32> -> vector<2x64xf32>
    %c36 = arith.constant 36 : index
    %c0_208 = arith.constant 0 : index
    %199 = vector.load %arg11[%c36, %c0_208] : memref<128x64xf32, #tpu.memory_space<vmem>>, vector<1x64xf32>
    %c100 = arith.constant 100 : index
    %c0_209 = arith.constant 0 : index
    %200 = vector.load %arg11[%c100, %c0_209] : memref<128x64xf32, #tpu.memory_space<vmem>>, vector<1x64xf32>
    %201 = tpu.concatenate %199, %200 in 0 : vector<1x64xf32>, vector<1x64xf32> -> vector<2x64xf32>
    %c37 = arith.constant 37 : index
    %c0_210 = arith.constant 0 : index
    %202 = vector.load %arg11[%c37, %c0_210] : memref<128x64xf32, #tpu.memory_space<vmem>>, vector<1x64xf32>
    %c101 = arith.constant 101 : index
    %c0_211 = arith.constant 0 : index
    %203 = vector.load %arg11[%c101, %c0_211] : memref<128x64xf32, #tpu.memory_space<vmem>>, vector<1x64xf32>
    %204 = tpu.concatenate %202, %203 in 0 : vector<1x64xf32>, vector<1x64xf32> -> vector<2x64xf32>
    %c38 = arith.constant 38 : index
    %c0_212 = arith.constant 0 : index
    %205 = vector.load %arg11[%c38, %c0_212] : memref<128x64xf32, #tpu.memory_space<vmem>>, vector<1x64xf32>
    %c102 = arith.constant 102 : index
    %c0_213 = arith.constant 0 : index
    %206 = vector.load %arg11[%c102, %c0_213] : memref<128x64xf32, #tpu.memory_space<vmem>>, vector<1x64xf32>
    %207 = tpu.concatenate %205, %206 in 0 : vector<1x64xf32>, vector<1x64xf32> -> vector<2x64xf32>
    %c39 = arith.constant 39 : index
    %c0_214 = arith.constant 0 : index
    %208 = vector.load %arg11[%c39, %c0_214] : memref<128x64xf32, #tpu.memory_space<vmem>>, vector<1x64xf32>
    %c103 = arith.constant 103 : index
    %c0_215 = arith.constant 0 : index
    %209 = vector.load %arg11[%c103, %c0_215] : memref<128x64xf32, #tpu.memory_space<vmem>>, vector<1x64xf32>
    %210 = tpu.concatenate %208, %209 in 0 : vector<1x64xf32>, vector<1x64xf32> -> vector<2x64xf32>
    %211 = tpu.concatenate %189, %192, %195, %198, %201, %204, %207, %210 in 1 : vector<2x64xf32>, vector<2x64xf32>, vector<2x64xf32>, vector<2x64xf32>, vector<2x64xf32>, vector<2x64xf32>, vector<2x64xf32>, vector<2x64xf32> -> vector<2x512xf32>
    %212 = arith.truncf %211 : vector<2x512xf32> to vector<2x512xbf16>
    %c4_216 = arith.constant 4 : index
    %c0_217 = arith.constant 0 : index
    %c0_218 = arith.constant 0 : index
    %213 = vector.load %arg12[%c4_216, %c0_217, %c0_218] : memref<8x512x256xbf16, #tpu.memory_space<vmem>>, vector<1x512x256xbf16>
    %214 = vector.shape_cast %213 : vector<1x512x256xbf16> to vector<512x256xbf16>
    %cst_219 = arith.constant dense<0.000000e+00> : vector<2x256xf32>
    %215 = tpu.matmul %212, %214, %cst_219 {dimension_numbers = #tpu.dot_dimension_numbers<[1], [0], [0], [1], [0, 0, 1, 1], [], []>} : vector<2x512xbf16>, vector<512x256xbf16>, vector<2x256xf32> -> vector<2x256xf32>
    %216 = arith.addf %186, %215 : vector<2x256xf32>
    %c40 = arith.constant 40 : index
    %c0_220 = arith.constant 0 : index
    %217 = vector.load %arg11[%c40, %c0_220] : memref<128x64xf32, #tpu.memory_space<vmem>>, vector<1x64xf32>
    %c104 = arith.constant 104 : index
    %c0_221 = arith.constant 0 : index
    %218 = vector.load %arg11[%c104, %c0_221] : memref<128x64xf32, #tpu.memory_space<vmem>>, vector<1x64xf32>
    %219 = tpu.concatenate %217, %218 in 0 : vector<1x64xf32>, vector<1x64xf32> -> vector<2x64xf32>
    %c41 = arith.constant 41 : index
    %c0_222 = arith.constant 0 : index
    %220 = vector.load %arg11[%c41, %c0_222] : memref<128x64xf32, #tpu.memory_space<vmem>>, vector<1x64xf32>
    %c105 = arith.constant 105 : index
    %c0_223 = arith.constant 0 : index
    %221 = vector.load %arg11[%c105, %c0_223] : memref<128x64xf32, #tpu.memory_space<vmem>>, vector<1x64xf32>
    %222 = tpu.concatenate %220, %221 in 0 : vector<1x64xf32>, vector<1x64xf32> -> vector<2x64xf32>
    %c42 = arith.constant 42 : index
    %c0_224 = arith.constant 0 : index
    %223 = vector.load %arg11[%c42, %c0_224] : memref<128x64xf32, #tpu.memory_space<vmem>>, vector<1x64xf32>
    %c106 = arith.constant 106 : index
    %c0_225 = arith.constant 0 : index
    %224 = vector.load %arg11[%c106, %c0_225] : memref<128x64xf32, #tpu.memory_space<vmem>>, vector<1x64xf32>
    %225 = tpu.concatenate %223, %224 in 0 : vector<1x64xf32>, vector<1x64xf32> -> vector<2x64xf32>
    %c43 = arith.constant 43 : index
    %c0_226 = arith.constant 0 : index
    %226 = vector.load %arg11[%c43, %c0_226] : memref<128x64xf32, #tpu.memory_space<vmem>>, vector<1x64xf32>
    %c107 = arith.constant 107 : index
    %c0_227 = arith.constant 0 : index
    %227 = vector.load %arg11[%c107, %c0_227] : memref<128x64xf32, #tpu.memory_space<vmem>>, vector<1x64xf32>
    %228 = tpu.concatenate %226, %227 in 0 : vector<1x64xf32>, vector<1x64xf32> -> vector<2x64xf32>
    %c44 = arith.constant 44 : index
    %c0_228 = arith.constant 0 : index
    %229 = vector.load %arg11[%c44, %c0_228] : memref<128x64xf32, #tpu.memory_space<vmem>>, vector<1x64xf32>
    %c108 = arith.constant 108 : index
    %c0_229 = arith.constant 0 : index
    %230 = vector.load %arg11[%c108, %c0_229] : memref<128x64xf32, #tpu.memory_space<vmem>>, vector<1x64xf32>
    %231 = tpu.concatenate %229, %230 in 0 : vector<1x64xf32>, vector<1x64xf32> -> vector<2x64xf32>
    %c45 = arith.constant 45 : index
    %c0_230 = arith.constant 0 : index
    %232 = vector.load %arg11[%c45, %c0_230] : memref<128x64xf32, #tpu.memory_space<vmem>>, vector<1x64xf32>
    %c109 = arith.constant 109 : index
    %c0_231 = arith.constant 0 : index
    %233 = vector.load %arg11[%c109, %c0_231] : memref<128x64xf32, #tpu.memory_space<vmem>>, vector<1x64xf32>
    %234 = tpu.concatenate %232, %233 in 0 : vector<1x64xf32>, vector<1x64xf32> -> vector<2x64xf32>
    %c46 = arith.constant 46 : index
    %c0_232 = arith.constant 0 : index
    %235 = vector.load %arg11[%c46, %c0_232] : memref<128x64xf32, #tpu.memory_space<vmem>>, vector<1x64xf32>
    %c110 = arith.constant 110 : index
    %c0_233 = arith.constant 0 : index
    %236 = vector.load %arg11[%c110, %c0_233] : memref<128x64xf32, #tpu.memory_space<vmem>>, vector<1x64xf32>
    %237 = tpu.concatenate %235, %236 in 0 : vector<1x64xf32>, vector<1x64xf32> -> vector<2x64xf32>
    %c47 = arith.constant 47 : index
    %c0_234 = arith.constant 0 : index
    %238 = vector.load %arg11[%c47, %c0_234] : memref<128x64xf32, #tpu.memory_space<vmem>>, vector<1x64xf32>
    %c111 = arith.constant 111 : index
    %c0_235 = arith.constant 0 : index
    %239 = vector.load %arg11[%c111, %c0_235] : memref<128x64xf32, #tpu.memory_space<vmem>>, vector<1x64xf32>
    %240 = tpu.concatenate %238, %239 in 0 : vector<1x64xf32>, vector<1x64xf32> -> vector<2x64xf32>
    %241 = tpu.concatenate %219, %222, %225, %228, %231, %234, %237, %240 in 1 : vector<2x64xf32>, vector<2x64xf32>, vector<2x64xf32>, vector<2x64xf32>, vector<2x64xf32>, vector<2x64xf32>, vector<2x64xf32>, vector<2x64xf32> -> vector<2x512xf32>
    %242 = arith.truncf %241 : vector<2x512xf32> to vector<2x512xbf16>
    %c5_236 = arith.constant 5 : index
    %c0_237 = arith.constant 0 : index
    %c0_238 = arith.constant 0 : index
    %243 = vector.load %arg12[%c5_236, %c0_237, %c0_238] : memref<8x512x256xbf16, #tpu.memory_space<vmem>>, vector<1x512x256xbf16>
    %244 = vector.shape_cast %243 : vector<1x512x256xbf16> to vector<512x256xbf16>
    %cst_239 = arith.constant dense<0.000000e+00> : vector<2x256xf32>
    %245 = tpu.matmul %242, %244, %cst_239 {dimension_numbers = #tpu.dot_dimension_numbers<[1], [0], [0], [1], [0, 0, 1, 1], [], []>} : vector<2x512xbf16>, vector<512x256xbf16>, vector<2x256xf32> -> vector<2x256xf32>
    %246 = arith.addf %216, %245 : vector<2x256xf32>
    %c48 = arith.constant 48 : index
    %c0_240 = arith.constant 0 : index
    %247 = vector.load %arg11[%c48, %c0_240] : memref<128x64xf32, #tpu.memory_space<vmem>>, vector<1x64xf32>
    %c112 = arith.constant 112 : index
    %c0_241 = arith.constant 0 : index
    %248 = vector.load %arg11[%c112, %c0_241] : memref<128x64xf32, #tpu.memory_space<vmem>>, vector<1x64xf32>
    %249 = tpu.concatenate %247, %248 in 0 : vector<1x64xf32>, vector<1x64xf32> -> vector<2x64xf32>
    %c49 = arith.constant 49 : index
    %c0_242 = arith.constant 0 : index
    %250 = vector.load %arg11[%c49, %c0_242] : memref<128x64xf32, #tpu.memory_space<vmem>>, vector<1x64xf32>
    %c113 = arith.constant 113 : index
    %c0_243 = arith.constant 0 : index
    %251 = vector.load %arg11[%c113, %c0_243] : memref<128x64xf32, #tpu.memory_space<vmem>>, vector<1x64xf32>
    %252 = tpu.concatenate %250, %251 in 0 : vector<1x64xf32>, vector<1x64xf32> -> vector<2x64xf32>
    %c50 = arith.constant 50 : index
    %c0_244 = arith.constant 0 : index
    %253 = vector.load %arg11[%c50, %c0_244] : memref<128x64xf32, #tpu.memory_space<vmem>>, vector<1x64xf32>
    %c114 = arith.constant 114 : index
    %c0_245 = arith.constant 0 : index
    %254 = vector.load %arg11[%c114, %c0_245] : memref<128x64xf32, #tpu.memory_space<vmem>>, vector<1x64xf32>
    %255 = tpu.concatenate %253, %254 in 0 : vector<1x64xf32>, vector<1x64xf32> -> vector<2x64xf32>
    %c51 = arith.constant 51 : index
    %c0_246 = arith.constant 0 : index
    %256 = vector.load %arg11[%c51, %c0_246] : memref<128x64xf32, #tpu.memory_space<vmem>>, vector<1x64xf32>
    %c115 = arith.constant 115 : index
    %c0_247 = arith.constant 0 : index
    %257 = vector.load %arg11[%c115, %c0_247] : memref<128x64xf32, #tpu.memory_space<vmem>>, vector<1x64xf32>
    %258 = tpu.concatenate %256, %257 in 0 : vector<1x64xf32>, vector<1x64xf32> -> vector<2x64xf32>
    %c52 = arith.constant 52 : index
    %c0_248 = arith.constant 0 : index
    %259 = vector.load %arg11[%c52, %c0_248] : memref<128x64xf32, #tpu.memory_space<vmem>>, vector<1x64xf32>
    %c116 = arith.constant 116 : index
    %c0_249 = arith.constant 0 : index
    %260 = vector.load %arg11[%c116, %c0_249] : memref<128x64xf32, #tpu.memory_space<vmem>>, vector<1x64xf32>
    %261 = tpu.concatenate %259, %260 in 0 : vector<1x64xf32>, vector<1x64xf32> -> vector<2x64xf32>
    %c53 = arith.constant 53 : index
    %c0_250 = arith.constant 0 : index
    %262 = vector.load %arg11[%c53, %c0_250] : memref<128x64xf32, #tpu.memory_space<vmem>>, vector<1x64xf32>
    %c117 = arith.constant 117 : index
    %c0_251 = arith.constant 0 : index
    %263 = vector.load %arg11[%c117, %c0_251] : memref<128x64xf32, #tpu.memory_space<vmem>>, vector<1x64xf32>
    %264 = tpu.concatenate %262, %263 in 0 : vector<1x64xf32>, vector<1x64xf32> -> vector<2x64xf32>
    %c54 = arith.constant 54 : index
    %c0_252 = arith.constant 0 : index
    %265 = vector.load %arg11[%c54, %c0_252] : memref<128x64xf32, #tpu.memory_space<vmem>>, vector<1x64xf32>
    %c118 = arith.constant 118 : index
    %c0_253 = arith.constant 0 : index
    %266 = vector.load %arg11[%c118, %c0_253] : memref<128x64xf32, #tpu.memory_space<vmem>>, vector<1x64xf32>
    %267 = tpu.concatenate %265, %266 in 0 : vector<1x64xf32>, vector<1x64xf32> -> vector<2x64xf32>
    %c55 = arith.constant 55 : index
    %c0_254 = arith.constant 0 : index
    %268 = vector.load %arg11[%c55, %c0_254] : memref<128x64xf32, #tpu.memory_space<vmem>>, vector<1x64xf32>
    %c119 = arith.constant 119 : index
    %c0_255 = arith.constant 0 : index
    %269 = vector.load %arg11[%c119, %c0_255] : memref<128x64xf32, #tpu.memory_space<vmem>>, vector<1x64xf32>
    %270 = tpu.concatenate %268, %269 in 0 : vector<1x64xf32>, vector<1x64xf32> -> vector<2x64xf32>
    %271 = tpu.concatenate %249, %252, %255, %258, %261, %264, %267, %270 in 1 : vector<2x64xf32>, vector<2x64xf32>, vector<2x64xf32>, vector<2x64xf32>, vector<2x64xf32>, vector<2x64xf32>, vector<2x64xf32>, vector<2x64xf32> -> vector<2x512xf32>
    %272 = arith.truncf %271 : vector<2x512xf32> to vector<2x512xbf16>
    %c6_256 = arith.constant 6 : index
    %c0_257 = arith.constant 0 : index
    %c0_258 = arith.constant 0 : index
    %273 = vector.load %arg12[%c6_256, %c0_257, %c0_258] : memref<8x512x256xbf16, #tpu.memory_space<vmem>>, vector<1x512x256xbf16>
    %274 = vector.shape_cast %273 : vector<1x512x256xbf16> to vector<512x256xbf16>
    %cst_259 = arith.constant dense<0.000000e+00> : vector<2x256xf32>
    %275 = tpu.matmul %272, %274, %cst_259 {dimension_numbers = #tpu.dot_dimension_numbers<[1], [0], [0], [1], [0, 0, 1, 1], [], []>} : vector<2x512xbf16>, vector<512x256xbf16>, vector<2x256xf32> -> vector<2x256xf32>
    %276 = arith.addf %246, %275 : vector<2x256xf32>
    %c56 = arith.constant 56 : index
    %c0_260 = arith.constant 0 : index
    %277 = vector.load %arg11[%c56, %c0_260] : memref<128x64xf32, #tpu.memory_space<vmem>>, vector<1x64xf32>
    %c120 = arith.constant 120 : index
    %c0_261 = arith.constant 0 : index
    %278 = vector.load %arg11[%c120, %c0_261] : memref<128x64xf32, #tpu.memory_space<vmem>>, vector<1x64xf32>
    %279 = tpu.concatenate %277, %278 in 0 : vector<1x64xf32>, vector<1x64xf32> -> vector<2x64xf32>
    %c57 = arith.constant 57 : index
    %c0_262 = arith.constant 0 : index
    %280 = vector.load %arg11[%c57, %c0_262] : memref<128x64xf32, #tpu.memory_space<vmem>>, vector<1x64xf32>
    %c121 = arith.constant 121 : index
    %c0_263 = arith.constant 0 : index
    %281 = vector.load %arg11[%c121, %c0_263] : memref<128x64xf32, #tpu.memory_space<vmem>>, vector<1x64xf32>
    %282 = tpu.concatenate %280, %281 in 0 : vector<1x64xf32>, vector<1x64xf32> -> vector<2x64xf32>
    %c58 = arith.constant 58 : index
    %c0_264 = arith.constant 0 : index
    %283 = vector.load %arg11[%c58, %c0_264] : memref<128x64xf32, #tpu.memory_space<vmem>>, vector<1x64xf32>
    %c122 = arith.constant 122 : index
    %c0_265 = arith.constant 0 : index
    %284 = vector.load %arg11[%c122, %c0_265] : memref<128x64xf32, #tpu.memory_space<vmem>>, vector<1x64xf32>
    %285 = tpu.concatenate %283, %284 in 0 : vector<1x64xf32>, vector<1x64xf32> -> vector<2x64xf32>
    %c59 = arith.constant 59 : index
    %c0_266 = arith.constant 0 : index
    %286 = vector.load %arg11[%c59, %c0_266] : memref<128x64xf32, #tpu.memory_space<vmem>>, vector<1x64xf32>
    %c123 = arith.constant 123 : index
    %c0_267 = arith.constant 0 : index
    %287 = vector.load %arg11[%c123, %c0_267] : memref<128x64xf32, #tpu.memory_space<vmem>>, vector<1x64xf32>
    %288 = tpu.concatenate %286, %287 in 0 : vector<1x64xf32>, vector<1x64xf32> -> vector<2x64xf32>
    %c60 = arith.constant 60 : index
    %c0_268 = arith.constant 0 : index
    %289 = vector.load %arg11[%c60, %c0_268] : memref<128x64xf32, #tpu.memory_space<vmem>>, vector<1x64xf32>
    %c124 = arith.constant 124 : index
    %c0_269 = arith.constant 0 : index
    %290 = vector.load %arg11[%c124, %c0_269] : memref<128x64xf32, #tpu.memory_space<vmem>>, vector<1x64xf32>
    %291 = tpu.concatenate %289, %290 in 0 : vector<1x64xf32>, vector<1x64xf32> -> vector<2x64xf32>
    %c61 = arith.constant 61 : index
    %c0_270 = arith.constant 0 : index
    %292 = vector.load %arg11[%c61, %c0_270] : memref<128x64xf32, #tpu.memory_space<vmem>>, vector<1x64xf32>
    %c125 = arith.constant 125 : index
    %c0_271 = arith.constant 0 : index
    %293 = vector.load %arg11[%c125, %c0_271] : memref<128x64xf32, #tpu.memory_space<vmem>>, vector<1x64xf32>
    %294 = tpu.concatenate %292, %293 in 0 : vector<1x64xf32>, vector<1x64xf32> -> vector<2x64xf32>
    %c62 = arith.constant 62 : index
    %c0_272 = arith.constant 0 : index
    %295 = vector.load %arg11[%c62, %c0_272] : memref<128x64xf32, #tpu.memory_space<vmem>>, vector<1x64xf32>
    %c126 = arith.constant 126 : index
    %c0_273 = arith.constant 0 : index
    %296 = vector.load %arg11[%c126, %c0_273] : memref<128x64xf32, #tpu.memory_space<vmem>>, vector<1x64xf32>
    %297 = tpu.concatenate %295, %296 in 0 : vector<1x64xf32>, vector<1x64xf32> -> vector<2x64xf32>
    %c63 = arith.constant 63 : index
    %c0_274 = arith.constant 0 : index
    %298 = vector.load %arg11[%c63, %c0_274] : memref<128x64xf32, #tpu.memory_space<vmem>>, vector<1x64xf32>
    %c127 = arith.constant 127 : index
    %c0_275 = arith.constant 0 : index
    %299 = vector.load %arg11[%c127, %c0_275] : memref<128x64xf32, #tpu.memory_space<vmem>>, vector<1x64xf32>
    %300 = tpu.concatenate %298, %299 in 0 : vector<1x64xf32>, vector<1x64xf32> -> vector<2x64xf32>
    %301 = tpu.concatenate %279, %282, %285, %288, %291, %294, %297, %300 in 1 : vector<2x64xf32>, vector<2x64xf32>, vector<2x64xf32>, vector<2x64xf32>, vector<2x64xf32>, vector<2x64xf32>, vector<2x64xf32>, vector<2x64xf32> -> vector<2x512xf32>
    %302 = arith.truncf %301 : vector<2x512xf32> to vector<2x512xbf16>
    %c7_276 = arith.constant 7 : index
    %c0_277 = arith.constant 0 : index
    %c0_278 = arith.constant 0 : index
    %303 = vector.load %arg12[%c7_276, %c0_277, %c0_278] : memref<8x512x256xbf16, #tpu.memory_space<vmem>>, vector<1x512x256xbf16>
    %304 = vector.shape_cast %303 : vector<1x512x256xbf16> to vector<512x256xbf16>
    %cst_279 = arith.constant dense<0.000000e+00> : vector<2x256xf32>
    %305 = tpu.matmul %302, %304, %cst_279 {dimension_numbers = #tpu.dot_dimension_numbers<[1], [0], [0], [1], [0, 0, 1, 1], [], []>} : vector<2x512xbf16>, vector<512x256xbf16>, vector<2x256xf32> -> vector<2x256xf32>
    %306 = arith.addf %276, %305 : vector<2x256xf32>
    %c0_280 = arith.constant 0 : index
    %c0_281 = arith.constant 0 : index
    %307 = vector.load %arg5[%c0_280, %c0_281] : memref<1x256xf32, #tpu.memory_space<vmem>>, vector<1x256xf32>
    %308 = vector.broadcast %307 : vector<1x256xf32> to vector<2x256xf32>
    %309 = arith.addf %306, %308 : vector<2x256xf32>
    %cst_282 = arith.constant 0.000000e+00 : f32
    %310 = vector.broadcast %cst_282 : f32 to vector<2x256xf32>
    %311 = arith.maximumf %309, %310 : vector<2x256xf32>
    %312 = arith.truncf %311 : vector<2x256xf32> to vector<2x256xbf16>
    %c0_283 = arith.constant 0 : index
    %c0_284 = arith.constant 0 : index
    %313 = vector.load %arg6[%c0_283, %c0_284] : memref<256x4xbf16, #tpu.memory_space<vmem>>, vector<256x4xbf16>
    %cst_285 = arith.constant dense<0.000000e+00> : vector<2x4xf32>
    %314 = tpu.matmul %312, %313, %cst_285 {dimension_numbers = #tpu.dot_dimension_numbers<[1], [0], [0], [1], [0, 0, 1, 1], [], []>} : vector<2x256xbf16>, vector<256x4xbf16>, vector<2x4xf32> -> vector<2x4xf32>
    %c0_286 = arith.constant 0 : index
    %c0_287 = arith.constant 0 : index
    %315 = vector.load %arg7[%c0_286, %c0_287] : memref<1x4xf32, #tpu.memory_space<vmem>>, vector<1x4xf32>
    %316 = vector.broadcast %315 : vector<1x4xf32> to vector<2x4xf32>
    %317 = arith.addf %314, %316 : vector<2x4xf32>
    %c0_288 = arith.constant 0 : index
    %c0_289 = arith.constant 0 : index
    %318 = vector.load %arg9[%c0_288, %c0_289] : memref<2x4xf32, #tpu.memory_space<vmem>>, vector<2x4xf32>
    tpu.vector_store %arg9[%c0_288, %c0_289], %317 {strides = array<i32>} : memref<2x4xf32, #tpu.memory_space<vmem>>, vector<2x4xf32>,
    return
  }
}

</mosaic_0001>

<bundles_post_ra>
// kernel: dqn_forward.1
= control target key start
LH: loop header
LB: loop body
LE: loop exit
PB: predicated region body
PF: predicated region fallthrough
CT: control target
= control target key end

     0   :  { %14 = vsyncpa [#allocation7], 0  ;;  %s12274_s0 = inlined_call_operand.vmem [shape: f32[2,10,10,3], index: 0, kind: input, shape index: {}]   ;;  %s12275_s1 = inlined_call_operand.hbm [shape: bf16[27,64], index: 1, kind: input, shape index: {}]   ;;  %s12276_s2 = inlined_call_operand.hbm [shape: f32[1,64], index: 2, kind: input, shape index: {}]   ;;  %s12277_s3 = inlined_call_operand.vmem [shape: bf16[3,192,64], index: 3, kind: input, shape index: {}]   ;;  %s12278_s4 = inlined_call_operand.hbm [shape: f32[1,64], index: 4, kind: input, shape index: {}]   ;;  %s12279_s5 = inlined_call_operand.hbm [shape: f32[1,256], index: 5, kind: input, shape index: {}]   ;;  %s12280_s6 = inlined_call_operand.vmem [shape: bf16[256,4], index: 6, kind: input, shape index: {}]   ;;  %s12281_s7 = inlined_call_operand.hbm [shape: f32[1,4], index: 7, kind: input, shape index: {}]   ;;  %s12282_s8 = inlined_call_operand.hbm [shape: bf16[8,512,256], index: 8, kind: input, shape index: {}]   ;;  %s12283_s9 = inlined_call_operand.hbm [shape: f32[2,4], index: 9, kind: output, shape index: {}]  }
   0x1   :  { %15 = vsyncpa [#allocation10], 0 }
   0x2   :  { %16 = vsyncpa [#allocation13], 0  ;;  %s38_s11 = sshll.u32 %s12276_s2, 4  ;;  %s39_s11 = int_to_ptr.hbm [resolvable:$true] %s38_s11 }
   0x3   :  { %17 = vsyncpa [#allocation8], 0  ;;  %s10670_s12 = smov [#allocation9]   ;;  %s62_s16 = sshll.u32 %s12279_s5, 4  ;;  %s63_s16 = int_to_ptr.hbm [resolvable:$true] %s62_s16 }
   0x4   :  { %s40_s13 = sshll.u32 %s10670_s12, 4  ;;  %s10671_s17 = smov [#allocation12]   ;;  %s41_s13 = int_to_ptr.vmem [resolvable:$true] %s40_s13 }
   0x5   :  { %43 = dma.hbm_to_vmem [thread:$0]  %s39_s11, 16, %s41_s13, [#allocation10]  }
   0x6   :  { %s64_s18 = sshll.u32 %s10671_s17, 4  ;;  %s24_s21 = sshll.u32 %s12275_s1, 4  ;;  %s65_s18 = int_to_ptr.vmem [resolvable:$true] %s64_s18  ;;  %s25_s21 = int_to_ptr.hbm [resolvable:$true] %s24_s21 }
   0x7   :  { %67 = dma.hbm_to_vmem [thread:$0]  %s63_s16, 32, %s65_s18, [#allocation13]  }
   0x8   :  { %s10672_s2 = smov [#allocation6]   ;;  %s51_s25 = sshll.u32 %s12278_s4, 4  ;;  %s52_s25 = int_to_ptr.hbm [resolvable:$true] %s51_s25 }
   0x9   :  { %s26_s22 = sshll.u32 %s10672_s2, 4  ;;  %s10673_s26 = smov 64   ;;  %s27_s22 = int_to_ptr.vmem [resolvable:$true] %s26_s22 }
   0xa   :  { %s10674_s5 = smov 4   ;;  %s10675_s27 = smov [#allocation11]  }
   0xb   :  { %32 = dma.hbm_to_vmem [thread:$0]  %s25_s21, 256, %s27_s22, [#allocation7], %s10673_s26, %s10673_s26, %s10674_s5  }
   0xc   :  { %s53_s28 = sshll.u32 %s10675_s27, 4  ;;  %s75_s30 = sshll.u32 %s12281_s7, 4  ;;  %s54_s28 = int_to_ptr.vmem [resolvable:$true] %s53_s28  ;;  %s76_s30 = int_to_ptr.hbm [resolvable:$true] %s75_s30 }
   0xd   :  { %56 = dma.hbm_to_vmem [thread:$0]  %s52_s25, 16, %s54_s28, [#allocation10]  }
   0xe   :  { %s10676_s10 = smov [#allocation14]  }
   0xf   :  { %s77_s11 = sshll.u32 %s10676_s10, 4  ;;  %s78_s11 = int_to_ptr.vmem [resolvable:$true] %s77_s11 }
  0x10   :  { %80 = dma.hbm_to_vmem [thread:$0]  %s76_s30, 16, %s78_s11, [#allocation13]  }
  0x11   :  { %10660 = dma.done.wait [#allocation7], 256  }
  0x12   :  { %10661 = vsyncadd [#allocation7], 4294967040 }
  0x13   :  { %10662 = dma.done.wait [#allocation10], 32  }
  0x14   :  { %10663 = vsyncadd [#allocation10], 4294967264 }
  0x15   :  { %10664 = dma.done.wait [#allocation13], 48  }
  0x16   :  { %10665 = vsyncadd [#allocation13], 4294967248  ;;  %v131_v0 = vld [vmem:[%s12274_s0 + $0x1] sm:$0xff]  ;;  %v132_v1 = vld [vmem:[%s12274_s0 + $0x11] sm:$0xff]  ;;  %s10677_s2 = smov 3   ;;  %s10678_s22 = smov 9  }
  0x17   :  { %v10765_v2 = vld [vmem:[%s12274_s0 + $0x10] sm:$0xff]  ;;  %v9979_v3 = vpack.i.bf16 %v132_v1, %v131_v0  ;;  %v10770_v4 = vld [vmem:[%s12274_s0 + $0x20] sm:$0xff]  ;;  %s10679_s27 = smov 15   ;;  %s10680_s1 = smov 6   ;;  %vm961_vm0 = vcmask 1044480   ;;  %vm962_vm1 = vcmask 1045504  }
  0x18   :  { %v9989_v5 = vpack.i.bf16 %v10770_v4, %v10765_v2  ;;  %v148_v6 = vld [vmem:[%s12274_s0 + $0x12] sm:$0xff]  ;;  %v7033_v7 = vld [vmem:[%s12274_s0 + $0x22] sm:$0xff]  ;;  %s10681_s30 = smov 12   ;;  %s10682_s13 = smov 18   ;;  %vm773_vm2 = vcmask 23552   ;;  %vm790_vm3 = vcmask 48128  }
  0x19   :  { %9980 = vrot.lane.b32.xlu0 %v9979_v3, %s10677_s2  ;;  %v9999_v8 = vpack.i.bf16 %v7033_v7, %v148_v6  ;;  %v147_v9 = vld [vmem:[%s12274_s0 + $0x2] sm:$0xff]  ;;  %v10792_v13 = vld [vmem:[%s12274_s0 + $0x30] sm:$0xff]  ;;  %s10683_s14 = smov 21   ;;  %s10684_s7 = smov 24   ;;  %vm807_vm4 = vcmask 72704   ;;  %vm824_vm5 = vcmask 97280  }
  0x1a   :  { %9990 = vrot.lane.b32.xlu1 %v9989_v5, %s10678_s22  ;;  %v6970_v10 = vld [vmem:[%s12274_s0 + $0x21] sm:$0xff]  ;;  %v9984_v11 = vpack.i.bf16 %v148_v6, %v147_v9  ;;  %v10004_v14 = vpack.i.bf16 %v10792_v13, %v10770_v4  ;;  %v7018_v15 = vld [vmem:[%s12274_s0 + $0x31] sm:$0xff]  ;;  %vm841_vm6 = vcmask 121856   ;;  %vm858_vm7 = vcmask 146432  }
  0x1b   :  { %10000 = vrot.lane.b32.xlu2 %v9999_v8, %s10679_s27  ;;  %v9994_v12 = vpack.i.bf16 %v6970_v10, %v132_v1  ;;  %v7034_v16 = vld [vmem:[%s12274_s0 + $0x32] sm:$0xff]  ;;  %v10009_v17 = vpack.i.bf16 %v7018_v15, %v6970_v10  ;;  %v10810_v19 = vld [vmem:[%s12274_s0 + $0x40] sm:$0xff]  ;;  %v7055_v10 = vld [vmem:[#allocation6 + $0x8] sm:$0xf]  ;;  %vm875_vm8 = vcmask 171008   ;;  %vm892_vm9 = vcmask 195584  }
  0x1c   :  { %v10014_v18 = vpack.i.bf16 %v7034_v16, %v7033_v7  ;;  %v10029_v20 = vpack.i.bf16 %v10810_v19, %v10792_v13  ;;  %v135_v21 = vld [vmem:[%s12274_s0 + $0x41] sm:$0xff]  ;;  %v10826_v24 = vld [vmem:[%s12274_s0 + $0x50] sm:$0xff]  ;;  %vm936_vm10 = vcmask 220160   ;;  %vm1034_vm11 = vcmask 523264  }
  0x1d   :  { %v10034_v22 = vpack.i.bf16 %v135_v21, %v7018_v15  ;;  %v6988_v23 = vld [vmem:[%s12274_s0 + $0x42] sm:$0xff]  ;;  %v10044_v26 = vpack.i.bf16 %v10826_v24, %v10810_v19  ;;  %v136_v27 = vld [vmem:[%s12274_s0 + $0x51] sm:$0xff]  ;;  %vm1061_vm12 = vcmask 516096   ;;  %vm1052_vm13 = vcmask 517120  }
  0x1e   :  { %v10039_v25 = vpack.i.bf16 %v6988_v23, %v7034_v16  ;;  %v10059_v28 = vpack.i.bf16 %v136_v27, %v135_v21  ;;  %v7036_v29 = vld [vmem:[%s12274_s0 + $0x52] sm:$0xff]  ;;  %v10845_v31 = vld [vmem:[%s12274_s0 + $0x60] sm:$0xff] }
  0x1f   :  { %v10054_v30 = vpack.i.bf16 %v7036_v29, %v6988_v23  ;;  %v6974_v32 = vld [vmem:[%s12274_s0 + $0x61] sm:$0xff]  ;;  %v10069_v33 = vpack.i.bf16 %v10845_v31, %v10826_v24  ;;  %v10861_v37 = vld [vmem:[%s12274_s0 + $0x70] sm:$0xff] }
  0x20   :  { %v10074_v34 = vpack.i.bf16 %v6974_v32, %v136_v27  ;;  %v153_v35 = vld [vmem:[%s12274_s0 + $0x62] sm:$0xff]  ;;  %v7022_v38 = vld [vmem:[%s12274_s0 + $0x71] sm:$0xff]  ;;  %v10084_v39 = vpack.i.bf16 %v10861_v37, %v10845_v31 }
  0x21   :  { %9985 = vrot.lane.b32.xlu0 %v9984_v11, %s10680_s1  ;;  %v10079_v36 = vpack.i.bf16 %v153_v35, %v7036_v29  ;;  %v10089_v40 = vpack.i.bf16 %v7022_v38, %v6974_v32  ;;  %v154_v41 = vld [vmem:[%s12274_s0 + $0x72] sm:$0xff]  ;;  %v6960_v43 = vld [vmem:[%s12274_s0 + $0x80] sm:$0xff]  ;;  %v9395_v11 = vld [vmem:[#allocation6 + $0x8] sm:$0x30] }
  0x22   :  { %9995 = vrot.lane.b32.xlu1 %v9994_v12, %s10681_s30  ;;  %v10104_v42 = vpack.i.bf16 %v154_v41, %v153_v35  ;;  %v10109_v44 = vpack.i.bf16 %v6960_v43, %v10861_v37  ;;  %v6976_v45 = vld [vmem:[%s12274_s0 + $0x81] sm:$0xff]  ;;  %v7008_v47 = vld [vmem:[%s12274_s0 + $0x90] sm:$0xff]  ;;  %v7056_v12 = vor.u32 %v9395_v11, %v7055_v10 }
  0x23   :  { %10005 = vrot.lane.b32.xlu2 %v10004_v14, %s10682_s13  ;;  %v6992_v46 = vld [vmem:[%s12274_s0 + $0x82] sm:$0xff]  ;;  %v10114_v48 = vpack.i.bf16 %v6976_v45, %v7022_v38  ;;  %v10124_v50 = vpack.i.bf16 %v7008_v47, %v6960_v43  ;;  %v7024_v51 = vld [vmem:[%s12274_s0 + $0x91] sm:$0xff]  ;;  %v10685_v14 = vmov 65535  }
  0x24   :  { %v10119_v49 = vpack.i.bf16 %v6992_v46, %v154_v41  ;;  %v7040_v52 = vld [vmem:[%s12274_s0 + $0x92] sm:$0xff]  ;;  %v139_v53 = vld [vmem:[%s12274_s0 + $0xa1] sm:$0xff]  ;;  %v10129_v55 = vpack.i.bf16 %v7024_v51, %v6976_v45  ;;  %v963_v15 = vsel %vm961_vm0, 4294967295, %v10685_v14 }
  0x25   :  { %v140_v54 = vld [vmem:[%s12274_s0 + $0xb1] sm:$0xff]  ;;  %v10134_v56 = vpack.i.bf16 %v7040_v52, %v6992_v46  ;;  %v155_v58 = vld [vmem:[%s12274_s0 + $0xa2] sm:$0xff] }
  0x26   :  { %v10139_v57 = vpack.i.bf16 %v140_v54, %v139_v53  ;;  %v156_v59 = vld [vmem:[%s12274_s0 + $0xb2] sm:$0xff]  ;;  %v10922_v61 = vld [vmem:[%s12274_s0 + $0xc0] sm:$0xff] }
  0x27   :  { %v10917_v60 = vld [vmem:[%s12274_s0 + $0xb0] sm:$0xff]  ;;  %v10144_v62 = vpack.i.bf16 %v156_v59, %v155_v58  ;;  %v141_v0 = vld [vmem:[%s12274_s0 + $0xc1] sm:$0xff] }
  0x28   :  { %v10149_v63 = vpack.i.bf16 %v10922_v61, %v10917_v60  ;;  %v10154_v1 = vpack.i.bf16 %v141_v0, %v140_v54  ;;  %v6994_v3 = vld [vmem:[%s12274_s0 + $0xc2] sm:$0xff]  ;;  %v10938_v5 = vld [vmem:[%s12274_s0 + $0xd0] sm:$0xff] }
  0x29   :  { %10010 = vrot.lane.b32.xlu0 %v10009_v17, %s10683_s14  ;;  %v10159_v6 = vpack.i.bf16 %v6994_v3, %v156_v59  ;;  %v10164_v8 = vpack.i.bf16 %v10938_v5, %v10922_v61  ;;  %v142_v9 = vld [vmem:[%s12274_s0 + $0xd1] sm:$0xff]  ;;  %v9394_v23 = vld [vmem:[#allocation6] sm:$0xff] }
  0x2a   :  { %10015 = vrot.lane.b32.xlu1 %v10014_v18, %s10684_s7  ;;  %v10179_v16 = vpack.i.bf16 %v142_v9, %v141_v0  ;;  %v10984_v35 = vld [vmem:[%s12274_s0 + $0xf1] sm:$0xff]  ;;  %v115_v45 = vld [vmem:[%s12274_s0] sm:$0xff] }
  0x2b   :  { %10020 = vrot.lane.b32.xlu2 %v10009_v17, %s10677_s2  ;;  %v964_v17 = vsel %vm962_vm1, %v963_v15, 0  ;;  %v10995_v41 = vld [vmem:[%s12274_s0 + $0xf2] sm:$0xff]  ;;  %v11007_v52 = vld [vmem:[%s12274_s0 + $0x100] sm:$0xff] }
  0x2c   :  { %v6982_v10 = vld [vmem:[%s12274_s0 + $0x101] sm:$0xff] }
  0x2d   :  { %v6998_v14 = vld [vmem:[%s12274_s0 + $0x102] sm:$0xff] }
  0x31   :  { %10025 = vrot.lane.b32.xlu0 %v10014_v18, %s10680_s1  ;;  %v7042_v18 = vld [vmem:[%s12274_s0 + $0xd2] sm:$0xff] }
  0x32   :  { %10030 = vrot.lane.b32.xlu1 %v10029_v20, %s10678_s22  ;;  %v966_v20 = vand.u32 %v7056_v12, %v964_v17  ;;  %v10174_v21 = vpack.i.bf16 %v7042_v18, %v6994_v3 }
  0x33   :  { %10035 = vrot.lane.b32.xlu2 %v10034_v22, %s10681_s30 }
  0x34   :  { %974 = vmatpush.bf16.msra.mxu0 %v966_v20 }
  0x38   :  { %975 = vmatpush.bf16.msra.mxu0 %v9394_v23 }
  0x39   :  { %10040 = vrot.lane.b32.xlu0 %v10039_v25, %s10679_s27  ;;  %v10961_v25 = vld [vmem:[%s12274_s0 + $0xe0] sm:$0xff] }
  0x3a   :  { %10045 = vrot.lane.b32.xlu1 %v10044_v26, %s10682_s13  ;;  %v6980_v26 = vld [vmem:[%s12274_s0 + $0xe1] sm:$0xff]  ;;  %v10189_v27 = vpack.i.bf16 %v10961_v25, %v10938_v5 }
  0x3b   :  { %10050 = vrot.lane.b32.xlu2 %v10059_v28, %s10683_s14  ;;  %v10194_v29 = vpack.i.bf16 %v6980_v26, %v142_v9 }
  0x41   :  { %10055 = vrot.lane.b32.xlu0 %v10054_v30, %s10684_s7 }
  0x42   :  { %10060 = vrot.lane.b32.xlu1 %v10059_v28, %s10677_s2 }
  0x43   :  { %10065 = vrot.lane.b32.xlu2 %v10054_v30, %s10680_s1  ;;  %v159_v30 = vld [vmem:[%s12274_s0 + $0xe2] sm:$0xff] }
  0x44   :  { %v10199_v32 = vpack.i.bf16 %v159_v30, %v7042_v18  ;;  %v10234_v18 = vpack.i.bf16 %v6982_v10, %v10984_v35 }
  0x49   :  { %10070 = vrot.lane.b32.xlu0 %v10069_v33, %s10678_s22  ;;  %v10979_v33 = vld [vmem:[%s12274_s0 + $0xf0] sm:$0xff] }
  0x4a   :  { %10075 = vrot.lane.b32.xlu1 %v10074_v34, %s10681_s30  ;;  %v10204_v38 = vpack.i.bf16 %v10979_v33, %v10961_v25  ;;  %v10229_v0 = vpack.i.bf16 %v11007_v52, %v10979_v33 }
  0x4b   :  { %10080 = vrot.lane.b32.xlu2 %v10079_v36, %s10679_s27 }
  0x51   :  { %10085 = vrot.lane.b32.xlu0 %v10084_v39, %s10682_s13 }
  0x52   :  { %10090 = vrot.lane.b32.xlu1 %v10089_v40, %s10683_s14 }
  0x53   :  { %10095 = vrot.lane.b32.xlu2 %v10104_v42, %s10684_s7 }
  0x59   :  { %10100 = vrot.lane.b32.xlu0 %v10089_v40, %s10677_s2  ;;  %v10209_v40 = vpack.i.bf16 %v10984_v35, %v6980_v26 }
  0x5a   :  { %10105 = vrot.lane.b32.xlu1 %v10104_v42, %s10680_s1 }
  0x5b   :  { %10110 = vrot.lane.b32.xlu2 %v10109_v44, %s10678_s22  ;;  %v10224_v44 = vpack.i.bf16 %v10995_v41, %v159_v30  ;;  %v10239_v30 = vpack.i.bf16 %v6998_v14, %v10995_v41  ;;  %v7030_v41 = vld [vmem:[%s12274_s0 + $0x111] sm:$0xff] }
  0x61   :  { %10115 = vrot.lane.b32.xlu0 %v10114_v48, %s10681_s30 }
  0x62   :  { %10120 = vrot.lane.b32.xlu1 %v10119_v49, %s10679_s27 }
  0x63   :  { %10125 = vrot.lane.b32.xlu2 %v10124_v50, %s10682_s13 }
  0x69   :  { %10130 = vrot.lane.b32.xlu0 %v10129_v55, %s10683_s14 }
  0x6a   :  { %10135 = vrot.lane.b32.xlu1 %v10134_v56, %s10684_s7 }
  0x6b   :  { %10140 = vrot.lane.b32.xlu2 %v10139_v57, %s10677_s2 }
  0x71   :  { %10145 = vrot.lane.b32.xlu0 %v10144_v62, %s10680_s1 }
  0x72   :  { %10150 = vrot.lane.b32.xlu1 %v10149_v63, %s10678_s22 }
  0x73   :  { %10155 = vrot.lane.b32.xlu2 %v10154_v1, %s10681_s30 }
  0x75   :  { %v10941_v7 = vpop.permute.xlu2 %10000 }
  0x76   :  { %v10003_v1 = vunpack.i.h.bf16 %v10941_v7 }
  0x79   :  { %10160 = vrot.lane.b32.xlu0 %v10159_v6, %s10679_s27 }
  0x7a   :  { %10165 = vrot.lane.b32.xlu1 %v10164_v8, %s10682_s13 }
  0x7b   :  { %10170 = vrot.lane.b32.xlu2 %v10179_v16, %s10683_s14 }
  0x7d   :  { %v10954_v22 = vpop.permute.xlu2 %10005 }
  0x7e   :  { %v10008_v8 = vunpack.i.h.bf16 %v10954_v22  ;;  %v10007_v9 = vunpack.i.l.bf16 %v10954_v22 }
  0x81   :  { %10175 = vrot.lane.b32.xlu0 %v10174_v21, %s10684_s7 }
  0x82   :  { %10180 = vrot.lane.b32.xlu1 %v10179_v16, %s10677_s2 }
  0x83   :  { %10185 = vrot.lane.b32.xlu2 %v10174_v21, %s10680_s1 }
  0x85   :  { %v10969_v28 = vpop.permute.xlu2 %10020 }
  0x89   :  { %10190 = vrot.lane.b32.xlu0 %v10189_v27, %s10678_s22 }
  0x8a   :  { %10195 = vrot.lane.b32.xlu1 %v10194_v29, %s10681_s30 }
  0x8b   :  { %v9981_v34 = vpop.permute.xlu0 %9980  ;;  %10200 = vrot.lane.b32.xlu2 %v10199_v32, %s10679_s27  ;;  %v11048_v32 = vld [vmem:[%s12274_s0 + $0x110] sm:$0xff] }
  0x8c   :  { %v9991_v36 = vpop.permute.xlu1 %9990  ;;  %v9983_v42 = vunpack.i.h.bf16 %v9981_v34  ;;  %v9982_v43 = vunpack.i.l.bf16 %v9981_v34 }
  0x8d   :  { %v10989_v39 = vpop.permute.xlu2 %10035  ;;  %v9993_v47 = vunpack.i.h.bf16 %v9991_v36  ;;  %v9992_v48 = vunpack.i.l.bf16 %v9991_v36  ;;  %v10244_v36 = vpack.i.bf16 %v11048_v32, %v11007_v52 }
  0x8e   :  { %v774_v53 = vsel %vm773_vm2, %v115_v45, %v9982_v43  ;;  %v775_v54 = vsel %vm773_vm2, %v10765_v2, %v9983_v42  ;;  %v10002_v2 = vunpack.i.l.bf16 %v10941_v7  ;;  %v10022_v42 = vunpack.i.l.bf16 %v10969_v28 }
  0x91   :  { %10205 = vrot.lane.b32.xlu0 %v10204_v38, %s10682_s13 }
  0x92   :  { %10210 = vrot.lane.b32.xlu1 %v10209_v40, %s10683_s14 }
  0x93   :  { %v9986_v46 = vpop.permute.xlu0 %9985  ;;  %10215 = vrot.lane.b32.xlu2 %v10224_v44, %s10684_s7 }
  0x94   :  { %v9988_v49 = vunpack.i.h.bf16 %v9986_v46  ;;  %v9987_v50 = vunpack.i.l.bf16 %v9986_v46  ;;  %v9996_v51 = vpop.permute.xlu1 %9995 }
  0x95   :  { %v9998_v55 = vunpack.i.h.bf16 %v9996_v51  ;;  %v9997_v56 = vunpack.i.l.bf16 %v9996_v51  ;;  %v11012_v57 = vpop.permute.xlu2 %10050 }
  0x96   :  { %v791_v58 = vsel %vm790_vm3, %v774_v53, %v9987_v50  ;;  %v792_v59 = vsel %vm790_vm3, %v775_v54, %v9988_v49  ;;  %v10249_v49 = vpack.i.bf16 %v7030_v41, %v6982_v10 }
  0x97   :  { %v808_v62 = vsel %vm807_vm4, %v791_v58, %v9992_v48  ;;  %v809_v63 = vsel %vm807_vm4, %v792_v59, %v9993_v47  ;;  %v776_v47 = vsel %vm773_vm2, %v10770_v4, %v10022_v42  ;;  %v10038_v58 = vunpack.i.h.bf16 %v10989_v39  ;;  %v6968_v4 = vld [vmem:[%s12274_s0 + $0x120] sm:$0xff] }
  0x98   :  { %v825_v3 = vsel %vm824_vm5, %v808_v62, %v9997_v56  ;;  %v826_v6 = vsel %vm824_vm5, %v809_v63, %v9998_v55  ;;  %v10037_v59 = vunpack.i.l.bf16 %v10989_v39  ;;  %v6984_v39 = vld [vmem:[%s12274_s0 + $0x121] sm:$0xff] }
  0x99   :  { %10220 = vrot.lane.b32.xlu0 %v10209_v40, %s10677_s2  ;;  %v842_v11 = vsel %vm841_vm6, %v825_v3, %v10002_v2  ;;  %v843_v12 = vsel %vm841_vm6, %v826_v6, %v10003_v1  ;;  %v10023_v40 = vunpack.i.h.bf16 %v10969_v28  ;;  %v10269_v3 = vpack.i.bf16 %v6968_v4, %v11048_v32 }
  0x9a   :  { %10225 = vrot.lane.b32.xlu1 %v10224_v44, %s10680_s1  ;;  %v859_v20 = vsel %vm858_vm7, %v842_v11, %v10007_v9  ;;  %v860_v21 = vsel %vm858_vm7, %v843_v12, %v10008_v8  ;;  %v7046_v44 = vld [vmem:[%s12274_s0 + $0x112] sm:$0xff] }
  0x9b   :  { %v10011_v7 = vpop.permute.xlu0 %10010  ;;  %10230 = vrot.lane.b32.xlu2 %v10229_v0, %s10678_s22  ;;  %v777_v48 = vsel %vm773_vm2, %v10792_v13, %v10023_v40  ;;  %v10254_v51 = vpack.i.bf16 %v7046_v44, %v6998_v14  ;;  %v10274_v14 = vpack.i.bf16 %v6984_v39, %v7030_v41 }
  0x9c   :  { %v10013_v15 = vunpack.i.h.bf16 %v10011_v7  ;;  %v10012_v16 = vunpack.i.l.bf16 %v10011_v7  ;;  %v10016_v17 = vpop.permute.xlu1 %10015 }
  0x9d   :  { %v10018_v22 = vunpack.i.h.bf16 %v10016_v17  ;;  %v10017_v23 = vunpack.i.l.bf16 %v10016_v17  ;;  %v11040_v26 = vpop.permute.xlu2 %10065 }
  0x9e   :  { %v876_v27 = vsel %vm875_vm8, %v859_v20, %v10012_v16  ;;  %v877_v29 = vsel %vm875_vm8, %v860_v21, %v10013_v15  ;;  %v10053_v15 = vunpack.i.h.bf16 %v11012_v57  ;;  %v10052_v16 = vunpack.i.l.bf16 %v11012_v57  ;;  %v7000_v20 = vld [vmem:[%s12274_s0 + $0x122] sm:$0xff] }
  0x9f   :  { %v893_v34 = vsel %vm892_vm9, %v876_v27, %v10017_v23  ;;  %v894_v35 = vsel %vm892_vm9, %v877_v29, %v10018_v22  ;;  %v7016_v22 = vld [vmem:[%s12274_s0 + $0x130] sm:$0xff] }
  0xa0   :  { %v909_v38 = vpack.c.bf16 %v894_v35, %v893_v34  ;;  %v10279_v34 = vpack.i.bf16 %v7000_v20, %v7046_v44  ;;  %v7032_v35 = vld [vmem:[%s12274_s0 + $0x131] sm:$0xff]  ;;  %v10284_v40 = vpack.i.bf16 %v7016_v22, %v6968_v4  ;;  %v10068_v44 = vunpack.i.h.bf16 %v11040_v26 }
  0xa1   :  { %10235 = vrot.lane.b32.xlu0 %v10234_v18, %s10681_s30 }
  0xa2   :  { %10240 = vrot.lane.b32.xlu1 %v10239_v30, %s10679_s27  ;;  %7057 = vmatmul.msk.bf16.vlgmr.msra.gmra.mxu0 %vm936_vm10, %v909_v38 }
  0xa3   :  { %v10026_v43 = vpop.permute.xlu0 %10025  ;;  %10245 = vrot.lane.b32.xlu2 %v10244_v36, %s10682_s13 }
  0xa4   :  { %v10028_v45 = vunpack.i.h.bf16 %v10026_v43  ;;  %v10027_v46 = vunpack.i.l.bf16 %v10026_v43  ;;  %v10031_v28 = vpop.permute.xlu1 %10030 }
  0xa5   :  { %v11070_v50 = vpop.permute.xlu2 %10080  ;;  %v10033_v53 = vunpack.i.h.bf16 %v10031_v28  ;;  %v10032_v54 = vunpack.i.l.bf16 %v10031_v28  ;;  %v10067_v28 = vunpack.i.l.bf16 %v11040_v26 }
  0xa6   :  { %v793_v55 = vsel %vm790_vm3, %v776_v47, %v10027_v46  ;;  %v794_v56 = vsel %vm790_vm3, %v777_v48, %v10028_v45  ;;  %v10289_v46 = vpack.i.bf16 %v7032_v35, %v6984_v39  ;;  %v7048_v47 = vld [vmem:[%s12274_s0 + $0x132] sm:$0xff] }
  0xa7   :  { %v810_v13 = vsel %vm807_vm4, %v793_v55, %v10032_v54  ;;  %v811_v62 = vsel %vm807_vm4, %v794_v56, %v10033_v53  ;;  %v10294_v56 = vpack.i.bf16 %v7048_v47, %v7000_v20 }
  0xa8   :  { %v827_v8 = vsel %vm824_vm5, %v810_v13, %v10037_v59  ;;  %v828_v9 = vsel %vm824_vm5, %v811_v62, %v10038_v58 }
  0xa9   :  { %10250 = vrot.lane.b32.xlu0 %v10249_v49, %s10683_s14 }
  0xaa   :  { %10255 = vrot.lane.b32.xlu1 %v10254_v51, %s10684_s7 }
  0xab   :  { %v10041_v63 = vpop.permute.xlu0 %10040  ;;  %10260 = vrot.lane.b32.xlu2 %v10249_v49, %s10677_s2 }
  0xac   :  { %v10043_v0 = vunpack.i.h.bf16 %v10041_v63  ;;  %v10042_v1 = vunpack.i.l.bf16 %v10041_v63  ;;  %v10046_v2 = vpop.permute.xlu1 %10045  ;;  %v10082_v63 = vunpack.i.l.bf16 %v11070_v50 }
  0xad   :  { %v11085_v6 = vpop.permute.xlu2 %10095  ;;  %v10048_v10 = vunpack.i.h.bf16 %v10046_v2  ;;  %v10047_v11 = vunpack.i.l.bf16 %v10046_v2 }
  0xae   :  { %v844_v12 = vsel %vm841_vm6, %v827_v8, %v10042_v1  ;;  %v845_v7 = vsel %vm841_vm6, %v828_v9, %v10043_v0  ;;  %v10098_v9 = vunpack.i.h.bf16 %v11085_v6 }
  0xaf   :  { %v861_v17 = vsel %vm858_vm7, %v844_v12, %v10047_v11  ;;  %v862_v18 = vsel %vm858_vm7, %v845_v7, %v10048_v10  ;;  %v10097_v10 = vunpack.i.l.bf16 %v11085_v6 }
  0xb0   :  { %v878_v29 = vsel %vm875_vm8, %v861_v17, %v10052_v16  ;;  %v879_v30 = vsel %vm875_vm8, %v862_v18, %v10053_v15 }
  0xb1   :  { %10265 = vrot.lane.b32.xlu0 %v10254_v51, %s10680_s1  ;;  %s109_s1 = sshll.u32 %s12282_s8, 4  ;;  %s110_s1 = int_to_ptr.hbm [resolvable:$true] %s109_s1 }
  0xb2   :  { %10270 = vrot.lane.b32.xlu1 %v10269_v3, %s10678_s22 }
  0xb3   :  { %v10056_v21 = vpop.permute.xlu0 %10055  ;;  %10275 = vrot.lane.b32.xlu2 %v10274_v14, %s10681_s30  ;;  %s10687_s30 = smov [#allocation4]  }
  0xb4   :  { %v10058_v57 = vunpack.i.h.bf16 %v10056_v21  ;;  %v10057_v23 = vunpack.i.l.bf16 %v10056_v21  ;;  %v10061_v27 = vpop.permute.xlu1 %10060  ;;  %s111_s21 = sshll.u32 %s10687_s30, 4  ;;  %s112_s21 = int_to_ptr.vmem [resolvable:$true] %s111_s21 }
  0xb5   :  { %v11114_v42 = vpop.permute.xlu2 %10110  ;;  %v10063_v41 = vunpack.i.h.bf16 %v10061_v27  ;;  %v10062_v43 = vunpack.i.l.bf16 %v10061_v27  ;;  %114 = dma.hbm_to_vmem [thread:$0]  %s110_s1, 65536, %s112_s21, [#allocation5] }
  0xb6   :  { %v895_v36 = vsel %vm892_vm9, %v878_v29, %v10057_v23  ;;  %v896_v38 = vsel %vm892_vm9, %v879_v30, %v10058_v57 }
  0xb7   :  { %v910_v45 = vpack.c.bf16 %v896_v38, %v895_v36  ;;  %v778_v48 = vsel %vm773_vm2, %v10810_v19, %v10062_v43  ;;  %v779_v49 = vsel %vm773_vm2, %v10826_v24, %v10063_v41  ;;  %v10083_v24 = vunpack.i.h.bf16 %v11070_v50 }
  0xb8   :  { %v795_v26 = vsel %vm790_vm3, %v778_v48, %v10067_v28  ;;  %v796_v58 = vsel %vm790_vm3, %v779_v49, %v10068_v44  ;;  %v10113_v36 = vunpack.i.h.bf16 %v11114_v42  ;;  %v10112_v38 = vunpack.i.l.bf16 %v11114_v42 }
  0xb9   :  { %10280 = vrot.lane.b32.xlu0 %v10279_v34, %s10679_s27  ;;  %7058 = vmatmul.msk.bf16.gmra.mxu0 %vm936_vm10, %v910_v45 }
  0xba   :  { %10285 = vrot.lane.b32.xlu1 %v10284_v40, %s10682_s13 }
  0xbb   :  { %v10071_v51 = vpop.permute.xlu0 %10070  ;;  %10290 = vrot.lane.b32.xlu2 %v10289_v46, %s10683_s14 }
  0xbc   :  { %v10073_v53 = vunpack.i.h.bf16 %v10071_v51  ;;  %v10072_v54 = vunpack.i.l.bf16 %v10071_v51  ;;  %v10076_v55 = vpop.permute.xlu1 %10075 }
  0xbd   :  { %v10078_v59 = vunpack.i.h.bf16 %v10076_v55  ;;  %v10077_v4 = vunpack.i.l.bf16 %v10076_v55  ;;  %v10126_v62 = vpop.permute.xlu2 %10125 }
  0xbe   :  { %v812_v13 = vsel %vm807_vm4, %v795_v26, %v10072_v54  ;;  %v813_v19 = vsel %vm807_vm4, %v796_v58, %v10073_v53  ;;  %v10128_v42 = vunpack.i.h.bf16 %v10126_v62  ;;  %v10127_v53 = vunpack.i.l.bf16 %v10126_v62 }
  0xbf   :  { %v829_v0 = vsel %vm824_vm5, %v812_v13, %v10077_v4  ;;  %v830_v1 = vsel %vm824_vm5, %v813_v19, %v10078_v59 }
  0xc0   :  { %v846_v11 = vsel %vm841_vm6, %v829_v0, %v10082_v63  ;;  %v847_v12 = vsel %vm841_vm6, %v830_v1, %v10083_v24 }
  0xc1   :  { %10295 = vrot.lane.b32.xlu0 %v10294_v56, %s10684_s7 }
  0xc3   :  { %v10086_v2 = vpop.permute.xlu0 %10085 }
  0xc4   :  { %v10088_v3 = vunpack.i.h.bf16 %v10086_v2  ;;  %v10087_v39 = vunpack.i.l.bf16 %v10086_v2  ;;  %v10091_v8 = vpop.permute.xlu1 %10090 }
  0xc5   :  { %v10093_v7 = vunpack.i.h.bf16 %v10091_v8  ;;  %v10092_v50 = vunpack.i.l.bf16 %v10091_v8  ;;  %v10141_v6 = vpop.permute.xlu2 %10140 }
  0xc6   :  { %v863_v14 = vsel %vm858_vm7, %v846_v11, %v10087_v39  ;;  %v864_v15 = vsel %vm858_vm7, %v847_v12, %v10088_v3  ;;  %v10143_v39 = vunpack.i.h.bf16 %v10141_v6  ;;  %v10142_v8 = vunpack.i.l.bf16 %v10141_v6 }
  0xc7   :  { %v880_v16 = vsel %vm875_vm8, %v863_v14, %v10092_v50  ;;  %v881_v17 = vsel %vm875_vm8, %v864_v15, %v10093_v7 }
  0xc8   :  { %v897_v18 = vsel %vm892_vm9, %v880_v16, %v10097_v10  ;;  %v898_v20 = vsel %vm892_vm9, %v881_v17, %v10098_v9  ;;  %v123_v9 = vld [vmem:[%s12274_s0 + $0xa0] sm:$0xff]  ;;  %v783_v14 = vsel %vm773_vm2, %v10917_v60, %v10143_v39 }
  0xc9   :  { %v911_v21 = vpack.c.bf16 %v898_v20, %v897_v18  ;;  %v782_v50 = vsel %vm773_vm2, %v123_v9, %v10142_v8 }
  0xcb   :  { %v10101_v22 = vpop.permute.xlu0 %10100  ;;  %7059 = vmatmul.msk.bf16.gmra.mxu0 %vm936_vm10, %v911_v21 }
  0xcc   :  { %v10103_v57 = vunpack.i.h.bf16 %v10101_v22  ;;  %v10102_v23 = vunpack.i.l.bf16 %v10101_v22  ;;  %v10106_v27 = vpop.permute.xlu1 %10105 }
  0xcd   :  { %v10108_v29 = vunpack.i.h.bf16 %v10106_v27  ;;  %v10107_v30 = vunpack.i.l.bf16 %v10106_v27  ;;  %v10156_v28 = vpop.permute.xlu2 %10155 }
  0xce   :  { %v780_v34 = vsel %vm773_vm2, %v10845_v31, %v10102_v23  ;;  %v781_v35 = vsel %vm773_vm2, %v10861_v37, %v10103_v57  ;;  %v10158_v21 = vunpack.i.h.bf16 %v10156_v28  ;;  %v10157_v6 = vunpack.i.l.bf16 %v10156_v28 }
  0xcf   :  { %v797_v40 = vsel %vm790_vm3, %v780_v34, %v10107_v30  ;;  %v798_v41 = vsel %vm790_vm3, %v781_v35, %v10108_v29 }
  0xd0   :  { %v814_v47 = vsel %vm807_vm4, %v797_v40, %v10112_v38  ;;  %v815_v31 = vsel %vm807_vm4, %v798_v41, %v10113_v36 }
  0xd3   :  { %v10116_v43 = vpop.permute.xlu0 %10115 }
  0xd4   :  { %v10118_v45 = vunpack.i.h.bf16 %v10116_v43  ;;  %v10117_v46 = vunpack.i.l.bf16 %v10116_v43  ;;  %v10121_v44 = vpop.permute.xlu1 %10120 }
  0xd5   :  { %v10123_v48 = vunpack.i.h.bf16 %v10121_v44  ;;  %v10122_v49 = vunpack.i.l.bf16 %v10121_v44  ;;  %v10171_v1 = vpop.permute.xlu2 %10170 }
  0xd6   :  { %v831_v37 = vsel %vm824_vm5, %v814_v47, %v10117_v46  ;;  %v832_v51 = vsel %vm824_vm5, %v815_v31, %v10118_v45  ;;  %v10173_v41 = vunpack.i.h.bf16 %v10171_v1  ;;  %v10172_v43 = vunpack.i.l.bf16 %v10171_v1 }
  0xd7   :  { %v848_v54 = vsel %vm841_vm6, %v831_v37, %v10122_v49  ;;  %v849_v55 = vsel %vm841_vm6, %v832_v51, %v10123_v48 }
  0xd8   :  { %v865_v4 = vsel %vm858_vm7, %v848_v54, %v10127_v53  ;;  %v866_v13 = vsel %vm858_vm7, %v849_v55, %v10128_v42 }
  0xdb   :  { %v10131_v56 = vpop.permute.xlu0 %10130 }
  0xdc   :  { %v10133_v26 = vunpack.i.h.bf16 %v10131_v56  ;;  %v10132_v58 = vunpack.i.l.bf16 %v10131_v56  ;;  %v10136_v59 = vpop.permute.xlu1 %10135 }
  0xdd   :  { %v10138_v19 = vunpack.i.h.bf16 %v10136_v59  ;;  %v10137_v24 = vunpack.i.l.bf16 %v10136_v59  ;;  %v10186_v20 = vpop.permute.xlu2 %10185 }
  0xde   :  { %v882_v63 = vsel %vm875_vm8, %v865_v4, %v10132_v58  ;;  %v883_v0 = vsel %vm875_vm8, %v866_v13, %v10133_v26  ;;  %v10188_v56 = vunpack.i.h.bf16 %v10186_v20  ;;  %v10187_v26 = vunpack.i.l.bf16 %v10186_v20 }
  0xdf   :  { %v899_v62 = vsel %vm892_vm9, %v882_v63, %v10137_v24  ;;  %v900_v2 = vsel %vm892_vm9, %v883_v0, %v10138_v19 }
  0xe0   :  { %v912_v3 = vpack.c.bf16 %v900_v2, %v899_v62 }
  0xe2   :  { %7060 = vmatmul.msk.bf16.gmra.mxu0 %vm936_vm10, %v912_v3 }
  0xe3   :  { %v10146_v10 = vpop.permute.xlu0 %10145 }
  0xe4   :  { %v10148_v11 = vunpack.i.h.bf16 %v10146_v10  ;;  %v10147_v12 = vunpack.i.l.bf16 %v10146_v10  ;;  %v10151_v7 = vpop.permute.xlu1 %10150 }
  0xe5   :  { %v10153_v15 = vunpack.i.h.bf16 %v10151_v7  ;;  %v10152_v16 = vunpack.i.l.bf16 %v10151_v7  ;;  %v10201_v44 = vpop.permute.xlu2 %10200 }
  0xe6   :  { %v799_v17 = vsel %vm790_vm3, %v782_v50, %v10147_v12  ;;  %v800_v18 = vsel %vm790_vm3, %v783_v14, %v10148_v11  ;;  %v10203_v8 = vunpack.i.h.bf16 %v10201_v44 }
  0xe7   :  { %v816_v22 = vsel %vm807_vm4, %v799_v17, %v10152_v16  ;;  %v817_v57 = vsel %vm807_vm4, %v800_v18, %v10153_v15  ;;  %v10686_v15 = vmov 0.0  }
  0xe8   :  { %v833_v34 = vsel %vm824_vm5, %v816_v22, %v10157_v6  ;;  %v834_v60 = vsel %vm824_vm5, %v817_v57, %v10158_v21  ;;  %1078 = vst.msk [vmem:[#allocation2 + $0x19] sm:$0x1] %vm1061_vm12, %v10686_v15  ;;  %v9419_v21 = vld [vmem:[%s12277_s3 + $0xb8] sm:$0xff] }
  0xe9   :  { %1079 = vst.msk [vmem:[#allocation2 + $0x29] sm:$0x1] %vm1061_vm12, %v10686_v15  ;;  %1580 = vmatpush.bf16.msra.mxu2 %v9419_v21 }
  0xea   :  { %1051 = vst.msk [vmem:[#allocation2] sm:$0xff] %vm1034_vm11, %v10686_v15 }
  0xeb   :  { %v10161_v23 = vpop.permute.xlu0 %10160  ;;  %1054 = vst.msk [vmem:[#allocation2 + $0xa0] sm:$0xff] %vm1034_vm11, %v10686_v15 }
  0xec   :  { %v10163_v27 = vunpack.i.h.bf16 %v10161_v23  ;;  %v10162_v29 = vunpack.i.l.bf16 %v10161_v23  ;;  %v10166_v30 = vpop.permute.xlu1 %10165  ;;  %1057 = vst.msk [vmem:[#allocation2 + $0x90] sm:$0xff] %vm1034_vm11, %v10686_v15 }
  0xed   :  { %v10168_v35 = vunpack.i.h.bf16 %v10166_v30  ;;  %v10167_v36 = vunpack.i.l.bf16 %v10166_v30  ;;  %v10216_v63 = vpop.permute.xlu2 %10215  ;;  %1059 = vst.msk [vmem:[#allocation2 + $0x130] sm:$0xff] %vm1034_vm11, %v10686_v15 }
  0xee   :  { %v850_v38 = vsel %vm841_vm6, %v833_v34, %v10162_v29  ;;  %v851_v40 = vsel %vm841_vm6, %v834_v60, %v10163_v27  ;;  %v10218_v50 = vunpack.i.h.bf16 %v10216_v63  ;;  %v10217_v14 = vunpack.i.l.bf16 %v10216_v63  ;;  %v9418_v60 = vld [vmem:[%s12277_s3 + $0xb0] sm:$0xff]  ;;  %1062 = vst.msk [vmem:[#allocation2 + $0x10] sm:$0x1] %vm1061_vm12, %v10686_v15 }
  0xef   :  { %v867_v45 = vsel %vm858_vm7, %v850_v38, %v10167_v36  ;;  %v868_v46 = vsel %vm858_vm7, %v851_v40, %v10168_v35  ;;  %1581 = vmatpush.bf16.msra.mxu2 %v9418_v60  ;;  %1063 = vst.msk [vmem:[#allocation2 + $0x20] sm:$0x1] %vm1061_vm12, %v10686_v15 }
  0xf0   :  { %v884_v49 = vsel %vm875_vm8, %v867_v45, %v10172_v43  ;;  %v885_v37 = vsel %vm875_vm8, %v868_v46, %v10173_v41  ;;  %1064 = vst.msk [vmem:[#allocation2 + $0x30] sm:$0x1] %vm1061_vm12, %v10686_v15  ;;  %v9417_v41 = vld [vmem:[%s12277_s3 + $0xa8] sm:$0xff] }
  0xf1   :  { %1065 = vst.msk [vmem:[#allocation2 + $0x40] sm:$0x1] %vm1061_vm12, %v10686_v15 }
  0xf2   :  { %1066 = vst.msk [vmem:[#allocation2 + $0x50] sm:$0x1] %vm1061_vm12, %v10686_v15 }
  0xf3   :  { %v10176_v28 = vpop.permute.xlu0 %10175  ;;  %1582 = vmatpush.bf16.msra.mxu2 %v9417_v41  ;;  %1067 = vst.msk [vmem:[#allocation2 + $0x60] sm:$0x1] %vm1061_vm12, %v10686_v15 }
  0xf4   :  { %v10178_v47 = vunpack.i.h.bf16 %v10176_v28  ;;  %v10177_v31 = vunpack.i.l.bf16 %v10176_v28  ;;  %v10181_v48 = vpop.permute.xlu1 %10180  ;;  %1068 = vst.msk [vmem:[#allocation2 + $0x70] sm:$0x1] %vm1061_vm12, %v10686_v15 }
  0xf5   :  { %v10183_v53 = vunpack.i.h.bf16 %v10181_v48  ;;  %v10182_v54 = vunpack.i.l.bf16 %v10181_v48  ;;  %v10231_v57 = vpop.permute.xlu2 %10230  ;;  %1069 = vst.msk [vmem:[#allocation2 + $0x80] sm:$0x1] %vm1061_vm12, %v10686_v15 }
  0xf6   :  { %v901_v51 = vsel %vm892_vm9, %v884_v49, %v10177_v31  ;;  %v902_v42 = vsel %vm892_vm9, %v885_v37, %v10178_v47  ;;  %v9416_v47 = vld [vmem:[%s12277_s3 + $0xa0] sm:$0xff]  ;;  %v10233_v31 = vunpack.i.h.bf16 %v10231_v57  ;;  %v10232_v48 = vunpack.i.l.bf16 %v10231_v57  ;;  %1070 = vst.msk [vmem:[#allocation2 + $0xb0] sm:$0x1] %vm1061_vm12, %v10686_v15 }
  0xf7   :  { %v913_v55 = vpack.c.bf16 %v902_v42, %v901_v51  ;;  %v784_v58 = vsel %vm773_vm2, %v10922_v61, %v10182_v54  ;;  %v785_v59 = vsel %vm773_vm2, %v10938_v5, %v10183_v53  ;;  %v10202_v61 = vunpack.i.l.bf16 %v10201_v44  ;;  %1583 = vmatpush.bf16.msra.mxu2 %v9416_v47  ;;  %1071 = vst.msk [vmem:[#allocation2 + $0xc0] sm:$0x1] %vm1061_vm12, %v10686_v15 }
  0xf8   :  { %v801_v0 = vsel %vm790_vm3, %v784_v58, %v10187_v26  ;;  %v802_v1 = vsel %vm790_vm3, %v785_v59, %v10188_v56  ;;  %1072 = vst.msk [vmem:[#allocation2 + $0xd0] sm:$0x1] %vm1061_vm12, %v10686_v15 }
  0xf9   :  { %7061 = vmatmul.msk.bf16.gmra.mxu0 %vm936_vm10, %v913_v55  ;;  %1073 = vst.msk [vmem:[#allocation2 + $0xe0] sm:$0x1] %vm1061_vm12, %v10686_v15 }
  0xfa   :  { %1074 = vst.msk [vmem:[#allocation2 + $0xf0] sm:$0x1] %vm1061_vm12, %v10686_v15 }
  0xfb   :  { %v10191_v4 = vpop.permute.xlu0 %10190  ;;  %1075 = vst.msk [vmem:[#allocation2 + $0x100] sm:$0x1] %vm1061_vm12, %v10686_v15 }
  0xfc   :  { %v10193_v13 = vunpack.i.h.bf16 %v10191_v4  ;;  %v10192_v19 = vunpack.i.l.bf16 %v10191_v4  ;;  %v10196_v24 = vpop.permute.xlu1 %10195  ;;  %1076 = vst.msk [vmem:[#allocation2 + $0x110] sm:$0x1] %vm1061_vm12, %v10686_v15  ;;  %v9407_v4 = vld [vmem:[%s12277_s3 + $0x58] sm:$0xff] }
  0xfd   :  { %v10198_v62 = vunpack.i.h.bf16 %v10196_v24  ;;  %v10197_v2 = vunpack.i.l.bf16 %v10196_v24  ;;  %v10246_v28 = vpop.permute.xlu2 %10245  ;;  %1077 = vst.msk [vmem:[#allocation2 + $0x120] sm:$0x1] %vm1061_vm12, %v10686_v15  ;;  %1774 = vmatpush.bf16.msrb.mxu0 %v9407_v4 }
  0xfe   :  { %v818_v3 = vsel %vm807_vm4, %v801_v0, %v10192_v19  ;;  %v819_v39 = vsel %vm807_vm4, %v802_v1, %v10193_v13  ;;  %v10248_v13 = vunpack.i.h.bf16 %v10246_v28  ;;  %v10247_v19 = vunpack.i.l.bf16 %v10246_v28  ;;  %1080 = vst.msk [vmem:[#allocation2 + $0x39] sm:$0x1] %vm1061_vm12, %v10686_v15 }
  0xff   :  { %v835_v9 = vsel %vm824_vm5, %v818_v3, %v10197_v2  ;;  %v836_v5 = vsel %vm824_vm5, %v819_v39, %v10198_v62  ;;  %1081 = vst.msk [vmem:[#allocation2 + $0x49] sm:$0x1] %vm1061_vm12, %v10686_v15  ;;  %v11285_v3 = vld [vmem:[#allocation9] ss:$0 sm:$0xff] }
 0x100   :  { %v852_v16 = vsel %vm841_vm6, %v835_v9, %v10202_v61  ;;  %v853_v17 = vsel %vm841_vm6, %v836_v5, %v10203_v8  ;;  %1082 = vst.msk [vmem:[#allocation2 + $0x59] sm:$0x1] %vm1061_vm12, %v10686_v15  ;;  %v9406_v39 = vld [vmem:[%s12277_s3 + $0x50] sm:$0xff] }
 0x101   :  { %1083 = vst.msk [vmem:[#allocation2 + $0x69] sm:$0x1] %vm1061_vm12, %v10686_v15  ;;  %1775 = vmatpush.bf16.msrb.mxu0 %v9406_v39 }
 0x102   :  { %1084 = vst.msk [vmem:[#allocation2 + $0x79] sm:$0x1] %vm1061_vm12, %v10686_v15 }
 0x103   :  { %v10206_v10 = vpop.permute.xlu0 %10205  ;;  %1085 = vst.msk [vmem:[#allocation2 + $0x89] sm:$0x1] %vm1061_vm12, %v10686_v15 }
 0x104   :  { %v10208_v11 = vunpack.i.h.bf16 %v10206_v10  ;;  %v10207_v12 = vunpack.i.l.bf16 %v10206_v10  ;;  %v10211_v7 = vpop.permute.xlu1 %10210  ;;  %1086 = vst.msk [vmem:[#allocation2 + $0xb9] sm:$0x1] %vm1061_vm12, %v10686_v15 }
 0x105   :  { %v10213_v18 = vunpack.i.h.bf16 %v10211_v7  ;;  %v10212_v20 = vunpack.i.l.bf16 %v10211_v7  ;;  %v10261_v59 = vpop.permute.xlu2 %10260  ;;  %1087 = vst.msk [vmem:[#allocation2 + $0xc9] sm:$0x1] %vm1061_vm12, %v10686_v15 }
 0x106   :  { %v869_v6 = vsel %vm858_vm7, %v852_v16, %v10207_v12  ;;  %v870_v22 = vsel %vm858_vm7, %v853_v17, %v10208_v11  ;;  %v10263_v7 = vunpack.i.h.bf16 %v10261_v59  ;;  %1088 = vst.msk [vmem:[#allocation2 + $0xd9] sm:$0x1] %vm1061_vm12, %v10686_v15 }
 0x107   :  { %v886_v23 = vsel %vm875_vm8, %v869_v6, %v10212_v20  ;;  %v887_v27 = vsel %vm875_vm8, %v870_v22, %v10213_v18  ;;  %v9405_v20 = vld [vmem:[%s12277_s3 + $0x48] sm:$0xff]  ;;  %1089 = vst.msk [vmem:[#allocation2 + $0xe9] sm:$0x1] %vm1061_vm12, %v10686_v15 }
 0x108   :  { %v903_v29 = vsel %vm892_vm9, %v886_v23, %v10217_v14  ;;  %v904_v30 = vsel %vm892_vm9, %v887_v27, %v10218_v50  ;;  %v10262_v50 = vunpack.i.l.bf16 %v10261_v59  ;;  %v789_v57 = vsel %vm773_vm2, %v11048_v32, %v10263_v7  ;;  %1776 = vmatpush.bf16.msrb.mxu0 %v9405_v20  ;;  %v9404_v27 = vld [vmem:[%s12277_s3 + $0x40] sm:$0xff]  ;;  %1090 = vst.msk [vmem:[#allocation2 + $0xf9] sm:$0x1] %vm1061_vm12, %v10686_v15 }
 0x109   :  { %v914_v34 = vpack.c.bf16 %v904_v30, %v903_v29  ;;  %1091 = vst.msk [vmem:[#allocation2 + $0x109] sm:$0x1] %vm1061_vm12, %v10686_v15 }
 0x10a   :  { %v788_v22 = vsel %vm773_vm2, %v11007_v52, %v10262_v50  ;;  %1092 = vst.msk [vmem:[#allocation2 + $0x119] sm:$0x1] %vm1061_vm12, %v10686_v15 }
 0x10b   :  { %v10221_v35 = vpop.permute.xlu0 %10220  ;;  %7062 = vmatmul.msk.bf16.gmra.mxu0 %vm936_vm10, %v914_v34  ;;  %1093 = vst.msk [vmem:[#allocation2 + $0x129] sm:$0x1] %vm1061_vm12, %v10686_v15 }
 0x10c   :  { %v10223_v36 = vunpack.i.h.bf16 %v10221_v35  ;;  %v10222_v38 = vunpack.i.l.bf16 %v10221_v35  ;;  %v10226_v40 = vpop.permute.xlu1 %10225  ;;  %1777 = vmatpush.bf16.msrb.mxu0 %v9404_v27  ;;  %1053 = vst.msk [vmem:[#allocation2 + $0x8] sm:$0x3] %vm1052_vm13, %v10686_v15 }
 0x10d   :  { %v10228_v43 = vunpack.i.h.bf16 %v10226_v40  ;;  %v10227_v45 = vunpack.i.l.bf16 %v10226_v40  ;;  %v10276_v6 = vpop.permute.xlu2 %10275  ;;  %1055 = vst.msk [vmem:[#allocation2 + $0xa8] sm:$0x3] %vm1052_vm13, %v10686_v15 }
 0x10e   :  { %v786_v46 = vsel %vm773_vm2, %v10961_v25, %v10222_v38  ;;  %v787_v44 = vsel %vm773_vm2, %v10979_v33, %v10223_v36  ;;  %v10278_v38 = vunpack.i.h.bf16 %v10276_v6  ;;  %v10277_v40 = vunpack.i.l.bf16 %v10276_v6  ;;  %1058 = vst.msk [vmem:[#allocation2 + $0x98] sm:$0x3] %vm1052_vm13, %v10686_v15 }
 0x10f   :  { %v803_v25 = vsel %vm790_vm3, %v786_v46, %v10227_v45  ;;  %v804_v33 = vsel %vm790_vm3, %v787_v44, %v10228_v43  ;;  %1060 = vst.msk [vmem:[#allocation2 + $0x138] sm:$0x3] %vm1052_vm13, %v10686_v15 }
 0x110   :  { %v820_v53 = vsel %vm807_vm4, %v803_v25, %v10232_v48  ;;  %v821_v54 = vsel %vm807_vm4, %v804_v33, %v10233_v31 }
 0x113   :  { %v10236_v49 = vpop.permute.xlu0 %10235  ;;  %v1126_v50 = vld [vmem:[#allocation2 + $0x2] sm:$0xff] }
 0x114   :  { %v10238_v37 = vunpack.i.h.bf16 %v10236_v49  ;;  %v10237_v51 = vunpack.i.l.bf16 %v10236_v49  ;;  %v10241_v42 = vpop.permute.xlu1 %10240 }
 0x115   :  { %v10243_v55 = vunpack.i.h.bf16 %v10241_v42  ;;  %v10242_v56 = vunpack.i.l.bf16 %v10241_v42  ;;  %v10291_v33 = vpop.permute.xlu2 %10290 }
 0x116   :  { %v837_v26 = vsel %vm824_vm5, %v820_v53, %v10237_v51  ;;  %v838_v58 = vsel %vm824_vm5, %v821_v54, %v10238_v37  ;;  %v10293_v53 = vunpack.i.h.bf16 %v10291_v33  ;;  %v10292_v54 = vunpack.i.l.bf16 %v10291_v33 }
 0x117   :  { %v854_v24 = vsel %vm841_vm6, %v837_v26, %v10242_v56  ;;  %v855_v63 = vsel %vm841_vm6, %v838_v58, %v10243_v55 }
 0x118   :  { %v871_v8 = vsel %vm858_vm7, %v854_v24, %v10247_v19  ;;  %v872_v61 = vsel %vm858_vm7, %v855_v63, %v10248_v13 }
 0x11b   :  { %v10251_v0 = vpop.permute.xlu0 %10250 }
 0x11c   :  { %v10253_v1 = vunpack.i.h.bf16 %v10251_v0  ;;  %v10252_v62 = vunpack.i.l.bf16 %v10251_v0  ;;  %v10256_v2 = vpop.permute.xlu1 %10255 }
 0x11d   :  { %v10258_v9 = vunpack.i.h.bf16 %v10256_v2  ;;  %v10257_v5 = vunpack.i.l.bf16 %v10256_v2 }
 0x11e   :  { %v888_v10 = vsel %vm875_vm8, %v871_v8, %v10252_v62  ;;  %v889_v11 = vsel %vm875_vm8, %v872_v61, %v10253_v1 }
 0x11f   :  { %v977_v12 = vpop.f32.mrf.mxu0  ;;  %v905_v14 = vsel %vm892_vm9, %v888_v10, %v10257_v5  ;;  %v906_v16 = vsel %vm892_vm9, %v889_v11, %v10258_v9 }
 0x120   :  { %v978_v17 = vadd.f32 %v11285_v3, %v977_v12  ;;  %v915_v18 = vpack.c.bf16 %v906_v16, %v905_v14 }
 0x122   :  { %v1017_v21 = vmax.f32 %v978_v17, 0.0  ;;  %7063 = vmatmul.msk.bf16.gmra.mxu0 %vm936_vm10, %v915_v18 }
 0x123   :  { %v10266_v23 = vpop.permute.xlu0 %10265 }
 0x124   :  { %1035 = vst.msk [vmem:[#allocation2 + $0x11] sm:$0xff] %vm1034_vm11, %v1017_v21  ;;  %v10268_v29 = vunpack.i.h.bf16 %v10266_v23  ;;  %v10267_v30 = vunpack.i.l.bf16 %v10266_v23  ;;  %v10271_v34 = vpop.permute.xlu1 %10270 }
 0x125   :  { %v10273_v60 = vunpack.i.h.bf16 %v10271_v34  ;;  %v10272_v35 = vunpack.i.l.bf16 %v10271_v34 }
 0x126   :  { %v805_v52 = vsel %vm790_vm3, %v788_v22, %v10267_v30  ;;  %v806_v32 = vsel %vm790_vm3, %v789_v57, %v10268_v29 }
 0x127   :  { %v979_v36 = vpop.f32.mrf.mxu0  ;;  %v822_v43 = vsel %vm807_vm4, %v805_v52, %v10272_v35  ;;  %v823_v45 = vsel %vm807_vm4, %v806_v32, %v10273_v60 }
 0x128   :  { %v980_v41 = vadd.f32 %v11285_v3, %v979_v36  ;;  %v839_v44 = vsel %vm824_vm5, %v822_v43, %v10277_v40  ;;  %v840_v28 = vsel %vm824_vm5, %v823_v45, %v10278_v38 }
 0x12a   :  { %v1018_v46 = vmax.f32 %v980_v41, 0.0 }
 0x12b   :  { %v10281_v47 = vpop.permute.xlu0 %10280  ;;  %v1294_v26 = vld [vmem:[#allocation2 + $0x12] sm:$0xff] }
 0x12c   :  { %1036 = vst.msk [vmem:[#allocation2 + $0x21] sm:$0xff] %vm1034_vm11, %v1018_v46  ;;  %v10283_v31 = vunpack.i.h.bf16 %v10281_v47  ;;  %v10282_v48 = vunpack.i.l.bf16 %v10281_v47  ;;  %v10286_v25 = vpop.permute.xlu1 %10285  ;;  %v11355_v19 = vld [vmem:[#allocation2 + $0x11] sm:$0xff]  ;;  %v1223_v14 = vpack.c.bf16 %v1294_v26, %v1126_v50 }
 0x12d   :  { %v10288_v49 = vunpack.i.h.bf16 %v10286_v25  ;;  %v10287_v37 = vunpack.i.l.bf16 %v10286_v25 }
 0x12e   :  { %v856_v51 = vsel %vm841_vm6, %v839_v44, %v10282_v48  ;;  %v857_v42 = vsel %vm841_vm6, %v840_v28, %v10283_v31  ;;  %v9415_v48 = vld [vmem:[%s12277_s3 + $0x98] sm:$0xff] }
 0x12f   :  { %v873_v55 = vsel %vm858_vm7, %v856_v51, %v10287_v37  ;;  %v874_v56 = vsel %vm858_vm7, %v857_v42, %v10288_v49  ;;  %1527 = vmatpush.bf16.msra.mxu1 %v9415_v48  ;;  %v9414_v42 = vld [vmem:[%s12277_s3 + $0x90] sm:$0xff] }
 0x130   :  { %v890_v58 = vsel %vm875_vm8, %v873_v55, %v10292_v54  ;;  %v891_v59 = vsel %vm875_vm8, %v874_v56, %v10293_v53  ;;  %v9413_v56 = vld [vmem:[%s12277_s3 + $0x88] sm:$0xff] }
 0x133   :  { %v10296_v4 = vpop.permute.xlu0 %10295  ;;  %v1295_v13 = vld [vmem:[#allocation2 + $0x22] sm:$0xff]  ;;  %1528 = vmatpush.bf16.msra.mxu1 %v9414_v42 }
 0x134   :  { %v1279_v15 = vld [vmem:[#allocation2 + $0x21] sm:$0xff]  ;;  %v10298_v24 = vunpack.i.h.bf16 %v10296_v4  ;;  %v10297_v63 = vunpack.i.l.bf16 %v10296_v4  ;;  %v1391_v0 = vpack.c.bf16 %v1295_v13, %v1294_v26 }
 0x135   :  { %v10299_v1 = vpack.i.bf16 %v1279_v15, %v11355_v19 }
 0x136   :  { %v982_v62 = vpop.f32.mrf.mxu0  ;;  %7137 = vmatmul.msk.bf16.vlgmr.msra.gmra.mxu2 %vm1034_vm11, %v1391_v0  ;;  %v907_v2 = vsel %vm892_vm9, %v890_v58, %v10297_v63  ;;  %v908_v39 = vsel %vm892_vm9, %v891_v59, %v10298_v24  ;;  %v9412_v58 = vld [vmem:[%s12277_s3 + $0x80] sm:$0xff]  ;;  %v9410_v0 = vld [vmem:[%s12277_s3 + $0x70] sm:$0xff] }
 0x137   :  { %10300 = vrot.lane.b32.xlu1 %v10299_v1, %s10673_s26  ;;  %v983_v8 = vadd.f32 %v11285_v3, %v982_v62  ;;  %v916_v61 = vpack.c.bf16 %v908_v39, %v907_v2  ;;  %1529 = vmatpush.bf16.msra.mxu1 %v9413_v56  ;;  %v1134_v24 = vld [vmem:[#allocation2 + $0xa2] sm:$0xff] }
 0x139   :  { %v1019_v9 = vmax.f32 %v983_v8, 0.0  ;;  %7064 = vmatmul.msk.bf16.gmra.mxu0 %vm936_vm10, %v916_v61 }
 0x13b   :  { %1037 = vst.msk [vmem:[#allocation2 + $0x31] sm:$0xff] %vm1034_vm11, %v1019_v9  ;;  %1530 = vmatpush.bf16.msra.mxu1 %v9412_v58  ;;  %v9409_v9 = vld [vmem:[%s12277_s3 + $0x68] sm:$0xff] }
 0x13e   :  { %v984_v5 = vpop.f32.mrf.mxu0 }
 0x13f   :  { %v985_v10 = vadd.f32 %v11285_v3, %v984_v5 }
 0x141   :  { %v1020_v11 = vmax.f32 %v985_v10, 0.0 }
 0x142   :  { %v1280_v12 = vld [vmem:[#allocation2 + $0x31] sm:$0xff] }
 0x143   :  { %1038 = vst.msk [vmem:[#allocation2 + $0x41] sm:$0xff] %vm1034_vm11, %v1020_v11  ;;  %v11367_v7 = vpack.i.bf16 %v1280_v12, %v1279_v15  ;;  %v11371_v20 = vld [vmem:[#allocation2 + $0x32] sm:$0xff] }
 0x144   :  { %v1225_v60 = vpack.c.bf16 %v11371_v20, %v1295_v13  ;;  %v9411_v15 = vld [vmem:[%s12277_s3 + $0x78] sm:$0xff] }
 0x145   :  { %1531 = vmatpush.bf16.msra.mxu1 %v9411_v15  ;;  %v11491_v15 = vld [vmem:[#allocation2 + $0x30] sm:$0xff] }
 0x148   :  { %v987_v16 = vpop.f32.mrf.mxu0 }
 0x149   :  { %v988_v17 = vadd.f32 %v11285_v3, %v987_v16  ;;  %7193 = vmatmul.msk.bf16.vlgmr.msrb.gmra.mxu0 %vm1034_vm11, %v1223_v14  ;;  %1532 = vmatpush.bf16.msra.mxu1 %v9410_v0 }
 0x14a   :  { %v1281_v18 = vld [vmem:[#allocation2 + $0x41] sm:$0xff] }
 0x14b   :  { %v1297_v21 = vld [vmem:[#allocation2 + $0x42] sm:$0xff]  ;;  %v1021_v6 = vmax.f32 %v988_v17, 0.0  ;;  %v10304_v22 = vpack.i.bf16 %v1281_v18, %v1280_v12 }
 0x14c   :  { %v1393_v57 = vpack.c.bf16 %v1297_v21, %v11371_v20  ;;  %v9408_v12 = vld [vmem:[%s12277_s3 + $0x60] sm:$0xff] }
 0x14d   :  { %1039 = vst.msk [vmem:[#allocation2 + $0x51] sm:$0xff] %vm1034_vm11, %v1021_v6  ;;  %10305 = vrot.lane.b32.xlu2 %v10304_v22, %s10673_s26  ;;  %1533 = vmatpush.bf16.msra.mxu1 %v9409_v9 }
 0x14e   :  { %7138 = vmatmul.msk.bf16.gmra.mxu2 %vm1034_vm11, %v1393_v57 }
 0x150   :  { %v989_v23 = vpop.f32.mrf.mxu0 }
 0x151   :  { %v990_v27 = vadd.f32 %v11285_v3, %v989_v23  ;;  %1534 = vmatpush.bf16.msra.mxu1 %v9408_v12 }
 0x153   :  { %v1022_v29 = vmax.f32 %v990_v27, 0.0 }
 0x154   :  { %v1282_v30 = vld [vmem:[#allocation2 + $0x51] sm:$0xff] }
 0x155   :  { %1040 = vst.msk [vmem:[#allocation2 + $0x61] sm:$0xff] %vm1034_vm11, %v1022_v29  ;;  %v11379_v34 = vpack.i.bf16 %v1282_v30, %v1281_v18  ;;  %v1298_v52 = vld [vmem:[#allocation2 + $0x52] sm:$0xff] }
 0x156   :  { %v11387_v46 = vpack.c.bf16 %v1298_v52, %v1297_v21 }
 0x159   :  { %7194 = vmatmul.msk.bf16.gmra.mxu0 %vm1034_vm11, %v1225_v60  ;;  %v1110_v60 = vld [vmem:[#allocation2 + $0x1] sm:$0xff] }
 0x15c   :  { %v1283_v35 = vld [vmem:[#allocation2 + $0x61] sm:$0xff] }
 0x15d   :  { %v1299_v32 = vld [vmem:[#allocation2 + $0x62] sm:$0xff]  ;;  %v10309_v36 = vpack.i.bf16 %v1283_v35, %v1282_v30 }
 0x15e   :  { %v1395_v38 = vpack.c.bf16 %v1299_v32, %v1298_v52 }
 0x15f   :  { %v992_v40 = vpop.f32.mrf.mxu0  ;;  %10310 = vrot.lane.b32.xlu0 %v10309_v36, %s10673_s26 }
 0x160   :  { %7139 = vmatmul.msk.bf16.gmra.mxu2 %vm1034_vm11, %v1395_v38  ;;  %v993_v41 = vadd.f32 %v11285_v3, %v992_v40 }
 0x162   :  { %v1023_v43 = vmax.f32 %v993_v41, 0.0 }
 0x164   :  { %1041 = vst.msk [vmem:[#allocation2 + $0x71] sm:$0xff] %vm1034_vm11, %v1023_v43 }
 0x167   :  { %v994_v45 = vpop.f32.mrf.mxu0 }
 0x168   :  { %v995_v44 = vadd.f32 %v11285_v3, %v994_v45  ;;  %v11465_v45 = vld [vmem:[#allocation2 + $0x10] sm:$0xff] }
 0x169   :  { %7195 = vmatmul.msk.bf16.gmra.mxu0 %vm1034_vm11, %v11387_v46 }
 0x16a   :  { %v1024_v28 = vmax.f32 %v995_v44, 0.0  ;;  %v11467_v44 = vld [vmem:[#allocation2 + $0x20] sm:$0xff] }
 0x16b   :  { %v1284_v47 = vld [vmem:[#allocation2 + $0x71] sm:$0xff] }
 0x16c   :  { %1042 = vst.msk [vmem:[#allocation2 + $0x81] sm:$0xff] %vm1034_vm11, %v1024_v28  ;;  %v11393_v31 = vpack.i.bf16 %v1284_v47, %v1283_v35  ;;  %v1300_v25 = vld [vmem:[#allocation2 + $0x72] sm:$0xff]  ;;  %v10339_v35 = vpack.i.bf16 %v11355_v19, %v1110_v60 }
 0x16d   :  { %v11410_v55 = vpack.c.bf16 %v1300_v25, %v1299_v32  ;;  %v9427_v32 = vld [vmem:[%s12277_s3 + $0xf8] sm:$0xff]  ;;  %v11531_v60 = vld [vmem:[#allocation2 + $0x50] sm:$0xff] }
 0x16e   :  { %2085 = vmatpush.bf16.msrb.mxu2 %v9427_v32 }
 0x173   :  { %v11398_v33 = vld [vmem:[#allocation2 + $0x82] sm:$0xff] }
 0x174   :  { %v11400_v49 = vld [vmem:[#allocation2 + $0x81] sm:$0xff]  ;;  %v1397_v37 = vpack.c.bf16 %v11398_v33, %v1300_v25 }
 0x175   :  { %v10314_v51 = vpack.i.bf16 %v11400_v49, %v1284_v47 }
 0x176   :  { %v997_v53 = vpop.f32.mrf.mxu0  ;;  %7140 = vmatmul.msk.bf16.gmra.mxu2 %vm1034_vm11, %v1397_v37  ;;  %v9431_v37 = vld [vmem:[%s12277_s3 + $0x118] sm:$0xff] }
 0x177   :  { %10315 = vrot.lane.b32.xlu1 %v10314_v51, %s10673_s26  ;;  %v998_v54 = vadd.f32 %v11285_v3, %v997_v53  ;;  %2138 = vmatpush.bf16.msrb.mxu1 %v9431_v37  ;;  %v11566_v37 = vld [vmem:[#allocation2 + $0x70] sm:$0xff] }
 0x179   :  { %v1025_v26 = vmax.f32 %v998_v54, 0.0  ;;  %7196 = vmatmul.msk.bf16.gmra.mxu0 %vm1034_vm11, %v11410_v55 }
 0x17b   :  { %1043 = vst.msk [vmem:[#allocation2 + $0xb1] sm:$0xff] %vm1034_vm11, %v1025_v26 }
 0x17e   :  { %v999_v59 = vpop.f32.mrf.mxu0 }
 0x17f   :  { %v1000_v4 = vadd.f32 %v11285_v3, %v999_v59 }
 0x181   :  { %v1026_v13 = vmax.f32 %v1000_v4, 0.0 }
 0x182   :  { %v1135_v63 = vld [vmem:[#allocation2 + $0xb2] sm:$0xff] }
 0x183   :  { %1044 = vst.msk [vmem:[#allocation2 + $0xc1] sm:$0xff] %vm1034_vm11, %v1026_v13  ;;  %v1231_v1 = vpack.c.bf16 %v1135_v63, %v1134_v24  ;;  %v11431_v39 = vld [vmem:[#allocation2 + $0xb1] sm:$0xff]  ;;  %v11493_v24 = vld [vmem:[#allocation2 + $0x40] sm:$0xff] }
 0x188   :  { %v1002_v62 = vpop.f32.mrf.mxu0 }
 0x189   :  { %v1003_v2 = vadd.f32 %v11285_v3, %v1002_v62  ;;  %7197 = vmatmul.msk.bf16.gmra.mxu0 %vm1034_vm11, %v1231_v1 }
 0x18a   :  { %v11433_v8 = vld [vmem:[#allocation2 + $0xc1] sm:$0xff] }
 0x18b   :  { %v1303_v61 = vld [vmem:[#allocation2 + $0xc2] sm:$0xff]  ;;  %v1027_v5 = vmax.f32 %v1003_v2, 0.0  ;;  %v10319_v10 = vpack.i.bf16 %v11433_v8, %v11431_v39 }
 0x18c   :  { %v1399_v11 = vpack.c.bf16 %v1303_v61, %v1135_v63  ;;  %v9426_v63 = vld [vmem:[%s12277_s3 + $0xf0] sm:$0xff] }
 0x18d   :  { %1045 = vst.msk [vmem:[#allocation2 + $0xd1] sm:$0xff] %vm1034_vm11, %v1027_v5  ;;  %10320 = vrot.lane.b32.xlu2 %v10319_v10, %s10673_s26  ;;  %2086 = vmatpush.bf16.msrb.mxu2 %v9426_v63  ;;  %v11585_v63 = vld [vmem:[#allocation2 + $0xb0] sm:$0xff] }
 0x18e   :  { %7141 = vmatmul.msk.bf16.gmra.mxu2 %vm1034_vm11, %v1399_v11 }
 0x190   :  { %v1004_v50 = vpop.f32.mrf.mxu0 }
 0x191   :  { %v1005_v14 = vadd.f32 %v11285_v3, %v1004_v50  ;;  %v1843_v50 = vld [vmem:[#allocation2 + $0x91] sm:$0xff] }
 0x193   :  { %v1028_v16 = vmax.f32 %v1005_v14, 0.0  ;;  %v1851_v14 = vld [vmem:[#allocation2 + $0x131] sm:$0xff] }
 0x194   :  { %v1137_v17 = vld [vmem:[#allocation2 + $0xd2] sm:$0xff] }
 0x195   :  { %1046 = vst.msk [vmem:[#allocation2 + $0xe1] sm:$0xff] %vm1034_vm11, %v1028_v16  ;;  %v11448_v18 = vpack.c.bf16 %v1137_v17, %v1303_v61  ;;  %v1288_v21 = vld [vmem:[#allocation2 + $0xd1] sm:$0xff] }
 0x196   :  { %v10384_v61 = vpack.i.bf16 %v1288_v21, %v11433_v8 }
 0x199   :  { %7198 = vmatmul.msk.bf16.gmra.mxu0 %vm1034_vm11, %v11448_v18 }
 0x19c   :  { %v11452_v6 = vld [vmem:[#allocation2 + $0xe1] sm:$0xff] }
 0x19d   :  { %v1305_v22 = vld [vmem:[#allocation2 + $0xe2] sm:$0xff]  ;;  %v10324_v57 = vpack.i.bf16 %v11452_v6, %v1288_v21 }
 0x19e   :  { %v1401_v23 = vpack.c.bf16 %v1305_v22, %v1137_v17 }
 0x19f   :  { %v1007_v27 = vpop.f32.mrf.mxu0  ;;  %10325 = vrot.lane.b32.xlu0 %v10324_v57, %s10673_s26 }
 0x1a0   :  { %7142 = vmatmul.msk.bf16.gmra.mxu2 %vm1034_vm11, %v1401_v23  ;;  %v1008_v29 = vadd.f32 %v11285_v3, %v1007_v27  ;;  %v9430_v23 = vld [vmem:[%s12277_s3 + $0x110] sm:$0xff] }
 0x1a1   :  { %2139 = vmatpush.bf16.msrb.mxu1 %v9430_v23  ;;  %v1094_v23 = vld [vmem:[#allocation2] sm:$0xff] }
 0x1a2   :  { %v1029_v30 = vmax.f32 %v1008_v29, 0.0 }
 0x1a4   :  { %1047 = vst.msk [vmem:[#allocation2 + $0xf1] sm:$0xff] %vm1034_vm11, %v1029_v30 }
 0x1a7   :  { %v1009_v52 = vpop.f32.mrf.mxu0  ;;  %10340 = vrot.lane.b32.xlu0 %v10339_v35, %s10673_s26  ;;  %v10306_v51 = vpop.permute.xlu2 %10305 }
 0x1a8   :  { %v1010_v36 = vadd.f32 %v11285_v3, %v1009_v52  ;;  %v10308_v58 = vunpack.i.h.bf16 %v10306_v51  ;;  %v10307_v59 = vunpack.i.l.bf16 %v10306_v51  ;;  %v11568_v51 = vld [vmem:[#allocation2 + $0x80] sm:$0xff] }
 0x1a9   :  { %v10301_v38 = vpop.permute.xlu1 %10300 }
 0x1aa   :  { %v10303_v40 = vunpack.i.h.bf16 %v10301_v38  ;;  %v10302_v41 = vunpack.i.l.bf16 %v10301_v38  ;;  %v1030_v43 = vmax.f32 %v1010_v36, 0.0  ;;  %v1376_v1 = vsel %vm1034_vm11, %v11491_v15, %v10307_v59  ;;  %v9424_v36 = vld [vmem:[%s12277_s3 + $0xe0] sm:$0xff]  ;;  %v9398_v59 = vld [vmem:[%s12277_s3 + $0x10] sm:$0xff] }
 0x1ab   :  { %v1139_v47 = vld [vmem:[#allocation2 + $0xf2] sm:$0xff]  ;;  %v1377_v62 = vsel %vm1034_vm11, %v11493_v24, %v10308_v58 }
 0x1ac   :  { %v1374_v19 = vsel %vm1034_vm11, %v11465_v45, %v10302_v41  ;;  %v1375_v28 = vsel %vm1034_vm11, %v11467_v44, %v10303_v40  ;;  %1048 = vst.msk [vmem:[#allocation2 + $0x101] sm:$0xff] %vm1034_vm11, %v1030_v43  ;;  %v11474_v25 = vpack.c.bf16 %v1139_v47, %v1305_v22  ;;  %v1290_v53 = vld [vmem:[#allocation2 + $0xf1] sm:$0xff]  ;;  %v1392_v2 = vpack.c.bf16 %v1377_v62, %v1376_v1  ;;  %v1118_v40 = vld [vmem:[#allocation2 + $0xa1] sm:$0xff] }
 0x1ad   :  { %v1390_v48 = vpack.c.bf16 %v1375_v28, %v1374_v19  ;;  %v10399_v8 = vpack.i.bf16 %v1290_v53, %v11452_v6  ;;  %v10374_v6 = vpack.i.bf16 %v1843_v50, %v11400_v49  ;;  %v11533_v49 = vld [vmem:[#allocation2 + $0x60] sm:$0xff]  ;;  %v9402_v41 = vld [vmem:[%s12277_s3 + $0x30] sm:$0xff]  ;;  %v10379_v43 = vpack.i.bf16 %v11431_v39, %v1118_v40  ;;  %v9423_v19 = vld [vmem:[%s12277_s3 + $0xd8] sm:$0xff] }
 0x1ae   :  { %7199 = vmatmul.msk.bf16.gmra.mxu0 %vm1034_vm11, %v11474_v25  ;;  %v9397_v1 = vld [vmem:[%s12277_s3 + $0x8] sm:$0xff]  ;;  %v9422_v62 = vld [vmem:[%s12277_s3 + $0xd0] sm:$0xff] }
 0x1af   :  { %1535 = vmatmul.bf16.vlgmr.msra.gmra.mxu1 %v1390_v48  ;;  %10355 = vrot.lane.b32.xlu0 %v11379_v34, %s10673_s26 }
 0x1b3   :  { %v1307_v42 = vld [vmem:[#allocation2 + $0x102] sm:$0xff] }
 0x1b4   :  { %v11483_v54 = vld [vmem:[#allocation2 + $0x101] sm:$0xff]  ;;  %v1403_v56 = vpack.c.bf16 %v1307_v42, %v1139_v47 }
 0x1b5   :  { %v10329_v26 = vpack.i.bf16 %v11483_v54, %v1290_v53  ;;  %v9400_v47 = vld [vmem:[%s12277_s3 + $0x20] sm:$0xff] }
 0x1b6   :  { %v1012_v4 = vpop.f32.mrf.mxu0  ;;  %7143 = vmatmul.msk.bf16.gmra.mxu2 %vm1034_vm11, %v1403_v56  ;;  %v9429_v56 = vld [vmem:[%s12277_s3 + $0x108] sm:$0xff] }
 0x1b7   :  { %10330 = vrot.lane.b32.xlu1 %v10329_v26, %s10673_s26  ;;  %v1013_v13 = vadd.f32 %v11285_v3, %v1012_v4  ;;  %10370 = vrot.lane.b32.xlu0 %v11393_v31, %s10673_s26  ;;  %v9399_v26 = vld [vmem:[%s12277_s3 + $0x18] sm:$0xff] }
 0x1b8   :  { %2140 = vmatpush.bf16.msrb.mxu1 %v9429_v56 }
 0x1b9   :  { %v1031_v0 = vmax.f32 %v1013_v13, 0.0 }
 0x1bb   :  { %1049 = vst.msk [vmem:[#allocation2 + $0x111] sm:$0xff] %vm1034_vm11, %v1031_v0  ;;  %v11587_v0 = vld [vmem:[#allocation2 + $0xc0] sm:$0xff] }
 0x1be   :  { %v1014_v9 = vpop.f32.mrf.mxu0 }
 0x1bf   :  { %10345 = vrot.lane.b32.xlu1 %v11367_v7, %s10673_s26  ;;  %1540 = vmatmul.bf16.gmra.mxu1 %v1392_v2  ;;  %v1015_v5 = vadd.f32 %v11285_v3, %v1014_v9  ;;  %v9425_v3 = vld [vmem:[%s12277_s3 + $0xe8] sm:$0xff]  ;;  %v9396_v9 = vld [vmem:[%s12277_s3] sm:$0xff] }
 0x1c0   :  { %10385 = vrot.lane.b32.xlu0 %v10384_v61, %s10673_s26  ;;  %2087 = vmatpush.bf16.msrb.mxu2 %v9425_v3 }
 0x1c1   :  { %v1032_v10 = vmax.f32 %v1015_v5, 0.0 }
 0x1c2   :  { %v1141_v11 = vld [vmem:[#allocation2 + $0x112] sm:$0xff] }
 0x1c3   :  { %1050 = vst.msk [vmem:[#allocation2 + $0x121] sm:$0xff] %vm1034_vm11, %v1032_v10  ;;  %v11509_v12 = vpack.c.bf16 %v1141_v11, %v1307_v42  ;;  %v1292_v16 = vld [vmem:[#allocation2 + $0x111] sm:$0xff]  ;;  %v9421_v10 = vld [vmem:[%s12277_s3 + $0xc8] sm:$0xff] }
 0x1c4   :  { %2088 = vmatpush.bf16.msrb.mxu2 %v9424_v36  ;;  %v10404_v38 = vpack.i.bf16 %v1292_v16, %v11483_v54 }
 0x1c5   :  { %7200 = vmatmul.msk.bf16.gmra.mxu0 %vm1034_vm11, %v11509_v12 }
 0x1c7   :  { %10360 = vrot.lane.b32.xlu1 %v11379_v34, %s10673_s26 }
 0x1c8   :  { %10400 = vrot.lane.b32.xlu0 %v10399_v8, %s10673_s26  ;;  %2089 = vmatpush.bf16.msrb.mxu2 %v9423_v19  ;;  %v11626_v19 = vld [vmem:[#allocation2 + $0x100] sm:$0xff] }
 0x1ca   :  { %v1293_v17 = vld [vmem:[#allocation2 + $0x121] sm:$0xff] }
 0x1cb   :  { %v11520_v21 = vld [vmem:[#allocation2 + $0x122] sm:$0xff]  ;;  %v10334_v22 = vpack.i.bf16 %v1293_v17, %v1292_v16  ;;  %v10414_v34 = vpack.i.bf16 %v1851_v14, %v1293_v17  ;;  %v11608_v14 = vld [vmem:[#allocation2 + $0xd0] sm:$0xff] }
 0x1cc   :  { %v1405_v57 = vpack.c.bf16 %v11520_v21, %v1141_v11  ;;  %2090 = vmatpush.bf16.msrb.mxu2 %v9422_v62  ;;  %v9428_v11 = vld [vmem:[%s12277_s3 + $0x100] sm:$0xff] }
 0x1cd   :  { %10335 = vrot.lane.b32.xlu2 %v10334_v22, %s10673_s26  ;;  %2141 = vmatpush.bf16.msrb.mxu1 %v9428_v11  ;;  %v11610_v16 = vld [vmem:[#allocation2 + $0xe0] sm:$0xff] }
 0x1ce   :  { %7144 = vmatmul.msk.bf16.gmra.mxu2 %vm1034_vm11, %v1405_v57  ;;  %v9420_v57 = vld [vmem:[%s12277_s3 + $0xc0] sm:$0xff] }
 0x1cf   :  { %10375 = vrot.lane.b32.xlu1 %v10374_v6, %s10673_s26  ;;  %v11645_v11 = vld [vmem:[#allocation2 + $0x120] sm:$0xff] }
 0x1d0   :  { %10415 = vrot.lane.b32.xlu0 %v10414_v34, %s10673_s26  ;;  %2091 = vmatpush.bf16.msrb.mxu2 %v9421_v10  ;;  %v11643_v10 = vld [vmem:[#allocation2 + $0x110] sm:$0xff] }
 0x1d1   :  { %v10311_v27 = vpop.permute.xlu0 %10310 }
 0x1d2   :  { %v10313_v29 = vunpack.i.h.bf16 %v10311_v27  ;;  %v10312_v30 = vunpack.i.l.bf16 %v10311_v27 }
 0x1d4   :  { %v1378_v35 = vsel %vm1034_vm11, %v11531_v60, %v10312_v30  ;;  %v1379_v52 = vsel %vm1034_vm11, %v11533_v49, %v10313_v29  ;;  %2092 = vmatpush.bf16.msrb.mxu2 %v9420_v57 }
 0x1d5   :  { %10350 = vrot.lane.b32.xlu2 %v11367_v7, %s10673_s26  ;;  %v1394_v32 = vpack.c.bf16 %v1379_v52, %v1378_v35  ;;  %v9403_v7 = vld [vmem:[%s12277_s3 + $0x38] sm:$0xff] }
 0x1d6   :  { %1721 = vmatpush.bf16.msra.mxu3 %v9403_v7  ;;  %v11622_v7 = vpop.f32.mrf.mxu2 }
 0x1d7   :  { %10390 = vrot.lane.b32.xlu1 %v10384_v61, %s10673_s26  ;;  %1545 = vmatmul.bf16.gmra.mxu1 %v1394_v32 }
 0x1da   :  { %1722 = vmatpush.bf16.msra.mxu3 %v9402_v41 }
 0x1dd   :  { %10365 = vrot.lane.b32.xlu2 %v11393_v31, %s10673_s26  ;;  %v9401_v31 = vld [vmem:[%s12277_s3 + $0x28] sm:$0xff] }
 0x1de   :  { %1723 = vmatpush.bf16.msra.mxu3 %v9401_v31  ;;  %v1274_v31 = vld [vmem:[#allocation2 + $0xf0] sm:$0xff] }
 0x1df   :  { %10405 = vrot.lane.b32.xlu1 %v10404_v38, %s10673_s26 }
 0x1e2   :  { %1724 = vmatpush.bf16.msra.mxu3 %v9400_v47 }
 0x1e5   :  { %10380 = vrot.lane.b32.xlu2 %v10379_v43, %s10673_s26 }
 0x1e6   :  { %1725 = vmatpush.bf16.msra.mxu3 %v9399_v26 }
 0x1e7   :  { %v10321_v58 = vpop.permute.xlu2 %10320 }
 0x1e8   :  { %v10323_v4 = vunpack.i.h.bf16 %v10321_v58  ;;  %v10322_v13 = vunpack.i.l.bf16 %v10321_v58 }
 0x1e9   :  { %v10316_v28 = vpop.permute.xlu1 %10315 }
 0x1ea   :  { %v10318_v48 = vunpack.i.h.bf16 %v10316_v28  ;;  %v10317_v39 = vunpack.i.l.bf16 %v10316_v28  ;;  %1726 = vmatpush.bf16.msra.mxu3 %v9398_v59  ;;  %v1382_v2 = vsel %vm1034_vm11, %v11585_v63, %v10322_v13  ;;  %v1383_v61 = vsel %vm1034_vm11, %v11587_v0, %v10323_v4  ;;  %v11637_v4 = vpop.f32.mrf.mxu2 }
 0x1eb   :  { %v1398_v5 = vpack.c.bf16 %v1383_v61, %v1382_v2 }
 0x1ec   :  { %v1380_v42 = vsel %vm1034_vm11, %v11566_v37, %v10317_v39  ;;  %v1381_v53 = vsel %vm1034_vm11, %v11568_v51, %v10318_v48 }
 0x1ed   :  { %v1396_v54 = vpack.c.bf16 %v1381_v53, %v1380_v42  ;;  %10395 = vrot.lane.b32.xlu2 %v10399_v8, %s10673_s26 }
 0x1ee   :  { %1727 = vmatpush.bf16.msra.mxu3 %v9397_v1 }
 0x1ef   :  { %1550 = vmatmul.bf16.gmra.mxu1 %v1396_v54 }
 0x1f2   :  { %1728 = vmatpush.bf16.msra.mxu3 %v9396_v9 }
 0x1f5   :  { %10410 = vrot.lane.b32.xlu2 %v10404_v38, %s10673_s26 }
 0x1ff   :  { %1555 = vmatmul.bf16.gmra.mxu1 %v1398_v5 }
 0x211   :  { %v10326_v8 = vpop.permute.xlu0 %10325 }
 0x212   :  { %v10328_v3 = vunpack.i.h.bf16 %v10326_v8  ;;  %v10327_v50 = vunpack.i.l.bf16 %v10326_v8 }
 0x214   :  { %v1384_v17 = vsel %vm1034_vm11, %v11608_v14, %v10327_v50  ;;  %v1385_v22 = vsel %vm1034_vm11, %v11610_v16, %v10328_v3 }
 0x215   :  { %v1400_v6 = vpack.c.bf16 %v1385_v22, %v1384_v17  ;;  %v11651_v22 = vpop.f32.mrf.mxu2 }
 0x217   :  { %1560 = vmatmul.bf16.gmra.mxu1 %v1400_v6 }
 0x219   :  { %v10341_v34 = vpop.permute.xlu0 %10340 }
 0x21a   :  { %v10343_v27 = vunpack.i.h.bf16 %v10341_v34  ;;  %v10342_v29 = vunpack.i.l.bf16 %v10341_v34 }
 0x21c   :  { %v1206_v30 = vsel %vm1034_vm11, %v1094_v23, %v10342_v29  ;;  %v1207_v35 = vsel %vm1034_vm11, %v11465_v45, %v10343_v27 }
 0x21d   :  { %v1222_v52 = vpack.c.bf16 %v1207_v35, %v1206_v30 }
 0x21f   :  { %1729 = vmatmul.bf16.vlgmr.msra.gmra.mxu3 %v1222_v52 }
 0x221   :  { %v10356_v32 = vpop.permute.xlu0 %10355 }
 0x222   :  { %v10358_v30 = vunpack.i.h.bf16 %v10356_v32  ;;  %v10357_v35 = vunpack.i.l.bf16 %v10356_v32 }
 0x227   :  { %v10336_v36 = vpop.permute.xlu2 %10335 }
 0x228   :  { %v10338_v2 = vunpack.i.h.bf16 %v10336_v36  ;;  %v10337_v61 = vunpack.i.l.bf16 %v10336_v36 }
 0x229   :  { %v10331_v38 = vpop.permute.xlu1 %10330  ;;  %v11624_v43 = vpop.permute.xlu0 %10370 }
 0x22a   :  { %v10333_v40 = vunpack.i.h.bf16 %v10331_v38  ;;  %v10332_v41 = vunpack.i.l.bf16 %v10331_v38  ;;  %v1388_v3 = vsel %vm1034_vm11, %v11643_v10, %v10337_v61 }
 0x22c   :  { %v1386_v28 = vsel %vm1034_vm11, %v1274_v31, %v10332_v41  ;;  %v1387_v47 = vsel %vm1034_vm11, %v11626_v19, %v10333_v40  ;;  %v11653_v57 = vpop.f32.mrf.mxu1 }
 0x22d   :  { %v1402_v45 = vpack.c.bf16 %v1387_v47, %v1386_v28  ;;  %v1934_v28 = vsel %vm1034_vm11, %v11493_v24, %v10357_v35  ;;  %v1935_v47 = vsel %vm1034_vm11, %v11531_v60, %v10358_v30 }
 0x22f   :  { %1565 = vmatmul.bf16.gmra.mxu1 %v1402_v45  ;;  %v10351_v48 = vpop.permute.xlu2 %10350  ;;  %v1950_v45 = vpack.c.bf16 %v1935_v47, %v1934_v28 }
 0x230   :  { %v10353_v39 = vunpack.i.h.bf16 %v10351_v48  ;;  %v10352_v42 = vunpack.i.l.bf16 %v10351_v48  ;;  %v11674_v48 = vpop.f32.mrf.mxu2 }
 0x231   :  { %v10346_v53 = vpop.permute.xlu1 %10345 }
 0x232   :  { %v10348_v54 = vunpack.i.h.bf16 %v10346_v53  ;;  %v10347_v56 = vunpack.i.l.bf16 %v10346_v53  ;;  %v11631_v26 = vpop.permute.xlu0 %10385  ;;  %v1208_v58 = vsel %vm1034_vm11, %v11467_v44, %v10352_v42  ;;  %v1209_v59 = vsel %vm1034_vm11, %v11491_v15, %v10353_v39 }
 0x233   :  { %v1224_v13 = vpack.c.bf16 %v1209_v59, %v1208_v58 }
 0x234   :  { %v1932_v1 = vsel %vm1034_vm11, %v11467_v44, %v10347_v56  ;;  %v1933_v62 = vsel %vm1034_vm11, %v11491_v15, %v10348_v54  ;;  %v1389_v44 = vsel %vm1034_vm11, %v11645_v11, %v10338_v2  ;;  %v11676_v39 = vpop.f32.mrf.mxu1 }
 0x235   :  { %v1948_v9 = vpack.c.bf16 %v1933_v62, %v1932_v1  ;;  %1734 = vmatmul.bf16.gmra.mxu3 %v1224_v13  ;;  %v1404_v6 = vpack.c.bf16 %v1389_v44, %v1388_v3  ;;  %v10373_v13 = vunpack.i.h.bf16 %v11624_v43  ;;  %v10372_v1 = vunpack.i.l.bf16 %v11624_v43 }
 0x237   :  { %2093 = vmatmul.bf16.vlgmr.msrb.gmra.mxu2 %v1948_v9  ;;  %v10366_v5 = vpop.permute.xlu2 %10365  ;;  %v1213_v43 = vsel %vm1034_vm11, %v11566_v37, %v10373_v13 }
 0x238   :  { %v11690_v2 = vpop.f32.mrf.mxu2  ;;  %v10368_v61 = vunpack.i.h.bf16 %v10366_v5  ;;  %v10367_v9 = vunpack.i.l.bf16 %v10366_v5 }
 0x239   :  { %v10361_v8 = vpop.permute.xlu1 %10360 }
 0x23a   :  { %v10401_v50 = vpop.permute.xlu0 %10400  ;;  %v10363_v34 = vunpack.i.h.bf16 %v10361_v8  ;;  %v10362_v23 = vunpack.i.l.bf16 %v10361_v8  ;;  %v1937_v5 = vsel %vm1034_vm11, %v11566_v37, %v10368_v61 }
 0x23b   :  { %v10403_v17 = vunpack.i.h.bf16 %v10401_v50  ;;  %v10402_v15 = vunpack.i.l.bf16 %v10401_v50  ;;  %v1212_v50 = vsel %vm1034_vm11, %v11533_v49, %v10372_v1 }
 0x23c   :  { %v1210_v40 = vsel %vm1034_vm11, %v11493_v24, %v10362_v23  ;;  %v1211_v41 = vsel %vm1034_vm11, %v11531_v60, %v10363_v34  ;;  %v1852_v60 = vld [vmem:[#allocation2 + $0x22] sm:$0xff]  ;;  %v1228_v23 = vpack.c.bf16 %v1213_v43, %v1212_v50 }
 0x23d   :  { %v11657_v27 = vsel %vm1034_vm11, %v11610_v16, %v10402_v15  ;;  %v11660_v29 = vsel %vm1034_vm11, %v1274_v31, %v10403_v17  ;;  %v1226_v32 = vpack.c.bf16 %v1211_v41, %v1210_v40  ;;  %v1949_v62 = vpack.c.bf16 %v11371_v20, %v1852_v60 }
 0x23e   :  { %v1234_v52 = vpack.c.bf16 %v11660_v29, %v11657_v27  ;;  %v1936_v15 = vsel %vm1034_vm11, %v11533_v49, %v10367_v9 }
 0x23f   :  { %1570 = vmatmul.bf16.gmra.mxu1 %v1404_v6  ;;  %v10381_v36 = vpop.permute.xlu2 %10380  ;;  %v1952_v41 = vpack.c.bf16 %v1937_v5, %v1936_v15 }
 0x240   :  { %v11711_v49 = vpop.f32.mrf.mxu2  ;;  %v10383_v47 = vunpack.i.h.bf16 %v10381_v36 }
 0x241   :  { %v11664_v38 = vpop.permute.xlu1 %10375 }
 0x242   :  { %v1215_v60 = vsel %vm1034_vm11, %v11585_v63, %v10383_v47  ;;  %v10387_v63 = vunpack.i.l.bf16 %v11631_v26  ;;  %v10416_v27 = vpop.permute.xlu0 %10415 }
 0x243   :  { %v10418_v29 = vunpack.i.h.bf16 %v10416_v27 }
 0x244   :  { %v1940_v50 = vsel %vm1034_vm11, %v11587_v0, %v10387_v63 }
 0x245   :  { %1739 = vmatmul.bf16.gmra.mxu3 %v1226_v32  ;;  %v10382_v32 = vunpack.i.l.bf16 %v10381_v36 }
 0x247   :  { %2098 = vmatmul.bf16.gmra.mxu2 %v1950_v45  ;;  %v10396_v42 = vpop.permute.xlu2 %10395  ;;  %v10378_v45 = vunpack.i.h.bf16 %v11664_v38 }
 0x248   :  { %v10398_v53 = vunpack.i.h.bf16 %v10396_v42  ;;  %v10397_v54 = vunpack.i.l.bf16 %v10396_v42  ;;  %v10377_v42 = vunpack.i.l.bf16 %v11664_v38 }
 0x249   :  { %v10391_v56 = vpop.permute.xlu1 %10390 }
 0x24a   :  { %v11680_v58 = vsel %vm1034_vm11, %v11610_v16, %v10397_v54  ;;  %v11683_v24 = vsel %vm1034_vm11, %v1274_v31, %v10398_v53  ;;  %v11693_v16 = vpop.f32.mrf.mxu1  ;;  %v1102_v53 = vld [vmem:[#allocation2 + $0xa0] sm:$0xff]  ;;  %v1938_v36 = vsel %vm1034_vm11, %v11568_v51, %v10377_v42  ;;  %v10393_v9 = vunpack.i.h.bf16 %v10391_v56  ;;  %v1867_v42 = vld [vmem:[#allocation2 + $0x132] sm:$0xff] }
 0x24b   :  { %v1958_v59 = vpack.c.bf16 %v11683_v24, %v11680_v58  ;;  %v1214_v54 = vsel %vm1034_vm11, %v1102_v53, %v10382_v32  ;;  %v1835_v58 = vld [vmem:[#allocation2 + $0x130] sm:$0xff] }
 0x24c   :  { %v1230_v38 = vpack.c.bf16 %v1215_v60, %v1214_v54  ;;  %v1963_v60 = vpack.c.bf16 %v1867_v42, %v11520_v21 }
 0x24f   :  { %7273 = vmatmul.msk.bf16.vlgmr.msrb.gmra.mxu1 %vm1034_vm11, %v1949_v62  ;;  %v10411_v31 = vpop.permute.xlu2 %10410 }
 0x250   :  { %v10413_v8 = vunpack.i.h.bf16 %v10411_v31  ;;  %v10412_v3 = vunpack.i.l.bf16 %v10411_v31  ;;  %v10392_v31 = vunpack.i.l.bf16 %v10391_v56 }
 0x251   :  { %v10406_v44 = vpop.permute.xlu1 %10405 }
 0x252   :  { %v10408_v17 = vunpack.i.h.bf16 %v10406_v44  ;;  %v10407_v20 = vunpack.i.l.bf16 %v10406_v44  ;;  %v1220_v6 = vsel %vm1034_vm11, %v11626_v19, %v10412_v3  ;;  %v1221_v34 = vsel %vm1034_vm11, %v11643_v10, %v10413_v8  ;;  %v11713_v37 = vpop.f32.mrf.mxu1 }
 0x253   :  { %v1236_v30 = vpack.c.bf16 %v1221_v34, %v1220_v6  ;;  %v10388_v8 = vunpack.i.h.bf16 %v11631_v26  ;;  %v1216_v51 = vsel %vm1034_vm11, %v11587_v0, %v10392_v31  ;;  %v1217_v3 = vsel %vm1034_vm11, %v11608_v14, %v10393_v9 }
 0x254   :  { %v1944_v35 = vsel %vm1034_vm11, %v11626_v19, %v10407_v20  ;;  %v1945_v40 = vsel %vm1034_vm11, %v11643_v10, %v10408_v17  ;;  %v1827_v19 = vld [vmem:[#allocation2 + $0x90] sm:$0xff]  ;;  %v11719_v10 = vpop.f32.mrf.mxu2  ;;  %v1232_v26 = vpack.c.bf16 %v1217_v3, %v1216_v51  ;;  %v1586_v9 = vadd.f32 %v11622_v7, %v11653_v57 }
 0x255   :  { %v1960_v28 = vpack.c.bf16 %v1945_v40, %v1944_v35  ;;  %1744 = vmatmul.bf16.gmra.mxu3 %v1228_v23  ;;  %v1939_v1 = vsel %vm1034_vm11, %v1827_v19, %v10378_v45  ;;  %v1941_v56 = vsel %vm1034_vm11, %v11608_v14, %v10388_v8  ;;  %v1593_v42 = vadd.f32 %v11674_v48, %v11713_v37 }
 0x256   :  { %v1954_v62 = vpack.c.bf16 %v1939_v1, %v1938_v36  ;;  %v1956_v17 = vpack.c.bf16 %v1941_v56, %v1940_v50  ;;  %v11800_v50 = vld [vmem:[#allocation11] ss:$0 sm:$0xff]  ;;  %v1588_v56 = vadd.f32 %v11637_v4, %v11676_v39 }
 0x257   :  { %2103 = vmatmul.bf16.gmra.mxu2 %v1952_v41 }
 0x25a   :  { %v11724_v13 = vpop.f32.mrf.mxu1 }
 0x25f   :  { %7274 = vmatmul.msk.bf16.gmra.mxu1 %vm1034_vm11, %v11387_v46  ;;  %v11729_v46 = vpop.f32.mrf.mxu2 }
 0x262   :  { %v11731_v61 = vpop.f32.mrf.mxu1 }
 0x265   :  { %1749 = vmatmul.bf16.gmra.mxu3 %v1230_v38 }
 0x267   :  { %2108 = vmatmul.bf16.gmra.mxu2 %v1954_v62  ;;  %v11741_v44 = vpop.f32.mrf.mxu2 }
 0x26c   :  { %v11747_v43 = vpop.f32.mrf.mxu1 }
 0x26f   :  { %7275 = vmatmul.msk.bf16.gmra.mxu1 %vm1034_vm11, %v11410_v55  ;;  %v1859_v55 = vld [vmem:[#allocation2 + $0x92] sm:$0xff]  ;;  %v11749_v20 = vpop.f32.mrf.mxu2 }
 0x270   :  { %v1955_v15 = vpack.c.bf16 %v1859_v55, %v11398_v33 }
 0x274   :  { %v11752_v5 = vpop.f32.mrf.mxu1 }
 0x275   :  { %1754 = vmatmul.bf16.gmra.mxu3 %v1232_v26 }
 0x277   :  { %2113 = vmatmul.bf16.gmra.mxu2 %v1956_v17  ;;  %v11755_v6 = vpop.f32.mrf.mxu2 }
 0x27c   :  { %v11763_v0 = vpop.f32.mrf.mxu1 }
 0x27f   :  { %7276 = vmatmul.msk.bf16.gmra.mxu1 %vm1034_vm11, %v1955_v15  ;;  %v11765_v14 = vpop.f32.mrf.mxu2 }
 0x284   :  { %v11769_v33 = vpop.f32.mrf.mxu1 }
 0x285   :  { %1759 = vmatmul.bf16.gmra.mxu3 %v1234_v52  ;;  %v10417_v52 = vunpack.i.l.bf16 %v10416_v27 }
 0x287   :  { %2118 = vmatmul.bf16.gmra.mxu2 %v1958_v59  ;;  %v11771_v34 = vpop.f32.mrf.mxu2  ;;  %v1947_v59 = vsel %vm1034_vm11, %v1835_v58, %v10418_v29  ;;  %v1591_v58 = vadd.f32 %v11651_v22, %v11693_v16 }
 0x28f   :  { %7277 = vmatmul.msk.bf16.gmra.mxu1 %vm1034_vm11, %v11448_v18  ;;  %v11777_v24 = vpop.f32.mrf.mxu2  ;;  %v1946_v18 = vsel %vm1034_vm11, %v11645_v11, %v10417_v52 }
 0x294   :  { %v11773_v23 = vpop.f32.mrf.mxu1 }
 0x295   :  { %1764 = vmatmul.bf16.gmra.mxu3 %v1236_v30  ;;  %v1962_v30 = vpack.c.bf16 %v1947_v59, %v1946_v18 }
 0x297   :  { %2123 = vmatmul.bf16.gmra.mxu2 %v1960_v28  ;;  %v11784_v40 = vpop.f32.mrf.mxu2 }
 0x29c   :  { %v11782_v35 = vpop.f32.mrf.mxu1 }
 0x29f   :  { %7278 = vmatmul.msk.bf16.gmra.mxu1 %vm1034_vm11, %v11474_v25  ;;  %v1779_v25 = vpop.f32.mrf.mxu0  ;;  %v1622_v47 = vpop.f32.mrf.mxu2 }
 0x2a2   :  { %v1730_v41 = vpop.f32.mrf.mxu3 }
 0x2a3   :  { %v1731_v31 = vadd.f32 %v1730_v41, %v1586_v9 }
 0x2a5   :  { %v1780_v51 = vadd.f32 %v1779_v25, %v1731_v31 }
 0x2a7   :  { %2128 = vmatmul.bf16.gmra.mxu2 %v1962_v30  ;;  %v1781_v53 = vpop.f32.mrf.mxu0 }
 0x2aa   :  { %v1732_v32 = vpop.f32.mrf.mxu3 }
 0x2ab   :  { %v1733_v57 = vadd.f32 %v1732_v32, %v1588_v56 }
 0x2ac   :  { %v11786_v28 = vpop.f32.mrf.mxu1 }
 0x2ad   :  { %v1782_v29 = vadd.f32 %v1781_v53, %v1733_v57 }
 0x2af   :  { %7279 = vmatmul.msk.bf16.gmra.mxu1 %vm1034_vm11, %v11509_v12  ;;  %v1784_v38 = vpop.f32.mrf.mxu0 }
 0x2b4   :  { %v11790_v45 = vpop.f32.mrf.mxu1 }
 0x2b7   :  { %v1786_v21 = vpop.f32.mrf.mxu0 }
 0x2b8   :  { %v1735_v19 = vpop.f32.mrf.mxu3 }
 0x2b9   :  { %v1736_v4 = vadd.f32 %v1735_v19, %v1591_v58 }
 0x2ba   :  { %v2094_v11 = vpop.f32.mrf.mxu2 }
 0x2bb   :  { %v1785_v32 = vadd.f32 %v1784_v38, %v1736_v4  ;;  %v1596_v38 = vadd.f32 %v11690_v2, %v11724_v13 }
 0x2bc   :  { %v11792_v54 = vpop.f32.mrf.mxu1 }
 0x2bf   :  { %7280 = vmatmul.msk.bf16.gmra.mxu1 %vm1034_vm11, %v1963_v60  ;;  %v1789_v59 = vpop.f32.mrf.mxu0 }
 0x2c0   :  { %v1737_v12 = vpop.f32.mrf.mxu3 }
 0x2c1   :  { %v1738_v60 = vadd.f32 %v1737_v12, %v1593_v42 }
 0x2c2   :  { %v2096_v36 = vpop.f32.mrf.mxu2 }
 0x2c3   :  { %v1787_v31 = vadd.f32 %v1786_v21, %v1738_v60  ;;  %v1598_v21 = vadd.f32 %v11711_v49, %v11731_v61 }
 0x2c4   :  { %v1573_v1 = vpop.f32.mrf.mxu1 }
 0x2c5   :  { %v11796_v62 = vadd.f32 %v1622_v47, %v1573_v1 }
 0x2c8   :  { %v1740_v7 = vpop.f32.mrf.mxu3 }
 0x2ca   :  { %v2099_v8 = vpop.f32.mrf.mxu2 }
 0x2cc   :  { %v2143_v63 = vpop.f32.mrf.mxu1 }
 0x2cd   :  { %v2144_v3 = vadd.f32 %v2143_v63, %v2094_v11 }
 0x2cf   :  { %v2183_v26 = vadd.f32 %v2144_v3, %v1780_v51  ;;  %v1741_v51 = vadd.f32 %v1740_v7, %v1596_v38 }
 0x2d0   :  { %v1742_v30 = vpop.f32.mrf.mxu3 }
 0x2d1   :  { %v2203_v17 = vadd.f32 %v11800_v50, %v2183_v26  ;;  %v1790_v26 = vadd.f32 %v1789_v59, %v1741_v51 }
 0x2d2   :  { %v2101_v55 = vpop.f32.mrf.mxu2 }
 0x2d3   :  { %v2219_v15 = vmax.f32 %v2203_v17, 0.0 }
 0x2d4   :  { %v2145_v27 = vpop.f32.mrf.mxu1 }
 0x2d5   :  { %2235 = vst.msk [vmem:[#allocation3] sm:$0xff] %vm1034_vm11, %v2219_v15  ;;  %v2146_v52 = vadd.f32 %v2145_v27, %v2096_v36  ;;  %v1791_v36 = vpop.f32.mrf.mxu0  ;;  %v1743_v15 = vadd.f32 %v1742_v30, %v1598_v21 }
 0x2d7   :  { %v2184_v18 = vadd.f32 %v2146_v52, %v1782_v29  ;;  %v1792_v29 = vadd.f32 %v1791_v36, %v1743_v15  ;;  %v1611_v15 = vadd.f32 %v11755_v6, %v11773_v23 }
 0x2d8   :  { %v1745_v1 = vpop.f32.mrf.mxu3 }
 0x2d9   :  { %v2204_v39 = vadd.f32 %v11800_v50, %v2184_v18  ;;  %v1601_v18 = vadd.f32 %v11719_v10, %v11747_v43 }
 0x2da   :  { %v2104_v41 = vpop.f32.mrf.mxu2 }
 0x2db   :  { %v2220_v25 = vmax.f32 %v2204_v39, 0.0  ;;  %v1746_v39 = vadd.f32 %v1745_v1, %v1601_v18  ;;  %v1613_v18 = vadd.f32 %v11765_v14, %v11782_v35 }
 0x2dc   :  { %v2148_v47 = vpop.f32.mrf.mxu1 }
 0x2dd   :  { %2236 = vst.msk [vmem:[#allocation3 + $0x8] sm:$0xff] %vm1034_vm11, %v2220_v25  ;;  %v2149_v11 = vadd.f32 %v2148_v47, %v2099_v8  ;;  %v1794_v56 = vpop.f32.mrf.mxu0 }
 0x2df   :  { %v2185_v53 = vadd.f32 %v2149_v11, %v1785_v32  ;;  %v1603_v32 = vadd.f32 %v11729_v46, %v11752_v5 }
 0x2e0   :  { %v1747_v17 = vpop.f32.mrf.mxu3 }
 0x2e1   :  { %v2205_v22 = vadd.f32 %v11800_v50, %v2185_v53  ;;  %v1748_v53 = vadd.f32 %v1747_v17, %v1603_v32 }
 0x2e2   :  { %v2106_v16 = vpop.f32.mrf.mxu2 }
 0x2e3   :  { %v2221_v19 = vmax.f32 %v2205_v22, 0.0 }
 0x2e4   :  { %v2150_v9 = vpop.f32.mrf.mxu1 }
 0x2e5   :  { %2237 = vst.msk [vmem:[#allocation3 + $0x10] sm:$0xff] %vm1034_vm11, %v2221_v19  ;;  %v2151_v63 = vadd.f32 %v2150_v9, %v2101_v55  ;;  %v1796_v58 = vpop.f32.mrf.mxu0  ;;  %v1606_v19 = vadd.f32 %v11741_v44, %v11763_v0 }
 0x2e7   :  { %v2186_v8 = vadd.f32 %v2151_v63, %v1787_v31 }
 0x2e8   :  { %v1750_v4 = vpop.f32.mrf.mxu3 }
 0x2e9   :  { %v2206_v48 = vadd.f32 %v11800_v50, %v2186_v8  ;;  %v1751_v31 = vadd.f32 %v1750_v4, %v1606_v19 }
 0x2ea   :  { %v2109_v37 = vpop.f32.mrf.mxu2 }
 0x2eb   :  { %v2222_v12 = vmax.f32 %v2206_v48, 0.0 }
 0x2ec   :  { %v2153_v3 = vpop.f32.mrf.mxu1 }
 0x2ed   :  { %2238 = vst.msk [vmem:[#allocation3 + $0x18] sm:$0xff] %vm1034_vm11, %v2222_v12  ;;  %v2154_v57 = vadd.f32 %v2153_v3, %v2104_v41  ;;  %v1795_v41 = vadd.f32 %v1794_v56, %v1746_v39  ;;  %v1799_v42 = vpop.f32.mrf.mxu0 }
 0x2ee   :  { %v1800_v51 = vadd.f32 %v1799_v42, %v1751_v31 }
 0x2ef   :  { %v2187_v55 = vadd.f32 %v2154_v57, %v1790_v26 }
 0x2f0   :  { %v1752_v43 = vpop.f32.mrf.mxu3 }
 0x2f1   :  { %v2207_v2 = vadd.f32 %v11800_v50, %v2187_v55 }
 0x2f2   :  { %v2111_v7 = vpop.f32.mrf.mxu2 }
 0x2f3   :  { %v2223_v13 = vmax.f32 %v2207_v2, 0.0 }
 0x2f4   :  { %v2155_v27 = vpop.f32.mrf.mxu1 }
 0x2f5   :  { %2239 = vst.msk [vmem:[#allocation3 + $0x20] sm:$0xff] %vm1034_vm11, %v2223_v13  ;;  %v2156_v52 = vadd.f32 %v2155_v27, %v2106_v16  ;;  %v1797_v16 = vadd.f32 %v1796_v58, %v1748_v53  ;;  %v1801_v5 = vpop.f32.mrf.mxu0 }
 0x2f7   :  { %v2188_v59 = vadd.f32 %v2156_v52, %v1792_v29 }
 0x2f8   :  { %v1755_v38 = vpop.f32.mrf.mxu3 }
 0x2f9   :  { %v2208_v49 = vadd.f32 %v11800_v50, %v2188_v59  ;;  %v1756_v13 = vadd.f32 %v1755_v38, %v1611_v15 }
 0x2fa   :  { %v2114_v47 = vpop.f32.mrf.mxu2 }
 0x2fb   :  { %v2224_v61 = vmax.f32 %v2208_v49, 0.0 }
 0x2fc   :  { %v2158_v30 = vpop.f32.mrf.mxu1 }
 0x2fd   :  { %2240 = vst.msk [vmem:[#allocation3 + $0x28] sm:$0xff] %vm1034_vm11, %v2224_v61  ;;  %v2159_v25 = vadd.f32 %v2158_v30, %v2109_v37  ;;  %v1608_v37 = vadd.f32 %v11749_v20, %v11769_v33  ;;  %v1804_v57 = vpop.f32.mrf.mxu0 }
 0x2fe   :  { %v1805_v29 = vadd.f32 %v1804_v57, %v1756_v13 }
 0x2ff   :  { %v2189_v11 = vadd.f32 %v2159_v25, %v1795_v41  ;;  %v1753_v3 = vadd.f32 %v1752_v43, %v1608_v37 }
 0x300   :  { %v1757_v55 = vpop.f32.mrf.mxu3 }
 0x301   :  { %v2209_v10 = vadd.f32 %v11800_v50, %v2189_v11  ;;  %v1802_v17 = vadd.f32 %v1801_v5, %v1753_v3  ;;  %v1758_v39 = vadd.f32 %v1757_v55, %v1613_v18  ;;  %v1621_v5 = vadd.f32 %v11784_v40, %v11792_v54 }
 0x302   :  { %v2116_v9 = vpop.f32.mrf.mxu2 }
 0x303   :  { %v2225_v60 = vmax.f32 %v2209_v10, 0.0 }
 0x304   :  { %v2160_v22 = vpop.f32.mrf.mxu1 }
 0x305   :  { %2241 = vst.msk [vmem:[#allocation3 + $0x30] sm:$0xff] %vm1034_vm11, %v2225_v60  ;;  %v2161_v36 = vadd.f32 %v2160_v22, %v2111_v7  ;;  %v1806_v58 = vpop.f32.mrf.mxu0  ;;  %v1618_v60 = vadd.f32 %v11777_v24, %v11790_v45 }
 0x306   :  { %v1807_v61 = vadd.f32 %v1806_v58, %v1758_v39 }
 0x307   :  { %v2190_v1 = vadd.f32 %v2161_v36, %v1797_v16 }
 0x308   :  { %v1760_v4 = vpop.f32.mrf.mxu3 }
 0x309   :  { %v2210_v46 = vadd.f32 %v11800_v50, %v2190_v1 }
 0x30a   :  { %v2119_v0 = vpop.f32.mrf.mxu2 }
 0x30b   :  { %v2226_v63 = vmax.f32 %v2210_v46, 0.0 }
 0x30c   :  { %v2163_v8 = vpop.f32.mrf.mxu1 }
 0x30d   :  { %2242 = vst.msk [vmem:[#allocation3 + $0x38] sm:$0xff] %vm1034_vm11, %v2226_v63  ;;  %v2164_v48 = vadd.f32 %v2163_v8, %v2114_v47  ;;  %v1809_v25 = vpop.f32.mrf.mxu0  ;;  %v1616_v47 = vadd.f32 %v11771_v34, %v11786_v28 }
 0x30f   :  { %v2191_v12 = vadd.f32 %v2164_v48, %v1800_v51  ;;  %v1761_v11 = vadd.f32 %v1760_v4, %v1616_v47 }
 0x310   :  { %v1762_v35 = vpop.f32.mrf.mxu3 }
 0x311   :  { %v2211_v44 = vadd.f32 %v11800_v50, %v2191_v12  ;;  %v1810_v10 = vadd.f32 %v1809_v25, %v1761_v11  ;;  %v1763_v19 = vadd.f32 %v1762_v35, %v1618_v60 }
 0x312   :  { %v2121_v7 = vpop.f32.mrf.mxu2 }
 0x313   :  { %v2227_v56 = vmax.f32 %v2211_v44, 0.0 }
 0x314   :  { %v2165_v26 = vpop.f32.mrf.mxu1 }
 0x315   :  { %2243 = vst.msk [vmem:[#allocation3 + $0x40] sm:$0xff] %vm1034_vm11, %v2227_v56  ;;  %v2166_v21 = vadd.f32 %v2165_v26, %v2116_v9  ;;  %v1811_v36 = vpop.f32.mrf.mxu0 }
 0x316   :  { %v1812_v31 = vadd.f32 %v1811_v36, %v1763_v19 }
 0x317   :  { %v2192_v2 = vadd.f32 %v2166_v21, %v1802_v17 }
 0x318   :  { %v1765_v1 = vpop.f32.mrf.mxu3 }
 0x319   :  { %v2212_v20 = vadd.f32 %v11800_v50, %v2192_v2  ;;  %v1766_v8 = vadd.f32 %v1765_v1, %v1621_v5 }
 0x31a   :  { %v2124_v41 = vpop.f32.mrf.mxu2 }
 0x31b   :  { %v2228_v33 = vmax.f32 %v2212_v20, 0.0 }
 0x31c   :  { %v2168_v27 = vpop.f32.mrf.mxu1 }
 0x31d   :  { %2244 = vst.msk [vmem:[#allocation3 + $0x48] sm:$0xff] %vm1034_vm11, %v2228_v33  ;;  %v2169_v52 = vadd.f32 %v2168_v27, %v2119_v0  ;;  %v1814_v38 = vpop.f32.mrf.mxu0 }
 0x31e   :  { %v1815_v37 = vadd.f32 %v1814_v38, %v1766_v8 }
 0x31f   :  { %v2193_v59 = vadd.f32 %v2169_v52, %v1805_v29 }
 0x320   :  { %v1767_v3 = vpop.f32.mrf.mxu3 }
 0x321   :  { %v2213_v6 = vadd.f32 %v11800_v50, %v2193_v59  ;;  %v1768_v0 = vadd.f32 %v1767_v3, %v11796_v62 }
 0x322   :  { %v2126_v16 = vpop.f32.mrf.mxu2 }
 0x323   :  { %v2229_v23 = vmax.f32 %v2213_v6, 0.0 }
 0x324   :  { %v2170_v49 = vpop.f32.mrf.mxu1 }
 0x325   :  { %2245 = vst.msk [vmem:[#allocation3 + $0x50] sm:$0xff] %vm1034_vm11, %v2229_v23  ;;  %v2171_v30 = vadd.f32 %v2170_v49, %v2121_v7  ;;  %v1816_v26 = vpop.f32.mrf.mxu0 }
 0x326   :  { %v1817_v17 = vadd.f32 %v1816_v26, %v1768_v0 }
 0x327   :  { %v2194_v32 = vadd.f32 %v2171_v30, %v1807_v61 }
 0x329   :  { %v2214_v14 = vadd.f32 %v11800_v50, %v2194_v32 }
 0x32a   :  { %v2129_v45 = vpop.f32.mrf.mxu2 }
 0x32b   :  { %v2230_v42 = vmax.f32 %v2214_v14, 0.0 }
 0x32c   :  { %v2173_v53 = vpop.f32.mrf.mxu1 }
 0x32d   :  { %2246 = vst.msk [vmem:[#allocation3 + $0x58] sm:$0xff] %vm1034_vm11, %v2230_v42  ;;  %v2174_v43 = vadd.f32 %v2173_v53, %v2124_v41 }
 0x32f   :  { %v2195_v22 = vadd.f32 %v2174_v43, %v1810_v10 }
 0x331   :  { %v2215_v34 = vadd.f32 %v11800_v50, %v2195_v22 }
 0x332   :  { %v2131_v54 = vpop.f32.mrf.mxu2 }
 0x333   :  { %v2231_v28 = vmax.f32 %v2215_v34, 0.0 }
 0x334   :  { %v2175_v9 = vpop.f32.mrf.mxu1 }
 0x335   :  { %2247 = vst.msk [vmem:[#allocation3 + $0x60] sm:$0xff] %vm1034_vm11, %v2231_v28  ;;  %v2176_v46 = vadd.f32 %v2175_v9, %v2126_v16 }
 0x337   :  { %v2196_v63 = vadd.f32 %v2176_v46, %v1812_v31 }
 0x339   :  { %v2216_v24 = vadd.f32 %v11800_v50, %v2196_v63 }
 0x33b   :  { %v2232_v51 = vmax.f32 %v2216_v24, 0.0 }
 0x33c   :  { %v2178_v48 = vpop.f32.mrf.mxu1 }
 0x33d   :  { %2248 = vst.msk [vmem:[#allocation3 + $0x68] sm:$0xff] %vm1034_vm11, %v2232_v51  ;;  %v2179_v12 = vadd.f32 %v2178_v48, %v2129_v45 }
 0x33f   :  { %v2197_v44 = vadd.f32 %v2179_v12, %v1815_v37 }
 0x341   :  { %v2217_v56 = vadd.f32 %v11800_v50, %v2197_v44 }
 0x343   :  { %v2233_v40 = vmax.f32 %v2217_v56, 0.0 }
 0x344   :  { %v2180_v57 = vpop.f32.mrf.mxu1 }
 0x345   :  { %2249 = vst.msk [vmem:[#allocation3 + $0x70] sm:$0xff] %vm1034_vm11, %v2233_v40  ;;  %v2181_v21 = vadd.f32 %v2180_v57, %v2131_v54 }
 0x347   :  { %v2198_v55 = vadd.f32 %v2181_v21, %v1817_v17 }
 0x349   :  { %v2218_v15 = vadd.f32 %v11800_v50, %v2198_v55 }
 0x34b   :  { %v2234_v2 = vmax.f32 %v2218_v15, 0.0 }
 0x34d   :  { %2250 = vst.msk [vmem:[#allocation3 + $0x78] sm:$0xff] %vm1034_vm11, %v2234_v2 }
 0x34e   :  { %10666 = dma.done.wait [#allocation5], 65536 }
 0x34f   :  { %10667 = vsyncadd [#allocation5], 4294901760  ;;  %vm2261_vm14 = vcmask 1040384   ;;  %v2399_v62 = vld [vmem:[#allocation3 + $0x9] sm:$0x1]  ;;  %s6935_s7 = sshll.u32 %s12283_s9, 4  ;;  %s6936_s7 = int_to_ptr.hbm [resolvable:$true] %s6935_s7 }
 0x350   :  { %v2400_v13 = vld [vmem:[#allocation3 + $0x49] sm:$0x1]  ;;  %v2412_v33 = vld [vmem:[#allocation3 + $0x4b] sm:$0x1]  ;;  %v2423_v7 = vld [vmem:[#allocation3 + $0xd] sm:$0x1] }
 0x351   :  { %v2402_v20 = vrot.slane %v2400_v13, 7  ;;  %v2424_v27 = vld [vmem:[#allocation3 + $0x4d] sm:$0x1]  ;;  %v7339_v29 = vld [vmem:[#allocation4 + $0x270] sm:$0xf]  ;;  %v2414_v6 = vrot.slane %v2412_v33, 7 }
 0x352   :  { %v2426_v58 = vrot.slane %v2424_v27, 7  ;;  %v9511_v18 = vld [vmem:[#allocation4 + $0x274] sm:$0xf0]  ;;  %v2436_v59 = vld [vmem:[#allocation3 + $0x4f] sm:$0x1]  ;;  %vm6926_vm15 = vcmask 25600  }
 0x353   :  { %v2404_v52 = vsel %vm2261_vm14, %v2399_v62, %v2402_v20  ;;  %v7340_v50 = vor.u32 %v9511_v18, %v7339_v29  ;;  %v7331_v4 = vld [vmem:[#allocation4 + $0x260] sm:$0xf]  ;;  %v9509_v39 = vld [vmem:[#allocation4 + $0x264] sm:$0xf0]  ;;  %v2438_v30 = vrot.slane %v2436_v59, 7 }
 0x354   :  { %2442 = vrot.lane.b32.xlu0 %v2404_v52, %s10673_s26  ;;  %v2428_v23 = vsel %vm2261_vm14, %v2423_v7, %v2426_v58  ;;  %v2411_v49 = vld [vmem:[#allocation3 + $0xb] sm:$0x1]  ;;  %v7332_v61 = vor.u32 %v9509_v39, %v7331_v4  ;;  %v7323_v41 = vld [vmem:[#allocation4 + $0x250] sm:$0xf]  ;;  %v9507_v25 = vld [vmem:[#allocation4 + $0x254] sm:$0xf0] }
 0x355   :  { %2450 = vrot.lane.b32.xlu1 %v2428_v23, %s10673_s26  ;;  %2850 = vmatpush.bf16.msrb.mxu3 %v7340_v50  ;;  %v2435_v47 = vld [vmem:[#allocation3 + $0xf] sm:$0x1]  ;;  %v2275_v32 = vld [vmem:[#allocation3 + $0x3] sm:$0x1]  ;;  %v2416_v14 = vsel %vm2261_vm14, %v2411_v49, %v2414_v6  ;;  %v2299_v42 = vld [vmem:[#allocation3 + $0x7] sm:$0x1]  ;;  %v7324_v10 = vor.u32 %v9507_v25, %v7323_v41 }
 0x356   :  { %v2276_v11 = vld [vmem:[#allocation3 + $0x43] sm:$0x1]  ;;  %v2300_v53 = vld [vmem:[#allocation3 + $0x47] sm:$0x1]  ;;  %v9510_v60 = vld [vmem:[#allocation4 + $0x274] sm:$0xf]  ;;  %v2440_v22 = vsel %vm2261_vm14, %v2435_v47, %v2438_v30 }
 0x357   :  { %v2278_v35 = vrot.slane %v2276_v11, 7  ;;  %v2302_v43 = vrot.slane %v2300_v53, 7  ;;  %v7315_v16 = vld [vmem:[#allocation4 + $0x240] sm:$0xf]  ;;  %v9505_v36 = vld [vmem:[#allocation4 + $0x244] sm:$0xf0] }
 0x358   :  { %v7341_v34 = vld [vmem:[#allocation4 + $0x278] sm:$0xf0]  ;;  %v2263_v9 = vld [vmem:[#allocation3 + $0x1] sm:$0x1]  ;;  %v2287_v5 = vld [vmem:[#allocation3 + $0x5] sm:$0x1]  ;;  %v7316_v38 = vor.u32 %v9505_v36, %v7315_v16 }
 0x359   :  { %2851 = vmatpush.bf16.msrb.mxu3 %v7332_v61  ;;  %v2280_v19 = vsel %vm2261_vm14, %v2275_v32, %v2278_v35  ;;  %v2304_v28 = vsel %vm2261_vm14, %v2299_v42, %v2302_v43  ;;  %v7344_v1 = vor.u32 %v9510_v60, %v7341_v34  ;;  %v2264_v46 = vld [vmem:[#allocation3 + $0x41] sm:$0x1]  ;;  %v2288_v63 = vld [vmem:[#allocation3 + $0x45] sm:$0x1]  ;;  %v7333_v51 = vld [vmem:[#allocation4 + $0x268] sm:$0xf0] }
 0x35a   :  { %v10421_v31 = vpack.i.bf16 %v2304_v28, %v2280_v19  ;;  %v2266_v8 = vrot.slane %v2264_v46, 7  ;;  %v2290_v24 = vrot.slane %v2288_v63, 7  ;;  %v9508_v45 = vld [vmem:[#allocation4 + $0x264] sm:$0xf]  ;;  %v7307_v48 = vld [vmem:[#allocation4 + $0x230] sm:$0xf] }
 0x35b   :  { %v9503_v37 = vld [vmem:[#allocation4 + $0x234] sm:$0xf0]  ;;  %2902 = vmatpush.bf16.msra.mxu0 %v7344_v1  ;;  %v7336_v12 = vor.u32 %v9508_v45, %v7333_v51  ;;  %v9506_v3 = vld [vmem:[#allocation4 + $0x254] sm:$0xf]  ;;  %v7325_v56 = vld [vmem:[#allocation4 + $0x258] sm:$0xf0] }
 0x35c   :  { %2446 = vrot.lane.b32.xlu0 %v2416_v14, %s10673_s26  ;;  %10422 = vrot.lane.b32.xlu2 %v10421_v31, %s10673_s26  ;;  %v2268_v44 = vsel %vm2261_vm14, %v2263_v9, %v2266_v8  ;;  %v2292_v0 = vsel %vm2261_vm14, %v2287_v5, %v2290_v24  ;;  %v9526_v26 = vld [vmem:[#allocation4 + $0x2f4] sm:$0xf]  ;;  %v7405_v40 = vld [vmem:[#allocation4 + $0x2f8] sm:$0xf0]  ;;  %v7308_v57 = vor.u32 %v9503_v37, %v7307_v48  ;;  %v9524_v17 = vld [vmem:[#allocation4 + $0x2e4] sm:$0xf] }
 0x35d   :  { %2454 = vrot.lane.b32.xlu1 %v2440_v22, %s10673_s26  ;;  %2852 = vmatpush.bf16.msrb.mxu3 %v7324_v10  ;;  %v7408_v54 = vor.u32 %v9526_v26, %v7405_v40  ;;  %v7397_v21 = vld [vmem:[#allocation4 + $0x2e8] sm:$0xf0]  ;;  %v7299_v55 = vld [vmem:[#allocation4 + $0x220] sm:$0xf]  ;;  %v9501_v15 = vld [vmem:[#allocation4 + $0x224] sm:$0xf0]  ;;  %v10426_v2 = vpack.i.bf16 %v2292_v0, %v2268_v44  ;;  %v7328_v62 = vor.u32 %v9506_v3, %v7325_v56 }
 0x35e   :  { %v9504_v13 = vld [vmem:[#allocation4 + $0x244] sm:$0xf]  ;;  %v7317_v20 = vld [vmem:[#allocation4 + $0x248] sm:$0xf0]  ;;  %v7400_v33 = vor.u32 %v9524_v17, %v7397_v21  ;;  %v9522_v7 = vld [vmem:[#allocation4 + $0x2d4] sm:$0xf]  ;;  %v7300_v58 = vor.u32 %v9501_v15, %v7299_v55 }
 0x35f   :  { %2903 = vmatpush.bf16.msra.mxu0 %v7336_v12  ;;  %2915 = vmatpush.bf16.msra.mxu2 %v7408_v54  ;;  %v7389_v27 = vld [vmem:[#allocation4 + $0x2d8] sm:$0xf0]  ;;  %v9542_v29 = vld [vmem:[#allocation4 + $0x374] sm:$0xf]  ;;  %v7291_v50 = vld [vmem:[#allocation4 + $0x210] sm:$0xf]  ;;  %v7320_v4 = vor.u32 %v9504_v13, %v7317_v20 }
 0x360   :  { %v7469_v52 = vld [vmem:[#allocation4 + $0x378] sm:$0xf0]  ;;  %v9499_v59 = vld [vmem:[#allocation4 + $0x214] sm:$0xf0]  ;;  %v9540_v39 = vld [vmem:[#allocation4 + $0x364] sm:$0xf]  ;;  %v7392_v49 = vor.u32 %v9522_v7, %v7389_v27 }
 0x361   :  { %2853 = vmatpush.bf16.msrb.mxu3 %v7316_v38  ;;  %v7472_v18 = vor.u32 %v9542_v29, %v7469_v52  ;;  %v9502_v6 = vld [vmem:[#allocation4 + $0x234] sm:$0xf]  ;;  %v7309_v23 = vld [vmem:[#allocation4 + $0x238] sm:$0xf0]  ;;  %v7461_v61 = vld [vmem:[#allocation4 + $0x368] sm:$0xf0]  ;;  %v7292_v47 = vor.u32 %v9499_v59, %v7291_v50 }
 0x362   :  { %v9520_v30 = vld [vmem:[#allocation4 + $0x2c4] sm:$0xf]  ;;  %v7381_v41 = vld [vmem:[#allocation4 + $0x2c8] sm:$0xf0]  ;;  %v7464_v25 = vor.u32 %v9540_v39, %v7461_v61  ;;  %v7283_v32 = vld [vmem:[#allocation4 + $0x200] sm:$0xf]  ;;  %v7312_v53 = vor.u32 %v9502_v6, %v7309_v23 }
 0x363   :  { %2904 = vmatpush.bf16.msra.mxu0 %v7328_v62  ;;  %2916 = vmatpush.bf16.msra.mxu2 %v7400_v33  ;;  %v9538_v11 = vld [vmem:[#allocation4 + $0x354] sm:$0xf]  ;;  %v7453_v14 = vld [vmem:[#allocation4 + $0x358] sm:$0xf0]  ;;  %v9497_v35 = vld [vmem:[#allocation4 + $0x204] sm:$0xf0]  ;;  %v7384_v22 = vor.u32 %v9520_v30, %v7381_v41 }
 0x364   :  { %10427 = vrot.lane.b32.xlu2 %v10426_v2, %s10673_s26  ;;  %2928 = vmatpush.bf16.msra.mxu1 %v7472_v18  ;;  %v7403_v42 = vld [vmem:[#allocation4 + $0x2f0] sm:$0xf]  ;;  %v9527_v10 = vld [vmem:[#allocation4 + $0x2f4] sm:$0xf0]  ;;  %v9500_v43 = vld [vmem:[#allocation4 + $0x224] sm:$0xf]  ;;  %v7456_v16 = vor.u32 %v9538_v11, %v7453_v14  ;;  %v7284_v34 = vor.u32 %v9497_v35, %v7283_v32 }
 0x365   :  { %2854 = vmatpush.bf16.msrb.mxu3 %v7308_v57  ;;  %v7301_v60 = vld [vmem:[#allocation4 + $0x228] sm:$0xf0]  ;;  %v9518_v36 = vld [vmem:[#allocation4 + $0x2b4] sm:$0xf]  ;;  %v7373_v19 = vld [vmem:[#allocation4 + $0x2b8] sm:$0xf0]  ;;  %v7404_v28 = vor.u32 %v9527_v10, %v7403_v42 }
 0x366   :  { %v7395_v1 = vld [vmem:[#allocation4 + $0x2e0] sm:$0xf]  ;;  %v7304_v9 = vor.u32 %v9500_v43, %v7301_v60  ;;  %v9525_v31 = vld [vmem:[#allocation4 + $0x2e4] sm:$0xf0]  ;;  %v9498_v46 = vld [vmem:[#allocation4 + $0x214] sm:$0xf]  ;;  %v7376_v63 = vor.u32 %v9518_v36, %v7373_v19 }
 0x367   :  { %2905 = vmatpush.bf16.msra.mxu0 %v7320_v4  ;;  %2917 = vmatpush.bf16.msra.mxu2 %v7392_v49  ;;  %v7293_v5 = vld [vmem:[#allocation4 + $0x218] sm:$0xf0]  ;;  %v7396_v38 = vor.u32 %v9525_v31, %v7395_v1  ;;  %v7387_v24 = vld [vmem:[#allocation4 + $0x2d0] sm:$0xf]  ;;  %v9523_v45 = vld [vmem:[#allocation4 + $0x2d4] sm:$0xf0] }
 0x368   :  { %2929 = vmatpush.bf16.msra.mxu1 %v7464_v25  ;;  %v7296_v8 = vor.u32 %v9498_v46, %v7293_v5  ;;  %v7388_v51 = vor.u32 %v9523_v45, %v7387_v24  ;;  %v7379_v48 = vld [vmem:[#allocation4 + $0x2c0] sm:$0xf]  ;;  %v9521_v37 = vld [vmem:[#allocation4 + $0x2c4] sm:$0xf0]  ;;  %v7371_v3 = vld [vmem:[#allocation4 + $0x2b0] sm:$0xf] }
 0x369   :  { %2855 = vmatpush.bf16.msrb.mxu3 %v7300_v58  ;;  %v7380_v12 = vor.u32 %v9521_v37, %v7379_v48  ;;  %v9519_v44 = vld [vmem:[#allocation4 + $0x2b4] sm:$0xf0]  ;;  %v7363_v56 = vld [vmem:[#allocation4 + $0x2a0] sm:$0xf]  ;;  %v9517_v26 = vld [vmem:[#allocation4 + $0x2a4] sm:$0xf0] }
 0x36a   :  { %v7372_v0 = vor.u32 %v9519_v44, %v7371_v3  ;;  %v7364_v40 = vor.u32 %v9517_v26, %v7363_v56  ;;  %v7355_v54 = vld [vmem:[#allocation4 + $0x290] sm:$0xf]  ;;  %v9515_v57 = vld [vmem:[#allocation4 + $0x294] sm:$0xf0]  ;;  %v9496_v21 = vld [vmem:[#allocation4 + $0x204] sm:$0xf] }
 0x36b   :  { %2906 = vmatpush.bf16.msra.mxu0 %v7312_v53  ;;  %2918 = vmatpush.bf16.msra.mxu2 %v7384_v22  ;;  %v7356_v17 = vor.u32 %v9515_v57, %v7355_v54  ;;  %v7285_v55 = vld [vmem:[#allocation4 + $0x208] sm:$0xf0]  ;;  %v9516_v2 = vld [vmem:[#allocation4 + $0x2a4] sm:$0xf]  ;;  %v7347_v7 = vld [vmem:[#allocation4 + $0x280] sm:$0xf] }
 0x36c   :  { %2930 = vmatpush.bf16.msra.mxu1 %v7456_v16  ;;  %v7288_v15 = vor.u32 %v9496_v21, %v7285_v55  ;;  %v7365_v62 = vld [vmem:[#allocation4 + $0x2a8] sm:$0xf0]  ;;  %v9536_v20 = vld [vmem:[#allocation4 + $0x344] sm:$0xf]  ;;  %v9513_v29 = vld [vmem:[#allocation4 + $0x284] sm:$0xf0] }
 0x36d   :  { %2856 = vmatpush.bf16.msrb.mxu3 %v7292_v47  ;;  %v7368_v13 = vor.u32 %v9516_v2, %v7365_v62  ;;  %v7445_v33 = vld [vmem:[#allocation4 + $0x348] sm:$0xf0]  ;;  %v7348_v52 = vor.u32 %v9513_v29, %v7347_v7  ;;  %v9514_v58 = vld [vmem:[#allocation4 + $0x294] sm:$0xf]  ;;  %v7357_v18 = vld [vmem:[#allocation4 + $0x298] sm:$0xf0] }
 0x36e   :  { %v7448_v27 = vor.u32 %v9536_v20, %v7445_v33  ;;  %v9534_v50 = vld [vmem:[#allocation4 + $0x334] sm:$0xf]  ;;  %v7360_v59 = vor.u32 %v9514_v58, %v7357_v18  ;;  %v7437_v4 = vld [vmem:[#allocation4 + $0x338] sm:$0xf0]  ;;  %v9512_v6 = vld [vmem:[#allocation4 + $0x284] sm:$0xf] }
 0x36f   :  { %2907 = vmatpush.bf16.msra.mxu0 %v7304_v9  ;;  %2919 = vmatpush.bf16.msra.mxu2 %v7376_v63  ;;  %v7440_v39 = vor.u32 %v9534_v50, %v7437_v4  ;;  %v7349_v23 = vld [vmem:[#allocation4 + $0x288] sm:$0xf0]  ;;  %v9532_v49 = vld [vmem:[#allocation4 + $0x324] sm:$0xf]  ;;  %v9530_v25 = vld [vmem:[#allocation4 + $0x314] sm:$0xf] }
 0x370   :  { %2931 = vmatpush.bf16.msra.mxu1 %v7448_v27  ;;  %v7352_v61 = vor.u32 %v9512_v6, %v7349_v23  ;;  %v7429_v30 = vld [vmem:[#allocation4 + $0x328] sm:$0xf0]  ;;  %v7421_v47 = vld [vmem:[#allocation4 + $0x318] sm:$0xf0]  ;;  %v9528_v11 = vld [vmem:[#allocation4 + $0x304] sm:$0xf] }
 0x371   :  { %2857 = vmatpush.bf16.msrb.mxu3 %v7284_v34  ;;  %v7432_v41 = vor.u32 %v9532_v49, %v7429_v30  ;;  %v7424_v32 = vor.u32 %v9530_v25, %v7421_v47  ;;  %v7413_v14 = vld [vmem:[#allocation4 + $0x308] sm:$0xf0]  ;;  %v2394_v42 = vld [vmem:[#allocation3 + $0x48] sm:$0x1]  ;;  %v7467_v36 = vld [vmem:[#allocation4 + $0x370] sm:$0xf] }
 0x372   :  { %v7416_v35 = vor.u32 %v9528_v11, %v7413_v14  ;;  %v2418_v53 = vld [vmem:[#allocation3 + $0x4c] sm:$0x1]  ;;  %v2396_v10 = vrot.slane %v2394_v42, 7  ;;  %v2393_v43 = vld [vmem:[#allocation3 + $0x8] sm:$0x1] }
 0x373   :  { %2908 = vmatpush.bf16.msra.mxu0 %v7296_v8  ;;  %2920 = vmatpush.bf16.msra.mxu2 %v7368_v13  ;;  %v2420_v60 = vrot.slane %v2418_v53, 7  ;;  %v2417_v22 = vld [vmem:[#allocation3 + $0xc] sm:$0x1]  ;;  %v9543_v19 = vld [vmem:[#allocation4 + $0x374] sm:$0xf0] }
 0x374   :  { %2932 = vmatpush.bf16.msra.mxu1 %v7440_v39  ;;  %v2398_v16 = vsel %vm2261_vm14, %v2393_v43, %v2396_v10  ;;  %v2406_v34 = vld [vmem:[#allocation3 + $0x4a] sm:$0x1]  ;;  %v7468_v31 = vor.u32 %v9543_v19, %v7467_v36  ;;  %v7459_v63 = vld [vmem:[#allocation4 + $0x360] sm:$0xf]  ;;  %v9463_v37 = vld [vmem:[#allocation4 + $0xf4] sm:$0xf0] }
 0x375   :  { %2863 = vmatpush.bf16.msra.mxu3 %v7404_v28  ;;  %v2422_v1 = vsel %vm2261_vm14, %v2417_v22, %v2420_v60  ;;  %v2408_v5 = vrot.slane %v2406_v34, 7  ;;  %v2405_v24 = vld [vmem:[#allocation3 + $0xa] sm:$0x1]  ;;  %v9539_v56 = vld [vmem:[#allocation4 + $0x354] sm:$0xf0] }
 0x376   :  { %v7595_v26 = vld [vmem:[#allocation4 + $0x70] sm:$0xf]  ;;  %v7651_v54 = vld [vmem:[#allocation4 + $0xe0] sm:$0xf]  ;;  %v9461_v21 = vld [vmem:[#allocation4 + $0xe4] sm:$0xf0] }
 0x377   :  { %2909 = vmatpush.bf16.msra.mxu0 %v7288_v15  ;;  %2921 = vmatpush.bf16.msra.mxu2 %v7360_v59  ;;  %v2410_v44 = vsel %vm2261_vm14, %v2405_v24, %v2408_v5  ;;  %v7652_v2 = vor.u32 %v9461_v21, %v7651_v54  ;;  %v7443_v13 = vld [vmem:[#allocation4 + $0x340] sm:$0xf]  ;;  %v9537_v20 = vld [vmem:[#allocation4 + $0x344] sm:$0xf0]  ;;  %v7643_v27 = vld [vmem:[#allocation4 + $0xd0] sm:$0xf] }
 0x378   :  { %2933 = vmatpush.bf16.msra.mxu1 %v7432_v41  ;;  %v7587_v33 = vld [vmem:[#allocation4 + $0x60] sm:$0xf]  ;;  %v9445_v7 = vld [vmem:[#allocation4 + $0x64] sm:$0xf0]  ;;  %v7723_v58 = vld [vmem:[#allocation4 + $0x170] sm:$0xf]  ;;  %v7444_v50 = vor.u32 %v9537_v20, %v7443_v13 }
 0x379   :  { %2864 = vmatpush.bf16.msra.mxu3 %v7396_v38  ;;  %v9541_v38 = vld [vmem:[#allocation4 + $0x364] sm:$0xf0]  ;;  %v7588_v29 = vor.u32 %v9445_v7, %v7587_v33  ;;  %v9479_v18 = vld [vmem:[#allocation4 + $0x174] sm:$0xf0]  ;;  %v7435_v39 = vld [vmem:[#allocation4 + $0x330] sm:$0xf] }
 0x37a   :  { %v7724_v4 = vor.u32 %v9479_v18, %v7723_v58  ;;  %v9535_v6 = vld [vmem:[#allocation4 + $0x334] sm:$0xf0]  ;;  %v7579_v23 = vld [vmem:[#allocation4 + $0x50] sm:$0xf]  ;;  %v9457_v41 = vld [vmem:[#allocation4 + $0xc4] sm:$0xf0] }
 0x37b   :  { %2922 = vmatpush.bf16.msra.mxu2 %v7352_v61  ;;  %v9443_v49 = vld [vmem:[#allocation4 + $0x54] sm:$0xf0]  ;;  %v7635_v61 = vld [vmem:[#allocation4 + $0xc0] sm:$0xf]  ;;  %v9477_v47 = vld [vmem:[#allocation4 + $0x164] sm:$0xf0] }
 0x37c   :  { %2934 = vmatpush.bf16.msra.mxu1 %v7424_v32  ;;  %v7580_v30 = vor.u32 %v9443_v49, %v7579_v23  ;;  %v7715_v25 = vld [vmem:[#allocation4 + $0x160] sm:$0xf]  ;;  %v7436_v32 = vor.u32 %v9535_v6, %v7435_v39  ;;  %v7636_v11 = vor.u32 %v9457_v41, %v7635_v61  ;;  %v9533_v42 = vld [vmem:[#allocation4 + $0x324] sm:$0xf0]  ;;  %v7627_v43 = vld [vmem:[#allocation4 + $0xb0] sm:$0xf] }
 0x37d   :  { %2865 = vmatpush.bf16.msra.mxu3 %v7388_v51  ;;  %v7659_v51 = vld [vmem:[#allocation4 + $0xf0] sm:$0xf]  ;;  %v7716_v14 = vor.u32 %v9477_v47, %v7715_v25  ;;  %v7571_v53 = vld [vmem:[#allocation4 + $0x40] sm:$0xf]  ;;  %v9441_v10 = vld [vmem:[#allocation4 + $0x44] sm:$0xf0] }
 0x37e   :  { %v7660_v3 = vor.u32 %v9463_v37, %v7659_v51  ;;  %v7419_v60 = vld [vmem:[#allocation4 + $0x310] sm:$0xf]  ;;  %v7572_v22 = vor.u32 %v9441_v10, %v7571_v53  ;;  %v9475_v19 = vld [vmem:[#allocation4 + $0x154] sm:$0xf0]  ;;  %v7619_v37 = vld [vmem:[#allocation4 + $0xa0] sm:$0xf] }
 0x37f   :  { %v7707_v36 = vld [vmem:[#allocation4 + $0x150] sm:$0xf]  ;;  %v9439_v51 = vld [vmem:[#allocation4 + $0x34] sm:$0xf0]  ;;  %v7411_v54 = vld [vmem:[#allocation4 + $0x300] sm:$0xf] }
 0x380   :  { %2935 = vmatpush.bf16.msra.mxu1 %v7416_v35  ;;  %3287 = vmatpush.bf16.msrb.mxu2 %v7660_v3  ;;  %v7427_v35 = vld [vmem:[#allocation4 + $0x320] sm:$0xf]  ;;  %v7563_v24 = vld [vmem:[#allocation4 + $0x30] sm:$0xf]  ;;  %v9471_v49 = vld [vmem:[#allocation4 + $0x134] sm:$0xf0] }
 0x381   :  { %2866 = vmatpush.bf16.msra.mxu3 %v7380_v12  ;;  %v7460_v12 = vor.u32 %v9541_v38, %v7459_v63  ;;  %v7428_v34 = vor.u32 %v9533_v42, %v7427_v35  ;;  %v3420_v63 = vld [vmem:[#allocation3 + $0x17] sm:$0x1]  ;;  %v2270_v13 = vld [vmem:[#allocation3 + $0x42] sm:$0x1]  ;;  %v7691_v23 = vld [vmem:[#allocation4 + $0x130] sm:$0xf] }
 0x382   :  { %v3421_v38 = vld [vmem:[#allocation3 + $0x57] sm:$0x1]  ;;  %v2272_v20 = vrot.slane %v2270_v13, 7  ;;  %v7523_v7 = vld [vmem:[#allocation4 + $0x3e0] sm:$0xf]  ;;  %v7692_v47 = vor.u32 %v9471_v49, %v7691_v23 }
 0x383   :  { %v3384_v61 = vld [vmem:[#allocation3 + $0x11] sm:$0x1]  ;;  %v9444_v49 = vld [vmem:[#allocation4 + $0x64] sm:$0xf] }
 0x384   :  { %3288 = vmatpush.bf16.msrb.mxu2 %v7652_v2  ;;  %3300 = vmatpush.bf16.msrb.mxu1 %v7724_v4  ;;  %v7531_v2 = vld [vmem:[#allocation4 + $0x3f0] sm:$0xf]  ;;  %v9451_v4 = vld [vmem:[#allocation4 + $0x94] sm:$0xf0] }
 0x385   :  { %2867 = vmatpush.bf16.msra.mxu3 %v7372_v0  ;;  %v7451_v0 = vld [vmem:[#allocation4 + $0x350] sm:$0xf] }
 0x386   :  { %v7452_v15 = vor.u32 %v9539_v56, %v7451_v0  ;;  %v7564_v0 = vor.u32 %v9439_v51, %v7563_v24  ;;  %v7547_v53 = vld [vmem:[#allocation4 + $0x10] sm:$0xf]  ;;  %v2281_v51 = vld [vmem:[#allocation3 + $0x4] sm:$0x1] }
 0x388   :  { %3301 = vmatpush.bf16.msrb.mxu1 %v7716_v14  ;;  %v9555_v14 = vld [vmem:[#allocation4 + $0x3d4] sm:$0xf0] }
 0x389   :  { %2868 = vmatpush.bf16.msra.mxu3 %v7364_v40  ;;  %v9447_v40 = vld [vmem:[#allocation4 + $0x74] sm:$0xf0] }
 0x38d   :  { %2869 = vmatpush.bf16.msra.mxu3 %v7356_v17  ;;  %v7596_v17 = vor.u32 %v9447_v40, %v7595_v26  ;;  %v7699_v26 = vld [vmem:[#allocation4 + $0x140] sm:$0xf]  ;;  %v9473_v40 = vld [vmem:[#allocation4 + $0x144] sm:$0xf0] }
 0x38e   :  { %v7700_v21 = vor.u32 %v9473_v40, %v7699_v26  ;;  %v7539_v26 = vld [vmem:[#allocation4] sm:$0xf] }
 0x38f   :  { %3274 = vmatpush.bf16.msrb.mxu0 %v7596_v17 }
 0x391   :  { %2870 = vmatpush.bf16.msra.mxu3 %v7348_v52  ;;  %v9459_v52 = vld [vmem:[#allocation4 + $0xd4] sm:$0xf0] }
 0x392   :  { %v7644_v59 = vor.u32 %v9459_v52, %v7643_v27  ;;  %v9557_v27 = vld [vmem:[#allocation4 + $0x3e4] sm:$0xf0]  ;;  %v7555_v52 = vld [vmem:[#allocation4 + $0x20] sm:$0xf] }
 0x393   :  { %3275 = vmatpush.bf16.msrb.mxu0 %v7588_v29  ;;  %v2269_v29 = vld [vmem:[#allocation3 + $0x2] sm:$0x1]  ;;  %v7524_v10 = vor.u32 %v9557_v27, %v7523_v7  ;;  %v9460_v7 = vld [vmem:[#allocation4 + $0xe4] sm:$0xf] }
 0x394   :  { %3289 = vmatpush.bf16.msrb.mxu2 %v7644_v59  ;;  %v7611_v59 = vld [vmem:[#allocation4 + $0x90] sm:$0xf]  ;;  %v2274_v41 = vsel %vm2261_vm14, %v2269_v29, %v2272_v20  ;;  %v9446_v20 = vld [vmem:[#allocation4 + $0x74] sm:$0xf] }
 0x395   :  { %v7612_v25 = vor.u32 %v9451_v4, %v7611_v59  ;;  %v7499_v59 = vld [vmem:[#allocation4 + $0x3b0] sm:$0xf]  ;;  %v9551_v4 = vld [vmem:[#allocation4 + $0x3b4] sm:$0xf0] }
 0x397   :  { %3276 = vmatpush.bf16.msrb.mxu0 %v7580_v30  ;;  %v7515_v30 = vld [vmem:[#allocation4 + $0x3d0] sm:$0xf] }
 0x398   :  { %3290 = vmatpush.bf16.msrb.mxu2 %v7636_v11  ;;  %v3409_v11 = vld [vmem:[#allocation3 + $0x55] sm:$0x1]  ;;  %v7516_v24 = vor.u32 %v9555_v14, %v7515_v30  ;;  %v7725_v14 = vld [vmem:[#allocation4 + $0x178] sm:$0xf0] }
 0x399   :  { %v3411_v42 = vrot.slane %v3409_v11, 7  ;;  %v9458_v30 = vld [vmem:[#allocation4 + $0xd4] sm:$0xf] }
 0x39a   :  { %v9478_v11 = vld [vmem:[#allocation4 + $0x174] sm:$0xf] }
 0x39b   :  { %3277 = vmatpush.bf16.msrb.mxu0 %v7572_v22  ;;  %v9449_v22 = vld [vmem:[#allocation4 + $0x84] sm:$0xf0] }
 0x39f   :  { %3278 = vmatpush.bf16.msrb.mxu0 %v7564_v0 }
 0x3c6   :  { %v2443_v28 = vpop.permute.xlu0 %2442 }
 0x3c7   :  { %v2457_v9 = vsel %vm1034_vm11, %v2398_v16, %v2443_v28  ;;  %v2451_v8 = vpop.permute.xlu1 %2450  ;;  %v9455_v16 = vld [vmem:[#allocation4 + $0xb4] sm:$0xf0] }
 0x3c8   :  { %v2461_v46 = vpack.c.bf16 %v2457_v9, %v2457_v9  ;;  %v2459_v45 = vsel %vm1034_vm11, %v2422_v1, %v2451_v8  ;;  %v9531_v28 = vld [vmem:[#allocation4 + $0x314] sm:$0xf0]  ;;  %v7628_v1 = vor.u32 %v9455_v16, %v7627_v43  ;;  %v7708_v9 = vor.u32 %v9475_v19, %v7707_v36 }
 0x3c9   :  { %v11884_v48 = vpack.c.bf16 %v2459_v45, %v2459_v45  ;;  %v3423_v8 = vrot.slane %v3421_v38, 7  ;;  %v7420_v3 = vor.u32 %v9531_v28, %v7419_v60  ;;  %v9435_v43 = vld [vmem:[#allocation4 + $0x14] sm:$0xf0]  ;;  %v7603_v60 = vld [vmem:[#allocation4 + $0x80] sm:$0xf] }
 0x3ca   :  { %2858 = vmatmul.bf16.vlgmr.msrb.gmra.mxu3 %v2461_v46  ;;  %2910 = vmatmul.bf16.vlgmr.msra.gmra.mxu0 %v2461_v46  ;;  %v3397_v46 = vld [vmem:[#allocation3 + $0x53] sm:$0x1]  ;;  %v7548_v19 = vor.u32 %v9435_v43, %v7547_v53  ;;  %v7683_v28 = vld [vmem:[#allocation4 + $0x120] sm:$0xf]  ;;  %v9462_v38 = vld [vmem:[#allocation4 + $0xf4] sm:$0xf]  ;;  %v7728_v53 = vor.u32 %v9478_v11, %v7725_v14 }
 0x3cb   :  { %2876 = vmatpush.bf16.msrb.mxu3 %v7468_v31  ;;  %2936 = vmatmul.bf16.vlgmr.msra.gmra.mxu1 %v11884_v48  ;;  %v3396_v31 = vld [vmem:[#allocation3 + $0x13] sm:$0x1]  ;;  %v3399_v5 = vrot.slane %v3397_v46, 7  ;;  %v9553_v46 = vld [vmem:[#allocation4 + $0x3c4] sm:$0xf0] }
 0x3cc   :  { %3291 = vmatpush.bf16.msrb.mxu2 %v7628_v1  ;;  %3302 = vmatpush.bf16.msrb.mxu1 %v7708_v9  ;;  %v9469_v1 = vld [vmem:[#allocation4 + $0x124] sm:$0xf0]  ;;  %v9442_v43 = vld [vmem:[#allocation4 + $0x54] sm:$0xf]  ;;  %v7549_v14 = vld [vmem:[#allocation4 + $0x18] sm:$0xf0] }
 0x3cd   :  { %v3401_v45 = vsel %vm2261_vm14, %v3396_v31, %v3399_v5  ;;  %v7507_v31 = vld [vmem:[#allocation4 + $0x3c0] sm:$0xf] }
 0x3ce   :  { %v2447_v57 = vpop.permute.xlu0 %2446 }
 0x3cf   :  { %v2458_v55 = vsel %vm1034_vm11, %v2410_v44, %v2447_v57  ;;  %2877 = vmatpush.bf16.msrb.mxu3 %v7460_v12  ;;  %v9453_v12 = vld [vmem:[#allocation4 + $0xa4] sm:$0xf0]  ;;  %v3425_v44 = vsel %vm2261_vm14, %v3420_v63, %v3423_v8  ;;  %v7684_v63 = vor.u32 %v9469_v1, %v7683_v28  ;;  %v7661_v8 = vld [vmem:[#allocation4 + $0xf8] sm:$0xf0]  ;;  %v7717_v28 = vld [vmem:[#allocation4 + $0x168] sm:$0xf0] }
 0x3d0   :  { %v2462_v62 = vpack.c.bf16 %v2458_v55, %v2458_v55  ;;  %v7620_v56 = vor.u32 %v9453_v12, %v7619_v37  ;;  %v9529_v57 = vld [vmem:[#allocation4 + $0x304] sm:$0xf0]  ;;  %v10431_v17 = vpack.i.bf16 %v3425_v44, %v3401_v45  ;;  %v11891_v55 = vpop.permute.xlu2 %10422  ;;  %3303 = vmatpush.bf16.msrb.mxu1 %v7700_v21  ;;  %v7664_v45 = vor.u32 %v9462_v38, %v7661_v8  ;;  %v2282_v37 = vld [vmem:[#allocation3 + $0x44] sm:$0x1]  ;;  %v2256_v12 = vld [vmem:[#allocation3] sm:$0x1] }
 0x3d1   :  { %v7412_v33 = vor.u32 %v9529_v57, %v7411_v54  ;;  %v10424_v39 = vunpack.i.l.bf16 %v11891_v55  ;;  %v9433_v54 = vld [vmem:[#allocation4 + $0x4] sm:$0xf0]  ;;  %v7675_v57 = vld [vmem:[#allocation4 + $0x110] sm:$0xf]  ;;  %v7629_v38 = vld [vmem:[#allocation4 + $0xb8] sm:$0xf0] }
 0x3d2   :  { %2923 = vmatmul.bf16.vlgmr.msra.gmra.mxu2 %v2462_v62  ;;  %10432 = vrot.lane.b32.xlu0 %v10431_v17, %s10673_s26  ;;  %v7540_v21 = vor.u32 %v9433_v54, %v7539_v26  ;;  %v9474_v8 = vld [vmem:[#allocation4 + $0x154] sm:$0xf]  ;;  %v7565_v26 = vld [vmem:[#allocation4 + $0x38] sm:$0xf0]  ;;  %v7701_v54 = vld [vmem:[#allocation4 + $0x148] sm:$0xf0] }
 0x3d3   :  { %2878 = vmatpush.bf16.msrb.mxu3 %v7452_v15  ;;  %v3385_v15 = vld [vmem:[#allocation3 + $0x51] sm:$0x1]  ;;  %3292 = vmatpush.bf16.msrb.mxu2 %v7620_v56  ;;  %v2322_v16 = vsel %vm1034_vm11, %v2274_v41, %v10424_v39  ;;  %v2257_v56 = vld [vmem:[#allocation3 + $0x40] sm:$0x1]  ;;  %v7645_v41 = vld [vmem:[#allocation4 + $0xd8] sm:$0xf0] }
 0x3d4   :  { %v3387_v58 = vrot.slane %v3385_v15, 7  ;;  %3304 = vmatpush.bf16.msrb.mxu1 %v7692_v47  ;;  %v2259_v40 = vrot.slane %v2257_v56, 7  ;;  %v9467_v15 = vld [vmem:[#allocation4 + $0x114] sm:$0xf0] }
 0x3d5   :  { %v7676_v13 = vor.u32 %v9467_v15, %v7675_v57 }
 0x3d6   :  { %v3389_v35 = vsel %vm2261_vm14, %v3384_v61, %v3387_v58  ;;  %v7653_v58 = vld [vmem:[#allocation4 + $0xe8] sm:$0xf0] }
 0x3d7   :  { %2879 = vmatpush.bf16.msrb.mxu3 %v7444_v50  ;;  %v9437_v50 = vld [vmem:[#allocation4 + $0x24] sm:$0xf0]  ;;  %3293 = vmatpush.bf16.msrb.mxu2 %v7612_v25  ;;  %v7656_v39 = vor.u32 %v9460_v7, %v7653_v58  ;;  %v7589_v61 = vld [vmem:[#allocation4 + $0x68] sm:$0xf0]  ;;  %v7491_v25 = vld [vmem:[#allocation4 + $0x3a0] sm:$0xf] }
 0x3d8   :  { %v7556_v6 = vor.u32 %v9437_v50, %v7555_v52  ;;  %v10428_v9 = vpop.permute.xlu2 %10427  ;;  %3305 = vmatpush.bf16.msrb.mxu1 %v7684_v63  ;;  %v9465_v50 = vld [vmem:[#allocation4 + $0x104] sm:$0xf0]  ;;  %v7592_v47 = vor.u32 %v9444_v49, %v7589_v61  ;;  %v7557_v58 = vld [vmem:[#allocation4 + $0x28] sm:$0xf0]  ;;  %v9556_v61 = vld [vmem:[#allocation4 + $0x3e4] sm:$0xf] }
 0x3d9   :  { %v10430_v44 = vunpack.i.h.bf16 %v10428_v9  ;;  %v10429_v0 = vunpack.i.l.bf16 %v10428_v9 }
 0x3da   :  { %2871 = vmatmul.bf16.vlgmr.msra.gmra.mxu3 %v2462_v62  ;;  %v9559_v62 = vld [vmem:[#allocation4 + $0x3f4] sm:$0xf0]  ;;  %3279 = vmatpush.bf16.msrb.mxu0 %v7556_v6 }
 0x3db   :  { %2880 = vmatpush.bf16.msrb.mxu3 %v7436_v32  ;;  %v7532_v18 = vor.u32 %v9559_v62, %v7531_v2  ;;  %v3408_v32 = vld [vmem:[#allocation3 + $0x15] sm:$0x1]  ;;  %v7508_v2 = vor.u32 %v9553_v46, %v7507_v31  ;;  %v2262_v62 = vsel %vm2261_vm14, %v2256_v12, %v2259_v40  ;;  %v9440_v31 = vld [vmem:[#allocation4 + $0x44] sm:$0xf]  ;;  %v7573_v46 = vld [vmem:[#allocation4 + $0x48] sm:$0xf0] }
 0x3dc   :  { %v3413_v36 = vsel %vm2261_vm14, %v3408_v32, %v3411_v42  ;;  %v2321_v29 = vsel %vm1034_vm11, %v2262_v62, %v10429_v0  ;;  %3306 = vmatpush.bf16.msrb.mxu1 %v7676_v13  ;;  %v7648_v32 = vor.u32 %v9458_v30, %v7645_v41  ;;  %v9549_v42 = vld [vmem:[#allocation4 + $0x3a4] sm:$0xf0]  ;;  %v2429_v12 = vld [vmem:[#allocation3 + $0xe] sm:$0x1]  ;;  %v9438_v0 = vld [vmem:[#allocation4 + $0x34] sm:$0xf] }
 0x3dd   :  { %v10436_v5 = vpack.i.bf16 %v3413_v36, %v3389_v35  ;;  %v11908_v6 = vpack.c.bf16 %v2321_v29, %v2321_v29  ;;  %v7500_v35 = vor.u32 %v9551_v4, %v7499_v59  ;;  %v9476_v36 = vld [vmem:[#allocation4 + $0x164] sm:$0xf]  ;;  %v7492_v63 = vor.u32 %v9549_v42, %v7491_v25  ;;  %v7475_v62 = vld [vmem:[#allocation4 + $0x380] sm:$0xf]  ;;  %v9545_v13 = vld [vmem:[#allocation4 + $0x384] sm:$0xf0] }
 0x3de   :  { %3280 = vmatpush.bf16.msrb.mxu0 %v7548_v19  ;;  %v2430_v19 = vld [vmem:[#allocation3 + $0x4e] sm:$0x1]  ;;  %v7720_v9 = vor.u32 %v9476_v36, %v7717_v28  ;;  %v9472_v40 = vld [vmem:[#allocation4 + $0x144] sm:$0xf]  ;;  %v7568_v7 = vor.u32 %v9438_v0, %v7565_v26  ;;  %v7476_v4 = vor.u32 %v9545_v13, %v7475_v62 }
 0x3df   :  { %2881 = vmatpush.bf16.msrb.mxu3 %v7428_v34  ;;  %v7604_v34 = vor.u32 %v9449_v22, %v7603_v60  ;;  %10437 = vrot.lane.b32.xlu1 %v10436_v5, %s10673_s26  ;;  %v7581_v60 = vld [vmem:[#allocation4 + $0x58] sm:$0xf0]  ;;  %v9456_v22 = vld [vmem:[#allocation4 + $0xc4] sm:$0xf]  ;;  %v9454_v5 = vld [vmem:[#allocation4 + $0xb4] sm:$0xf] }
 0x3e0   :  { %v7632_v56 = vor.u32 %v9454_v5, %v7629_v38  ;;  %v9436_v29 = vld [vmem:[#allocation4 + $0x24] sm:$0xf]  ;;  %v7525_v30 = vld [vmem:[#allocation4 + $0x3e8] sm:$0xf0] }
 0x3e1   :  { %3294 = vmatpush.bf16.msrb.mxu2 %v7604_v34  ;;  %v7584_v34 = vor.u32 %v9442_v43, %v7581_v60  ;;  %v7560_v41 = vor.u32 %v9436_v29, %v7557_v58  ;;  %v7685_v42 = vld [vmem:[#allocation4 + $0x128] sm:$0xf0]  ;;  %v7528_v60 = vor.u32 %v9556_v61, %v7525_v30  ;;  %v9432_v28 = vld [vmem:[#allocation4 + $0x4] sm:$0xf]  ;;  %v9591_v58 = vld [vmem:[#allocation4 + $0x4f4] sm:$0xf0] }
 0x3e2   :  { %3281 = vmatpush.bf16.msrb.mxu0 %v7540_v21  ;;  %v7621_v21 = vld [vmem:[#allocation4 + $0xa8] sm:$0xf0]  ;;  %v9552_v5 = vld [vmem:[#allocation4 + $0x3c4] sm:$0xf]  ;;  %v7771_v61 = vld [vmem:[#allocation4 + $0x1d0] sm:$0xf] }
 0x3e3   :  { %2882 = vmatpush.bf16.msrb.mxu3 %v7420_v3  ;;  %v2284_v3 = vrot.slane %v2282_v37, 7  ;;  %v2432_v37 = vrot.slane %v2430_v19, 7  ;;  %v7605_v43 = vld [vmem:[#allocation4 + $0x88] sm:$0xf0]  ;;  %v9548_v0 = vld [vmem:[#allocation4 + $0x3a4] sm:$0xf] }
 0x3e4   :  { %v9491_v30 = vld [vmem:[#allocation4 + $0x1d4] sm:$0xf0] }
 0x3e5   :  { %3339 = vmatpush.bf16.msra.mxu2 %v7664_v45  ;;  %v2286_v17 = vsel %vm2261_vm14, %v2281_v51, %v2284_v3  ;;  %3282 = vmatmul.bf16.vlgmr.msrb.gmra.mxu0 %v11908_v6  ;;  %v7483_v45 = vld [vmem:[#allocation4 + $0x390] sm:$0xf]  ;;  %v9547_v51 = vld [vmem:[#allocation4 + $0x394] sm:$0xf0]  ;;  %v7576_v3 = vor.u32 %v9440_v31, %v7573_v46  ;;  %v2434_v15 = vsel %vm2261_vm14, %v2429_v12, %v2432_v37  ;;  %v7677_v31 = vld [vmem:[#allocation4 + $0x118] sm:$0xf0] }
 0x3e6   :  { %v2323_v27 = vsel %vm1034_vm11, %v2286_v17, %v10430_v44  ;;  %v7484_v57 = vor.u32 %v9547_v51, %v7483_v45  ;;  %v9452_v17 = vld [vmem:[#allocation4 + $0xa4] sm:$0xf]  ;;  %v7669_v45 = vld [vmem:[#allocation4 + $0x108] sm:$0xf0]  ;;  %v9550_v37 = vld [vmem:[#allocation4 + $0x3b4] sm:$0xf] }
 0x3e7   :  { %2883 = vmatpush.bf16.msrb.mxu3 %v7412_v33  ;;  %v7597_v33 = vld [vmem:[#allocation4 + $0x78] sm:$0xf0] }
 0x3e8   :  { %v7600_v52 = vor.u32 %v9446_v20, %v7597_v33  ;;  %v9558_v20 = vld [vmem:[#allocation4 + $0x3f4] sm:$0xf]  ;;  %v7533_v33 = vld [vmem:[#allocation4 + $0x3f8] sm:$0xf0] }
 0x3e9   :  { %3340 = vmatpush.bf16.msra.mxu2 %v7656_v39  ;;  %v9450_v39 = vld [vmem:[#allocation4 + $0x94] sm:$0xf]  ;;  %v7536_v49 = vor.u32 %v9558_v20, %v7533_v33  ;;  %v7501_v12 = vld [vmem:[#allocation4 + $0x3b8] sm:$0xf0]  ;;  %v9495_v20 = vld [vmem:[#allocation4 + $0x1f4] sm:$0xf0] }
 0x3ea   :  { %2884 = vmatmul.bf16.vlgmr.msrb.gmra.mxu3 %v11884_v48  ;;  %v11901_v48 = vpack.c.bf16 %v2322_v16, %v2322_v16  ;;  %3326 = vmatpush.bf16.msra.mxu0 %v7600_v52  ;;  %v7637_v16 = vld [vmem:[#allocation4 + $0xc8] sm:$0xf0]  ;;  %v7624_v52 = vor.u32 %v9452_v17, %v7621_v21  ;;  %v9544_v17 = vld [vmem:[#allocation4 + $0x384] sm:$0xf]  ;;  %v3972_v21 = vld [vmem:[#allocation3 + $0x5d] sm:$0x1] }
 0x3eb   :  { %2889 = vmatpush.bf16.msra.mxu3 %v7532_v18  ;;  %v7667_v18 = vld [vmem:[#allocation4 + $0x100] sm:$0xf]  ;;  %v7640_v1 = vor.u32 %v9456_v22, %v7637_v16  ;;  %v9554_v22 = vld [vmem:[#allocation4 + $0x3d4] sm:$0xf]  ;;  %v7517_v16 = vld [vmem:[#allocation4 + $0x3d8] sm:$0xf0] }
 0x3ec   :  { %3295 = vmatmul.bf16.vlgmr.msrb.gmra.mxu2 %v11901_v48  ;;  %v7668_v23 = vor.u32 %v9465_v50, %v7667_v18  ;;  %v9470_v18 = vld [vmem:[#allocation4 + $0x134] sm:$0xf]  ;;  %v7693_v50 = vld [vmem:[#allocation4 + $0x138] sm:$0xf0]  ;;  %v7520_v46 = vor.u32 %v9554_v22, %v7517_v16  ;;  %v3974_v13 = vrot.slane %v3972_v21, 7 }
 0x3ed   :  { %3341 = vmatpush.bf16.msra.mxu2 %v7648_v32  ;;  %v7696_v25 = vor.u32 %v9470_v18, %v7693_v50  ;;  %v3971_v33 = vld [vmem:[#allocation3 + $0x1d] sm:$0x1]  ;;  %v7763_v22 = vld [vmem:[#allocation4 + $0x1c0] sm:$0xf]  ;;  %v9489_v16 = vld [vmem:[#allocation4 + $0x1c4] sm:$0xf0] }
 0x3ee   :  { %3307 = vmatpush.bf16.msrb.mxu1 %v7668_v23  ;;  %3327 = vmatpush.bf16.msra.mxu0 %v7592_v47  ;;  %v7613_v23 = vld [vmem:[#allocation4 + $0x98] sm:$0xf0]  ;;  %v9434_v47 = vld [vmem:[#allocation4 + $0x14] sm:$0xf] }
 0x3ef   :  { %2890 = vmatpush.bf16.msra.mxu3 %v7524_v10  ;;  %v11911_v10 = vpack.c.bf16 %v2323_v27, %v2323_v27  ;;  %v7704_v27 = vor.u32 %v9472_v40, %v7701_v54  ;;  %v7616_v11 = vor.u32 %v9450_v39, %v7613_v23  ;;  %v7552_v36 = vor.u32 %v9434_v47, %v7549_v14  ;;  %v9546_v40 = vld [vmem:[#allocation4 + $0x394] sm:$0xf]  ;;  %v7485_v54 = vld [vmem:[#allocation4 + $0x398] sm:$0xf0]  ;;  %v7907_v39 = vld [vmem:[#allocation4 + $0x4e0] sm:$0xf] }
 0x3f0   :  { %v9589_v23 = vld [vmem:[#allocation4 + $0x4e4] sm:$0xf0]  ;;  %v9575_v47 = vld [vmem:[#allocation4 + $0x474] sm:$0xf0]  ;;  %v3983_v21 = vld [vmem:[#allocation3 + $0x1f] sm:$0x1] }
 0x3f1   :  { %3308 = vmatmul.bf16.vlgmr.msrb.gmra.mxu1 %v11911_v10  ;;  %3342 = vmatpush.bf16.msra.mxu2 %v7640_v1  ;;  %v7541_v1 = vld [vmem:[#allocation4 + $0x8] sm:$0xf0] }
 0x3f2   :  { %3352 = vmatpush.bf16.msra.mxu1 %v7728_v53  ;;  %3328 = vmatpush.bf16.msra.mxu0 %v7584_v34  ;;  %v9448_v53 = vld [vmem:[#allocation4 + $0x84] sm:$0xf]  ;;  %v7544_v38 = vor.u32 %v9432_v28, %v7541_v1  ;;  %v7971_v28 = vld [vmem:[#allocation4 + $0x560] sm:$0xf] }
 0x3f3   :  { %2891 = vmatpush.bf16.msra.mxu3 %v7516_v24  ;;  %v7709_v24 = vld [vmem:[#allocation4 + $0x158] sm:$0xf0]  ;;  %v7608_v34 = vor.u32 %v9448_v53, %v7605_v43  ;;  %v7899_v53 = vld [vmem:[#allocation4 + $0x4d0] sm:$0xf]  ;;  %v9587_v43 = vld [vmem:[#allocation4 + $0x4d4] sm:$0xf0] }
 0x3f4   :  { %v7712_v44 = vor.u32 %v9474_v8, %v7709_v24  ;;  %v9464_v24 = vld [vmem:[#allocation4 + $0x104] sm:$0xf] }
 0x3f5   :  { %3343 = vmatpush.bf16.msra.mxu2 %v7632_v56  ;;  %v7493_v56 = vld [vmem:[#allocation4 + $0x3a8] sm:$0xf0] }
 0x3f6   :  { %3353 = vmatpush.bf16.msra.mxu1 %v7720_v9  ;;  %3329 = vmatpush.bf16.msra.mxu0 %v7576_v3  ;;  %v9466_v9 = vld [vmem:[#allocation4 + $0x114] sm:$0xf]  ;;  %v7672_v3 = vor.u32 %v9464_v24, %v7669_v45  ;;  %v7496_v26 = vor.u32 %v9548_v0, %v7493_v56  ;;  %v7835_v24 = vld [vmem:[#allocation4 + $0x450] sm:$0xf]  ;;  %v9571_v45 = vld [vmem:[#allocation4 + $0x454] sm:$0xf0] }
 0x3f7   :  { %2892 = vmatpush.bf16.msra.mxu3 %v7508_v2  ;;  %v2455_v2 = vpop.permute.xlu1 %2454  ;;  %v7680_v8 = vor.u32 %v9466_v9, %v7677_v31  ;;  %v9605_v9 = vld [vmem:[#allocation4 + $0x564] sm:$0xf0]  ;;  %v7891_v31 = vld [vmem:[#allocation4 + $0x4c0] sm:$0xf] }
 0x3f8   :  { %v2460_v59 = vsel %vm1034_vm11, %v2434_v15, %v2455_v2  ;;  %v7477_v15 = vld [vmem:[#allocation4 + $0x388] sm:$0xf0]  ;;  %v7787_v2 = vld [vmem:[#allocation4 + $0x1f0] sm:$0xf]  ;;  %v9485_v0 = vld [vmem:[#allocation4 + $0x1a4] sm:$0xf0] }
 0x3f9   :  { %v11916_v32 = vpack.c.bf16 %v2460_v59, %v2460_v59  ;;  %3344 = vmatpush.bf16.msra.mxu2 %v7624_v52  ;;  %v7480_v29 = vor.u32 %v9544_v17, %v7477_v15  ;;  %v7788_v18 = vor.u32 %v9495_v20, %v7787_v2  ;;  %v7779_v59 = vld [vmem:[#allocation4 + $0x1e0] sm:$0xf]  ;;  %v3984_v15 = vld [vmem:[#allocation3 + $0x5f] sm:$0x1]  ;;  %v9569_v20 = vld [vmem:[#allocation4 + $0x444] sm:$0xf0] }
 0x3fa   :  { %3354 = vmatpush.bf16.msra.mxu1 %v7712_v44  ;;  %3330 = vmatpush.bf16.msra.mxu0 %v7568_v7  ;;  %v7504_v44 = vor.u32 %v9550_v37, %v7501_v12  ;;  %v7836_v37 = vor.u32 %v9571_v45, %v7835_v24  ;;  %v9603_v12 = vld [vmem:[#allocation4 + $0x554] sm:$0xf0]  ;;  %v7917_v24 = vld [vmem:[#allocation4 + $0x4f8] sm:$0xf0] }
 0x3fb   :  { %2893 = vmatpush.bf16.msra.mxu3 %v7500_v35  ;;  %v9468_v35 = vld [vmem:[#allocation4 + $0x124] sm:$0xf] }
 0x3fc   :  { %v7688_v19 = vor.u32 %v9468_v35, %v7685_v42  ;;  %v9607_v35 = vld [vmem:[#allocation4 + $0x574] sm:$0xf0] }
 0x3fd   :  { %3345 = vmatpush.bf16.msra.mxu2 %v7616_v11  ;;  %v7979_v11 = vld [vmem:[#allocation4 + $0x570] sm:$0xf] }
 0x3fe   :  { %3355 = vmatpush.bf16.msra.mxu1 %v7704_v27  ;;  %3331 = vmatpush.bf16.msra.mxu0 %v7560_v41  ;;  %v3976_v27 = vsel %vm2261_vm14, %v3971_v33, %v3974_v13  ;;  %v7908_v41 = vor.u32 %v9589_v23, %v7907_v39  ;;  %v7980_v42 = vor.u32 %v9607_v35, %v7979_v11  ;;  %v7827_v13 = vld [vmem:[#allocation4 + $0x440] sm:$0xf]  ;;  %v9579_v35 = vld [vmem:[#allocation4 + $0x494] sm:$0xf0] }
 0x3ff   :  { %2894 = vmatpush.bf16.msra.mxu3 %v7492_v63  ;;  %v7509_v63 = vld [vmem:[#allocation4 + $0x3c8] sm:$0xf0]  ;;  %v7955_v33 = vld [vmem:[#allocation4 + $0x540] sm:$0xf] }
 0x400   :  { %v7512_v51 = vor.u32 %v9552_v5, %v7509_v63  ;;  %v7764_v5 = vor.u32 %v9489_v16, %v7763_v22  ;;  %v7755_v63 = vld [vmem:[#allocation4 + $0x1b0] sm:$0xf] }
 0x401   :  { %3346 = vmatpush.bf16.msra.mxu2 %v7608_v34  ;;  %v9573_v34 = vld [vmem:[#allocation4 + $0x464] sm:$0xf0] }
 0x402   :  { %3356 = vmatpush.bf16.msra.mxu1 %v7696_v25  ;;  %3332 = vmatpush.bf16.msra.mxu0 %v7552_v36  ;;  %v7851_v25 = vld [vmem:[#allocation4 + $0x470] sm:$0xf]  ;;  %v7900_v36 = vor.u32 %v9587_v43, %v7899_v53  ;;  %v7731_v43 = vld [vmem:[#allocation4 + $0x180] sm:$0xf] }
 0x403   :  { %2895 = vmatpush.bf16.msra.mxu3 %v7484_v57  ;;  %v7488_v57 = vor.u32 %v9546_v40, %v7485_v54  ;;  %v7852_v14 = vor.u32 %v9575_v47, %v7851_v25  ;;  %v9583_v40 = vld [vmem:[#allocation4 + $0x4b4] sm:$0xf0] }
 0x404   :  { %3347 = vmatmul.bf16.vlgmr.msra.gmra.mxu2 %v11901_v48  ;;  %v3948_v48 = vld [vmem:[#allocation3 + $0x59] sm:$0x1]  ;;  %v3959_v54 = vld [vmem:[#allocation3 + $0x1b] sm:$0x1] }
 0x405   :  { %v3950_v62 = vrot.slane %v3948_v48, 7  ;;  %v3960_v48 = vld [vmem:[#allocation3 + $0x5b] sm:$0x1] }
 0x406   :  { %3357 = vmatpush.bf16.msra.mxu1 %v7688_v19  ;;  %3333 = vmatpush.bf16.msra.mxu0 %v7544_v38  ;;  %v7843_v19 = vld [vmem:[#allocation4 + $0x460] sm:$0xf]  ;;  %v9487_v38 = vld [vmem:[#allocation4 + $0x1b4] sm:$0xf0]  ;;  %v3962_v2 = vrot.slane %v3960_v48, 7 }
 0x407   :  { %2896 = vmatpush.bf16.msra.mxu3 %v7476_v4  ;;  %v9493_v4 = vld [vmem:[#allocation4 + $0x1e4] sm:$0xf0]  ;;  %v7844_v1 = vor.u32 %v9573_v34, %v7843_v19  ;;  %v9599_v47 = vld [vmem:[#allocation4 + $0x534] sm:$0xf0]  ;;  %v7939_v34 = vld [vmem:[#allocation4 + $0x520] sm:$0xf] }
 0x408   :  { %v9565_v19 = vld [vmem:[#allocation4 + $0x424] sm:$0xf0]  ;;  %v9588_v48 = vld [vmem:[#allocation4 + $0x4e4] sm:$0xf] }
 0x409   :  { %3334 = vmatmul.bf16.vlgmr.msra.gmra.mxu0 %v11908_v6  ;;  %v3947_v6 = vld [vmem:[#allocation3 + $0x19] sm:$0x1] }
 0x40a   :  { %2897 = vmatmul.bf16.vlgmr.msra.gmra.mxu3 %v11916_v32  ;;  %3358 = vmatpush.bf16.msra.mxu1 %v7680_v8  ;;  %v3952_v7 = vsel %vm2261_vm14, %v3947_v6, %v3950_v62  ;;  %v3986_v62 = vrot.slane %v3984_v15, 7  ;;  %v7828_v6 = vor.u32 %v9569_v20, %v7827_v13  ;;  %v9561_v13 = vld [vmem:[#allocation4 + $0x404] sm:$0xf0]  ;;  %v7923_v20 = vld [vmem:[#allocation4 + $0x500] sm:$0xf] }
 0x40b   :  { %2941 = vmatpush.bf16.msrb.mxu3 %v7536_v49  ;;  %v10446_v52 = vpack.i.bf16 %v3976_v27, %v3952_v7  ;;  %v7780_v49 = vor.u32 %v9493_v4, %v7779_v59  ;;  %3835 = vmatpush.bf16.msrb.mxu0 %v7852_v14  ;;  %v9601_v7 = vld [vmem:[#allocation4 + $0x544] sm:$0xf0]  ;;  %v3964_v27 = vsel %vm2261_vm14, %v3959_v54, %v3962_v2  ;;  %v7739_v59 = vld [vmem:[#allocation4 + $0x190] sm:$0xf]  ;;  %v9483_v4 = vld [vmem:[#allocation4 + $0x194] sm:$0xf0] }
 0x40c   :  { %v7867_v14 = vld [vmem:[#allocation4 + $0x490] sm:$0xf]  ;;  %v7740_v53 = vor.u32 %v9483_v4, %v7739_v59  ;;  %v7901_v59 = vld [vmem:[#allocation4 + $0x4d8] sm:$0xf0] }
 0x40d   :  { %10447 = vrot.lane.b32.xlu0 %v10446_v52, %s10673_s26  ;;  %v7956_v52 = vor.u32 %v9601_v7, %v7955_v33  ;;  %v7868_v22 = vor.u32 %v9579_v35, %v7867_v14  ;;  %v9593_v33 = vld [vmem:[#allocation4 + $0x504] sm:$0xf0]  ;;  %v9574_v7 = vld [vmem:[#allocation4 + $0x474] sm:$0xf]  ;;  %v9584_v14 = vld [vmem:[#allocation4 + $0x4c4] sm:$0xf] }
 0x40e   :  { %3359 = vmatpush.bf16.msra.mxu1 %v7672_v3  ;;  %v2294_v3 = vld [vmem:[#allocation3 + $0x46] sm:$0x1]  ;;  %v7893_v35 = vld [vmem:[#allocation4 + $0x4c8] sm:$0xf0] }
 0x40f   :  { %2942 = vmatpush.bf16.msrb.mxu3 %v7528_v60  ;;  %v7772_v60 = vor.u32 %v9491_v30, %v7771_v61  ;;  %3836 = vmatpush.bf16.msrb.mxu0 %v7844_v1  ;;  %v9567_v61 = vld [vmem:[#allocation4 + $0x434] sm:$0xf0]  ;;  %v7947_v30 = vld [vmem:[#allocation4 + $0x530] sm:$0xf]  ;;  %v7789_v1 = vld [vmem:[#allocation4 + $0x1f8] sm:$0xf0] }
 0x410   :  { %v7948_v11 = vor.u32 %v9599_v47, %v7947_v30  ;;  %v7845_v30 = vld [vmem:[#allocation4 + $0x468] sm:$0xf0] }
 0x411   :  { %3360 = vmatmul.bf16.vlgmr.msra.gmra.mxu1 %v11911_v10  ;;  %v7915_v10 = vld [vmem:[#allocation4 + $0x4f0] sm:$0xf]  ;;  %v7973_v47 = vld [vmem:[#allocation4 + $0x568] sm:$0xf0] }
 0x412   :  { %v7916_v50 = vor.u32 %v9591_v58, %v7915_v10  ;;  %3861 = vmatpush.bf16.msrb.mxu1 %v7980_v42  ;;  %v7875_v10 = vld [vmem:[#allocation4 + $0x4a0] sm:$0xf]  ;;  %v9581_v58 = vld [vmem:[#allocation4 + $0x4a4] sm:$0xf0]  ;;  %v10425_v42 = vunpack.i.h.bf16 %v11891_v55 }
 0x413   :  { %2943 = vmatpush.bf16.msrb.mxu3 %v7520_v46  ;;  %v9585_v46 = vld [vmem:[#allocation4 + $0x4c4] sm:$0xf0]  ;;  %3837 = vmatpush.bf16.msrb.mxu0 %v7836_v37  ;;  %v7876_v23 = vor.u32 %v9581_v58, %v7875_v10  ;;  %v7803_v37 = vld [vmem:[#allocation4 + $0x410] sm:$0xf]  ;;  %v9606_v10 = vld [vmem:[#allocation4 + $0x574] sm:$0xf] }
 0x414   :  { %3848 = vmatpush.bf16.msrb.mxu2 %v7916_v50  ;;  %v7892_v8 = vor.u32 %v9585_v46, %v7891_v31  ;;  %v7859_v46 = vld [vmem:[#allocation4 + $0x480] sm:$0xf]  ;;  %v9577_v55 = vld [vmem:[#allocation4 + $0x484] sm:$0xf0]  ;;  %v7981_v58 = vld [vmem:[#allocation4 + $0x578] sm:$0xf0] }
 0x417   :  { %2944 = vmatpush.bf16.msrb.mxu3 %v7512_v51  ;;  %v7963_v51 = vld [vmem:[#allocation4 + $0x550] sm:$0xf]  ;;  %3838 = vmatpush.bf16.msrb.mxu0 %v7828_v6 }
 0x418   :  { %3849 = vmatpush.bf16.msrb.mxu2 %v7908_v41  ;;  %v7964_v56 = vor.u32 %v9603_v12, %v7963_v51  ;;  %v2293_v41 = vld [vmem:[#allocation3 + $0x6] sm:$0x1]  ;;  %v9563_v12 = vld [vmem:[#allocation4 + $0x414] sm:$0xf0] }
 0x41b   :  { %2945 = vmatpush.bf16.msrb.mxu3 %v7504_v44  ;;  %v7747_v44 = vld [vmem:[#allocation4 + $0x1a0] sm:$0xf] }
 0x41c   :  { %3850 = vmatpush.bf16.msrb.mxu2 %v7900_v36  ;;  %v7748_v50 = vor.u32 %v9485_v0, %v7747_v44  ;;  %v7811_v36 = vld [vmem:[#allocation4 + $0x420] sm:$0xf]  ;;  %v9492_v44 = vld [vmem:[#allocation4 + $0x1e4] sm:$0xf]  ;;  %v7781_v0 = vld [vmem:[#allocation4 + $0x1e8] sm:$0xf0] }
 0x41d   :  { %v7784_v15 = vor.u32 %v9492_v44, %v7781_v0  ;;  %v7877_v44 = vld [vmem:[#allocation4 + $0x4a8] sm:$0xf0]  ;;  %v4523_v0 = vld [vmem:[#allocation3 + $0x63] sm:$0x1] }
 0x41f   :  { %2946 = vmatpush.bf16.msrb.mxu3 %v7496_v26  ;;  %v7883_v26 = vld [vmem:[#allocation4 + $0x4b0] sm:$0xf] }
 0x420   :  { %3851 = vmatpush.bf16.msrb.mxu2 %v7892_v8  ;;  %v7884_v17 = vor.u32 %v9583_v40, %v7883_v26  ;;  %v9590_v8 = vld [vmem:[#allocation4 + $0x4f4] sm:$0xf]  ;;  %v9595_v26 = vld [vmem:[#allocation4 + $0x514] sm:$0xf0] }
 0x421   :  { %v7920_v51 = vor.u32 %v9590_v8, %v7917_v24  ;;  %v7829_v8 = vld [vmem:[#allocation4 + $0x448] sm:$0xf0]  ;;  %v9600_v24 = vld [vmem:[#allocation4 + $0x544] sm:$0xf] }
 0x423   :  { %2947 = vmatpush.bf16.msrb.mxu3 %v7488_v57  ;;  %v7756_v57 = vor.u32 %v9487_v38, %v7755_v63  ;;  %v7860_v38 = vor.u32 %v9577_v55, %v7859_v46  ;;  %v9484_v55 = vld [vmem:[#allocation4 + $0x1a4] sm:$0xf] }
 0x424   :  { %3852 = vmatpush.bf16.msrb.mxu2 %v7884_v17  ;;  %v7773_v17 = vld [vmem:[#allocation4 + $0x1d8] sm:$0xf0] }
 0x427   :  { %2948 = vmatpush.bf16.msrb.mxu3 %v7480_v29  ;;  %v3988_v29 = vsel %vm2261_vm14, %v3983_v21, %v3986_v62  ;;  %v7909_v21 = vld [vmem:[#allocation4 + $0x4e8] sm:$0xf0]  ;;  %v7795_v62 = vld [vmem:[#allocation4 + $0x400] sm:$0xf] }
 0x428   :  { %v10441_v39 = vpack.i.bf16 %v3988_v29, %v3964_v27  ;;  %3853 = vmatpush.bf16.msrb.mxu2 %v7876_v23  ;;  %v7912_v2 = vor.u32 %v9588_v48, %v7909_v21  ;;  %v7796_v6 = vor.u32 %v9561_v13, %v7795_v62  ;;  %v7853_v27 = vld [vmem:[#allocation4 + $0x478] sm:$0xf0]  ;;  %v7924_v29 = vor.u32 %v9593_v33, %v7923_v20  ;;  %v7765_v23 = vld [vmem:[#allocation4 + $0x1c8] sm:$0xf0]  ;;  %v3390_v62 = vld [vmem:[#allocation3 + $0x12] sm:$0x1] }
 0x429   :  { %v4525_v48 = vrot.slane %v4523_v0, 7  ;;  %v7741_v21 = vld [vmem:[#allocation4 + $0x198] sm:$0xf0]  ;;  %v4547_v20 = vld [vmem:[#allocation3 + $0x67] sm:$0x1] }
 0x42a   :  { %2949 = vmatmul.bf16.vlgmr.msrb.gmra.mxu3 %v11916_v32  ;;  %v7972_v32 = vor.u32 %v9605_v9, %v7971_v28  ;;  %10442 = vrot.lane.b32.xlu2 %v10441_v39, %s10673_s26  ;;  %v9494_v28 = vld [vmem:[#allocation4 + $0x1f4] sm:$0xf]  ;;  %v7812_v9 = vor.u32 %v9565_v19, %v7811_v36  ;;  %v9488_v39 = vld [vmem:[#allocation4 + $0x1c4] sm:$0xf]  ;;  %v7837_v36 = vld [vmem:[#allocation4 + $0x458] sm:$0xf0] }
 0x42b   :  { %3313 = vmatpush.bf16.msra.mxu3 %v7788_v18  ;;  %v2296_v18 = vrot.slane %v2294_v3, 7  ;;  %v7792_v45 = vor.u32 %v9494_v28, %v7789_v1  ;;  %v7931_v3 = vld [vmem:[#allocation4 + $0x510] sm:$0xf]  ;;  %v9602_v19 = vld [vmem:[#allocation4 + $0x554] sm:$0xf] }
 0x42c   :  { %3862 = vmatpush.bf16.msrb.mxu1 %v7972_v32  ;;  %3854 = vmatpush.bf16.msrb.mxu2 %v7868_v22  ;;  %v9597_v32 = vld [vmem:[#allocation4 + $0x524] sm:$0xf0]  ;;  %v7932_v54 = vor.u32 %v9595_v26, %v7931_v3  ;;  %v7896_v22 = vor.u32 %v9584_v14, %v7893_v35  ;;  %v7965_v1 = vld [vmem:[#allocation4 + $0x558] sm:$0xf0]  ;;  %v9580_v3 = vld [vmem:[#allocation4 + $0x4a4] sm:$0xf] }
 0x42d   :  { %v2298_v16 = vsel %vm2261_vm14, %v2293_v41, %v2296_v18  ;;  %v7940_v31 = vor.u32 %v9597_v32, %v7939_v34  ;;  %v7984_v18 = vor.u32 %v9606_v10, %v7981_v58  ;;  %v9604_v41 = vld [vmem:[#allocation4 + $0x564] sm:$0xf]  ;;  %v9582_v32 = vld [vmem:[#allocation4 + $0x4b4] sm:$0xf] }
 0x42e   :  { %v9480_v10 = vld [vmem:[#allocation4 + $0x184] sm:$0xf] }
 0x42f   :  { %3314 = vmatpush.bf16.msra.mxu3 %v7780_v49  ;;  %v7819_v49 = vld [vmem:[#allocation4 + $0x430] sm:$0xf] }
 0x430   :  { %3863 = vmatpush.bf16.msrb.mxu1 %v7964_v56  ;;  %v7820_v25 = vor.u32 %v9567_v61, %v7819_v49  ;;  %3855 = vmatpush.bf16.msrb.mxu2 %v7860_v38  ;;  %v7804_v56 = vor.u32 %v9563_v12, %v7803_v37  ;;  %v9572_v61 = vld [vmem:[#allocation4 + $0x464] sm:$0xf]  ;;  %v7957_v37 = vld [vmem:[#allocation4 + $0x548] sm:$0xf0] }
 0x431   :  { %v9568_v38 = vld [vmem:[#allocation4 + $0x444] sm:$0xf]  ;;  %v7960_v12 = vor.u32 %v9600_v24, %v7957_v37  ;;  %v7861_v37 = vld [vmem:[#allocation4 + $0x488] sm:$0xf0] }
 0x432   :  { %3839 = vmatpush.bf16.msrb.mxu0 %v7820_v25  ;;  %v7848_v25 = vor.u32 %v9572_v61, %v7845_v30  ;;  %v9578_v61 = vld [vmem:[#allocation4 + $0x494] sm:$0xf]  ;;  %v7869_v30 = vld [vmem:[#allocation4 + $0x498] sm:$0xf0] }
 0x433   :  { %3315 = vmatpush.bf16.msra.mxu3 %v7772_v60  ;;  %v9481_v60 = vld [vmem:[#allocation4 + $0x184] sm:$0xf0] }
 0x434   :  { %3864 = vmatpush.bf16.msrb.mxu1 %v7956_v52  ;;  %v7732_v63 = vor.u32 %v9481_v60, %v7731_v43  ;;  %3900 = vmatpush.bf16.msra.mxu2 %v7920_v51  ;;  %v7856_v52 = vor.u32 %v9574_v7, %v7853_v27  ;;  %v9486_v43 = vld [vmem:[#allocation4 + $0x1b4] sm:$0xf]  ;;  %v7757_v60 = vld [vmem:[#allocation4 + $0x1b8] sm:$0xf0]  ;;  %v7832_v51 = vor.u32 %v9568_v38, %v7829_v8  ;;  %v4549_v7 = vrot.slane %v4547_v20, 7 }
 0x435   :  { %v7760_v46 = vor.u32 %v9486_v43, %v7757_v60  ;;  %v9566_v27 = vld [vmem:[#allocation4 + $0x434] sm:$0xf]  ;;  %v7872_v43 = vor.u32 %v9578_v61, %v7869_v30  ;;  %v3379_v60 = vld [vmem:[#allocation3 + $0x50] sm:$0x1]  ;;  %v9639_v61 = vld [vmem:[#allocation4 + $0x674] sm:$0xf0] }
 0x436   :  { %3840 = vmatpush.bf16.msrb.mxu0 %v7812_v9  ;;  %v7968_v9 = vor.u32 %v9602_v19, %v7965_v1  ;;  %v7813_v1 = vld [vmem:[#allocation4 + $0x428] sm:$0xf0]  ;;  %v3402_v38 = vld [vmem:[#allocation3 + $0x14] sm:$0x1] }
 0x437   :  { %3316 = vmatpush.bf16.msra.mxu3 %v7764_v5  ;;  %v2324_v5 = vsel %vm1034_vm11, %v2298_v16, %v10425_v42  ;;  %v9570_v16 = vld [vmem:[#allocation4 + $0x454] sm:$0xf] }
 0x438   :  { %3865 = vmatpush.bf16.msrb.mxu1 %v7948_v11  ;;  %v11932_v40 = vpack.c.bf16 %v2324_v5, %v2324_v5  ;;  %3901 = vmatpush.bf16.msra.mxu2 %v7912_v2  ;;  %v7976_v11 = vor.u32 %v9604_v41, %v7973_v47  ;;  %v7840_v28 = vor.u32 %v9570_v16, %v7837_v36  ;;  %v7749_v5 = vld [vmem:[#allocation4 + $0x1a8] sm:$0xf0]  ;;  %v4546_v2 = vld [vmem:[#allocation3 + $0x27] sm:$0x1]  ;;  %v8043_v47 = vld [vmem:[#allocation4 + $0x5f0] sm:$0xf] }
 0x439   :  { %v7752_v26 = vor.u32 %v9484_v55, %v7749_v5  ;;  %v8035_v36 = vld [vmem:[#allocation4 + $0x5e0] sm:$0xf]  ;;  %v3378_v55 = vld [vmem:[#allocation3 + $0x10] sm:$0x1]  ;;  %v7941_v5 = vld [vmem:[#allocation4 + $0x528] sm:$0xf0] }
 0x43a   :  { %3841 = vmatpush.bf16.msrb.mxu0 %v7804_v56 }
 0x43b   :  { %3317 = vmatpush.bf16.msra.mxu3 %v7756_v57  ;;  %v9490_v57 = vld [vmem:[#allocation4 + $0x1d4] sm:$0xf] }
 0x43c   :  { %3866 = vmatpush.bf16.msrb.mxu1 %v7940_v31  ;;  %v7776_v4 = vor.u32 %v9490_v57, %v7773_v17  ;;  %v7885_v31 = vld [vmem:[#allocation4 + $0x4b8] sm:$0xf0]  ;;  %v7880_v57 = vor.u32 %v9580_v3, %v7877_v44  ;;  %v4522_v17 = vld [vmem:[#allocation3 + $0x23] sm:$0x1]  ;;  %v8171_v44 = vld [vmem:[#allocation4 + $0x6f0] sm:$0xf] }
 0x43d   :  { %v4527_v33 = vsel %vm2261_vm14, %v4522_v17, %v4525_v48  ;;  %v8027_v17 = vld [vmem:[#allocation4 + $0x5d0] sm:$0xf]  ;;  %v9619_v48 = vld [vmem:[#allocation4 + $0x5d4] sm:$0xf0] }
 0x43e   :  { %3842 = vmatpush.bf16.msrb.mxu0 %v7796_v6  ;;  %v8028_v30 = vor.u32 %v9619_v48, %v8027_v17 }
 0x43f   :  { %3318 = vmatpush.bf16.msra.mxu3 %v7748_v50  ;;  %v9586_v50 = vld [vmem:[#allocation4 + $0x4d4] sm:$0xf] }
 0x440   :  { %3867 = vmatpush.bf16.msrb.mxu1 %v7932_v54  ;;  %v7904_v49 = vor.u32 %v9586_v50, %v7901_v59  ;;  %v9482_v54 = vld [vmem:[#allocation4 + $0x194] sm:$0xf]  ;;  %v7949_v50 = vld [vmem:[#allocation4 + $0x538] sm:$0xf0]  ;;  %v7733_v59 = vld [vmem:[#allocation4 + $0x188] sm:$0xf0] }
 0x441   :  { %v7736_v16 = vor.u32 %v9480_v10, %v7733_v59 }
 0x442   :  { %3887 = vmatpush.bf16.msra.mxu0 %v7856_v52  ;;  %3902 = vmatpush.bf16.msra.mxu2 %v7904_v49  ;;  %v7744_v52 = vor.u32 %v9482_v54, %v7741_v21  ;;  %v9594_v54 = vld [vmem:[#allocation4 + $0x514] sm:$0xf] }
 0x443   :  { %3319 = vmatpush.bf16.msra.mxu3 %v7740_v53  ;;  %v7768_v53 = vor.u32 %v9488_v39, %v7765_v23  ;;  %v4551_v23 = vsel %vm2261_vm14, %v4546_v2, %v4549_v7  ;;  %v9560_v7 = vld [vmem:[#allocation4 + $0x404] sm:$0xf] }
 0x444   :  { %3868 = vmatpush.bf16.msrb.mxu1 %v7924_v29  ;;  %v7821_v29 = vld [vmem:[#allocation4 + $0x438] sm:$0xf0]  ;;  %v11943_v39 = vpop.permute.xlu0 %10432  ;;  %v10451_v35 = vpack.i.bf16 %v4551_v23, %v4527_v33  ;;  %v9653_v33 = vld [vmem:[#allocation4 + $0x6e4] sm:$0xf0]  ;;  %v7925_v23 = vld [vmem:[#allocation4 + $0x508] sm:$0xf0] }
 0x445   :  { %v7824_v58 = vor.u32 %v9566_v27, %v7821_v29  ;;  %v10434_v14 = vunpack.i.l.bf16 %v11943_v39 }
 0x446   :  { %3888 = vmatpush.bf16.msra.mxu0 %v7848_v25  ;;  %3903 = vmatpush.bf16.msra.mxu2 %v7896_v22  ;;  %v9564_v22 = vld [vmem:[#allocation4 + $0x424] sm:$0xf] }
 0x447   :  { %3320 = vmatpush.bf16.msra.mxu3 %v7732_v63  ;;  %v11935_v42 = vpop.f32.mrf.mxu0  ;;  %v7888_v63 = vor.u32 %v9582_v32, %v7885_v31  ;;  %10452 = vrot.lane.b32.xlu1 %v10451_v35, %s10673_s26  ;;  %v7816_v8 = vor.u32 %v9564_v22, %v7813_v1  ;;  %v8155_v35 = vld [vmem:[#allocation4 + $0x6d0] sm:$0xf]  ;;  %v8147_v1 = vld [vmem:[#allocation4 + $0x6c0] sm:$0xf] }
 0x448   :  { %3913 = vmatpush.bf16.msra.mxu1 %v7984_v18  ;;  %v11937_v34 = vpop.f32.mrf.mxu1  ;;  %v9598_v18 = vld [vmem:[#allocation4 + $0x534] sm:$0xf] }
 0x449   :  { %v7952_v49 = vor.u32 %v9598_v18, %v7949_v50  ;;  %v9592_v18 = vld [vmem:[#allocation4 + $0x504] sm:$0xf] }
 0x44a   :  { %3321 = vmatmul.bf16.vlgmr.msra.gmra.mxu3 %v11932_v40  ;;  %3889 = vmatpush.bf16.msra.mxu0 %v7840_v28  ;;  %v3403_v28 = vld [vmem:[#allocation3 + $0x54] sm:$0x1]  ;;  %v7928_v22 = vor.u32 %v9592_v18, %v7925_v23 }
 0x44b   :  { %3365 = vmatpush.bf16.msrb.mxu3 %v7792_v45  ;;  %3904 = vmatpush.bf16.msra.mxu2 %v7888_v63  ;;  %v3381_v63 = vrot.slane %v3379_v60, 7 }
 0x44c   :  { %3914 = vmatpush.bf16.msra.mxu1 %v7976_v11  ;;  %v9623_v11 = vld [vmem:[#allocation4 + $0x5f4] sm:$0xf0] }
 0x44d   :  { %v11939_v45 = vpop.f32.mrf.mxu3  ;;  %v8044_v31 = vor.u32 %v9623_v11, %v8043_v47 }
 0x44e   :  { %3890 = vmatpush.bf16.msra.mxu0 %v7832_v51  ;;  %v9576_v51 = vld [vmem:[#allocation4 + $0x484] sm:$0xf] }
 0x44f   :  { %3366 = vmatpush.bf16.msrb.mxu3 %v7784_v15  ;;  %v2913_v56 = vpop.f32.mrf.mxu0  ;;  %v3391_v15 = vld [vmem:[#allocation3 + $0x52] sm:$0x1]  ;;  %3905 = vmatpush.bf16.msra.mxu2 %v7880_v57  ;;  %v7864_v3 = vor.u32 %v9576_v51, %v7861_v37  ;;  %v9635_v37 = vld [vmem:[#allocation4 + $0x654] sm:$0xf0] }
 0x450   :  { %3915 = vmatpush.bf16.msra.mxu1 %v7968_v9  ;;  %v3393_v13 = vrot.slane %v3391_v15, 7  ;;  %v2939_v6 = vpop.f32.mrf.mxu1  ;;  %v9596_v9 = vld [vmem:[#allocation4 + $0x524] sm:$0xf]  ;;  %v9562_v56 = vld [vmem:[#allocation4 + $0x414] sm:$0xf] }
 0x451   :  { %v7944_v24 = vor.u32 %v9596_v9, %v7941_v5  ;;  %v7933_v15 = vld [vmem:[#allocation4 + $0x518] sm:$0xf0]  ;;  %v8163_v6 = vld [vmem:[#allocation4 + $0x6e0] sm:$0xf]  ;;  %v8091_v51 = vld [vmem:[#allocation4 + $0x650] sm:$0xf] }
 0x452   :  { %3891 = vmatpush.bf16.msra.mxu0 %v7824_v58  ;;  %v7936_v20 = vor.u32 %v9594_v54, %v7933_v15  ;;  %v8164_v10 = vor.u32 %v9653_v33, %v8163_v6  ;;  %v7797_v58 = vld [vmem:[#allocation4 + $0x408] sm:$0xf0]  ;;  %v9613_v54 = vld [vmem:[#allocation4 + $0x5a4] sm:$0xf0]  ;;  %v8092_v17 = vor.u32 %v9635_v37, %v8091_v51  ;;  %v4511_v6 = vld [vmem:[#allocation3 + $0x61] sm:$0x1] }
 0x453   :  { %3367 = vmatpush.bf16.msrb.mxu3 %v7776_v4  ;;  %v3395_v4 = vsel %vm2261_vm14, %v3390_v62, %v3393_v13  ;;  %3906 = vmatpush.bf16.msra.mxu2 %v7872_v43  ;;  %v3383_v13 = vsel %vm2261_vm14, %v3378_v55, %v3381_v63  ;;  %v9649_v55 = vld [vmem:[#allocation4 + $0x6c4] sm:$0xf0]  ;;  %v8011_v63 = vld [vmem:[#allocation4 + $0x5b0] sm:$0xf] }
 0x454   :  { %3916 = vmatpush.bf16.msra.mxu1 %v7960_v12  ;;  %v3443_v19 = vsel %vm1034_vm11, %v3395_v4, %v10434_v14  ;;  %v3405_v12 = vrot.slane %v3403_v28, 7  ;;  %v7800_v4 = vor.u32 %v9560_v7, %v7797_v58  ;;  %v9633_v15 = vld [vmem:[#allocation4 + $0x644] sm:$0xf0]  ;;  %v3414_v7 = vld [vmem:[#allocation3 + $0x16] sm:$0x1] }
 0x455   :  { %v2861_v41 = vpop.f32.mrf.mxu3  ;;  %v2924_v25 = vpop.f32.mrf.mxu2 }
 0x456   :  { %3892 = vmatpush.bf16.msra.mxu0 %v7816_v8  ;;  %v3407_v29 = vsel %vm2261_vm14, %v3402_v38, %v3405_v12  ;;  %v8235_v41 = vld [vmem:[#allocation4 + $0x770] sm:$0xf]  ;;  %v9615_v38 = vld [vmem:[#allocation4 + $0x5b4] sm:$0xf0] }
 0x457   :  { %3368 = vmatpush.bf16.msrb.mxu3 %v7768_v53  ;;  %v2925_v53 = vadd.f32 %v2924_v25, %v11935_v42  ;;  %v11953_v42 = vpack.c.bf16 %v3443_v19, %v3443_v19  ;;  %3907 = vmatpush.bf16.msra.mxu2 %v7864_v3  ;;  %v9617_v25 = vld [vmem:[#allocation4 + $0x5c4] sm:$0xf0]  ;;  %v8139_v3 = vld [vmem:[#allocation4 + $0x6b0] sm:$0xf] }
 0x458   :  { %3917 = vmatpush.bf16.msra.mxu1 %v7952_v49  ;;  %v8107_v49 = vld [vmem:[#allocation4 + $0x670] sm:$0xf]  ;;  %v9637_v19 = vld [vmem:[#allocation4 + $0x664] sm:$0xf0] }
 0x459   :  { %v11951_v32 = vadd.f32 %v11937_v34, %v2925_v53  ;;  %3856 = vmatmul.bf16.vlgmr.msrb.gmra.mxu2 %v11953_v42  ;;  %v9655_v34 = vld [vmem:[#allocation4 + $0x6f4] sm:$0xf0]  ;;  %v8108_v14 = vor.u32 %v9639_v61, %v8107_v49  ;;  %v8075_v49 = vld [vmem:[#allocation4 + $0x630] sm:$0xf] }
 0x45a   :  { %v8172_v0 = vor.u32 %v9655_v34, %v8171_v44  ;;  %v9651_v53 = vld [vmem:[#allocation4 + $0x6d4] sm:$0xf0]  ;;  %v8012_v34 = vor.u32 %v9615_v38, %v8011_v63 }
 0x45b   :  { %3369 = vmatpush.bf16.msrb.mxu3 %v7760_v46  ;;  %v9621_v46 = vld [vmem:[#allocation4 + $0x5e4] sm:$0xf0]  ;;  %v9647_v44 = vld [vmem:[#allocation4 + $0x6b4] sm:$0xf0] }
 0x45c   :  { %v8036_v57 = vor.u32 %v9621_v46, %v8035_v36  ;;  %3918 = vmatpush.bf16.msra.mxu1 %v7944_v24  ;;  %4411 = vmatpush.bf16.msrb.mxu2 %v8172_v0  ;;  %v8099_v36 = vld [vmem:[#allocation4 + $0x660] sm:$0xf]  ;;  %v9669_v46 = vld [vmem:[#allocation4 + $0x764] sm:$0xf0]  ;;  %v8148_v24 = vor.u32 %v9649_v55, %v8147_v1  ;;  %v8219_v0 = vld [vmem:[#allocation4 + $0x750] sm:$0xf]  ;;  %v8140_v48 = vor.u32 %v9647_v44, %v8139_v3 }
 0x45d   :  { %v2872_v2 = vpop.f32.mrf.mxu3  ;;  %v2926_v62 = vpop.f32.mrf.mxu2  ;;  %v8100_v8 = vor.u32 %v9637_v19, %v8099_v36  ;;  %v9631_v61 = vld [vmem:[#allocation4 + $0x634] sm:$0xf0]  ;;  %v9609_v36 = vld [vmem:[#allocation4 + $0x584] sm:$0xf0]  ;;  %v9622_v19 = vld [vmem:[#allocation4 + $0x5f4] sm:$0xf] }
 0x45e   :  { %v11958_v27 = vadd.f32 %v2872_v2, %v11939_v45  ;;  %v8019_v45 = vld [vmem:[#allocation4 + $0x5c0] sm:$0xf]  ;;  %v8076_v1 = vor.u32 %v9631_v61, %v8075_v49  ;;  %v9661_v3 = vld [vmem:[#allocation4 + $0x724] sm:$0xf0] }
 0x45f   :  { %3370 = vmatpush.bf16.msrb.mxu3 %v7752_v26  ;;  %v7805_v26 = vld [vmem:[#allocation4 + $0x418] sm:$0xf0]  ;;  %v8020_v9 = vor.u32 %v9617_v25, %v8019_v45  ;;  %v8211_v2 = vld [vmem:[#allocation4 + $0x740] sm:$0xf] }
 0x460   :  { %v7808_v21 = vor.u32 %v9562_v56, %v7805_v26  ;;  %3919 = vmatpush.bf16.msra.mxu1 %v7936_v20  ;;  %4412 = vmatpush.bf16.msrb.mxu2 %v8164_v10  ;;  %v9667_v56 = vld [vmem:[#allocation4 + $0x754] sm:$0xf0]  ;;  %v8003_v26 = vld [vmem:[#allocation4 + $0x5a0] sm:$0xf]  ;;  %v9645_v20 = vld [vmem:[#allocation4 + $0x6a4] sm:$0xf0] }
 0x461   :  { %v8220_v62 = vor.u32 %v9667_v56, %v8219_v0  ;;  %v8004_v33 = vor.u32 %v9613_v54, %v8003_v26  ;;  %v4535_v10 = vld [vmem:[#allocation3 + $0x65] sm:$0x1]  ;;  %v8067_v55 = vld [vmem:[#allocation4 + $0x620] sm:$0xf]  ;;  %v9654_v54 = vld [vmem:[#allocation4 + $0x6f4] sm:$0xf] }
 0x462   :  { %3893 = vmatpush.bf16.msra.mxu0 %v7808_v21  ;;  %v8083_v21 = vld [vmem:[#allocation4 + $0x640] sm:$0xf]  ;;  %v4537_v25 = vrot.slane %v4535_v10, 7  ;;  %v8029_v10 = vld [vmem:[#allocation4 + $0x5d8] sm:$0xf0] }
 0x463   :  { %3371 = vmatpush.bf16.msrb.mxu3 %v7744_v52  ;;  %v10438_v52 = vpop.permute.xlu1 %10437  ;;  %v8179_v61 = vld [vmem:[#allocation4 + $0x700] sm:$0xf] }
 0x464   :  { %v10440_v50 = vunpack.i.h.bf16 %v10438_v52  ;;  %v10439_v59 = vunpack.i.l.bf16 %v10438_v52  ;;  %3920 = vmatpush.bf16.msra.mxu1 %v7928_v22  ;;  %v4513_v52 = vrot.slane %v4511_v6, 7  ;;  %v9618_v6 = vld [vmem:[#allocation4 + $0x5d4] sm:$0xf] }
 0x465   :  { %v2874_v5 = vpop.f32.mrf.mxu3 }
 0x466   :  { %v3444_v47 = vsel %vm1034_vm11, %v3407_v29, %v10440_v50  ;;  %v3442_v11 = vsel %vm1034_vm11, %v3383_v13, %v10439_v59  ;;  %3894 = vmatpush.bf16.msra.mxu0 %v7800_v4  ;;  %v8131_v13 = vld [vmem:[#allocation4 + $0x6a0] sm:$0xf]  ;;  %v9665_v29 = vld [vmem:[#allocation4 + $0x744] sm:$0xf0]  ;;  %v7995_v50 = vld [vmem:[#allocation4 + $0x590] sm:$0xf]  ;;  %v8084_v4 = vor.u32 %v9633_v15, %v8083_v21 }
 0x467   :  { %3372 = vmatpush.bf16.msrb.mxu3 %v7736_v16  ;;  %v11964_v43 = vpack.c.bf16 %v3444_v47, %v3444_v47  ;;  %v11966_v60 = vpack.c.bf16 %v3442_v11, %v3442_v11  ;;  %v8156_v16 = vor.u32 %v9651_v53, %v8155_v35  ;;  %v9611_v59 = vld [vmem:[#allocation4 + $0x594] sm:$0xf0]  ;;  %v8212_v45 = vor.u32 %v9665_v29, %v8211_v2  ;;  %v8123_v53 = vld [vmem:[#allocation4 + $0x690] sm:$0xf]  ;;  %v9629_v5 = vld [vmem:[#allocation4 + $0x624] sm:$0xf0] }
 0x468   :  { %v10435_v47 = vunpack.i.h.bf16 %v11943_v39  ;;  %v7996_v11 = vor.u32 %v9611_v59, %v7995_v50  ;;  %v8068_v26 = vor.u32 %v9629_v5, %v8067_v55  ;;  %v8059_v21 = vld [vmem:[#allocation4 + $0x610] sm:$0xf]  ;;  %v8165_v29 = vld [vmem:[#allocation4 + $0x6e8] sm:$0xf0]  ;;  %v9638_v59 = vld [vmem:[#allocation4 + $0x674] sm:$0xf] }
 0x469   :  { %3843 = vmatmul.bf16.vlgmr.msrb.gmra.mxu0 %v11966_v60  ;;  %3869 = vmatmul.bf16.vlgmr.msrb.gmra.mxu1 %v11964_v43  ;;  %v8149_v55 = vld [vmem:[#allocation4 + $0x6c8] sm:$0xf0]  ;;  %v9614_v5 = vld [vmem:[#allocation4 + $0x5b4] sm:$0xf] }
 0x46a   :  { %3373 = vmatmul.bf16.vlgmr.msrb.gmra.mxu3 %v11932_v40  ;;  %v9671_v40 = vld [vmem:[#allocation4 + $0x774] sm:$0xf0]  ;;  %4398 = vmatpush.bf16.msrb.mxu0 %v8108_v14 }
 0x46b   :  { %3874 = vmatpush.bf16.msra.mxu3 %v8044_v31  ;;  %v8236_v28 = vor.u32 %v9671_v40, %v8235_v41  ;;  %v8227_v31 = vld [vmem:[#allocation4 + $0x760] sm:$0xf]  ;;  %4413 = vmatpush.bf16.msrb.mxu2 %v8156_v16  ;;  %v4534_v40 = vld [vmem:[#allocation3 + $0x25] sm:$0x1]  ;;  %v9663_v14 = vld [vmem:[#allocation4 + $0x734] sm:$0xf0] }
 0x46c   :  { %v8228_v12 = vor.u32 %v9669_v46, %v8227_v31  ;;  %3908 = vmatmul.bf16.vlgmr.msra.gmra.mxu2 %v11953_v42  ;;  %v8132_v42 = vor.u32 %v9645_v20, %v8131_v13  ;;  %v4510_v41 = vld [vmem:[#allocation3 + $0x21] sm:$0x1]  ;;  %v8045_v31 = vld [vmem:[#allocation4 + $0x5f8] sm:$0xf0]  ;;  %v8187_v13 = vld [vmem:[#allocation4 + $0x710] sm:$0xf] }
 0x46d   :  { %4424 = vmatpush.bf16.msrb.mxu1 %v8236_v28  ;;  %v2885_v58 = vpop.f32.mrf.mxu3  ;;  %v4515_v35 = vsel %vm2261_vm14, %v4510_v41, %v4513_v52  ;;  %v7987_v16 = vld [vmem:[#allocation4 + $0x580] sm:$0xf]  ;;  %v11977_v28 = vpop.f32.mrf.mxu0  ;;  %v8048_v44 = vor.u32 %v9622_v19, %v8045_v31  ;;  %v9659_v20 = vld [vmem:[#allocation4 + $0x714] sm:$0xf0]  ;;  %v8032_v41 = vor.u32 %v9618_v6, %v8029_v10  ;;  %v9644_v6 = vld [vmem:[#allocation4 + $0x6a4] sm:$0xf] }
 0x46e   :  { %4399 = vmatpush.bf16.msrb.mxu0 %v8100_v8  ;;  %v11972_v23 = vadd.f32 %v2885_v58, %v11958_v27  ;;  %v9643_v27 = vld [vmem:[#allocation4 + $0x694] sm:$0xf0]  ;;  %v8115_v8 = vld [vmem:[#allocation4 + $0x680] sm:$0xf]  ;;  %v7988_v37 = vor.u32 %v9609_v36, %v7987_v16  ;;  %v11984_v56 = vpop.f32.mrf.mxu1  ;;  %v8188_v50 = vor.u32 %v9659_v20, %v8187_v13  ;;  %v9636_v16 = vld [vmem:[#allocation4 + $0x664] sm:$0xf] }
 0x46f   :  { %3875 = vmatpush.bf16.msra.mxu3 %v8036_v57  ;;  %v3415_v57 = vld [vmem:[#allocation3 + $0x56] sm:$0x1]  ;;  %4414 = vmatpush.bf16.msrb.mxu2 %v8148_v24  ;;  %v8124_v46 = vor.u32 %v9643_v27, %v8123_v53  ;;  %v11980_v63 = vpop.f32.mrf.mxu2  ;;  %v9641_v24 = vld [vmem:[#allocation4 + $0x684] sm:$0xf0]  ;;  %v8051_v58 = vld [vmem:[#allocation4 + $0x600] sm:$0xf] }
 0x470   :  { %v3417_v18 = vrot.slane %v3415_v57, 7  ;;  %v8173_v57 = vld [vmem:[#allocation4 + $0x6f8] sm:$0xf0]  ;;  %v8021_v53 = vld [vmem:[#allocation4 + $0x5c8] sm:$0xf0] }
 0x471   :  { %4425 = vmatpush.bf16.msrb.mxu1 %v8228_v12  ;;  %v8195_v12 = vld [vmem:[#allocation4 + $0x720] sm:$0xf]  ;;  %v8101_v36 = vld [vmem:[#allocation4 + $0x668] sm:$0xf0] }
 0x472   :  { %4400 = vmatpush.bf16.msrb.mxu0 %v8092_v17  ;;  %v3419_v22 = vsel %vm2261_vm14, %v3414_v7, %v3417_v18  ;;  %v8037_v17 = vld [vmem:[#allocation4 + $0x5e8] sm:$0xf0]  ;;  %v8196_v2 = vor.u32 %v9661_v3, %v8195_v12  ;;  %v9652_v7 = vld [vmem:[#allocation4 + $0x6e4] sm:$0xf]  ;;  %v9625_v18 = vld [vmem:[#allocation4 + $0x604] sm:$0xf0] }
 0x473   :  { %3876 = vmatpush.bf16.msra.mxu3 %v8028_v30  ;;  %4415 = vmatpush.bf16.msrb.mxu2 %v8140_v48  ;;  %v8203_v30 = vld [vmem:[#allocation4 + $0x730] sm:$0xf]  ;;  %v3445_v51 = vsel %vm1034_vm11, %v3419_v22, %v10435_v47  ;;  %v8116_v48 = vor.u32 %v9641_v24, %v8115_v8  ;;  %v8168_v49 = vor.u32 %v9652_v7, %v8165_v29  ;;  %v9650_v47 = vld [vmem:[#allocation4 + $0x6d4] sm:$0xf]  ;;  %v8133_v29 = vld [vmem:[#allocation4 + $0x6a8] sm:$0xf0] }
 0x474   :  { %v8204_v38 = vor.u32 %v9663_v14, %v8203_v30  ;;  %v11988_v15 = vpack.c.bf16 %v3445_v51, %v3445_v51  ;;  %v9657_v30 = vld [vmem:[#allocation4 + $0x704] sm:$0xf0]  ;;  %v8104_v8 = vor.u32 %v9636_v16, %v8101_v36  ;;  %v9634_v24 = vld [vmem:[#allocation4 + $0x654] sm:$0xf]  ;;  %v8093_v51 = vld [vmem:[#allocation4 + $0x658] sm:$0xf0] }
 0x475   :  { %4426 = vmatpush.bf16.msrb.mxu1 %v8220_v62  ;;  %v2887_v0 = vpop.f32.mrf.mxu3  ;;  %v8176_v62 = vor.u32 %v9654_v54, %v8173_v57  ;;  %v3285_v52 = vpop.f32.mrf.mxu0  ;;  %v8180_v22 = vor.u32 %v9657_v30, %v8179_v61  ;;  %v9666_v3 = vld [vmem:[#allocation4 + $0x754] sm:$0xf]  ;;  %v9612_v54 = vld [vmem:[#allocation4 + $0x5a4] sm:$0xf]  ;;  %v8005_v57 = vld [vmem:[#allocation4 + $0x5a8] sm:$0xf0] }
 0x476   :  { %4401 = vmatpush.bf16.msrb.mxu0 %v8084_v4  ;;  %v8109_v4 = vld [vmem:[#allocation4 + $0x678] sm:$0xf0]  ;;  %v3311_v14 = vpop.f32.mrf.mxu1  ;;  %v9646_v0 = vld [vmem:[#allocation4 + $0x6b4] sm:$0xf]  ;;  %v8008_v7 = vor.u32 %v9612_v54, %v8005_v57  ;;  %v5085_v52 = vld [vmem:[#allocation3 + $0x2b] sm:$0x1] }
 0x477   :  { %3877 = vmatpush.bf16.msra.mxu3 %v8020_v9  ;;  %v4539_v9 = vsel %vm2261_vm14, %v4534_v40, %v4537_v25  ;;  %4416 = vmatpush.bf16.msrb.mxu2 %v8132_v42  ;;  %v3298_v42 = vpop.f32.mrf.mxu2  ;;  %v8052_v40 = vor.u32 %v9625_v18, %v8051_v58  ;;  %v8237_v25 = vld [vmem:[#allocation4 + $0x778] sm:$0xf0]  ;;  %v8112_v27 = vor.u32 %v9638_v59, %v8109_v4  ;;  %v5109_v59 = vld [vmem:[#allocation3 + $0x2f] sm:$0x1]  ;;  %v3953_v14 = vld [vmem:[#allocation3 + $0x1a] sm:$0x1] }
 0x478   :  { %v10456_v39 = vpack.i.bf16 %v4539_v9, %v4515_v35  ;;  %v9616_v35 = vld [vmem:[#allocation4 + $0x5c4] sm:$0xf]  ;;  %v5110_v4 = vld [vmem:[#allocation3 + $0x6f] sm:$0x1]  ;;  %v8205_v16 = vld [vmem:[#allocation4 + $0x738] sm:$0xf0] }
 0x479   :  { %4427 = vmatpush.bf16.msrb.mxu1 %v8212_v45  ;;  %3895 = vmatmul.bf16.vlgmr.msra.gmra.mxu0 %v11966_v60  ;;  %v9627_v60 = vld [vmem:[#allocation4 + $0x614] sm:$0xf0]  ;;  %v9670_v45 = vld [vmem:[#allocation4 + $0x774] sm:$0xf]  ;;  %v9668_v9 = vld [vmem:[#allocation4 + $0x764] sm:$0xf]  ;;  %v8024_v31 = vor.u32 %v9616_v35, %v8021_v53 }
 0x47a   :  { %3921 = vmatmul.bf16.vlgmr.msra.gmra.mxu1 %v11964_v43  ;;  %4402 = vmatpush.bf16.msrb.mxu0 %v8076_v1  ;;  %v8240_v19 = vor.u32 %v9670_v45, %v8237_v25  ;;  %v5112_v30 = vrot.slane %v5110_v4, 7  ;;  %v9630_v45 = vld [vmem:[#allocation4 + $0x634] sm:$0xf]  ;;  %v11995_v25 = vld [vmem:[#allocation4 + $0x588] sm:$0xf0] }
 0x47b   :  { %3878 = vmatpush.bf16.msra.mxu3 %v8012_v34  ;;  %v9620_v34 = vld [vmem:[#allocation4 + $0x5e4] sm:$0xf]  ;;  %10457 = vrot.lane.b32.xlu2 %v10456_v39, %s10673_s26  ;;  %v8229_v39 = vld [vmem:[#allocation4 + $0x768] sm:$0xf0]  ;;  %v9687_v36 = vld [vmem:[#allocation4 + $0x7f4] sm:$0xf0] }
 0x47c   :  { %4417 = vmatpush.bf16.msrb.mxu2 %v8124_v46  ;;  %v8040_v43 = vor.u32 %v9620_v34, %v8037_v17  ;;  %v9648_v46 = vld [vmem:[#allocation4 + $0x6c4] sm:$0xf]  ;;  %v8221_v34 = vld [vmem:[#allocation4 + $0x758] sm:$0xf0]  ;;  %v8096_v17 = vor.u32 %v9634_v24, %v8093_v51  ;;  %v5098_v4 = vld [vmem:[#allocation3 + $0x6d] sm:$0x1] }
 0x47d   :  { %4428 = vmatpush.bf16.msrb.mxu1 %v8204_v38  ;;  %v8013_v38 = vld [vmem:[#allocation4 + $0x5b8] sm:$0xf0]  ;;  %v8152_v12 = vor.u32 %v9648_v46, %v8149_v55  ;;  %v8224_v13 = vor.u32 %v9666_v3, %v8221_v34  ;;  %v9642_v46 = vld [vmem:[#allocation4 + $0x694] sm:$0xf] }
 0x47e   :  { %4403 = vmatpush.bf16.msrb.mxu0 %v8068_v26  ;;  %v8141_v26 = vld [vmem:[#allocation4 + $0x6b8] sm:$0xf0] }
 0x47f   :  { %3879 = vmatpush.bf16.msra.mxu3 %v8004_v33  ;;  %v8060_v33 = vor.u32 %v9627_v60, %v8059_v21  ;;  %v8085_v21 = vld [vmem:[#allocation4 + $0x648] sm:$0xf0]  ;;  %v9664_v60 = vld [vmem:[#allocation4 + $0x744] sm:$0xf]  ;;  %v8144_v20 = vor.u32 %v9646_v0, %v8141_v26  ;;  %v3965_v24 = vld [vmem:[#allocation3 + $0x1c] sm:$0x1]  ;;  %v10448_v57 = vpop.permute.xlu0 %10447 }
 0x480   :  { %4418 = vmatpush.bf16.msrb.mxu2 %v8116_v48  ;;  %v9632_v48 = vld [vmem:[#allocation4 + $0x644] sm:$0xf]  ;;  %v3966_v3 = vld [vmem:[#allocation3 + $0x5c] sm:$0x1] }
 0x481   :  { %4429 = vmatpush.bf16.msrb.mxu1 %v8196_v2  ;;  %v9610_v2 = vld [vmem:[#allocation4 + $0x594] sm:$0xf]  ;;  %v8088_v18 = vor.u32 %v9632_v48, %v8085_v21  ;;  %v3968_v54 = vrot.slane %v3966_v3, 7  ;;  %v9660_v48 = vld [vmem:[#allocation4 + $0x724] sm:$0xf] }
 0x482   :  { %4404 = vmatpush.bf16.msrb.mxu0 %v8060_v33  ;;  %v5086_v33 = vld [vmem:[#allocation3 + $0x6b] sm:$0x1]  ;;  %v8181_v3 = vld [vmem:[#allocation4 + $0x708] sm:$0xf0] }
 0x483   :  { %3880 = vmatpush.bf16.msra.mxu3 %v7996_v11  ;;  %v8157_v11 = vld [vmem:[#allocation4 + $0x6d8] sm:$0xf0]  ;;  %v5088_v10 = vrot.slane %v5086_v33, 7  ;;  %v3970_v33 = vsel %vm2261_vm14, %v3965_v24, %v3968_v54  ;;  %v9624_v24 = vld [vmem:[#allocation4 + $0x604] sm:$0xf] }
 0x484   :  { %4463 = vmatpush.bf16.msra.mxu2 %v8176_v62  ;;  %v8160_v1 = vor.u32 %v9650_v47, %v8157_v11  ;;  %v7997_v62 = vld [vmem:[#allocation4 + $0x598] sm:$0xf0]  ;;  %v8136_v11 = vor.u32 %v9644_v6, %v8133_v29  ;;  %v9703_v54 = vld [vmem:[#allocation4 + $0x874] sm:$0xf0] }
 0x485   :  { %4430 = vmatpush.bf16.msrb.mxu1 %v8188_v50  ;;  %v3954_v50 = vld [vmem:[#allocation3 + $0x5a] sm:$0x1]  ;;  %v5090_v61 = vsel %vm2261_vm14, %v5085_v52, %v5088_v10  ;;  %v8000_v53 = vor.u32 %v9610_v2, %v7997_v62  ;;  %v9685_v2 = vld [vmem:[#allocation4 + $0x7e4] sm:$0xf0] }
 0x486   :  { %4405 = vmatpush.bf16.msrb.mxu0 %v8052_v40  ;;  %v11993_v40 = vld [vmem:[#allocation4 + $0x584] sm:$0xf]  ;;  %v5073_v52 = vld [vmem:[#allocation3 + $0x29] sm:$0x1] }
 0x487   :  { %3881 = vmatpush.bf16.msra.mxu3 %v7988_v37  ;;  %v8232_v37 = vor.u32 %v9668_v9, %v8229_v39  ;;  %v12004_v9 = vpop.permute.xlu2 %10442  ;;  %v7992_v0 = vor.u32 %v11993_v40, %v11995_v25  ;;  %v5074_v10 = vld [vmem:[#allocation3 + $0x69] sm:$0x1]  ;;  %v8117_v40 = vld [vmem:[#allocation4 + $0x688] sm:$0xf0]  ;;  %v9683_v25 = vld [vmem:[#allocation4 + $0x7d4] sm:$0xf0] }
 0x488   :  { %4464 = vmatpush.bf16.msra.mxu2 %v8168_v49  ;;  %v3956_v49 = vrot.slane %v3954_v50, 7 }
 0x489   :  { %4431 = vmatpush.bf16.msrb.mxu1 %v8180_v22  ;;  %v9662_v22 = vld [vmem:[#allocation4 + $0x734] sm:$0xf] }
 0x48a   :  { %3882 = vmatmul.bf16.vlgmr.msra.gmra.mxu3 %v11988_v15  ;;  %4450 = vmatpush.bf16.msra.mxu0 %v8112_v27  ;;  %v5114_v27 = vsel %vm2261_vm14, %v5109_v59, %v5112_v30  ;;  %v8208_v51 = vor.u32 %v9662_v22, %v8205_v16  ;;  %v5076_v59 = vrot.slane %v5074_v10, 7  ;;  %v9626_v16 = vld [vmem:[#allocation4 + $0x614] sm:$0xf]  ;;  %v9679_v10 = vld [vmem:[#allocation4 + $0x7b4] sm:$0xf0] }
 0x48b   :  { %3926 = vmatpush.bf16.msrb.mxu3 %v8048_v44  ;;  %v8016_v44 = vor.u32 %v9614_v5, %v8013_v38  ;;  %v10444_v5 = vunpack.i.l.bf16 %v12004_v9  ;;  %v3941_v38 = vld [vmem:[#allocation3 + $0x18] sm:$0x1] }
 0x48c   :  { %4465 = vmatpush.bf16.msra.mxu2 %v8160_v1  ;;  %v3958_v1 = vsel %vm2261_vm14, %v3953_v14, %v3956_v49 }
 0x48d   :  { %4476 = vmatpush.bf16.msra.mxu1 %v8240_v19  ;;  %v2898_v58 = vpop.f32.mrf.mxu3  ;;  %v12001_v19 = vpop.f32.mrf.mxu0  ;;  %v4006_v26 = vsel %vm1034_vm11, %v3958_v1, %v10444_v5  ;;  %v9658_v1 = vld [vmem:[#allocation4 + $0x714] sm:$0xf] }
 0x48e   :  { %4451 = vmatpush.bf16.msra.mxu0 %v8104_v8  ;;  %v2899_v42 = vadd.f32 %v2898_v58, %v11972_v23  ;;  %v11998_v23 = vld [vmem:[#allocation4 + $0x7f0] sm:$0xf]  ;;  %v3942_v8 = vld [vmem:[#allocation3 + $0x58] sm:$0x1]  ;;  %v12018_v62 = vpack.c.bf16 %v4006_v26, %v4006_v26  ;;  %v12021_v6 = vpop.f32.mrf.mxu1  ;;  %v5097_v58 = vld [vmem:[#allocation3 + $0x2d] sm:$0x1] }
 0x48f   :  { %3927 = vmatpush.bf16.msrb.mxu3 %v8040_v43  ;;  %v8213_v43 = vld [vmem:[#allocation4 + $0x748] sm:$0xf0]  ;;  %v8300_v21 = vor.u32 %v9687_v36, %v11998_v23  ;;  %v8061_v36 = vld [vmem:[#allocation4 + $0x618] sm:$0xf0]  ;;  %v8363_v26 = vld [vmem:[#allocation4 + $0x870] sm:$0xf] }
 0x490   :  { %4466 = vmatpush.bf16.msra.mxu2 %v8152_v12  ;;  %v8216_v47 = vor.u32 %v9664_v60, %v8213_v43  ;;  %v3284_v35 = vadd.f32 %v11977_v28, %v2899_v42  ;;  %v8125_v28 = vld [vmem:[#allocation4 + $0x698] sm:$0xf0]  ;;  %v3944_v12 = vrot.slane %v3942_v8, 7  ;;  %v8291_v60 = vld [vmem:[#allocation4 + $0x7e0] sm:$0xf] }
 0x491   :  { %4477 = vmatpush.bf16.msra.mxu1 %v8232_v37  ;;  %v8128_v37 = vor.u32 %v9642_v46, %v8125_v28  ;;  %v8197_v43 = vld [vmem:[#allocation4 + $0x728] sm:$0xf0]  ;;  %v9640_v42 = vld [vmem:[#allocation4 + $0x684] sm:$0xf]  ;;  %v8292_v49 = vor.u32 %v9685_v2, %v8291_v60  ;;  %4419 = vmatmul.bf16.vlgmr.msrb.gmra.mxu2 %v12018_v62  ;;  %v8189_v46 = vld [vmem:[#allocation4 + $0x718] sm:$0xf0] }
 0x492   :  { %4452 = vmatpush.bf16.msra.mxu0 %v8096_v17  ;;  %v3297_v55 = vadd.f32 %v11980_v63, %v3284_v35  ;;  %v12013_v63 = vpop.f32.mrf.mxu2  ;;  %v8069_v17 = vld [vmem:[#allocation4 + $0x628] sm:$0xf0]  ;;  %v8200_v50 = vor.u32 %v9660_v48, %v8197_v43  ;;  %v8120_v14 = vor.u32 %v9640_v42, %v8117_v40  ;;  %v8427_v35 = vld [vmem:[#allocation4 + $0x8f0] sm:$0xf]  ;;  %v8275_v28 = vld [vmem:[#allocation4 + $0x7c0] sm:$0xf]  ;;  %v8192_v5 = vor.u32 %v9658_v1, %v8189_v46 }
 0x493   :  { %3928 = vmatpush.bf16.msrb.mxu3 %v8032_v41  ;;  %v8077_v41 = vld [vmem:[#allocation4 + $0x638] sm:$0xf0]  ;;  %v9717_v8 = vld [vmem:[#allocation4 + $0x8e4] sm:$0xf0]  ;;  %v9735_v60 = vld [vmem:[#allocation4 + $0x974] sm:$0xf0] }
 0x494   :  { %4467 = vmatpush.bf16.msra.mxu2 %v8144_v20  ;;  %v8080_v39 = vor.u32 %v9630_v45, %v8077_v41  ;;  %v12009_v34 = vadd.f32 %v11984_v56, %v3297_v55  ;;  %v10450_v20 = vunpack.i.h.bf16 %v10448_v57  ;;  %v5100_v41 = vrot.slane %v5098_v4, 7  ;;  %v9681_v55 = vld [vmem:[#allocation4 + $0x7c4] sm:$0xf0]  ;;  %v8347_v42 = vld [vmem:[#allocation4 + $0x850] sm:$0xf] }
 0x495   :  { %4478 = vmatpush.bf16.msra.mxu1 %v8224_v13  ;;  %v2900_v56 = vpop.f32.mrf.mxu3  ;;  %v3946_v13 = vsel %vm2261_vm14, %v3941_v38, %v3944_v12  ;;  %v3337_v23 = vpop.f32.mrf.mxu0  ;;  %v8419_v38 = vld [vmem:[#allocation4 + $0x8e0] sm:$0xf]  ;;  %v8053_v12 = vld [vmem:[#allocation4 + $0x608] sm:$0xf0]  ;;  %v8276_v43 = vor.u32 %v9681_v55, %v8275_v28  ;;  %v8251_v28 = vld [vmem:[#allocation4 + $0x790] sm:$0xf] }
 0x496   :  { %4453 = vmatpush.bf16.msra.mxu0 %v8088_v18  ;;  %v4007_v18 = vsel %vm1034_vm11, %v3970_v33, %v10450_v20  ;;  %v8411_v56 = vld [vmem:[#allocation4 + $0x8d0] sm:$0xf]  ;;  %v8355_v20 = vld [vmem:[#allocation4 + $0x860] sm:$0xf]  ;;  %v9701_v33 = vld [vmem:[#allocation4 + $0x864] sm:$0xf0] }
 0x497   :  { %3929 = vmatpush.bf16.msrb.mxu3 %v8024_v31  ;;  %v10461_v31 = vpack.i.bf16 %v5114_v27, %v5090_v61  ;;  %v8283_v61 = vld [vmem:[#allocation4 + $0x7d0] sm:$0xf]  ;;  %v12025_v30 = vpack.c.bf16 %v4007_v18, %v4007_v18  ;;  %v5102_v27 = vsel %vm2261_vm14, %v5097_v58, %v5100_v41  ;;  %v8356_v18 = vor.u32 %v9701_v33, %v8355_v20  ;;  %v9731_v41 = vld [vmem:[#allocation4 + $0x954] sm:$0xf0]  ;;  %v8259_v40 = vld [vmem:[#allocation4 + $0x7a0] sm:$0xf] }
 0x498   :  { %4468 = vmatpush.bf16.msra.mxu2 %v8136_v11  ;;  %v5078_v11 = vsel %vm2261_vm14, %v5073_v52, %v5076_v59  ;;  %v8267_v52 = vld [vmem:[#allocation4 + $0x7b0] sm:$0xf]  ;;  %v9713_v59 = vld [vmem:[#allocation4 + $0x8c4] sm:$0xf0]  ;;  %v9711_v23 = vld [vmem:[#allocation4 + $0x8b4] sm:$0xf0] }
 0x499   :  { %4479 = vmatpush.bf16.msra.mxu1 %v8216_v47  ;;  %10462 = vrot.lane.b32.xlu0 %v10461_v31, %s10673_s26  ;;  %v10466_v31 = vpack.i.bf16 %v5102_v27, %v5078_v11  ;;  %v8467_v1 = vld [vmem:[#allocation4 + $0x940] sm:$0xf]  ;;  %v9675_v55 = vld [vmem:[#allocation4 + $0x794] sm:$0xf0] }
 0x49a   :  { %4454 = vmatpush.bf16.msra.mxu0 %v8080_v39  ;;  %4432 = vmatmul.bf16.vlgmr.msrb.gmra.mxu1 %v12025_v30  ;;  %v8064_v39 = vor.u32 %v9626_v16, %v8061_v36  ;;  %v9697_v16 = vld [vmem:[#allocation4 + $0x844] sm:$0xf0] }
 0x49b   :  { %3930 = vmatpush.bf16.msrb.mxu3 %v8016_v44  ;;  %v9628_v44 = vld [vmem:[#allocation4 + $0x624] sm:$0xf]  ;;  %10467 = vrot.lane.b32.xlu1 %v10466_v31, %s10673_s26  ;;  %v9729_v31 = vld [vmem:[#allocation4 + $0x944] sm:$0xf0] }
 0x49c   :  { %v8072_v29 = vor.u32 %v9628_v44, %v8069_v17  ;;  %4469 = vmatpush.bf16.msra.mxu2 %v8128_v37  ;;  %v8284_v37 = vor.u32 %v9683_v25, %v8283_v61  ;;  %v8420_v44 = vor.u32 %v9717_v8, %v8419_v38  ;;  %v3363_v17 = vpop.f32.mrf.mxu1  ;;  %v8268_v61 = vor.u32 %v9679_v10, %v8267_v52  ;;  %v9677_v25 = vld [vmem:[#allocation4 + $0x7a4] sm:$0xf0]  ;;  %v3977_v8 = vld [vmem:[#allocation3 + $0x1e] sm:$0x1]  ;;  %v9684_v10 = vld [vmem:[#allocation4 + $0x7e4] sm:$0xf] }
 0x49d   :  { %4480 = vmatpush.bf16.msra.mxu1 %v8208_v51  ;;  %v3350_v51 = vpop.f32.mrf.mxu2  ;;  %v8260_v36 = vor.u32 %v9677_v25, %v8259_v40  ;;  %v9686_v17 = vld [vmem:[#allocation4 + $0x7f4] sm:$0xf]  ;;  %v8443_v40 = vld [vmem:[#allocation4 + $0x910] sm:$0xf]  ;;  %v9723_v25 = vld [vmem:[#allocation4 + $0x914] sm:$0xf0] }
 0x49e   :  { %4455 = vmatpush.bf16.msra.mxu0 %v8072_v29  ;;  %v9733_v29 = vld [vmem:[#allocation4 + $0x964] sm:$0xf0] }
 0x49f   :  { %3931 = vmatpush.bf16.msrb.mxu3 %v8008_v7  ;;  %v10449_v7 = vunpack.i.l.bf16 %v10448_v57  ;;  %v8491_v57 = vld [vmem:[#allocation4 + $0x970] sm:$0xf]  ;;  %v9709_v51 = vld [vmem:[#allocation4 + $0x8a4] sm:$0xf0] }
 0x4a0   :  { %4470 = vmatpush.bf16.msra.mxu2 %v8120_v14  ;;  %v8492_v2 = vor.u32 %v9735_v60, %v8491_v57  ;;  %v3978_v14 = vld [vmem:[#allocation3 + $0x5e] sm:$0x1]  ;;  %v9673_v57 = vld [vmem:[#allocation4 + $0x784] sm:$0xf0] }
 0x4a1   :  { %v4005_v45 = vsel %vm1034_vm11, %v3946_v13, %v10449_v7  ;;  %4481 = vmatpush.bf16.msra.mxu1 %v8200_v50  ;;  %v9715_v13 = vld [vmem:[#allocation4 + $0x8d4] sm:$0xf0]  ;;  %v8483_v7 = vld [vmem:[#allocation4 + $0x960] sm:$0xf]  ;;  %v3980_v46 = vrot.slane %v3978_v14, 7 }
 0x4a2   :  { %v12029_v47 = vpack.c.bf16 %v4005_v45, %v4005_v45  ;;  %4456 = vmatpush.bf16.msra.mxu0 %v8064_v39  ;;  %v8412_v58 = vor.u32 %v9715_v13, %v8411_v56  ;;  %v8403_v50 = vld [vmem:[#allocation4 + $0x8c0] sm:$0xf]  ;;  %v8484_v4 = vor.u32 %v9733_v29, %v8483_v7  ;;  %v8475_v45 = vld [vmem:[#allocation4 + $0x950] sm:$0xf]  ;;  %v9693_v13 = vld [vmem:[#allocation4 + $0x824] sm:$0xf0] }
 0x4a3   :  { %3932 = vmatpush.bf16.msrb.mxu3 %v8000_v53  ;;  %v9719_v53 = vld [vmem:[#allocation4 + $0x8f4] sm:$0xf0]  ;;  %v8404_v11 = vor.u32 %v9713_v59, %v8403_v50  ;;  %v8476_v27 = vor.u32 %v9731_v41, %v8475_v45  ;;  %4471 = vmatmul.bf16.vlgmr.msra.gmra.mxu2 %v12018_v62  ;;  %v8387_v62 = vld [vmem:[#allocation4 + $0x8a0] sm:$0xf]  ;;  %v9725_v29 = vld [vmem:[#allocation4 + $0x924] sm:$0xf0] }
 0x4a4   :  { %v8428_v22 = vor.u32 %v9719_v53, %v8427_v35  ;;  %4406 = vmatmul.bf16.vlgmr.msrb.gmra.mxu0 %v12029_v47  ;;  %v8395_v53 = vld [vmem:[#allocation4 + $0x8b0] sm:$0xf]  ;;  %v8451_v7 = vld [vmem:[#allocation4 + $0x920] sm:$0xf]  ;;  %v9691_v41 = vld [vmem:[#allocation4 + $0x814] sm:$0xf0] }
 0x4a5   :  { %4482 = vmatpush.bf16.msra.mxu1 %v8192_v5  ;;  %v8396_v5 = vor.u32 %v9711_v23, %v8395_v53  ;;  %v8371_v59 = vld [vmem:[#allocation4 + $0x880] sm:$0xf]  ;;  %v8315_v45 = vld [vmem:[#allocation4 + $0x810] sm:$0xf]  ;;  %v9682_v14 = vld [vmem:[#allocation4 + $0x7d4] sm:$0xf] }
 0x4a6   :  { %4974 = vmatpush.bf16.msrb.mxu2 %v8428_v22  ;;  %v8339_v22 = vld [vmem:[#allocation4 + $0x840] sm:$0xf]  ;;  %v8285_v53 = vld [vmem:[#allocation4 + $0x7d8] sm:$0xf0] }
 0x4a7   :  { %3933 = vmatpush.bf16.msrb.mxu3 %v7992_v0  ;;  %v8056_v0 = vor.u32 %v9624_v24, %v8053_v12  ;;  %v8340_v24 = vor.u32 %v9697_v16, %v8339_v22  ;;  %v8331_v12 = vld [vmem:[#allocation4 + $0x830] sm:$0xf]  ;;  %v9716_v22 = vld [vmem:[#allocation4 + $0x8e4] sm:$0xf]  ;;  %v8421_v16 = vld [vmem:[#allocation4 + $0x8e8] sm:$0xf0] }
 0x4a9   :  { %4457 = vmatpush.bf16.msra.mxu0 %v8056_v0  ;;  %v8252_v0 = vor.u32 %v9675_v55, %v8251_v28  ;;  %v9702_v28 = vld [vmem:[#allocation4 + $0x874] sm:$0xf]  ;;  %v8365_v55 = vld [vmem:[#allocation4 + $0x878] sm:$0xf0] }
 0x4aa   :  { %3934 = vmatmul.bf16.vlgmr.msrb.gmra.mxu3 %v11988_v15  ;;  %v9656_v15 = vld [vmem:[#allocation4 + $0x704] sm:$0xf]  ;;  %4975 = vmatpush.bf16.msrb.mxu2 %v8420_v44  ;;  %v10445_v44 = vunpack.i.h.bf16 %v12004_v9  ;;  %v8323_v9 = vld [vmem:[#allocation4 + $0x820] sm:$0xf] }
 0x4ab   :  { %4437 = vmatpush.bf16.msra.mxu3 %v8300_v21  ;;  %v8184_v48 = vor.u32 %v9656_v15, %v8181_v3  ;;  %v8364_v21 = vor.u32 %v9703_v54, %v8363_v26  ;;  %v9695_v15 = vld [vmem:[#allocation4 + $0x834] sm:$0xf0]  ;;  %v8243_v54 = vld [vmem:[#allocation4 + $0x780] sm:$0xf]  ;;  %v8324_v50 = vor.u32 %v9693_v13, %v8323_v9  ;;  %v8349_v9 = vld [vmem:[#allocation4 + $0x858] sm:$0xf0] }
 0x4ac   :  { %v9727_v26 = vld [vmem:[#allocation4 + $0x934] sm:$0xf0]  ;;  %v8332_v60 = vor.u32 %v9695_v15, %v8331_v12  ;;  %v8244_v33 = vor.u32 %v9673_v57, %v8243_v54  ;;  %v8368_v15 = vor.u32 %v9702_v28, %v8365_v55  ;;  %v9732_v54 = vld [vmem:[#allocation4 + $0x964] sm:$0xf]  ;;  %v8485_v57 = vld [vmem:[#allocation4 + $0x968] sm:$0xf0] }
 0x4ad   :  { %4483 = vmatpush.bf16.msra.mxu1 %v8184_v48  ;;  %4961 = vmatpush.bf16.msrb.mxu0 %v8364_v21  ;;  %v2950_v39 = vpop.f32.mrf.mxu3  ;;  %v8388_v48 = vor.u32 %v9709_v51, %v8387_v62  ;;  %v8277_v62 = vld [vmem:[#allocation4 + $0x7c8] sm:$0xf0]  ;;  %v8424_v51 = vor.u32 %v9716_v22, %v8421_v16  ;;  %v4516_v22 = vld [vmem:[#allocation3 + $0x22] sm:$0x1]  ;;  %v9694_v16 = vld [vmem:[#allocation4 + $0x834] sm:$0xf] }
 0x4ae   :  { %4976 = vmatpush.bf16.msrb.mxu2 %v8412_v58  ;;  %v2951_v38 = vadd.f32 %v2950_v39, %v11951_v32  ;;  %v3982_v32 = vsel %vm2261_vm14, %v3977_v8, %v3980_v46  ;;  %v8293_v58 = vld [vmem:[#allocation4 + $0x7e8] sm:$0xf0]  ;;  %v8435_v39 = vld [vmem:[#allocation4 + $0x900] sm:$0xf]  ;;  %v9721_v46 = vld [vmem:[#allocation4 + $0x904] sm:$0xf0] }
 0x4af   :  { %4438 = vmatpush.bf16.msra.mxu3 %v8292_v49  ;;  %v9699_v49 = vld [vmem:[#allocation4 + $0x854] sm:$0xf0]  ;;  %v4008_v20 = vsel %vm1034_vm11, %v3982_v32, %v10445_v44  ;;  %v8493_v8 = vld [vmem:[#allocation4 + $0x978] sm:$0xf0]  ;;  %v8436_v12 = vor.u32 %v9721_v46, %v8435_v39  ;;  %v9726_v39 = vld [vmem:[#allocation4 + $0x934] sm:$0xf] }
 0x4b0   :  { %v8348_v35 = vor.u32 %v9699_v49, %v8347_v42  ;;  %4484 = vmatmul.bf16.vlgmr.msra.gmra.mxu1 %v12025_v30  ;;  %v3336_v3 = vadd.f32 %v12001_v19, %v2951_v38  ;;  %v8459_v30 = vld [vmem:[#allocation4 + $0x930] sm:$0xf]  ;;  %v9707_v19 = vld [vmem:[#allocation4 + $0x894] sm:$0xf0]  ;;  %v9718_v42 = vld [vmem:[#allocation4 + $0x8f4] sm:$0xf]  ;;  %v12049_v49 = vpack.c.bf16 %v4008_v20, %v4008_v20 }
 0x4b1   :  { %4987 = vmatpush.bf16.msrb.mxu1 %v8492_v2  ;;  %4962 = vmatpush.bf16.msrb.mxu0 %v8356_v18  ;;  %v8379_v2 = vld [vmem:[#allocation4 + $0x890] sm:$0xf]  ;;  %v8460_v56 = vor.u32 %v9727_v26, %v8459_v30  ;;  %v9734_v38 = vld [vmem:[#allocation4 + $0x974] sm:$0xf]  ;;  %v8413_v44 = vld [vmem:[#allocation4 + $0x8d8] sm:$0xf0] }
 0x4b2   :  { %4977 = vmatpush.bf16.msrb.mxu2 %v8404_v11  ;;  %v3349_v21 = vadd.f32 %v12013_v63, %v3336_v3  ;;  %v8380_v18 = vor.u32 %v9707_v19, %v8379_v2  ;;  %v8296_v11 = vor.u32 %v9684_v10, %v8293_v58  ;;  %v9714_v3 = vld [vmem:[#allocation4 + $0x8d4] sm:$0xf]  ;;  %v9700_v30 = vld [vmem:[#allocation4 + $0x864] sm:$0xf]  ;;  %v8357_v26 = vld [vmem:[#allocation4 + $0x868] sm:$0xf0]  ;;  %v8488_v19 = vor.u32 %v9732_v54, %v8485_v57 }
 0x4b3   :  { %4439 = vmatpush.bf16.msra.mxu3 %v8284_v37  ;;  %v8468_v37 = vor.u32 %v9729_v31, %v8467_v1  ;;  %v8307_v1 = vld [vmem:[#allocation4 + $0x800] sm:$0xf]  ;;  %v9689_v31 = vld [vmem:[#allocation4 + $0x804] sm:$0xf0]  ;;  %v8405_v2 = vld [vmem:[#allocation4 + $0x8c8] sm:$0xf0] }
 0x4b4   :  { %4458 = vmatmul.bf16.vlgmr.msra.gmra.mxu0 %v12029_v47  ;;  %v8301_v47 = vld [vmem:[#allocation4 + $0x7f8] sm:$0xf0]  ;;  %v9730_v20 = vld [vmem:[#allocation4 + $0x954] sm:$0xf]  ;;  %v8245_v28 = vld [vmem:[#allocation4 + $0x788] sm:$0xf0] }
 0x4b5   :  { %4988 = vmatpush.bf16.msrb.mxu1 %v8484_v4  ;;  %4963 = vmatpush.bf16.msrb.mxu0 %v8348_v35  ;;  %v2952_v52 = vpop.f32.mrf.mxu3  ;;  %v8304_v63 = vor.u32 %v9686_v17, %v8301_v47  ;;  %v9705_v4 = vld [vmem:[#allocation4 + $0x884] sm:$0xf0]  ;;  %v9678_v17 = vld [vmem:[#allocation4 + $0x7b4] sm:$0xf]  ;;  %v8360_v47 = vor.u32 %v9700_v30, %v8357_v26  ;;  %v8397_v58 = vld [vmem:[#allocation4 + $0x8b8] sm:$0xf0] }
 0x4b6   :  { %4978 = vmatpush.bf16.msrb.mxu2 %v8396_v5  ;;  %v8372_v35 = vor.u32 %v9705_v4, %v8371_v59  ;;  %v8288_v5 = vor.u32 %v9682_v14, %v8285_v53  ;;  %v9710_v10 = vld [vmem:[#allocation4 + $0x8b4] sm:$0xf]  ;;  %v8341_v59 = vld [vmem:[#allocation4 + $0x848] sm:$0xf0]  ;;  %v9708_v53 = vld [vmem:[#allocation4 + $0x8a4] sm:$0xf] }
 0x4b7   :  { %4440 = vmatpush.bf16.msra.mxu3 %v8276_v43  ;;  %v12047_v43 = vadd.f32 %v12021_v6, %v3349_v21  ;;  %v8452_v6 = vor.u32 %v9725_v29, %v8451_v7  ;;  %v8416_v21 = vor.u32 %v9714_v3, %v8413_v44  ;;  %v9676_v7 = vld [vmem:[#allocation4 + $0x7a4] sm:$0xf]  ;;  %v8261_v29 = vld [vmem:[#allocation4 + $0x7a8] sm:$0xf0]  ;;  %v8461_v46 = vld [vmem:[#allocation4 + $0x938] sm:$0xf0] }
 0x4b8   :  { %v8264_v4 = vor.u32 %v9676_v7, %v8261_v29  ;;  %v8555_v55 = vld [vmem:[#allocation4 + $0x9f0] sm:$0xf]  ;;  %v8464_v44 = vor.u32 %v9726_v39, %v8461_v46  ;;  %v9692_v30 = vld [vmem:[#allocation4 + $0x824] sm:$0xf]  ;;  %v8325_v26 = vld [vmem:[#allocation4 + $0x828] sm:$0xf0] }
 0x4b9   :  { %4989 = vmatpush.bf16.msrb.mxu1 %v8476_v27  ;;  %4964 = vmatpush.bf16.msrb.mxu0 %v8340_v24  ;;  %v8316_v27 = vor.u32 %v9691_v41, %v8315_v45  ;;  %v9680_v24 = vld [vmem:[#allocation4 + $0x7c4] sm:$0xf]  ;;  %v9674_v45 = vld [vmem:[#allocation4 + $0x794] sm:$0xf]  ;;  %v8253_v41 = vld [vmem:[#allocation4 + $0x798] sm:$0xf0] }
 0x4ba   :  { %4979 = vmatpush.bf16.msrb.mxu2 %v8388_v48  ;;  %v8280_v32 = vor.u32 %v9680_v24, %v8277_v62  ;;  %v8269_v48 = vld [vmem:[#allocation4 + $0x7b8] sm:$0xf0]  ;;  %v9706_v62 = vld [vmem:[#allocation4 + $0x894] sm:$0xf]  ;;  %v8675_v46 = vld [vmem:[#allocation4 + $0xae0] sm:$0xf] }
 0x4bb   :  { %4441 = vmatpush.bf16.msra.mxu3 %v8268_v61  ;;  %v8429_v61 = vld [vmem:[#allocation4 + $0x8f8] sm:$0xf0]  ;;  %v8272_v13 = vor.u32 %v9678_v17, %v8269_v48  ;;  %v9724_v17 = vld [vmem:[#allocation4 + $0x924] sm:$0xf]  ;;  %v8453_v48 = vld [vmem:[#allocation4 + $0x928] sm:$0xf0] }
 0x4bc   :  { %v8432_v23 = vor.u32 %v9718_v42, %v8429_v61  ;;  %v9728_v42 = vld [vmem:[#allocation4 + $0x944] sm:$0xf]  ;;  %v5660_v7 = vld [vmem:[#allocation3 + $0x35] sm:$0x1] }
 0x4bd   :  { %4990 = vmatpush.bf16.msrb.mxu1 %v8468_v37  ;;  %4965 = vmatpush.bf16.msrb.mxu0 %v8332_v60  ;;  %v8308_v37 = vor.u32 %v9689_v31, %v8307_v1  ;;  %v9712_v60 = vld [vmem:[#allocation4 + $0x8c4] sm:$0xf]  ;;  %v8256_v1 = vor.u32 %v9674_v45, %v8253_v41  ;;  %v5661_v29 = vld [vmem:[#allocation3 + $0x75] sm:$0x1] }
 0x4be   :  { %4980 = vmatpush.bf16.msrb.mxu2 %v8380_v18  ;;  %v8408_v52 = vor.u32 %v9712_v60, %v8405_v2  ;;  %v9672_v31 = vld [vmem:[#allocation4 + $0x784] sm:$0xf] }
 0x4bf   :  { %4442 = vmatpush.bf16.msra.mxu3 %v8260_v36  ;;  %v8444_v36 = vor.u32 %v9723_v25, %v8443_v40  ;;  %v8400_v40 = vor.u32 %v9710_v10, %v8397_v58  ;;  %v4517_v25 = vld [vmem:[#allocation3 + $0x62] sm:$0x1]  ;;  %v5663_v10 = vrot.slane %v5661_v29, 7  ;;  %v9704_v58 = vld [vmem:[#allocation4 + $0x884] sm:$0xf] }
 0x4c0   :  { %v8659_v29 = vld [vmem:[#allocation4 + $0xac0] sm:$0xf] }
 0x4c1   :  { %4991 = vmatpush.bf16.msrb.mxu1 %v8460_v56  ;;  %4966 = vmatpush.bf16.msrb.mxu0 %v8324_v50  ;;  %v9698_v56 = vld [vmem:[#allocation4 + $0x854] sm:$0xf]  ;;  %v9696_v50 = vld [vmem:[#allocation4 + $0x844] sm:$0xf]  ;;  %v5665_v41 = vsel %vm2261_vm14, %v5660_v7, %v5663_v10  ;;  %v9741_v10 = vld [vmem:[#allocation4 + $0x9a4] sm:$0xf0] }
 0x4c2   :  { %4981 = vmatpush.bf16.msrb.mxu2 %v8372_v35  ;;  %v8344_v14 = vor.u32 %v9696_v50, %v8341_v59  ;;  %v4519_v35 = vrot.slane %v4517_v25, 7  ;;  %v8539_v59 = vld [vmem:[#allocation4 + $0x9d0] sm:$0xf]  ;;  %v9783_v25 = vld [vmem:[#allocation4 + $0xaf4] sm:$0xf0] }
 0x4c3   :  { %4443 = vmatpush.bf16.msra.mxu3 %v8252_v0  ;;  %v8496_v0 = vor.u32 %v9734_v38, %v8493_v8  ;;  %v12056_v8 = vpop.permute.xlu1 %10452 }
 0x4c4   :  { %v4521_v38 = vsel %vm2261_vm14, %v4516_v22, %v4519_v35  ;;  %v10454_v3 = vunpack.i.l.bf16 %v12056_v8  ;;  %v8317_v35 = vld [vmem:[#allocation4 + $0x818] sm:$0xf0] }
 0x4c5   :  { %4992 = vmatpush.bf16.msrb.mxu1 %v8452_v6  ;;  %4967 = vmatpush.bf16.msrb.mxu0 %v8316_v27  ;;  %v8469_v6 = vld [vmem:[#allocation4 + $0x948] sm:$0xf0] }
 0x4c6   :  { %5026 = vmatpush.bf16.msra.mxu2 %v8432_v23  ;;  %v8389_v23 = vld [vmem:[#allocation4 + $0x8a8] sm:$0xf0]  ;;  %v8472_v27 = vor.u32 %v9728_v42, %v8469_v6  ;;  %v4569_v60 = vsel %vm1034_vm11, %v4521_v38, %v10454_v3  ;;  %v8683_v6 = vld [vmem:[#allocation4 + $0xaf0] sm:$0xf]  ;;  %v9688_v38 = vld [vmem:[#allocation4 + $0x804] sm:$0xf] }
 0x4c7   :  { %4444 = vmatpush.bf16.msra.mxu3 %v8244_v33  ;;  %v8477_v33 = vld [vmem:[#allocation4 + $0x958] sm:$0xf0]  ;;  %v9767_v3 = vld [vmem:[#allocation4 + $0xa74] sm:$0xf0] }
 0x4c8   :  { %v8480_v18 = vor.u32 %v9730_v20, %v8477_v33  ;;  %v8328_v20 = vor.u32 %v9692_v30, %v8325_v26  ;;  %v5637_v33 = vld [vmem:[#allocation3 + $0x71] sm:$0x1] }
 0x4c9   :  { %4993 = vmatpush.bf16.msrb.mxu1 %v8444_v36  ;;  %4968 = vmatpush.bf16.msrb.mxu0 %v8308_v37  ;;  %v8333_v36 = vld [vmem:[#allocation4 + $0x838] sm:$0xf0]  ;;  %v4505_v37 = vld [vmem:[#allocation3 + $0x60] sm:$0x1]  ;;  %v8747_v26 = vld [vmem:[#allocation4 + $0xb70] sm:$0xf] }
 0x4ca   :  { %4445 = vmatmul.bf16.vlgmr.msra.gmra.mxu3 %v12049_v49  ;;  %5027 = vmatpush.bf16.msra.mxu2 %v8424_v51  ;;  %v8336_v24 = vor.u32 %v9694_v16, %v8333_v36  ;;  %v8381_v51 = vld [vmem:[#allocation4 + $0x898] sm:$0xf0]  ;;  %v4507_v54 = vrot.slane %v4505_v37, 7  ;;  %v8684_v16 = vor.u32 %v9783_v25, %v8683_v6  ;;  %v9722_v36 = vld [vmem:[#allocation4 + $0x914] sm:$0xf] }
 0x4cb   :  { %4489 = vmatpush.bf16.msrb.mxu3 %v8304_v63  ;;  %v8352_v63 = vor.u32 %v9698_v56, %v8349_v9  ;;  %v8384_v2 = vor.u32 %v9706_v62, %v8381_v51  ;;  %v4528_v56 = vld [vmem:[#allocation3 + $0x24] sm:$0x1]  ;;  %v5636_v9 = vld [vmem:[#allocation3 + $0x31] sm:$0x1]  ;;  %v9795_v6 = vld [vmem:[#allocation4 + $0xb54] sm:$0xf0] }
 0x4cc   :  { %v9720_v62 = vld [vmem:[#allocation4 + $0x904] sm:$0xf] }
 0x4cd   :  { %4994 = vmatpush.bf16.msrb.mxu1 %v8436_v12  ;;  %5013 = vmatpush.bf16.msra.mxu0 %v8368_v15  ;;  %v3322_v61 = vpop.f32.mrf.mxu3  ;;  %v12058_v12 = vld [vmem:[#allocation4 + $0x9e0] sm:$0xf]  ;;  %v12060_v15 = vld [vmem:[#allocation4 + $0x9e4] sm:$0xf0] }
 0x4ce   :  { %5028 = vmatpush.bf16.msra.mxu2 %v8416_v21  ;;  %v8548_v50 = vor.u32 %v12060_v15, %v12058_v12  ;;  %v8437_v12 = vld [vmem:[#allocation4 + $0x908] sm:$0xf0]  ;;  %v8619_v15 = vld [vmem:[#allocation4 + $0xa70] sm:$0xf] }
 0x4cf   :  { %4490 = vmatpush.bf16.msrb.mxu3 %v8296_v11  ;;  %v12053_v11 = vadd.f32 %v3322_v61, %v12009_v34  ;;  %v8392_v34 = vor.u32 %v9708_v53, %v8389_v23  ;;  %v9747_v53 = vld [vmem:[#allocation4 + $0x9d4] sm:$0xf0] }
 0x4d0   :  { %v8540_v51 = vor.u32 %v9747_v53, %v8539_v59  ;;  %v8731_v59 = vld [vmem:[#allocation4 + $0xb50] sm:$0xf] }
 0x4d1   :  { %5039 = vmatpush.bf16.msra.mxu1 %v8496_v0  ;;  %5014 = vmatpush.bf16.msra.mxu0 %v8360_v47  ;;  %v4529_v0 = vld [vmem:[#allocation3 + $0x64] sm:$0x1] }
 0x4d2   :  { %5029 = vmatpush.bf16.msra.mxu2 %v8408_v52  ;;  %v4531_v57 = vrot.slane %v4529_v0, 7  ;;  %v8456_v52 = vor.u32 %v9724_v17, %v8453_v48  ;;  %v8667_v17 = vld [vmem:[#allocation4 + $0xad0] sm:$0xf]  ;;  %v9779_v48 = vld [vmem:[#allocation4 + $0xad4] sm:$0xf0] }
 0x4d3   :  { %4491 = vmatpush.bf16.msrb.mxu3 %v8288_v5  ;;  %v9751_v5 = vld [vmem:[#allocation4 + $0x9f4] sm:$0xf0] }
 0x4d4   :  { %v8556_v21 = vor.u32 %v9751_v5, %v8555_v55  ;;  %v4533_v42 = vsel %vm2261_vm14, %v4528_v56, %v4531_v57  ;;  %v8531_v55 = vld [vmem:[#allocation4 + $0x9c0] sm:$0xf]  ;;  %v8620_v57 = vor.u32 %v9767_v3, %v8619_v15  ;;  %v9797_v56 = vld [vmem:[#allocation4 + $0xb64] sm:$0xf0]  ;;  %v4540_v15 = vld [vmem:[#allocation3 + $0x26] sm:$0x1] }
 0x4d5   :  { %5040 = vmatpush.bf16.msra.mxu1 %v8488_v19  ;;  %5015 = vmatpush.bf16.msra.mxu0 %v8352_v63  ;;  %v3324_v47 = vpop.f32.mrf.mxu3  ;;  %v4504_v19 = vld [vmem:[#allocation3 + $0x20] sm:$0x1]  ;;  %v5639_v63 = vrot.slane %v5637_v33, 7  ;;  %v10458_v61 = vpop.permute.xlu2 %10457  ;;  %v8668_v33 = vor.u32 %v9779_v48, %v8667_v17  ;;  %v10455_v17 = vunpack.i.h.bf16 %v12056_v8 }
 0x4d6   :  { %5030 = vmatpush.bf16.msra.mxu2 %v8400_v40  ;;  %v10460_v23 = vunpack.i.h.bf16 %v10458_v61  ;;  %v8611_v47 = vld [vmem:[#allocation4 + $0xa60] sm:$0xf] }
 0x4d7   :  { %4492 = vmatpush.bf16.msrb.mxu3 %v8280_v32  ;;  %v8248_v32 = vor.u32 %v9672_v31, %v8245_v28  ;;  %v5641_v45 = vsel %vm2261_vm14, %v5636_v9, %v5639_v63  ;;  %v9781_v28 = vld [vmem:[#allocation4 + $0xae4] sm:$0xf0]  ;;  %v8523_v9 = vld [vmem:[#allocation4 + $0x9b0] sm:$0xf]  ;;  %v8515_v63 = vld [vmem:[#allocation4 + $0x9a0] sm:$0xf] }
 0x4d8   :  { %v10476_v22 = vpack.i.bf16 %v5665_v41, %v5641_v45  ;;  %v4570_v5 = vsel %vm1034_vm11, %v4533_v42, %v10460_v23  ;;  %v8676_v0 = vor.u32 %v9781_v28, %v8675_v46  ;;  %v4541_v42 = vld [vmem:[#allocation3 + $0x66] sm:$0x1]  ;;  %v5649_v45 = vld [vmem:[#allocation3 + $0x73] sm:$0x1]  ;;  %v8723_v28 = vld [vmem:[#allocation4 + $0xb40] sm:$0xf] }
 0x4d9   :  { %5041 = vmatpush.bf16.msra.mxu1 %v8480_v18  ;;  %5016 = vmatpush.bf16.msra.mxu0 %v8344_v14  ;;  %v8373_v18 = vld [vmem:[#allocation4 + $0x888] sm:$0xf0]  ;;  %v9690_v14 = vld [vmem:[#allocation4 + $0x814] sm:$0xf]  ;;  %v12077_v37 = vpack.c.bf16 %v4570_v5, %v4570_v5  ;;  %v5651_v25 = vrot.slane %v5649_v45, 7 }
 0x4da   :  { %5031 = vmatpush.bf16.msra.mxu2 %v8392_v34  ;;  %v8376_v40 = vor.u32 %v9704_v58, %v8373_v18  ;;  %v8320_v31 = vor.u32 %v9690_v14, %v8317_v35  ;;  %10477 = vrot.lane.b32.xlu0 %v10476_v22, %s10673_s26  ;;  %v8603_v18 = vld [vmem:[#allocation4 + $0xa50] sm:$0xf]  ;;  %v5672_v14 = vld [vmem:[#allocation3 + $0x37] sm:$0x1] }
 0x4db   :  { %4493 = vmatpush.bf16.msrb.mxu3 %v8272_v13  ;;  %v12064_v13 = vpack.c.bf16 %v4569_v60, %v4569_v60  ;;  %4995 = vmatmul.bf16.vlgmr.msrb.gmra.mxu1 %v12077_v37  ;;  %v9765_v60 = vld [vmem:[#allocation4 + $0xa64] sm:$0xf0]  ;;  %v5673_v35 = vld [vmem:[#allocation3 + $0x77] sm:$0x1]  ;;  %v8651_v23 = vld [vmem:[#allocation4 + $0xab0] sm:$0xf] }
 0x4dc   :  { %v8612_v7 = vor.u32 %v9765_v60, %v8611_v47  ;;  %v3857_v41 = vpop.f32.mrf.mxu2  ;;  %v5675_v22 = vrot.slane %v5673_v35, 7  ;;  %v9791_v47 = vld [vmem:[#allocation4 + $0xb34] sm:$0xf0]  ;;  %v9782_v35 = vld [vmem:[#allocation4 + $0xaf4] sm:$0xf] }
 0x4dd   :  { %5042 = vmatpush.bf16.msra.mxu1 %v8472_v27  ;;  %5017 = vmatpush.bf16.msra.mxu0 %v8336_v24  ;;  %v10459_v27 = vunpack.i.l.bf16 %v10458_v61  ;;  %v8309_v24 = vld [vmem:[#allocation4 + $0x808] sm:$0xf0]  ;;  %v5648_v61 = vld [vmem:[#allocation3 + $0x33] sm:$0x1] }
 0x4de   :  { %4982 = vmatmul.bf16.vlgmr.msrb.gmra.mxu2 %v12064_v13  ;;  %v8312_v30 = vor.u32 %v9688_v38, %v8309_v24  ;;  %v5677_v46 = vsel %vm2261_vm14, %v5672_v14, %v5675_v22  ;;  %v8507_v38 = vld [vmem:[#allocation4 + $0x990] sm:$0xf]  ;;  %v9739_v24 = vld [vmem:[#allocation4 + $0x994] sm:$0xf0]  ;;  %v9769_v14 = vld [vmem:[#allocation4 + $0xa84] sm:$0xf0] }
 0x4df   :  { %4494 = vmatpush.bf16.msrb.mxu3 %v8264_v4  ;;  %v4509_v4 = vsel %vm2261_vm14, %v4504_v19, %v4507_v54  ;;  %5032 = vmatpush.bf16.msra.mxu2 %v8384_v2  ;;  %v8440_v54 = vor.u32 %v9720_v62, %v8437_v12  ;;  %v8739_v19 = vld [vmem:[#allocation4 + $0xb60] sm:$0xf]  ;;  %v8508_v48 = vor.u32 %v9739_v24, %v8507_v38  ;;  %v9755_v22 = vld [vmem:[#allocation4 + $0xa14] sm:$0xf0]  ;;  %v8677_v38 = vld [vmem:[#allocation4 + $0xae8] sm:$0xf0] }
 0x4e0   :  { %v4568_v34 = vsel %vm1034_vm11, %v4509_v4, %v10459_v27  ;;  %v8740_v58 = vor.u32 %v9797_v56, %v8739_v19  ;;  %v9775_v27 = vld [vmem:[#allocation4 + $0xab4] sm:$0xf0]  ;;  %v9737_v19 = vld [vmem:[#allocation4 + $0x984] sm:$0xf0]  ;;  %v9750_v56 = vld [vmem:[#allocation4 + $0x9f4] sm:$0xf] }
 0x4e1   :  { %5043 = vmatpush.bf16.msra.mxu1 %v8464_v44  ;;  %5018 = vmatpush.bf16.msra.mxu0 %v8328_v20  ;;  %v9745_v44 = vld [vmem:[#allocation4 + $0x9c4] sm:$0xf0]  ;;  %v9743_v20 = vld [vmem:[#allocation4 + $0x9b4] sm:$0xf0]  ;;  %v8563_v24 = vld [vmem:[#allocation4 + $0xa00] sm:$0xf] }
 0x4e2   :  { %v8532_v2 = vor.u32 %v9745_v44, %v8531_v55  ;;  %v8524_v4 = vor.u32 %v9743_v20, %v8523_v9  ;;  %v9793_v55 = vld [vmem:[#allocation4 + $0xb44] sm:$0xf0] }
 0x4e3   :  { %4495 = vmatpush.bf16.msrb.mxu3 %v8256_v1  ;;  %v8445_v1 = vld [vmem:[#allocation4 + $0x918] sm:$0xf0]  ;;  %5033 = vmatpush.bf16.msra.mxu2 %v8376_v40 }
 0x4e4   :  { %v8448_v39 = vor.u32 %v9722_v36, %v8445_v1  ;;  %v5653_v36 = vsel %vm2261_vm14, %v5648_v61, %v5651_v25  ;;  %v8595_v1 = vld [vmem:[#allocation4 + $0xa40] sm:$0xf]  ;;  %v3859_v20 = vpop.f32.mrf.mxu2  ;;  %v8549_v61 = vld [vmem:[#allocation4 + $0x9e8] sm:$0xf0] }
 0x4e5   :  { %5044 = vmatpush.bf16.msra.mxu1 %v8456_v52  ;;  %5019 = vmatpush.bf16.msra.mxu0 %v8320_v31  ;;  %v9777_v52 = vld [vmem:[#allocation4 + $0xac4] sm:$0xf0]  ;;  %v10471_v12 = vpack.i.bf16 %v5677_v46, %v5653_v36  ;;  %v8627_v25 = vld [vmem:[#allocation4 + $0xa80] sm:$0xf]  ;;  %v9787_v36 = vld [vmem:[#allocation4 + $0xb14] sm:$0xf0] }
 0x4e6   :  { %v8660_v40 = vor.u32 %v9777_v52, %v8659_v29  ;;  %v9761_v31 = vld [vmem:[#allocation4 + $0xa44] sm:$0xf0]  ;;  %v3844_v62 = vpop.f32.mrf.mxu0  ;;  %v3870_v44 = vpop.f32.mrf.mxu1  ;;  %v8635_v29 = vld [vmem:[#allocation4 + $0xa90] sm:$0xf]  ;;  %v9771_v52 = vld [vmem:[#allocation4 + $0xa94] sm:$0xf0]  ;;  %v8628_v46 = vor.u32 %v9769_v14, %v8627_v25 }
 0x4e7   :  { %4496 = vmatpush.bf16.msrb.mxu3 %v8248_v32  ;;  %5537 = vmatpush.bf16.msrb.mxu2 %v8684_v16  ;;  %v9799_v32 = vld [vmem:[#allocation4 + $0xb74] sm:$0xf0]  ;;  %v8732_v16 = vor.u32 %v9795_v6, %v8731_v59  ;;  %v3858_v3 = vadd.f32 %v3857_v41, %v3844_v62  ;;  %v9789_v59 = vld [vmem:[#allocation4 + $0xb24] sm:$0xf0]  ;;  %v9748_v6 = vld [vmem:[#allocation4 + $0x9e4] sm:$0xf]  ;;  %v8636_v41 = vor.u32 %v9771_v52, %v8635_v29 }
 0x4e8   :  { %10472 = vrot.lane.b32.xlu2 %v10471_v12, %s10673_s26  ;;  %v8691_v12 = vld [vmem:[#allocation4 + $0xb00] sm:$0xf]  ;;  %v8669_v20 = vld [vmem:[#allocation4 + $0xad8] sm:$0xf0]  ;;  %v9776_v25 = vld [vmem:[#allocation4 + $0xac4] sm:$0xf] }
 0x4e9   :  { %5045 = vmatpush.bf16.msra.mxu1 %v8448_v39  ;;  %5020 = vmatpush.bf16.msra.mxu0 %v8312_v30  ;;  %v8516_v39 = vor.u32 %v9741_v10, %v8515_v63  ;;  %v8643_v30 = vld [vmem:[#allocation4 + $0xaa0] sm:$0xf]  ;;  %v9757_v10 = vld [vmem:[#allocation4 + $0xa24] sm:$0xf0]  ;;  %v8661_v14 = vld [vmem:[#allocation4 + $0xac8] sm:$0xf0] }
 0x4ea   :  { %4497 = vmatmul.bf16.vlgmr.msrb.gmra.mxu3 %v12049_v49  ;;  %v12079_v49 = vpack.c.bf16 %v4568_v34, %v4568_v34  ;;  %v4543_v34 = vrot.slane %v4541_v42, 7  ;;  %v8579_v63 = vld [vmem:[#allocation4 + $0xa20] sm:$0xf] }
 0x4eb   :  { %5000 = vmatpush.bf16.msra.mxu3 %v8556_v21  ;;  %v8748_v21 = vor.u32 %v9799_v32, %v8747_v26  ;;  %5538 = vmatpush.bf16.msrb.mxu2 %v8676_v0  ;;  %v8596_v0 = vor.u32 %v9761_v31, %v8595_v1  ;;  %v9773_v26 = vld [vmem:[#allocation4 + $0xaa4] sm:$0xf0]  ;;  %v8724_v32 = vor.u32 %v9793_v55, %v8723_v28  ;;  %v9746_v31 = vld [vmem:[#allocation4 + $0x9d4] sm:$0xf] }
 0x4ec   :  { %4969 = vmatmul.bf16.vlgmr.msrb.gmra.mxu0 %v12079_v49  ;;  %v4545_v60 = vsel %vm2261_vm14, %v4540_v15, %v4543_v34  ;;  %v8644_v9 = vor.u32 %v9773_v26, %v8643_v30  ;;  %v8552_v1 = vor.u32 %v9748_v6, %v8549_v61  ;;  %v9780_v34 = vld [vmem:[#allocation4 + $0xae4] sm:$0xf]  ;;  %v9785_v15 = vld [vmem:[#allocation4 + $0xb04] sm:$0xf0]  ;;  %v9742_v6 = vld [vmem:[#allocation4 + $0x9b4] sm:$0xf] }
 0x4ed   :  { %5046 = vmatpush.bf16.msra.mxu1 %v8440_v54  ;;  %5524 = vmatpush.bf16.msrb.mxu0 %v8620_v57  ;;  %v3374_v5 = vpop.f32.mrf.mxu3  ;;  %v8587_v54 = vld [vmem:[#allocation4 + $0xa30] sm:$0xf]  ;;  %v9759_v57 = vld [vmem:[#allocation4 + $0xa34] sm:$0xf0]  ;;  %v8525_v61 = vld [vmem:[#allocation4 + $0x9b8] sm:$0xf0] }
 0x4ee   :  { %5034 = vmatmul.bf16.vlgmr.msra.gmra.mxu2 %v12064_v13  ;;  %v12087_v13 = vadd.f32 %v3374_v5, %v12047_v43  ;;  %v8715_v43 = vld [vmem:[#allocation4 + $0xb30] sm:$0xf]  ;;  %v3846_v45 = vpop.f32.mrf.mxu0 }
 0x4ef   :  { %5001 = vmatpush.bf16.msra.mxu3 %v8548_v50  ;;  %v9763_v50 = vld [vmem:[#allocation4 + $0xa54] sm:$0xf0]  ;;  %5539 = vmatpush.bf16.msrb.mxu2 %v8668_v33  ;;  %v8557_v33 = vld [vmem:[#allocation4 + $0x9f8] sm:$0xf0]  ;;  %v8716_v8 = vor.u32 %v9791_v47, %v8715_v43  ;;  %v3909_v5 = vpop.f32.mrf.mxu2 }
 0x4f0   :  { %v8604_v53 = vor.u32 %v9763_v50, %v8603_v18  ;;  %5047 = vmatmul.bf16.vlgmr.msra.gmra.mxu1 %v12077_v37  ;;  %v8707_v50 = vld [vmem:[#allocation4 + $0xb20] sm:$0xf]  ;;  %v8560_v42 = vor.u32 %v9750_v56, %v8557_v33  ;;  %v8685_v37 = vld [vmem:[#allocation4 + $0xaf8] sm:$0xf0]  ;;  %v8692_v56 = vor.u32 %v9785_v15, %v8691_v12  ;;  %v6211_v33 = vld [vmem:[#allocation3 + $0x3b] sm:$0x1] }
 0x4f1   :  { %5550 = vmatpush.bf16.msrb.mxu1 %v8748_v21  ;;  %5525 = vmatpush.bf16.msrb.mxu0 %v8612_v7  ;;  %v12091_v21 = vadd.f32 %v3870_v44, %v3858_v3  ;;  %v8588_v7 = vor.u32 %v9759_v57, %v8587_v54  ;;  %v8688_v28 = vor.u32 %v9782_v35, %v8685_v37  ;;  %v9766_v3 = vld [vmem:[#allocation4 + $0xa74] sm:$0xf]  ;;  %v8621_v44 = vld [vmem:[#allocation4 + $0xa78] sm:$0xf0]  ;;  %v6212_v54 = vld [vmem:[#allocation3 + $0x7b] sm:$0x1] }
 0x4f2   :  { %v6236_v57 = vld [vmem:[#allocation3 + $0x7f] sm:$0x1]  ;;  %v8725_v12 = vld [vmem:[#allocation4 + $0xb48] sm:$0xf0] }
 0x4f3   :  { %5002 = vmatpush.bf16.msra.mxu3 %v8540_v51  ;;  %5540 = vmatpush.bf16.msrb.mxu2 %v8660_v40  ;;  %v8652_v51 = vor.u32 %v9775_v27, %v8651_v23  ;;  %v8580_v40 = vor.u32 %v9757_v10, %v8579_v63  ;;  %v8708_v23 = vor.u32 %v9789_v59, %v8707_v50  ;;  %v8571_v27 = vld [vmem:[#allocation4 + $0xa10] sm:$0xf]  ;;  %v6238_v29 = vrot.slane %v6236_v57, 7  ;;  %v9764_v63 = vld [vmem:[#allocation4 + $0xa64] sm:$0xf] }
 0x4f4   :  { %v8572_v55 = vor.u32 %v9755_v22, %v8571_v27  ;;  %v8613_v10 = vld [vmem:[#allocation4 + $0xa68] sm:$0xf0]  ;;  %v9796_v50 = vld [vmem:[#allocation4 + $0xb64] sm:$0xf]  ;;  %v8605_v37 = vld [vmem:[#allocation4 + $0xa58] sm:$0xf0]  ;;  %v8528_v27 = vor.u32 %v9742_v6, %v8525_v61 }
 0x4f5   :  { %5551 = vmatpush.bf16.msrb.mxu1 %v8740_v58  ;;  %5526 = vmatpush.bf16.msrb.mxu0 %v8604_v53  ;;  %v4571_v58 = vsel %vm1034_vm11, %v4545_v60, %v10455_v17  ;;  %v9744_v17 = vld [vmem:[#allocation4 + $0x9c4] sm:$0xf]  ;;  %v8680_v60 = vor.u32 %v9780_v34, %v8677_v38  ;;  %v8741_v59 = vld [vmem:[#allocation4 + $0xb68] sm:$0xf0] }
 0x4f6   :  { %v12097_v53 = vpack.c.bf16 %v4571_v58, %v4571_v58  ;;  %v3896_v26 = vpop.f32.mrf.mxu0  ;;  %v6235_v58 = vld [vmem:[#allocation3 + $0x3f] sm:$0x1]  ;;  %v8744_v35 = vor.u32 %v9796_v50, %v8741_v59  ;;  %v9760_v38 = vld [vmem:[#allocation4 + $0xa44] sm:$0xf]  ;;  %v8581_v6 = vld [vmem:[#allocation4 + $0xa28] sm:$0xf0] }
 0x4f7   :  { %5003 = vmatpush.bf16.msra.mxu3 %v8532_v2  ;;  %v8499_v2 = vld [vmem:[#allocation4 + $0x980] sm:$0xf]  ;;  %5541 = vmatpush.bf16.msrb.mxu2 %v8652_v51  ;;  %v9753_v51 = vld [vmem:[#allocation4 + $0xa04] sm:$0xf0]  ;;  %v3910_v43 = vadd.f32 %v3909_v5, %v3896_v26  ;;  %v8653_v5 = vld [vmem:[#allocation4 + $0xab8] sm:$0xf0] }
 0x4f8   :  { %v8500_v18 = vor.u32 %v9737_v19, %v8499_v2  ;;  %v8564_v2 = vor.u32 %v9753_v51, %v8563_v24  ;;  %v9778_v19 = vld [vmem:[#allocation4 + $0xad4] sm:$0xf]  ;;  %v8597_v24 = vld [vmem:[#allocation4 + $0xa48] sm:$0xf0]  ;;  %v9792_v51 = vld [vmem:[#allocation4 + $0xb44] sm:$0xf] }
 0x4f9   :  { %5552 = vmatpush.bf16.msrb.mxu1 %v8732_v16  ;;  %5527 = vmatpush.bf16.msrb.mxu0 %v8596_v0  ;;  %v8699_v16 = vld [vmem:[#allocation4 + $0xb10] sm:$0xf]  ;;  %v9798_v0 = vld [vmem:[#allocation4 + $0xb74] sm:$0xf]  ;;  %v8672_v45 = vor.u32 %v9778_v19, %v8669_v20  ;;  %v9772_v57 = vld [vmem:[#allocation4 + $0xaa4] sm:$0xf] }
 0x4fa   :  { %v8700_v62 = vor.u32 %v9787_v36, %v8699_v16  ;;  %v9794_v16 = vld [vmem:[#allocation4 + $0xb54] sm:$0xf]  ;;  %v8733_v36 = vld [vmem:[#allocation4 + $0xb58] sm:$0xf0] }
 0x4fb   :  { %5004 = vmatpush.bf16.msra.mxu3 %v8524_v4  ;;  %v3376_v4 = vpop.f32.mrf.mxu3  ;;  %5542 = vmatpush.bf16.msrb.mxu2 %v8644_v9  ;;  %v8624_v9 = vor.u32 %v9766_v3, %v8621_v44  ;;  %v8736_v34 = vor.u32 %v9794_v16, %v8733_v36  ;;  %v9738_v3 = vld [vmem:[#allocation4 + $0x994] sm:$0xf]  ;;  %v8509_v44 = vld [vmem:[#allocation4 + $0x998] sm:$0xf0]  ;;  %v5091_v16 = vld [vmem:[#allocation3 + $0x2c] sm:$0x1] }
 0x4fc   :  { %5021 = vmatmul.bf16.vlgmr.msra.gmra.mxu0 %v12079_v49  ;;  %v3872_v49 = vpop.f32.mrf.mxu1  ;;  %v8512_v19 = vor.u32 %v9738_v3, %v8509_v44  ;;  %v8717_v20 = vld [vmem:[#allocation4 + $0xb38] sm:$0xf0] }
 0x4fd   :  { %5553 = vmatpush.bf16.msrb.mxu1 %v8724_v32  ;;  %5528 = vmatpush.bf16.msrb.mxu0 %v8588_v7  ;;  %v8749_v32 = vld [vmem:[#allocation4 + $0xb78] sm:$0xf0]  ;;  %v6214_v7 = vrot.slane %v6212_v54, 7 }
 0x4fe   :  { %v3898_v22 = vpop.f32.mrf.mxu0 }
 0x4ff   :  { %5005 = vmatpush.bf16.msra.mxu3 %v8516_v39  ;;  %v8541_v39 = vld [vmem:[#allocation4 + $0x9d8] sm:$0xf0]  ;;  %5543 = vmatpush.bf16.msrb.mxu2 %v8636_v41  ;;  %v6216_v4 = vsel %vm2261_vm14, %v6211_v33, %v6214_v7  ;;  %v3911_v41 = vpop.f32.mrf.mxu2  ;;  %v8501_v33 = vld [vmem:[#allocation4 + $0x988] sm:$0xf0]  ;;  %v9815_v7 = vld [vmem:[#allocation4 + $0xbf4] sm:$0xf0] }
 0x500   :  { %v8544_v30 = vor.u32 %v9746_v31, %v8541_v39  ;;  %v8517_v31 = vld [vmem:[#allocation4 + $0x9a8] sm:$0xf0] }
 0x501   :  { %5554 = vmatpush.bf16.msrb.mxu1 %v8716_v8  ;;  %5529 = vmatpush.bf16.msrb.mxu0 %v8580_v40  ;;  %v8752_v8 = vor.u32 %v9798_v0, %v8749_v32  ;;  %v8616_v40 = vor.u32 %v9764_v63, %v8613_v10  ;;  %v8600_v32 = vor.u32 %v9760_v38, %v8597_v24  ;;  %v8709_v41 = vld [vmem:[#allocation4 + $0xb28] sm:$0xf0]  ;;  %v9786_v38 = vld [vmem:[#allocation4 + $0xb14] sm:$0xf]  ;;  %v8701_v24 = vld [vmem:[#allocation4 + $0xb18] sm:$0xf0] }
 0x503   :  { %5006 = vmatpush.bf16.msra.mxu3 %v8508_v48  ;;  %5544 = vmatpush.bf16.msrb.mxu2 %v8628_v46  ;;  %v8533_v48 = vld [vmem:[#allocation4 + $0x9c8] sm:$0xf0]  ;;  %v8664_v46 = vor.u32 %v9776_v25, %v8661_v14  ;;  %v9813_v25 = vld [vmem:[#allocation4 + $0xbe4] sm:$0xf0] }
 0x504   :  { %v3922_v47 = vpop.f32.mrf.mxu1 }
 0x505   :  { %5555 = vmatpush.bf16.msrb.mxu1 %v8708_v23  ;;  %5530 = vmatpush.bf16.msrb.mxu0 %v8572_v55  ;;  %v12100_v52 = vadd.f32 %v3922_v47, %v3910_v43  ;;  %v9762_v23 = vld [vmem:[#allocation4 + $0xa54] sm:$0xf]  ;;  %v5079_v43 = vld [vmem:[#allocation3 + $0x2a] sm:$0x1] }
 0x506   :  { %v9774_v55 = vld [vmem:[#allocation4 + $0xab4] sm:$0xf] }
 0x507   :  { %5007 = vmatpush.bf16.msra.mxu3 %v8500_v18  ;;  %5589 = vmatpush.bf16.msra.mxu2 %v8688_v28  ;;  %v8536_v18 = vor.u32 %v9744_v17, %v8533_v48  ;;  %v8608_v28 = vor.u32 %v9762_v23, %v8605_v37  ;;  %v8656_v0 = vor.u32 %v9774_v55, %v8653_v5  ;;  %v8645_v17 = vld [vmem:[#allocation4 + $0xaa8] sm:$0xf0]  ;;  %v9758_v47 = vld [vmem:[#allocation4 + $0xa34] sm:$0xf]  ;;  %v9847_v55 = vld [vmem:[#allocation4 + $0xcf4] sm:$0xf0] }
 0x508   :  { %v8728_v48 = vor.u32 %v9792_v51, %v8725_v12  ;;  %v9754_v5 = vld [vmem:[#allocation4 + $0xa14] sm:$0xf]  ;;  %v8795_v12 = vld [vmem:[#allocation4 + $0xbd0] sm:$0xf] }
 0x509   :  { %5556 = vmatpush.bf16.msrb.mxu1 %v8700_v62  ;;  %5531 = vmatpush.bf16.msrb.mxu0 %v8564_v2 }
 0x50a   :  { %5008 = vmatmul.bf16.vlgmr.msra.gmra.mxu3 %v12097_v53 }
 0x50b   :  { %5052 = vmatpush.bf16.msrb.mxu3 %v8560_v42  ;;  %v6240_v42 = vsel %vm2261_vm14, %v6235_v58, %v6238_v29  ;;  %5590 = vmatpush.bf16.msra.mxu2 %v8680_v60  ;;  %v8589_v60 = vld [vmem:[#allocation4 + $0xa38] sm:$0xf0]  ;;  %v8648_v29 = vor.u32 %v9772_v57, %v8645_v17  ;;  %v12110_v63 = vpop.permute.xlu0 %10462  ;;  %v9770_v58 = vld [vmem:[#allocation4 + $0xa94] sm:$0xf]  ;;  %v9845_v57 = vld [vmem:[#allocation4 + $0xce4] sm:$0xf0] }
 0x50c   :  { %v10481_v49 = vpack.i.bf16 %v6240_v42, %v6216_v4  ;;  %v3924_v39 = vpop.f32.mrf.mxu1  ;;  %v8592_v10 = vor.u32 %v9758_v47, %v8589_v60  ;;  %v10464_v50 = vunpack.i.l.bf16 %v12110_v63  ;;  %v5068_v4 = vld [vmem:[#allocation3 + $0x68] sm:$0x1]  ;;  %v5092_v42 = vld [vmem:[#allocation3 + $0x6c] sm:$0x1]  ;;  %v9752_v17 = vld [vmem:[#allocation4 + $0xa04] sm:$0xf] }
 0x50d   :  { %5557 = vmatpush.bf16.msrb.mxu1 %v8692_v56  ;;  %5576 = vmatpush.bf16.msra.mxu0 %v8624_v9  ;;  %v3883_v15 = vpop.f32.mrf.mxu3  ;;  %v9736_v56 = vld [vmem:[#allocation4 + $0x984] sm:$0xf]  ;;  %v9790_v9 = vld [vmem:[#allocation4 + $0xb34] sm:$0xf]  ;;  %v5070_v22 = vrot.slane %v5068_v4, 7  ;;  %v5094_v36 = vrot.slane %v5092_v42, 7 }
 0x50e   :  { %10482 = vrot.lane.b32.xlu1 %v10481_v49, %s10673_s26  ;;  %v3884_v26 = vadd.f32 %v3883_v15, %v12091_v21  ;;  %v8811_v21 = vld [vmem:[#allocation4 + $0xbf0] sm:$0xf]  ;;  %v8720_v59 = vor.u32 %v9790_v9, %v8717_v20  ;;  %v8504_v61 = vor.u32 %v9736_v56, %v8501_v33  ;;  %v8629_v39 = vld [vmem:[#allocation4 + $0xa88] sm:$0xf0]  ;;  %v9811_v15 = vld [vmem:[#allocation4 + $0xbd4] sm:$0xf0] }
 0x50f   :  { %5053 = vmatpush.bf16.msrb.mxu3 %v8552_v1  ;;  %v9740_v1 = vld [vmem:[#allocation4 + $0x9a4] sm:$0xf]  ;;  %5591 = vmatpush.bf16.msra.mxu2 %v8672_v45  ;;  %v8812_v49 = vor.u32 %v9815_v7, %v8811_v21  ;;  %v8693_v56 = vld [vmem:[#allocation4 + $0xb08] sm:$0xf0]  ;;  %v8875_v9 = vld [vmem:[#allocation4 + $0xc70] sm:$0xf]  ;;  %v8796_v20 = vor.u32 %v9811_v15, %v8795_v12 }
 0x510   :  { %v8520_v62 = vor.u32 %v9740_v1, %v8517_v31  ;;  %v12107_v2 = vadd.f32 %v3884_v26, %v12053_v11  ;;  %v9756_v11 = vld [vmem:[#allocation4 + $0xa24] sm:$0xf]  ;;  %v5096_v26 = vsel %vm2261_vm14, %v5091_v16, %v5094_v36  ;;  %v9003_v33 = vld [vmem:[#allocation4 + $0xd70] sm:$0xf]  ;;  %v9863_v21 = vld [vmem:[#allocation4 + $0xd74] sm:$0xf0] }
 0x511   :  { %5602 = vmatpush.bf16.msra.mxu1 %v8752_v8  ;;  %5577 = vmatpush.bf16.msra.mxu0 %v8616_v40  ;;  %v9788_v45 = vld [vmem:[#allocation4 + $0xb24] sm:$0xf]  ;;  %v8803_v40 = vld [vmem:[#allocation4 + $0xbe0] sm:$0xf]  ;;  %v8584_v1 = vor.u32 %v9756_v11, %v8581_v6  ;;  %v9809_v7 = vld [vmem:[#allocation4 + $0xbc4] sm:$0xf0] }
 0x512   :  { %v9768_v31 = vld [vmem:[#allocation4 + $0xa84] sm:$0xf]  ;;  %v8867_v42 = vld [vmem:[#allocation4 + $0xc60] sm:$0xf]  ;;  %v9829_v6 = vld [vmem:[#allocation4 + $0xc64] sm:$0xf0] }
 0x513   :  { %5054 = vmatpush.bf16.msrb.mxu3 %v8544_v30  ;;  %5592 = vmatpush.bf16.msra.mxu2 %v8664_v46  ;;  %v5080_v30 = vld [vmem:[#allocation3 + $0x6a] sm:$0x1]  ;;  %v8712_v46 = vor.u32 %v9788_v45, %v8709_v41  ;;  %v8632_v51 = vor.u32 %v9768_v31, %v8629_v39  ;;  %v9004_v41 = vor.u32 %v9863_v21, %v9003_v33  ;;  %v9807_v16 = vld [vmem:[#allocation4 + $0xbb4] sm:$0xf0]  ;;  %v8915_v39 = vld [vmem:[#allocation4 + $0xcc0] sm:$0xf] }
 0x514   :  { %v5082_v54 = vrot.slane %v5080_v30, 7  ;;  %v9827_v12 = vld [vmem:[#allocation4 + $0xc54] sm:$0xf0]  ;;  %v8987_v15 = vld [vmem:[#allocation4 + $0xd50] sm:$0xf] }
 0x515   :  { %5603 = vmatpush.bf16.msra.mxu1 %v8744_v35  ;;  %5578 = vmatpush.bf16.msra.mxu0 %v8608_v28  ;;  %v3885_v14 = vpop.f32.mrf.mxu3  ;;  %v8939_v28 = vld [vmem:[#allocation4 + $0xcf0] sm:$0xf]  ;;  %v9803_v21 = vld [vmem:[#allocation4 + $0xb94] sm:$0xf0] }
 0x516   :  { %v5084_v8 = vsel %vm2261_vm14, %v5079_v43, %v5082_v54  ;;  %v8940_v3 = vor.u32 %v9847_v55, %v8939_v28  ;;  %v8704_v54 = vor.u32 %v9786_v38, %v8701_v24  ;;  %v8787_v43 = vld [vmem:[#allocation4 + $0xbc0] sm:$0xf]  ;;  %v8868_v55 = vor.u32 %v9829_v6, %v8867_v42  ;;  %v8859_v38 = vld [vmem:[#allocation4 + $0xc50] sm:$0xf] }
 0x517   :  { %5055 = vmatpush.bf16.msrb.mxu3 %v8536_v18  ;;  %5593 = vmatpush.bf16.msra.mxu2 %v8656_v0  ;;  %v8637_v18 = vld [vmem:[#allocation4 + $0xa98] sm:$0xf0]  ;;  %v5132_v35 = vsel %vm1034_vm11, %v5084_v8, %v10464_v50  ;;  %v8931_v0 = vld [vmem:[#allocation4 + $0xce0] sm:$0xf]  ;;  %v8788_v14 = vor.u32 %v9809_v7, %v8787_v43  ;;  %v4433_v28 = vpop.f32.mrf.mxu1  ;;  %v8763_v33 = vld [vmem:[#allocation4 + $0xb90] sm:$0xf] }
 0x518   :  { %v8640_v23 = vor.u32 %v9770_v58, %v8637_v18  ;;  %v12114_v37 = vpack.c.bf16 %v5132_v35, %v5132_v35  ;;  %v8923_v58 = vld [vmem:[#allocation4 + $0xcd0] sm:$0xf]  ;;  %v9843_v18 = vld [vmem:[#allocation4 + $0xcd4] sm:$0xf0] }
 0x519   :  { %5604 = vmatpush.bf16.msra.mxu1 %v8736_v34  ;;  %5579 = vmatpush.bf16.msra.mxu0 %v8600_v32  ;;  %v8573_v34 = vld [vmem:[#allocation4 + $0xa18] sm:$0xf0]  ;;  %v10468_v32 = vpop.permute.xlu1 %10467  ;;  %v8924_v36 = vor.u32 %v9843_v18, %v8923_v58  ;;  %v8899_v58 = vld [vmem:[#allocation4 + $0xca0] sm:$0xf]  ;;  %v9837_v18 = vld [vmem:[#allocation4 + $0xca4] sm:$0xf0] }
 0x51a   :  { %5545 = vmatmul.bf16.vlgmr.msrb.gmra.mxu2 %v12114_v37  ;;  %v8576_v44 = vor.u32 %v9754_v5, %v8573_v34  ;;  %v10470_v47 = vunpack.i.h.bf16 %v10468_v32  ;;  %v10469_v60 = vunpack.i.l.bf16 %v10468_v32  ;;  %v4420_v32 = vpop.f32.mrf.mxu2  ;;  %v8843_v42 = vld [vmem:[#allocation4 + $0xc30] sm:$0xf] }
 0x51b   :  { %5056 = vmatpush.bf16.msrb.mxu3 %v8528_v27  ;;  %5594 = vmatpush.bf16.msra.mxu2 %v8648_v29  ;;  %v5067_v27 = vld [vmem:[#allocation3 + $0x28] sm:$0x1] }
 0x51c   :  { %v5072_v30 = vsel %vm2261_vm14, %v5067_v27, %v5070_v22  ;;  %v5133_v29 = vsel %vm1034_vm11, %v5096_v26, %v10470_v47  ;;  %v6224_v27 = vld [vmem:[#allocation3 + $0x7d] sm:$0x1]  ;;  %v8779_v22 = vld [vmem:[#allocation4 + $0xbb0] sm:$0xf]  ;;  %v5104_v26 = vld [vmem:[#allocation3 + $0x6e] sm:$0x1] }
 0x51d   :  { %5605 = vmatpush.bf16.msra.mxu1 %v8728_v48  ;;  %5580 = vmatpush.bf16.msra.mxu0 %v8592_v10  ;;  %v8565_v48 = vld [vmem:[#allocation4 + $0xa08] sm:$0xf0]  ;;  %v5131_v8 = vsel %vm1034_vm11, %v5072_v30, %v10469_v60  ;;  %v8932_v10 = vor.u32 %v9845_v57, %v8931_v0  ;;  %v12122_v11 = vpack.c.bf16 %v5133_v29, %v5133_v29  ;;  %v9805_v0 = vld [vmem:[#allocation4 + $0xba4] sm:$0xf0]  ;;  %v9839_v57 = vld [vmem:[#allocation4 + $0xcb4] sm:$0xf0] }
 0x51e   :  { %v12124_v50 = vpack.c.bf16 %v5131_v8, %v5131_v8  ;;  %v8780_v24 = vor.u32 %v9807_v16, %v8779_v22  ;;  %v8851_v47 = vld [vmem:[#allocation4 + $0xc40] sm:$0xf]  ;;  %v8813_v22 = vld [vmem:[#allocation4 + $0xbf8] sm:$0xf0] }
 0x51f   :  { %5057 = vmatpush.bf16.msrb.mxu3 %v8520_v62  ;;  %v8804_v62 = vor.u32 %v9813_v25, %v8803_v40  ;;  %5595 = vmatpush.bf16.msra.mxu2 %v8640_v23  ;;  %v6199_v40 = vld [vmem:[#allocation3 + $0x39] sm:$0x1]  ;;  %v6223_v23 = vld [vmem:[#allocation3 + $0x3d] sm:$0x1] }
 0x520   :  { %v6200_v25 = vld [vmem:[#allocation3 + $0x79] sm:$0x1]  ;;  %5532 = vmatmul.bf16.vlgmr.msrb.gmra.mxu0 %v12124_v50  ;;  %5558 = vmatmul.bf16.vlgmr.msrb.gmra.mxu1 %v12122_v11 }
 0x521   :  { %5606 = vmatpush.bf16.msra.mxu1 %v8720_v59  ;;  %5581 = vmatpush.bf16.msra.mxu0 %v8584_v1  ;;  %v8568_v59 = vor.u32 %v9752_v17, %v8565_v48  ;;  %v6202_v35 = vrot.slane %v6200_v25, 7  ;;  %v6226_v1 = vrot.slane %v6224_v27, 7  ;;  %v8860_v48 = vor.u32 %v9827_v12, %v8859_v38  ;;  %v8883_v12 = vld [vmem:[#allocation4 + $0xc80] sm:$0xf] }
 0x522   :  { %v8900_v27 = vor.u32 %v9837_v18, %v8899_v58  ;;  %v4422_v16 = vpop.f32.mrf.mxu2  ;;  %v8947_v58 = vld [vmem:[#allocation4 + $0xd00] sm:$0xf] }
 0x523   :  { %5058 = vmatpush.bf16.msrb.mxu3 %v8512_v19  ;;  %v9784_v19 = vld [vmem:[#allocation4 + $0xb04] sm:$0xf]  ;;  %5596 = vmatpush.bf16.msra.mxu2 %v8632_v51  ;;  %v6204_v31 = vsel %vm2261_vm14, %v6199_v40, %v6202_v35  ;;  %v6228_v34 = vsel %vm2261_vm14, %v6223_v23, %v6226_v1  ;;  %v4407_v51 = vpop.f32.mrf.mxu0  ;;  %v9855_v40 = vld [vmem:[#allocation4 + $0xd34] sm:$0xf0]  ;;  %v9801_v35 = vld [vmem:[#allocation4 + $0xb84] sm:$0xf0] }
 0x524   :  { %v8696_v4 = vor.u32 %v9784_v19, %v8693_v56  ;;  %v4421_v17 = vadd.f32 %v4420_v32, %v4407_v51  ;;  %v9825_v19 = vld [vmem:[#allocation4 + $0xc44] sm:$0xf0]  ;;  %v8979_v56 = vld [vmem:[#allocation4 + $0xd40] sm:$0xf]  ;;  %v9814_v23 = vld [vmem:[#allocation4 + $0xbf4] sm:$0xf] }
 0x525   :  { %5607 = vmatpush.bf16.msra.mxu1 %v8712_v46  ;;  %5582 = vmatpush.bf16.msra.mxu0 %v8576_v44  ;;  %v9841_v46 = vld [vmem:[#allocation4 + $0xcc4] sm:$0xf0]  ;;  %v8771_v44 = vld [vmem:[#allocation4 + $0xba0] sm:$0xf]  ;;  %v8805_v51 = vld [vmem:[#allocation4 + $0xbe8] sm:$0xf0] }
 0x526   :  { %v8916_v30 = vor.u32 %v9841_v46, %v8915_v39  ;;  %v8772_v60 = vor.u32 %v9805_v0, %v8771_v44  ;;  %v12132_v7 = vadd.f32 %v4433_v28, %v4421_v17  ;;  %v8835_v46 = vld [vmem:[#allocation4 + $0xc20] sm:$0xf]  ;;  %v9821_v28 = vld [vmem:[#allocation4 + $0xc24] sm:$0xf0]  ;;  %v8941_v0 = vld [vmem:[#allocation4 + $0xcf8] sm:$0xf0] }
 0x527   :  { %5059 = vmatpush.bf16.msrb.mxu3 %v8504_v61  ;;  %6100 = vmatpush.bf16.msrb.mxu2 %v8940_v3  ;;  %v8995_v61 = vld [vmem:[#allocation4 + $0xd60] sm:$0xf]  ;;  %v9859_v3 = vld [vmem:[#allocation4 + $0xd54] sm:$0xf0]  ;;  %v8836_v44 = vor.u32 %v9821_v28, %v8835_v46  ;;  %v9806_v16 = vld [vmem:[#allocation4 + $0xbb4] sm:$0xf] }
 0x528   :  { %v8988_v43 = vor.u32 %v9859_v3, %v8987_v15  ;;  %v9833_v15 = vld [vmem:[#allocation4 + $0xc84] sm:$0xf0]  ;;  %v9819_v32 = vld [vmem:[#allocation4 + $0xc14] sm:$0xf0]  ;;  %v9860_v46 = vld [vmem:[#allocation4 + $0xd64] sm:$0xf] }
 0x529   :  { %5608 = vmatpush.bf16.msra.mxu1 %v8704_v54  ;;  %5583 = vmatpush.bf16.msra.mxu0 %v8568_v59  ;;  %v8907_v54 = vld [vmem:[#allocation4 + $0xcb0] sm:$0xf]  ;;  %v4435_v59 = vpop.f32.mrf.mxu1  ;;  %v8884_v17 = vor.u32 %v9833_v15, %v8883_v12  ;;  %v8997_v28 = vld [vmem:[#allocation4 + $0xd68] sm:$0xf0]  ;;  %v8861_v12 = vld [vmem:[#allocation4 + $0xc58] sm:$0xf0] }
 0x52a   :  { %5060 = vmatmul.bf16.vlgmr.msrb.gmra.mxu3 %v12097_v53  ;;  %v9831_v53 = vld [vmem:[#allocation4 + $0xc74] sm:$0xf0]  ;;  %5597 = vmatmul.bf16.vlgmr.msra.gmra.mxu2 %v12114_v37  ;;  %v8908_v29 = vor.u32 %v9839_v57, %v8907_v54  ;;  %v8852_v37 = vor.u32 %v9825_v19, %v8851_v47  ;;  %v9810_v47 = vld [vmem:[#allocation4 + $0xbd4] sm:$0xf]  ;;  %v8773_v15 = vld [vmem:[#allocation4 + $0xba8] sm:$0xf0] }
 0x52b   :  { %5563 = vmatpush.bf16.msra.mxu3 %v8812_v49  ;;  %v8876_v45 = vor.u32 %v9831_v53, %v8875_v9  ;;  %v9861_v49 = vld [vmem:[#allocation4 + $0xd64] sm:$0xf0]  ;;  %6101 = vmatpush.bf16.msrb.mxu2 %v8932_v10  ;;  %v5106_v53 = vrot.slane %v5104_v26, 7  ;;  %v5103_v10 = vld [vmem:[#allocation3 + $0x2e] sm:$0x1] }
 0x52c   :  { %v8996_v5 = vor.u32 %v9861_v49, %v8995_v61  ;;  %v9857_v9 = vld [vmem:[#allocation4 + $0xd44] sm:$0xf0]  ;;  %v10465_v61 = vunpack.i.h.bf16 %v12110_v63  ;;  %v8971_v49 = vld [vmem:[#allocation4 + $0xd30] sm:$0xf] }
 0x52d   :  { %5609 = vmatpush.bf16.msra.mxu1 %v8696_v4  ;;  %6087 = vmatpush.bf16.msrb.mxu0 %v8876_v45  ;;  %v8980_v4 = vor.u32 %v9857_v9, %v8979_v56  ;;  %v8764_v45 = vor.u32 %v9803_v21, %v8763_v33  ;;  %v5108_v25 = vsel %vm2261_vm14, %v5103_v10, %v5106_v53  ;;  %v8827_v26 = vld [vmem:[#allocation4 + $0xc10] sm:$0xf]  ;;  %v4472_v56 = vpop.f32.mrf.mxu2  ;;  %v9844_v53 = vld [vmem:[#allocation4 + $0xce4] sm:$0xf]  ;;  %v8933_v33 = vld [vmem:[#allocation4 + $0xce8] sm:$0xf0] }
 0x52e   :  { %v8972_v63 = vor.u32 %v9855_v40, %v8971_v49  ;;  %v8828_v9 = vor.u32 %v9819_v32, %v8827_v26  ;;  %v9808_v21 = vld [vmem:[#allocation4 + $0xbc4] sm:$0xf]  ;;  %v9817_v10 = vld [vmem:[#allocation4 + $0xc04] sm:$0xf0]  ;;  %v9005_v49 = vld [vmem:[#allocation4 + $0xd78] sm:$0xf0] }
 0x52f   :  { %5564 = vmatpush.bf16.msra.mxu3 %v8804_v62  ;;  %v10486_v62 = vpack.i.bf16 %v6228_v34, %v6204_v31  ;;  %6102 = vmatpush.bf16.msrb.mxu2 %v8924_v36  ;;  %v8891_v36 = vld [vmem:[#allocation4 + $0xc90] sm:$0xf]  ;;  %v5134_v31 = vsel %vm1034_vm11, %v5108_v25, %v10465_v61  ;;  %v9812_v34 = vld [vmem:[#allocation4 + $0xbe4] sm:$0xf]  ;;  %v8789_v61 = vld [vmem:[#allocation4 + $0xbc8] sm:$0xf0] }
 0x530   :  { %5584 = vmatmul.bf16.vlgmr.msra.gmra.mxu0 %v12124_v50  ;;  %5610 = vmatmul.bf16.vlgmr.msra.gmra.mxu1 %v12122_v11  ;;  %v12143_v3 = vpack.c.bf16 %v5134_v31, %v5134_v31  ;;  %v9846_v50 = vld [vmem:[#allocation4 + $0xcf4] sm:$0xf]  ;;  %v8808_v11 = vor.u32 %v9812_v34, %v8805_v51  ;;  %v8925_v25 = vld [vmem:[#allocation4 + $0xcd8] sm:$0xf0] }
 0x531   :  { %6113 = vmatpush.bf16.msrb.mxu1 %v9004_v41  ;;  %10487 = vrot.lane.b32.xlu2 %v10486_v62, %s10673_s26  ;;  %v9823_v41 = vld [vmem:[#allocation4 + $0xc34] sm:$0xf0]  ;;  %v9853_v62 = vld [vmem:[#allocation4 + $0xd24] sm:$0xf0]  ;;  %v4485_v57 = vpop.f32.mrf.mxu1  ;;  %v8944_v19 = vor.u32 %v9846_v50, %v8941_v0  ;;  %v9826_v51 = vld [vmem:[#allocation4 + $0xc54] sm:$0xf] }
 0x532   :  { %6088 = vmatpush.bf16.msrb.mxu0 %v8868_v55  ;;  %v8844_v1 = vor.u32 %v9823_v41, %v8843_v42  ;;  %v8877_v42 = vld [vmem:[#allocation4 + $0xc78] sm:$0xf0]  ;;  %v9862_v41 = vld [vmem:[#allocation4 + $0xd74] sm:$0xf] }
 0x533   :  { %5565 = vmatpush.bf16.msra.mxu3 %v8796_v20  ;;  %v3935_v20 = vpop.f32.mrf.mxu3  ;;  %6103 = vmatpush.bf16.msrb.mxu2 %v8916_v30  ;;  %v9858_v50 = vld [vmem:[#allocation4 + $0xd54] sm:$0xf]  ;;  %v8989_v0 = vld [vmem:[#allocation4 + $0xd58] sm:$0xf0] }
 0x534   :  { %v3936_v8 = vadd.f32 %v3935_v20, %v12100_v52  ;;  %v4409_v52 = vpop.f32.mrf.mxu0  ;;  %v8909_v26 = vld [vmem:[#allocation4 + $0xcb8] sm:$0xf0]  ;;  %v9802_v32 = vld [vmem:[#allocation4 + $0xb94] sm:$0xf] }
 0x535   :  { %6114 = vmatpush.bf16.msrb.mxu1 %v8996_v5  ;;  %v8816_v5 = vor.u32 %v9814_v23, %v8813_v22  ;;  %v9842_v52 = vld [vmem:[#allocation4 + $0xcd4] sm:$0xf]  ;;  %v8792_v22 = vor.u32 %v9808_v21, %v8789_v61  ;;  %v8901_v21 = vld [vmem:[#allocation4 + $0xca8] sm:$0xf0]  ;;  %v8845_v61 = vld [vmem:[#allocation4 + $0xc38] sm:$0xf0] }
 0x536   :  { %6089 = vmatpush.bf16.msrb.mxu0 %v8860_v48  ;;  %v12136_v6 = vadd.f32 %v3936_v8, %v12087_v13  ;;  %v9835_v13 = vld [vmem:[#allocation4 + $0xc94] sm:$0xf0]  ;;  %v8955_v48 = vld [vmem:[#allocation4 + $0xd10] sm:$0xf]  ;;  %v8819_v8 = vld [vmem:[#allocation4 + $0xc00] sm:$0xf]  ;;  %v8928_v31 = vor.u32 %v9842_v52, %v8925_v25 }
 0x537   :  { %5566 = vmatpush.bf16.msra.mxu3 %v8788_v14  ;;  %v8755_v14 = vld [vmem:[#allocation4 + $0xb80] sm:$0xf]  ;;  %6104 = vmatpush.bf16.msrb.mxu2 %v8908_v29  ;;  %v8892_v38 = vor.u32 %v9835_v13, %v8891_v36  ;;  %v8820_v40 = vor.u32 %v9817_v10, %v8819_v8  ;;  %v9008_v36 = vor.u32 %v9862_v41, %v9005_v49  ;;  %v9828_v13 = vld [vmem:[#allocation4 + $0xc64] sm:$0xf]  ;;  %v5642_v10 = vld [vmem:[#allocation3 + $0x32] sm:$0x1] }
 0x538   :  { %v8756_v39 = vor.u32 %v9801_v35, %v8755_v14  ;;  %v9854_v41 = vld [vmem:[#allocation4 + $0xd34] sm:$0xf]  ;;  %v8973_v49 = vld [vmem:[#allocation4 + $0xd38] sm:$0xf0] }
 0x539   :  { %6115 = vmatpush.bf16.msrb.mxu1 %v8988_v43  ;;  %v9851_v43 = vld [vmem:[#allocation4 + $0xd14] sm:$0xf0] }
 0x53a   :  { %6090 = vmatpush.bf16.msrb.mxu0 %v8852_v37  ;;  %v8956_v29 = vor.u32 %v9851_v43, %v8955_v48  ;;  %v9849_v37 = vld [vmem:[#allocation4 + $0xd04] sm:$0xf0]  ;;  %v9824_v48 = vld [vmem:[#allocation4 + $0xc44] sm:$0xf]  ;;  %v8853_v43 = vld [vmem:[#allocation4 + $0xc48] sm:$0xf0] }
 0x53b   :  { %5567 = vmatpush.bf16.msra.mxu3 %v8780_v24  ;;  %v3937_v55 = vpop.f32.mrf.mxu3  ;;  %6105 = vmatpush.bf16.msrb.mxu2 %v8900_v27  ;;  %v8963_v24 = vld [vmem:[#allocation4 + $0xd20] sm:$0xf]  ;;  %v8948_v14 = vor.u32 %v9849_v37, %v8947_v58  ;;  %v4487_v27 = vpop.f32.mrf.mxu1  ;;  %v8856_v8 = vor.u32 %v9824_v48, %v8853_v43  ;;  %v8757_v37 = vld [vmem:[#allocation4 + $0xb88] sm:$0xf0]  ;;  %v8957_v48 = vld [vmem:[#allocation4 + $0xd18] sm:$0xf0] }
 0x53c   :  { %v8964_v30 = vor.u32 %v9853_v62, %v8963_v24  ;;  %v4459_v54 = vpop.f32.mrf.mxu0  ;;  %v9840_v55 = vld [vmem:[#allocation4 + $0xcc4] sm:$0xf]  ;;  %v9000_v62 = vor.u32 %v9860_v46, %v8997_v28  ;;  %v5631_v27 = vld [vmem:[#allocation3 + $0x70] sm:$0x1] }
 0x53d   :  { %6116 = vmatpush.bf16.msrb.mxu1 %v8980_v4  ;;  %v4473_v20 = vadd.f32 %v4472_v56, %v4459_v54  ;;  %v9830_v4 = vld [vmem:[#allocation4 + $0xc74] sm:$0xf]  ;;  %v9804_v24 = vld [vmem:[#allocation4 + $0xba4] sm:$0xf]  ;;  %v8864_v54 = vor.u32 %v9826_v51, %v8861_v12  ;;  %v8981_v56 = vld [vmem:[#allocation4 + $0xd48] sm:$0xf0] }
 0x53e   :  { %6091 = vmatpush.bf16.msrb.mxu0 %v8844_v1  ;;  %v8880_v35 = vor.u32 %v9830_v4, %v8877_v42  ;;  %v8869_v1 = vld [vmem:[#allocation4 + $0xc68] sm:$0xf0]  ;;  %v9822_v42 = vld [vmem:[#allocation4 + $0xc34] sm:$0xf]  ;;  %v9832_v12 = vld [vmem:[#allocation4 + $0xc84] sm:$0xf] }
 0x53f   :  { %5568 = vmatpush.bf16.msra.mxu3 %v8772_v60  ;;  %6106 = vmatpush.bf16.msrb.mxu2 %v8892_v38  ;;  %v8797_v60 = vld [vmem:[#allocation4 + $0xbd8] sm:$0xf0]  ;;  %v12146_v59 = vadd.f32 %v4485_v57, %v4473_v20  ;;  %v8872_v34 = vor.u32 %v9828_v13, %v8869_v1  ;;  %v8776_v57 = vor.u32 %v9804_v24, %v8773_v15  ;;  %v9877_v13 = vld [vmem:[#allocation4 + $0xde4] sm:$0xf0]  ;;  %v8885_v15 = vld [vmem:[#allocation4 + $0xc88] sm:$0xf0] }
 0x540   :  { %v8800_v18 = vor.u32 %v9810_v47, %v8797_v60  ;;  %v8976_v1 = vor.u32 %v9854_v41, %v8973_v49  ;;  %v9051_v43 = vld [vmem:[#allocation4 + $0xdd0] sm:$0xf]  ;;  %v9895_v41 = vld [vmem:[#allocation4 + $0xe74] sm:$0xf0]  ;;  %v9873_v49 = vld [vmem:[#allocation4 + $0xdc4] sm:$0xf0] }
 0x541   :  { %6117 = vmatpush.bf16.msrb.mxu1 %v8972_v63  ;;  %v8781_v63 = vld [vmem:[#allocation4 + $0xbb8] sm:$0xf0] }
 0x542   :  { %6092 = vmatpush.bf16.msrb.mxu0 %v8836_v44  ;;  %v8784_v38 = vor.u32 %v9806_v16, %v8781_v63  ;;  %v12153_v25 = vpop.permute.xlu2 %10472  ;;  %v9820_v63 = vld [vmem:[#allocation4 + $0xc24] sm:$0xf] }
 0x543   :  { %5569 = vmatpush.bf16.msra.mxu3 %v8764_v45  ;;  %6107 = vmatpush.bf16.msrb.mxu2 %v8884_v17  ;;  %v8936_v45 = vor.u32 %v9844_v53, %v8933_v33  ;;  %v8992_v17 = vor.u32 %v9858_v50, %v8989_v0  ;;  %v9836_v33 = vld [vmem:[#allocation4 + $0xca4] sm:$0xf]  ;;  %v9195_v0 = vld [vmem:[#allocation4 + $0xef0] sm:$0xf] }
 0x544   :  { %v4461_v23 = vpop.f32.mrf.mxu0 }
 0x545   :  { %6118 = vmatpush.bf16.msrb.mxu1 %v8964_v30  ;;  %v9838_v30 = vld [vmem:[#allocation4 + $0xcb4] sm:$0xf]  ;;  %v8848_v23 = vor.u32 %v9822_v42, %v8845_v61 }
 0x546   :  { %6093 = vmatpush.bf16.msrb.mxu0 %v8828_v9  ;;  %v8912_v60 = vor.u32 %v9838_v30, %v8909_v26  ;;  %v5643_v9 = vld [vmem:[#allocation3 + $0x72] sm:$0x1]  ;;  %v9911_v30 = vld [vmem:[#allocation4 + $0xef4] sm:$0xf0] }
 0x547   :  { %5570 = vmatpush.bf16.msra.mxu3 %v8756_v39  ;;  %6152 = vmatpush.bf16.msra.mxu2 %v8944_v19  ;;  %v4474_v39 = vpop.f32.mrf.mxu2  ;;  %v9856_v19 = vld [vmem:[#allocation4 + $0xd44] sm:$0xf]  ;;  %v5645_v53 = vrot.slane %v5643_v9, 7  ;;  %v9196_v9 = vor.u32 %v9911_v30, %v9195_v0  ;;  %v9891_v0 = vld [vmem:[#allocation4 + $0xe54] sm:$0xf0] }
 0x548   :  { %v8984_v4 = vor.u32 %v9856_v19, %v8981_v56  ;;  %v9869_v30 = vld [vmem:[#allocation4 + $0xda4] sm:$0xf0] }
 0x549   :  { %6119 = vmatpush.bf16.msrb.mxu1 %v8956_v29  ;;  %v9800_v29 = vld [vmem:[#allocation4 + $0xb84] sm:$0xf]  ;;  %v5647_v52 = vsel %vm2261_vm14, %v5642_v10, %v5645_v53 }
 0x54a   :  { %5571 = vmatmul.bf16.vlgmr.msra.gmra.mxu3 %v12143_v3  ;;  %6094 = vmatpush.bf16.msrb.mxu0 %v8820_v40  ;;  %v9879_v40 = vld [vmem:[#allocation4 + $0xdf4] sm:$0xf0]  ;;  %v8760_v16 = vor.u32 %v9800_v29, %v8757_v37  ;;  %v9909_v29 = vld [vmem:[#allocation4 + $0xee4] sm:$0xf0]  ;;  %v8821_v37 = vld [vmem:[#allocation4 + $0xc08] sm:$0xf0] }
 0x54b   :  { %5615 = vmatpush.bf16.msrb.mxu3 %v8816_v5  ;;  %6153 = vmatpush.bf16.msra.mxu2 %v8936_v45  ;;  %v8917_v5 = vld [vmem:[#allocation4 + $0xcc8] sm:$0xf0]  ;;  %v9067_v45 = vld [vmem:[#allocation4 + $0xdf0] sm:$0xf] }
 0x54c   :  { %v8920_v44 = vor.u32 %v9840_v55, %v8917_v5  ;;  %v9068_v39 = vor.u32 %v9879_v40, %v9067_v45  ;;  %v5630_v5 = vld [vmem:[#allocation3 + $0x30] sm:$0x1]  ;;  %v10478_v56 = vpop.permute.xlu0 %10477 }
 0x54d   :  { %6120 = vmatpush.bf16.msrb.mxu1 %v8948_v14  ;;  %v4446_v47 = vpop.f32.mrf.mxu3  ;;  %v9834_v14 = vld [vmem:[#allocation4 + $0xc94] sm:$0xf]  ;;  %v10479_v53 = vunpack.i.l.bf16 %v10478_v56 }
 0x54e   :  { %6139 = vmatpush.bf16.msra.mxu0 %v8880_v35  ;;  %v4447_v20 = vadd.f32 %v4446_v47, %v12132_v7  ;;  %v8904_v7 = vor.u32 %v9836_v33, %v8901_v21  ;;  %v10474_v35 = vunpack.i.l.bf16 %v12153_v25  ;;  %v9875_v47 = vld [vmem:[#allocation4 + $0xdd4] sm:$0xf0]  ;;  %v9187_v21 = vld [vmem:[#allocation4 + $0xee0] sm:$0xf] }
 0x54f   :  { %5616 = vmatpush.bf16.msrb.mxu3 %v8808_v11  ;;  %6154 = vmatpush.bf16.msra.mxu2 %v8928_v31  ;;  %v8765_v11 = vld [vmem:[#allocation4 + $0xb98] sm:$0xf0]  ;;  %v8837_v31 = vld [vmem:[#allocation4 + $0xc28] sm:$0xf0]  ;;  %v9052_v42 = vor.u32 %v9875_v47, %v9051_v43 }
 0x550   :  { %v12150_v58 = vadd.f32 %v4447_v20, %v12107_v2  ;;  %v8893_v2 = vld [vmem:[#allocation4 + $0xc98] sm:$0xf0]  ;;  %v5695_v28 = vsel %vm1034_vm11, %v5647_v52, %v10474_v35  ;;  %v8840_v50 = vor.u32 %v9820_v63, %v8837_v31  ;;  %v10480_v20 = vunpack.i.h.bf16 %v10478_v56  ;;  %v9927_v35 = vld [vmem:[#allocation4 + $0xf74] sm:$0xf0]  ;;  %v9123_v31 = vld [vmem:[#allocation4 + $0xe60] sm:$0xf] }
 0x551   :  { %6165 = vmatpush.bf16.msra.mxu1 %v9008_v36  ;;  %v9059_v36 = vld [vmem:[#allocation4 + $0xde0] sm:$0xf]  ;;  %v8896_v55 = vor.u32 %v9834_v14, %v8893_v2  ;;  %v12157_v24 = vpack.c.bf16 %v5695_v28, %v5695_v28  ;;  %v9188_v14 = vor.u32 %v9909_v29, %v9187_v21  ;;  %v9259_v2 = vld [vmem:[#allocation4 + $0xf70] sm:$0xf]  ;;  %v9867_v29 = vld [vmem:[#allocation4 + $0xd94] sm:$0xf0] }
 0x552   :  { %6140 = vmatpush.bf16.msra.mxu0 %v8872_v34  ;;  %v9852_v34 = vld [vmem:[#allocation4 + $0xd24] sm:$0xf]  ;;  %v9260_v63 = vor.u32 %v9927_v35, %v9259_v2  ;;  %v9865_v2 = vld [vmem:[#allocation4 + $0xd84] sm:$0xf0]  ;;  %v9099_v35 = vld [vmem:[#allocation4 + $0xe30] sm:$0xf] }
 0x553   :  { %5617 = vmatpush.bf16.msrb.mxu3 %v8800_v18  ;;  %6155 = vmatpush.bf16.msra.mxu2 %v8920_v44  ;;  %v8768_v18 = vor.u32 %v9802_v32, %v8765_v11  ;;  %v5654_v44 = vld [vmem:[#allocation3 + $0x34] sm:$0x1]  ;;  %v8888_v11 = vor.u32 %v9832_v12, %v8885_v15  ;;  %v5667_v15 = vld [vmem:[#allocation3 + $0x76] sm:$0x1] }
 0x554   :  { %v9818_v32 = vld [vmem:[#allocation4 + $0xc14] sm:$0xf]  ;;  %6108 = vmatmul.bf16.vlgmr.msrb.gmra.mxu2 %v12157_v24 }
 0x555   :  { %6166 = vmatpush.bf16.msra.mxu1 %v9000_v62  ;;  %v4448_v46 = vpop.f32.mrf.mxu3  ;;  %v5633_v62 = vrot.slane %v5631_v27, 7  ;;  %v9179_v27 = vld [vmem:[#allocation4 + $0xed0] sm:$0xf] }
 0x556   :  { %6141 = vmatpush.bf16.msra.mxu0 %v8864_v54  ;;  %v8829_v54 = vld [vmem:[#allocation4 + $0xc18] sm:$0xf0]  ;;  %v9871_v46 = vld [vmem:[#allocation4 + $0xdb4] sm:$0xf0] }
 0x557   :  { %5618 = vmatpush.bf16.msrb.mxu3 %v8792_v22  ;;  %6156 = vmatpush.bf16.msra.mxu2 %v8912_v60  ;;  %v5655_v22 = vld [vmem:[#allocation3 + $0x74] sm:$0x1]  ;;  %v5635_v60 = vsel %vm2261_vm14, %v5630_v5, %v5633_v62  ;;  %v8832_v33 = vor.u32 %v9818_v32, %v8829_v54  ;;  %v9925_v5 = vld [vmem:[#allocation4 + $0xf64] sm:$0xf0]  ;;  %v9027_v62 = vld [vmem:[#allocation4 + $0xda0] sm:$0xf] }
 0x558   :  { %v5657_v51 = vrot.slane %v5655_v22, 7  ;;  %v5694_v45 = vsel %vm1034_vm11, %v5635_v60, %v10479_v53  ;;  %v9907_v22 = vld [vmem:[#allocation4 + $0xed4] sm:$0xf0]  ;;  %v9243_v32 = vld [vmem:[#allocation4 + $0xf50] sm:$0xf]  ;;  %v9028_v60 = vor.u32 %v9869_v30, %v9027_v62 }
 0x559   :  { %6167 = vmatpush.bf16.msra.mxu1 %v8992_v17  ;;  %v9850_v17 = vld [vmem:[#allocation4 + $0xd14] sm:$0xf]  ;;  %v12167_v52 = vpack.c.bf16 %v5694_v45, %v5694_v45  ;;  %v9180_v28 = vor.u32 %v9907_v22, %v9179_v27  ;;  %v9923_v54 = vld [vmem:[#allocation4 + $0xf54] sm:$0xf0]  ;;  %v9107_v53 = vld [vmem:[#allocation4 + $0xe40] sm:$0xf] }
 0x55a   :  { %6142 = vmatpush.bf16.msra.mxu0 %v8856_v8  ;;  %v5659_v19 = vsel %vm2261_vm14, %v5654_v44, %v5657_v51  ;;  %v9043_v8 = vld [vmem:[#allocation4 + $0xdc0] sm:$0xf]  ;;  %v8960_v10 = vor.u32 %v9850_v17, %v8957_v48  ;;  %v9903_v17 = vld [vmem:[#allocation4 + $0xeb4] sm:$0xf0]  ;;  %v5669_v48 = vrot.slane %v5667_v15, 7 }
 0x55b   :  { %5619 = vmatpush.bf16.msrb.mxu3 %v8784_v38  ;;  %6157 = vmatpush.bf16.msra.mxu2 %v8904_v7  ;;  %v8965_v38 = vld [vmem:[#allocation4 + $0xd28] sm:$0xf0]  ;;  %v5696_v61 = vsel %vm1034_vm11, %v5659_v19, %v10480_v20  ;;  %v9131_v7 = vld [vmem:[#allocation4 + $0xe70] sm:$0xf]  ;;  %v9244_v20 = vor.u32 %v9923_v54, %v9243_v32  ;;  %v9901_v45 = vld [vmem:[#allocation4 + $0xea4] sm:$0xf0] }
 0x55c   :  { %v8968_v26 = vor.u32 %v9852_v34, %v8965_v38  ;;  %v12165_v40 = vpack.c.bf16 %v5696_v61, %v5696_v61  ;;  %6095 = vmatmul.bf16.vlgmr.msrb.gmra.mxu0 %v12167_v52  ;;  %v9171_v34 = vld [vmem:[#allocation4 + $0xec0] sm:$0xf]  ;;  %v9905_v38 = vld [vmem:[#allocation4 + $0xec4] sm:$0xf0]  ;;  %v9019_v19 = vld [vmem:[#allocation4 + $0xd90] sm:$0xf] }
 0x55d   :  { %6168 = vmatpush.bf16.msra.mxu1 %v8984_v4  ;;  %v9848_v4 = vld [vmem:[#allocation4 + $0xd04] sm:$0xf]  ;;  %v9155_v61 = vld [vmem:[#allocation4 + $0xea0] sm:$0xf]  ;;  %v9897_v30 = vld [vmem:[#allocation4 + $0xe84] sm:$0xf0] }
 0x55e   :  { %6143 = vmatpush.bf16.msra.mxu0 %v8848_v23  ;;  %6121 = vmatmul.bf16.vlgmr.msrb.gmra.mxu1 %v12165_v40  ;;  %v9156_v22 = vor.u32 %v9901_v45, %v9155_v61  ;;  %v9219_v15 = vld [vmem:[#allocation4 + $0xf20] sm:$0xf]  ;;  %v9910_v54 = vld [vmem:[#allocation4 + $0xef4] sm:$0xf]  ;;  %v9913_v61 = vld [vmem:[#allocation4 + $0xf04] sm:$0xf0] }
 0x55f   :  { %5620 = vmatpush.bf16.msrb.mxu3 %v8776_v57  ;;  %v9060_v57 = vor.u32 %v9877_v13, %v9059_v36  ;;  %6158 = vmatpush.bf16.msra.mxu2 %v8896_v55  ;;  %v9132_v36 = vor.u32 %v9895_v41, %v9131_v7  ;;  %v9044_v13 = vor.u32 %v9873_v49, %v9043_v8  ;;  %v9251_v55 = vld [vmem:[#allocation4 + $0xf60] sm:$0xf]  ;;  %v10475_v49 = vunpack.i.h.bf16 %v12153_v25 }
 0x560   :  { %v9252_v44 = vor.u32 %v9925_v5, %v9251_v55  ;;  %v9091_v5 = vld [vmem:[#allocation4 + $0xe20] sm:$0xf] }
 0x561   :  { %6169 = vmatpush.bf16.msra.mxu1 %v8976_v1  ;;  %v9035_v1 = vld [vmem:[#allocation4 + $0xdb0] sm:$0xf] }
 0x562   :  { %6144 = vmatpush.bf16.msra.mxu0 %v8840_v50  ;;  %v9036_v12 = vor.u32 %v9871_v46, %v9035_v1  ;;  %v9115_v50 = vld [vmem:[#allocation4 + $0xe50] sm:$0xf] }
 0x563   :  { %5621 = vmatpush.bf16.msrb.mxu3 %v8768_v18  ;;  %v9816_v18 = vld [vmem:[#allocation4 + $0xc04] sm:$0xf]  ;;  %6159 = vmatpush.bf16.msra.mxu2 %v8888_v11  ;;  %v9163_v11 = vld [vmem:[#allocation4 + $0xeb0] sm:$0xf]  ;;  %v9116_v47 = vor.u32 %v9891_v0, %v9115_v50  ;;  %v9061_v50 = vld [vmem:[#allocation4 + $0xde8] sm:$0xf0] }
 0x564   :  { %v8824_v23 = vor.u32 %v9816_v18, %v8821_v37  ;;  %v9164_v8 = vor.u32 %v9903_v17, %v9163_v11  ;;  %v9921_v18 = vld [vmem:[#allocation4 + $0xf44] sm:$0xf0]  ;;  %v9139_v0 = vld [vmem:[#allocation4 + $0xe80] sm:$0xf]  ;;  %v9083_v17 = vld [vmem:[#allocation4 + $0xe10] sm:$0xf] }
 0x565   :  { %6170 = vmatpush.bf16.msra.mxu1 %v8968_v26  ;;  %v9172_v26 = vor.u32 %v9905_v38, %v9171_v34  ;;  %v9885_v34 = vld [vmem:[#allocation4 + $0xe24] sm:$0xf0] }
 0x566   :  { %6145 = vmatpush.bf16.msra.mxu0 %v8832_v33  ;;  %v9889_v33 = vld [vmem:[#allocation4 + $0xe44] sm:$0xf0]  ;;  %6160 = vmatmul.bf16.vlgmr.msra.gmra.mxu2 %v12157_v24  ;;  %v9878_v24 = vld [vmem:[#allocation4 + $0xdf4] sm:$0xf]  ;;  %v9092_v32 = vor.u32 %v9885_v34, %v9091_v5 }
 0x567   :  { %5622 = vmatpush.bf16.msrb.mxu3 %v8760_v16  ;;  %6663 = vmatpush.bf16.msrb.mxu2 %v9196_v9  ;;  %v4996_v9 = vpop.f32.mrf.mxu1  ;;  %v9108_v7 = vor.u32 %v9889_v33, %v9107_v53  ;;  %v9908_v53 = vld [vmem:[#allocation4 + $0xee4] sm:$0xf]  ;;  %v9189_v33 = vld [vmem:[#allocation4 + $0xee8] sm:$0xf0] }
 0x569   :  { %6171 = vmatpush.bf16.msra.mxu1 %v8960_v10  ;;  %v4970_v43 = vpop.f32.mrf.mxu0  ;;  %v9235_v10 = vld [vmem:[#allocation4 + $0xf40] sm:$0xf] }
 0x56a   :  { %5623 = vmatmul.bf16.vlgmr.msrb.gmra.mxu3 %v12143_v3  ;;  %v8949_v3 = vld [vmem:[#allocation4 + $0xd08] sm:$0xf0]  ;;  %6146 = vmatpush.bf16.msra.mxu0 %v8824_v23  ;;  %v9887_v23 = vld [vmem:[#allocation4 + $0xe34] sm:$0xf0] }
 0x56b   :  { %6126 = vmatpush.bf16.msra.mxu3 %v9068_v39  ;;  %v8952_v16 = vor.u32 %v9848_v4, %v8949_v3  ;;  %v9893_v39 = vld [vmem:[#allocation4 + $0xe64] sm:$0xf0]  ;;  %6664 = vmatpush.bf16.msrb.mxu2 %v9188_v14  ;;  %v5666_v4 = vld [vmem:[#allocation3 + $0x36] sm:$0x1]  ;;  %v9011_v3 = vld [vmem:[#allocation4 + $0xd80] sm:$0xf]  ;;  %v9020_v14 = vor.u32 %v9867_v29, %v9019_v19 }
 0x56c   :  { %v9124_v51 = vor.u32 %v9893_v39, %v9123_v31  ;;  %v5671_v27 = vsel %vm2261_vm14, %v5666_v4, %v5669_v48  ;;  %v9100_v31 = vor.u32 %v9887_v23, %v9099_v35  ;;  %v9012_v46 = vor.u32 %v9865_v2, %v9011_v3  ;;  %v9883_v48 = vld [vmem:[#allocation4 + $0xe14] sm:$0xf0]  ;;  %v9053_v19 = vld [vmem:[#allocation4 + $0xdd8] sm:$0xf0]  ;;  %v9872_v29 = vld [vmem:[#allocation4 + $0xdc4] sm:$0xf] }
 0x56d   :  { %6172 = vmatpush.bf16.msra.mxu1 %v8952_v16  ;;  %v4498_v21 = vpop.f32.mrf.mxu3  ;;  %v9227_v16 = vld [vmem:[#allocation4 + $0xf30] sm:$0xf]  ;;  %v5697_v39 = vsel %vm1034_vm11, %v5671_v27, %v10475_v49  ;;  %6147 = vmatmul.bf16.vlgmr.msra.gmra.mxu0 %v12167_v52  ;;  %v9203_v4 = vld [vmem:[#allocation4 + $0xf00] sm:$0xf]  ;;  %v9894_v49 = vld [vmem:[#allocation4 + $0xe74] sm:$0xf] }
 0x56e   :  { %6650 = vmatpush.bf16.msrb.mxu0 %v9132_v36  ;;  %v4499_v37 = vadd.f32 %v4498_v21, %v12146_v59  ;;  %v9236_v59 = vor.u32 %v9921_v18, %v9235_v10  ;;  %v9919_v36 = vld [vmem:[#allocation4 + $0xf34] sm:$0xf0]  ;;  %v9075_v21 = vld [vmem:[#allocation4 + $0xe00] sm:$0xf]  ;;  %v9926_v2 = vld [vmem:[#allocation4 + $0xf74] sm:$0xf] }
 0x56f   :  { %6127 = vmatpush.bf16.msra.mxu3 %v9060_v57  ;;  %6665 = vmatpush.bf16.msrb.mxu2 %v9180_v28  ;;  %v4983_v57 = vpop.f32.mrf.mxu2  ;;  %v9228_v28 = vor.u32 %v9919_v36, %v9227_v16  ;;  %v4998_v55 = vpop.f32.mrf.mxu1  ;;  %v9261_v35 = vld [vmem:[#allocation4 + $0xf78] sm:$0xf0]  ;;  %v9906_v23 = vld [vmem:[#allocation4 + $0xed4] sm:$0xf]  ;;  %v6206_v27 = vld [vmem:[#allocation3 + $0x7a] sm:$0x1] }
 0x570   :  { %v4984_v56 = vadd.f32 %v4983_v57, %v4970_v43  ;;  %v12176_v41 = vadd.f32 %v4499_v37, %v12136_v6  ;;  %v9147_v6 = vld [vmem:[#allocation4 + $0xe90] sm:$0xf]  ;;  %6173 = vmatmul.bf16.vlgmr.msra.gmra.mxu1 %v12165_v40  ;;  %v9197_v57 = vld [vmem:[#allocation4 + $0xef8] sm:$0xf0]  ;;  %v9140_v43 = vor.u32 %v9897_v30, %v9139_v0  ;;  %v9874_v40 = vld [vmem:[#allocation4 + $0xdd4] sm:$0xf] }
 0x571   :  { %6676 = vmatpush.bf16.msrb.mxu1 %v9260_v63  ;;  %v9899_v63 = vld [vmem:[#allocation4 + $0xe94] sm:$0xf0]  ;;  %v4972_v25 = vpop.f32.mrf.mxu0  ;;  %v9881_v37 = vld [vmem:[#allocation4 + $0xe04] sm:$0xf0]  ;;  %v9056_v45 = vor.u32 %v9874_v40, %v9053_v19  ;;  %v9181_v16 = vld [vmem:[#allocation4 + $0xed8] sm:$0xf0] }
 0x572   :  { %6651 = vmatpush.bf16.msrb.mxu0 %v9124_v51  ;;  %v9876_v51 = vld [vmem:[#allocation4 + $0xde4] sm:$0xf]  ;;  %v6205_v36 = vld [vmem:[#allocation3 + $0x3a] sm:$0x1]  ;;  %v9264_v25 = vor.u32 %v9926_v2, %v9261_v35  ;;  %v9184_v55 = vor.u32 %v9906_v23, %v9181_v16  ;;  %v9029_v0 = vld [vmem:[#allocation4 + $0xda8] sm:$0xf0] }
 0x573   :  { %6128 = vmatpush.bf16.msra.mxu3 %v9052_v42  ;;  %6666 = vmatpush.bf16.msrb.mxu2 %v9172_v26  ;;  %v12172_v42 = vadd.f32 %v4996_v9, %v4984_v56  ;;  %v12183_v26 = vpack.c.bf16 %v5697_v39, %v5697_v39  ;;  %v9064_v52 = vor.u32 %v9876_v51, %v9061_v50  ;;  %v9892_v39 = vld [vmem:[#allocation4 + $0xe64] sm:$0xf]  ;;  %v9253_v51 = vld [vmem:[#allocation4 + $0xf68] sm:$0xf0] }
 0x574   :  { %v9200_v56 = vor.u32 %v9910_v54, %v9197_v57  ;;  %v9868_v50 = vld [vmem:[#allocation4 + $0xda4] sm:$0xf]  ;;  %v9890_v54 = vld [vmem:[#allocation4 + $0xe54] sm:$0xf]  ;;  %v6194_v57 = vld [vmem:[#allocation3 + $0x78] sm:$0x1] }
 0x575   :  { %6677 = vmatpush.bf16.msrb.mxu1 %v9252_v44  ;;  %v4500_v38 = vpop.f32.mrf.mxu3  ;;  %v9917_v44 = vld [vmem:[#allocation4 + $0xf24] sm:$0xf0]  ;;  %v9900_v16 = vld [vmem:[#allocation4 + $0xea4] sm:$0xf] }
 0x576   :  { %6652 = vmatpush.bf16.msrb.mxu0 %v9116_v47  ;;  %v9220_v11 = vor.u32 %v9917_v44, %v9219_v15  ;;  %v9211_v47 = vld [vmem:[#allocation4 + $0xf10] sm:$0xf]  ;;  %v9904_v15 = vld [vmem:[#allocation4 + $0xec4] sm:$0xf]  ;;  %v9173_v44 = vld [vmem:[#allocation4 + $0xec8] sm:$0xf0] }
 0x577   :  { %6129 = vmatpush.bf16.msra.mxu3 %v9044_v13  ;;  %6667 = vmatpush.bf16.msrb.mxu2 %v9164_v8  ;;  %v9069_v13 = vld [vmem:[#allocation4 + $0xdf8] sm:$0xf0]  ;;  %v4985_v1 = vpop.f32.mrf.mxu2  ;;  %v9045_v8 = vld [vmem:[#allocation4 + $0xdc8] sm:$0xf0]  ;;  %v9176_v19 = vor.u32 %v9904_v15, %v9173_v44  ;;  %v9898_v15 = vld [vmem:[#allocation4 + $0xe94] sm:$0xf] }
 0x578   :  { %v9072_v62 = vor.u32 %v9878_v24, %v9069_v13  ;;  %v6208_v13 = vrot.slane %v6206_v27, 7  ;;  %v9204_v1 = vor.u32 %v9913_v61, %v9203_v4  ;;  %v9032_v4 = vor.u32 %v9868_v50, %v9029_v0  ;;  %v9149_v44 = vld [vmem:[#allocation4 + $0xe98] sm:$0xf0] }
 0x579   :  { %6678 = vmatpush.bf16.msrb.mxu1 %v9244_v20  ;;  %v9084_v20 = vor.u32 %v9883_v48, %v9083_v17  ;;  %v5022_v18 = vpop.f32.mrf.mxu0 }
 0x57a   :  { %6653 = vmatpush.bf16.msrb.mxu0 %v9108_v7  ;;  %v5048_v7 = vpop.f32.mrf.mxu1  ;;  %v6210_v5 = vsel %vm2261_vm14, %v6205_v36, %v6208_v13  ;;  %v9157_v36 = vld [vmem:[#allocation4 + $0xea8] sm:$0xf0] }
 0x57b   :  { %6130 = vmatpush.bf16.msra.mxu3 %v9036_v12  ;;  %6668 = vmatpush.bf16.msrb.mxu2 %v9156_v22  ;;  %v9148_v12 = vor.u32 %v9899_v63, %v9147_v6  ;;  %v9076_v22 = vor.u32 %v9881_v37, %v9075_v21  ;;  %v9048_v63 = vor.u32 %v9872_v29, %v9045_v8  ;;  %v9902_v21 = vld [vmem:[#allocation4 + $0xeb4] sm:$0xf]  ;;  %v9165_v29 = vld [vmem:[#allocation4 + $0xeb8] sm:$0xf0]  ;;  %v9888_v37 = vld [vmem:[#allocation4 + $0xe44] sm:$0xf] }
 0x57c   :  { %v9866_v8 = vld [vmem:[#allocation4 + $0xd94] sm:$0xf]  ;;  %v9168_v35 = vor.u32 %v9902_v21, %v9165_v29 }
 0x57d   :  { %6679 = vmatpush.bf16.msrb.mxu1 %v9236_v59  ;;  %v9192_v59 = vor.u32 %v9908_v53, %v9189_v33  ;;  %v6217_v33 = vld [vmem:[#allocation3 + $0x3c] sm:$0x1]  ;;  %v9914_v29 = vld [vmem:[#allocation4 + $0xf14] sm:$0xf] }
 0x57e   :  { %6654 = vmatpush.bf16.msrb.mxu0 %v9100_v31  ;;  %v9870_v31 = vld [vmem:[#allocation4 + $0xdb4] sm:$0xf] }
 0x57f   :  { %6131 = vmatpush.bf16.msra.mxu3 %v9028_v60  ;;  %6669 = vmatpush.bf16.msrb.mxu2 %v9148_v12  ;;  %v9915_v60 = vld [vmem:[#allocation4 + $0xf14] sm:$0xf0]  ;;  %v5035_v9 = vpop.f32.mrf.mxu2 }
 0x580   :  { %v9212_v10 = vor.u32 %v9915_v60, %v9211_v47  ;;  %v5036_v3 = vadd.f32 %v5035_v9, %v5022_v18  ;;  %v12189_v34 = vpop.permute.xlu1 %10482  ;;  %v9922_v47 = vld [vmem:[#allocation4 + $0xf54] sm:$0xf]  ;;  %v6218_v60 = vld [vmem:[#allocation3 + $0x7c] sm:$0x1]  ;;  %v6193_v9 = vld [vmem:[#allocation3 + $0x38] sm:$0x1] }
 0x581   :  { %6680 = vmatpush.bf16.msrb.mxu1 %v9228_v28  ;;  %v9037_v28 = vld [vmem:[#allocation4 + $0xdb8] sm:$0xf0]  ;;  %v10484_v12 = vunpack.i.l.bf16 %v12189_v34  ;;  %v5024_v30 = vpop.f32.mrf.mxu0  ;;  %v6220_v53 = vrot.slane %v6218_v60, 7  ;;  %v9896_v60 = vld [vmem:[#allocation4 + $0xe84] sm:$0xf] }
 0x582   :  { %6655 = vmatpush.bf16.msrb.mxu0 %v9092_v32  ;;  %v12186_v24 = vadd.f32 %v5048_v7, %v5036_v3  ;;  %v5050_v48 = vpop.f32.mrf.mxu1  ;;  %v9920_v3 = vld [vmem:[#allocation4 + $0xf44] sm:$0xf]  ;;  %v9237_v7 = vld [vmem:[#allocation4 + $0xf48] sm:$0xf0] }
 0x583   :  { %6132 = vmatpush.bf16.msra.mxu3 %v9020_v14  ;;  %6670 = vmatpush.bf16.msrb.mxu2 %v9140_v43  ;;  %v9133_v14 = vld [vmem:[#allocation4 + $0xe78] sm:$0xf0]  ;;  %v6258_v17 = vsel %vm1034_vm11, %v6210_v5, %v10484_v12  ;;  %v6222_v2 = vsel %vm2261_vm14, %v6217_v33, %v6220_v53  ;;  %v9152_v48 = vor.u32 %v9898_v15, %v9149_v44  ;;  %v9267_v15 = vld [vmem:[#allocation4 + $0xf80] sm:$0xf]  ;;  %v9929_v44 = vld [vmem:[#allocation4 + $0xf84] sm:$0xf0] }
 0x584   :  { %v9136_v6 = vor.u32 %v9894_v49, %v9133_v14  ;;  %v9117_v43 = vld [vmem:[#allocation4 + $0xe58] sm:$0xf0]  ;;  %v12193_v40 = vpack.c.bf16 %v6258_v17, %v6258_v17 }
 0x585   :  { %6681 = vmatpush.bf16.msrb.mxu1 %v9220_v11  ;;  %v9040_v11 = vor.u32 %v9870_v31, %v9037_v28  ;;  %v9120_v18 = vor.u32 %v9890_v54, %v9117_v43  ;;  %v9101_v28 = vld [vmem:[#allocation4 + $0xe38] sm:$0xf0]  ;;  %v9093_v54 = vld [vmem:[#allocation4 + $0xe28] sm:$0xf0] }
 0x586   :  { %6656 = vmatpush.bf16.msrb.mxu0 %v9084_v20  ;;  %v6196_v20 = vrot.slane %v6194_v57, 7  ;;  %6671 = vmatmul.bf16.vlgmr.msrb.gmra.mxu2 %v12193_v40  ;;  %v9229_v12 = vld [vmem:[#allocation4 + $0xf38] sm:$0xf0]  ;;  %v9221_v43 = vld [vmem:[#allocation4 + $0xf28] sm:$0xf0] }
 0x587   :  { %6133 = vmatpush.bf16.msra.mxu3 %v9012_v46  ;;  %6715 = vmatpush.bf16.msra.mxu2 %v9200_v56  ;;  %v9125_v46 = vld [vmem:[#allocation4 + $0xe68] sm:$0xf0]  ;;  %v5037_v38 = vpop.f32.mrf.mxu2  ;;  %v9245_v56 = vld [vmem:[#allocation4 + $0xf58] sm:$0xf0] }
 0x588   :  { %v9128_v32 = vor.u32 %v9892_v39, %v9125_v46  ;;  %v9248_v61 = vor.u32 %v9922_v47, %v9245_v56  ;;  %v6198_v14 = vsel %vm2261_vm14, %v6193_v9, %v6196_v20  ;;  %v9941_v47 = vld [vmem:[#allocation4 + $0xfe4] sm:$0xf0]  ;;  %v9882_v20 = vld [vmem:[#allocation4 + $0xe14] sm:$0xf]  ;;  %v9085_v53 = vld [vmem:[#allocation4 + $0xe18] sm:$0xf0] }
 0x589   :  { %6682 = vmatpush.bf16.msrb.mxu1 %v9212_v10  ;;  %v9021_v10 = vld [vmem:[#allocation4 + $0xd98] sm:$0xf0] }
 0x58a   :  { %6134 = vmatmul.bf16.vlgmr.msra.gmra.mxu3 %v12183_v26  ;;  %6657 = vmatpush.bf16.msrb.mxu0 %v9076_v22  ;;  %v9024_v13 = vor.u32 %v9866_v8, %v9021_v10  ;;  %v9213_v8 = vld [vmem:[#allocation4 + $0xf18] sm:$0xf0]  ;;  %v9307_v10 = vld [vmem:[#allocation4 + $0xfd0] sm:$0xf] }
 0x58b   :  { %6178 = vmatpush.bf16.msrb.mxu3 %v9072_v62  ;;  %6716 = vmatpush.bf16.msra.mxu2 %v9192_v59  ;;  %v9924_v62 = vld [vmem:[#allocation4 + $0xf64] sm:$0xf]  ;;  %v10488_v59 = vpop.permute.xlu2 %10487 }
 0x58c   :  { %v10490_v27 = vunpack.i.h.bf16 %v10488_v59  ;;  %v10489_v22 = vunpack.i.l.bf16 %v10488_v59 }
 0x58d   :  { %6683 = vmatpush.bf16.msrb.mxu1 %v9204_v1  ;;  %v5009_v49 = vpop.f32.mrf.mxu3  ;;  %v9864_v1 = vld [vmem:[#allocation4 + $0xd84] sm:$0xf] }
 0x58e   :  { %6702 = vmatpush.bf16.msra.mxu0 %v9136_v6  ;;  %v5010_v23 = vadd.f32 %v5009_v49, %v12172_v42  ;;  %v6259_v39 = vsel %vm1034_vm11, %v6222_v2, %v10490_v27  ;;  %v6257_v46 = vsel %vm1034_vm11, %v6198_v14, %v10489_v22  ;;  %v9886_v42 = vld [vmem:[#allocation4 + $0xe34] sm:$0xf]  ;;  %v9205_v49 = vld [vmem:[#allocation4 + $0xf08] sm:$0xf0]  ;;  %v9299_v14 = vld [vmem:[#allocation4 + $0xfc0] sm:$0xf] }
 0x58f   :  { %6179 = vmatpush.bf16.msrb.mxu3 %v9064_v52  ;;  %v9256_v52 = vor.u32 %v9924_v62, %v9253_v51  ;;  %6717 = vmatpush.bf16.msra.mxu2 %v9184_v55  ;;  %v9323_v55 = vld [vmem:[#allocation4 + $0xff0] sm:$0xf]  ;;  %v12204_v5 = vpack.c.bf16 %v6259_v39, %v6259_v39  ;;  %v12206_v38 = vpack.c.bf16 %v6257_v46, %v6257_v46  ;;  %v9918_v51 = vld [vmem:[#allocation4 + $0xf34] sm:$0xf]  ;;  %v9937_v2 = vld [vmem:[#allocation4 + $0xfc4] sm:$0xf0] }
 0x590   :  { %v12200_v31 = vadd.f32 %v5010_v23, %v12150_v58  ;;  %v9160_v62 = vor.u32 %v9900_v16, %v9157_v36  ;;  %v9943_v58 = vld [vmem:[#allocation4 + $0xff4] sm:$0xf0]  ;;  %v9104_v50 = vor.u32 %v9886_v42, %v9101_v28  ;;  %v9232_v30 = vor.u32 %v9918_v51, %v9229_v12  ;;  %v9291_v23 = vld [vmem:[#allocation4 + $0xfb0] sm:$0xf]  ;;  %v9283_v16 = vld [vmem:[#allocation4 + $0xfa0] sm:$0xf] }
 0x591   :  { %6728 = vmatpush.bf16.msra.mxu1 %v9264_v25  ;;  %v9013_v25 = vld [vmem:[#allocation4 + $0xd88] sm:$0xf0]  ;;  %v9324_v57 = vor.u32 %v9943_v58, %v9323_v55  ;;  %6658 = vmatmul.bf16.vlgmr.msrb.gmra.mxu0 %v12206_v38  ;;  %v9935_v27 = vld [vmem:[#allocation4 + $0xfb4] sm:$0xf0]  ;;  %v9933_v36 = vld [vmem:[#allocation4 + $0xfa4] sm:$0xf0]  ;;  %v10485_v51 = vunpack.i.h.bf16 %v12189_v34 }
 0x592   :  { %6703 = vmatpush.bf16.msra.mxu0 %v9128_v32  ;;  %6684 = vmatmul.bf16.vlgmr.msrb.gmra.mxu1 %v12204_v5  ;;  %v9016_v0 = vor.u32 %v9864_v1, %v9013_v25  ;;  %v9884_v32 = vld [vmem:[#allocation4 + $0xe24] sm:$0xf]  ;;  %v9292_v22 = vor.u32 %v9935_v27, %v9291_v23  ;;  %v9275_v25 = vld [vmem:[#allocation4 + $0xf90] sm:$0xf]  ;;  %v9931_v39 = vld [vmem:[#allocation4 + $0xf94] sm:$0xf0] }
 0x593   :  { %6180 = vmatpush.bf16.msrb.mxu3 %v9056_v45  ;;  %v9109_v45 = vld [vmem:[#allocation4 + $0xe48] sm:$0xf0]  ;;  %6718 = vmatpush.bf16.msra.mxu2 %v9176_v19  ;;  %v9096_v56 = vor.u32 %v9884_v32, %v9093_v54  ;;  %v6229_v42 = vld [vmem:[#allocation3 + $0x3e] sm:$0x1]  ;;  %v9928_v23 = vld [vmem:[#allocation4 + $0xf84] sm:$0xf] }
 0x594   :  { %v9112_v6 = vor.u32 %v9888_v37, %v9109_v45  ;;  %v9141_v19 = vld [vmem:[#allocation4 + $0xe88] sm:$0xf0]  ;;  %v9088_v37 = vor.u32 %v9882_v20, %v9085_v53 }
 0x595   :  { %6729 = vmatpush.bf16.msra.mxu1 %v9256_v52  ;;  %v5011_v17 = vpop.f32.mrf.mxu3  ;;  %v9916_v52 = vld [vmem:[#allocation4 + $0xf24] sm:$0xf]  ;;  %v9144_v21 = vor.u32 %v9896_v60, %v9141_v19  ;;  %v9077_v45 = vld [vmem:[#allocation4 + $0xe08] sm:$0xf0] }
 0x596   :  { %6704 = vmatpush.bf16.msra.mxu0 %v9120_v18  ;;  %v9224_v9 = vor.u32 %v9916_v52, %v9221_v43  ;;  %v9939_v18 = vld [vmem:[#allocation4 + $0xfd4] sm:$0xf0]  ;;  %v9938_v43 = vld [vmem:[#allocation4 + $0xfd4] sm:$0xf]  ;;  %v9301_v20 = vld [vmem:[#allocation4 + $0xfc8] sm:$0xf0] }
 0x597   :  { %6181 = vmatpush.bf16.msrb.mxu3 %v9048_v63  ;;  %v9240_v63 = vor.u32 %v9920_v3, %v9237_v7  ;;  %6719 = vmatpush.bf16.msra.mxu2 %v9168_v35  ;;  %v9308_v3 = vor.u32 %v9939_v18, %v9307_v10  ;;  %v9912_v7 = vld [vmem:[#allocation4 + $0xf04] sm:$0xf]  ;;  %v9293_v10 = vld [vmem:[#allocation4 + $0xfb8] sm:$0xf0]  ;;  %v9269_v27 = vld [vmem:[#allocation4 + $0xf88] sm:$0xf0] }
 0x598   :  { %v9208_v35 = vor.u32 %v9912_v7, %v9205_v49 }
 0x599   :  { %6730 = vmatpush.bf16.msra.mxu1 %v9248_v61  ;;  %v9880_v61 = vld [vmem:[#allocation4 + $0xe04] sm:$0xf] }
 0x59a   :  { %6705 = vmatpush.bf16.msra.mxu0 %v9112_v6  ;;  %v9080_v59 = vor.u32 %v9880_v61, %v9077_v45  ;;  %v9284_v6 = vor.u32 %v9933_v36, %v9283_v16  ;;  %v9932_v61 = vld [vmem:[#allocation4 + $0xfa4] sm:$0xf]  ;;  %v9285_v45 = vld [vmem:[#allocation4 + $0xfa8] sm:$0xf0] }
 0x59b   :  { %6182 = vmatpush.bf16.msrb.mxu3 %v9040_v11  ;;  %v9315_v11 = vld [vmem:[#allocation4 + $0xfe0] sm:$0xf]  ;;  %6720 = vmatpush.bf16.msra.mxu2 %v9160_v62  ;;  %v9288_v7 = vor.u32 %v9932_v61, %v9285_v45 }
 0x59c   :  { %v9316_v33 = vor.u32 %v9941_v47, %v9315_v11  ;;  %v9940_v11 = vld [vmem:[#allocation4 + $0xfe4] sm:$0xf]  ;;  %v9309_v47 = vld [vmem:[#allocation4 + $0xfd8] sm:$0xf0] }
 0x59d   :  { %6731 = vmatpush.bf16.msra.mxu1 %v9240_v63  ;;  %v5546_v1 = vpop.f32.mrf.mxu2  ;;  %v5533_v46 = vpop.f32.mrf.mxu0  ;;  %v9312_v19 = vor.u32 %v9938_v43, %v9309_v47  ;;  %v9946_v43 = vld [vmem:[%s12280_s6 + $0x10] sm:$0xff]  ;;  %v9956_v45 = vld [vmem:[%s12280_s6 + $0x60] sm:$0xff] }
 0x59e   :  { %6706 = vmatpush.bf16.msra.mxu0 %v9104_v50  ;;  %v5547_v55 = vadd.f32 %v5546_v1, %v5533_v46  ;;  %v5559_v62 = vpop.f32.mrf.mxu1  ;;  %v9942_v50 = vld [vmem:[#allocation4 + $0xff4] sm:$0xf] }
 0x59f   :  { %6183 = vmatpush.bf16.msrb.mxu3 %v9032_v4  ;;  %6721 = vmatpush.bf16.msra.mxu2 %v9152_v48  ;;  %v9216_v4 = vor.u32 %v9914_v29, %v9213_v8  ;;  %v9934_v8 = vld [vmem:[#allocation4 + $0xfb4] sm:$0xf] }
 0x5a0   :  { %v5560_v12 = vadd.f32 %v5559_v62, %v5547_v55 }
 0x5a1   :  { %6732 = vmatpush.bf16.msra.mxu1 %v9232_v30 }
 0x5a2   :  { %6707 = vmatpush.bf16.msra.mxu0 %v9096_v56 }
 0x5a3   :  { %6184 = vmatpush.bf16.msrb.mxu3 %v9024_v13  ;;  %6722 = vmatpush.bf16.msra.mxu2 %v9144_v21  ;;  %v6230_v13 = vld [vmem:[#allocation3 + $0x7e] sm:$0x1] }
 0x5a5   :  { %6733 = vmatpush.bf16.msra.mxu1 %v9224_v9  ;;  %v5548_v30 = vpop.f32.mrf.mxu2  ;;  %v5535_v34 = vpop.f32.mrf.mxu0  ;;  %v9936_v9 = vld [vmem:[#allocation4 + $0xfc4] sm:$0xf] }
 0x5a6   :  { %6708 = vmatpush.bf16.msra.mxu0 %v9088_v37  ;;  %6723 = vmatmul.bf16.vlgmr.msra.gmra.mxu2 %v12193_v40  ;;  %v6232_v40 = vrot.slane %v6230_v13, 7  ;;  %v5561_v17 = vpop.f32.mrf.mxu1  ;;  %v9304_v29 = vor.u32 %v9936_v9, %v9301_v20  ;;  %v9296_v37 = vor.u32 %v9934_v8, %v9293_v10  ;;  %v9948_v34 = vld [vmem:[%s12280_s6 + $0x20] sm:$0xff]  ;;  %v9958_v10 = vld [vmem:[%s12280_s6 + $0x70] sm:$0xff] }
 0x5a7   :  { %6185 = vmatpush.bf16.msrb.mxu3 %v9016_v0  ;;  %v9325_v0 = vld [vmem:[#allocation4 + $0xff8] sm:$0xf0]  ;;  %v9944_v20 = vld [vmem:[%s12280_s6] sm:$0xff] }
 0x5a8   :  { %v6234_v58 = vsel %vm2261_vm14, %v6229_v42, %v6232_v40  ;;  %v9947_v17 = vld [vmem:[%s12280_s6 + $0x18] sm:$0xff] }
 0x5a9   :  { %6734 = vmatpush.bf16.msra.mxu1 %v9216_v4  ;;  %v6260_v32 = vsel %vm1034_vm11, %v6234_v58, %v10485_v51 }
 0x5aa   :  { %6186 = vmatmul.bf16.vlgmr.msrb.gmra.mxu3 %v12183_v26  ;;  %v9300_v26 = vor.u32 %v9937_v2, %v9299_v14  ;;  %6709 = vmatpush.bf16.msra.mxu0 %v9080_v59  ;;  %v6264_v48 = vpack.c.bf16 %v6260_v32, %v6260_v32  ;;  %v9930_v14 = vld [vmem:[#allocation4 + $0xf94] sm:$0xf]  ;;  %v9277_v2 = vld [vmem:[#allocation4 + $0xf98] sm:$0xf0] }
 0x5ab   :  { %6689 = vmatpush.bf16.msra.mxu3 %v9324_v57  ;;  %v9328_v57 = vor.u32 %v9942_v50, %v9325_v0  ;;  %v9951_v32 = vld [vmem:[%s12280_s6 + $0x38] sm:$0xff] }
 0x5ad   :  { %6735 = vmatpush.bf16.msra.mxu1 %v9208_v35  ;;  %6710 = vmatmul.bf16.vlgmr.msra.gmra.mxu0 %v12206_v38  ;;  %v5061_v63 = vpop.f32.mrf.mxu3  ;;  %v5598_v60 = vpop.f32.mrf.mxu2 }
 0x5ae   :  { %v5062_v28 = vadd.f32 %v5061_v63, %v12186_v24  ;;  %v9268_v24 = vor.u32 %v9929_v44, %v9267_v15  ;;  %v5585_v56 = vpop.f32.mrf.mxu0  ;;  %6900 = vmatpush.bf16.msrb.mxu0 %v9951_v32 }
 0x5af   :  { %6690 = vmatpush.bf16.msra.mxu3 %v9316_v33  ;;  %v5599_v53 = vadd.f32 %v5598_v60, %v5585_v56  ;;  %v5611_v33 = vpop.f32.mrf.mxu1  ;;  %v9945_v60 = vld [vmem:[%s12280_s6 + $0x8] sm:$0xff] }
 0x5b0   :  { %6736 = vmatmul.bf16.vlgmr.msra.gmra.mxu1 %v12204_v5  ;;  %v12217_v38 = vadd.f32 %v5062_v28, %v12176_v41  ;;  %v9276_v5 = vor.u32 %v9931_v39, %v9275_v25  ;;  %v9317_v41 = vld [vmem:[#allocation4 + $0xfe8] sm:$0xf0] }
 0x5b1   :  { %v9320_v52 = vor.u32 %v9940_v11, %v9317_v41  ;;  %v5612_v21 = vadd.f32 %v5611_v33, %v5599_v53  ;;  %v9959_v53 = vld [vmem:[%s12280_s6 + $0x78] sm:$0xff] }
 0x5b2   :  { %6913 = vmatpush.bf16.msrb.mxu2 %v9959_v53 }
 0x5b3   :  { %6691 = vmatpush.bf16.msra.mxu3 %v9308_v3 }
 0x5b5   :  { %v5063_v54 = vpop.f32.mrf.mxu3  ;;  %v5600_v18 = vpop.f32.mrf.mxu2 }
 0x5b6   :  { %v5587_v4 = vpop.f32.mrf.mxu0  ;;  %v9949_v54 = vld [vmem:[%s12280_s6 + $0x28] sm:$0xff]  ;;  %6914 = vmatpush.bf16.msrb.mxu2 %v9958_v10 }
 0x5b7   :  { %6692 = vmatpush.bf16.msra.mxu3 %v9300_v26  ;;  %v5613_v3 = vpop.f32.mrf.mxu1  ;;  %v9280_v26 = vor.u32 %v9930_v14, %v9277_v2  ;;  %v9957_v18 = vld [vmem:[%s12280_s6 + $0x68] sm:$0xff]  ;;  %v6756_v2 = vld [vmem:[#allocation12] sm:$0x3] }
 0x5b8   :  { %v9955_v3 = vld [vmem:[%s12280_s6 + $0x58] sm:$0xff] }
 0x5ba   :  { %6915 = vmatpush.bf16.msrb.mxu2 %v9957_v18 }
 0x5bb   :  { %6693 = vmatpush.bf16.msra.mxu3 %v9292_v22  ;;  %v9272_v22 = vor.u32 %v9928_v23, %v9269_v27  ;;  %v6758_v23 = vperm.slane %v6756_v2, 0 }
 0x5be   :  { %6916 = vmatpush.bf16.msrb.mxu2 %v9956_v45 }
 0x5bf   :  { %6694 = vmatpush.bf16.msra.mxu3 %v9284_v6 }
 0x5c2   :  { %6917 = vmatpush.bf16.msrb.mxu2 %v9955_v3 }
 0x5c3   :  { %6695 = vmatpush.bf16.msra.mxu3 %v9276_v5 }
 0x5c7   :  { %6696 = vmatpush.bf16.msra.mxu3 %v9268_v24 }
 0x5ca   :  { %6697 = vmatmul.bf16.vlgmr.msra.gmra.mxu3 %v6264_v48 }
 0x5cb   :  { %6741 = vmatpush.bf16.msrb.mxu3 %v9328_v57 }
 0x5cd   :  { %v5572_v49 = vpop.f32.mrf.mxu3 }
 0x5ce   :  { %v5573_v59 = vadd.f32 %v5572_v49, %v5560_v12  ;;  %v9954_v49 = vld [vmem:[%s12280_s6 + $0x50] sm:$0xff] }
 0x5cf   :  { %6742 = vmatpush.bf16.msrb.mxu3 %v9320_v52  ;;  %6918 = vmatpush.bf16.msrb.mxu2 %v9954_v49 }
 0x5d0   :  { %v5628_v35 = vadd.f32 %v5573_v59, %v12200_v31  ;;  %v9953_v59 = vld [vmem:[%s12280_s6 + $0x48] sm:$0xff] }
 0x5d3   :  { %6743 = vmatpush.bf16.msrb.mxu3 %v9312_v19  ;;  %6919 = vmatpush.bf16.msrb.mxu2 %v9953_v59 }
 0x5d5   :  { %v5574_v16 = vpop.f32.mrf.mxu3 }
 0x5d7   :  { %6744 = vmatpush.bf16.msrb.mxu3 %v9304_v29  ;;  %v6109_v13 = vpop.f32.mrf.mxu2 }
 0x5d9   :  { %v6096_v36 = vpop.f32.mrf.mxu0 }
 0x5da   :  { %v6110_v6 = vadd.f32 %v6109_v13, %v6096_v36 }
 0x5db   :  { %6745 = vmatpush.bf16.msrb.mxu3 %v9296_v37  ;;  %v6122_v40 = vpop.f32.mrf.mxu1 }
 0x5dc   :  { %v6123_v25 = vadd.f32 %v6122_v40, %v6110_v6 }
 0x5df   :  { %6746 = vmatpush.bf16.msrb.mxu3 %v9288_v7  ;;  %v6111_v31 = vpop.f32.mrf.mxu2 }
 0x5e1   :  { %v6098_v46 = vpop.f32.mrf.mxu0 }
 0x5e3   :  { %6747 = vmatpush.bf16.msrb.mxu3 %v9280_v26  ;;  %v6124_v28 = vpop.f32.mrf.mxu1 }
 0x5e7   :  { %6748 = vmatpush.bf16.msrb.mxu3 %v9272_v22  ;;  %v9952_v22 = vld [vmem:[%s12280_s6 + $0x40] sm:$0xff] }
 0x5e8   :  { %6920 = vmatpush.bf16.msrb.mxu2 %v9952_v22 }
 0x5e9   :  { %v6161_v55 = vpop.f32.mrf.mxu2 }
 0x5ea   :  { %6749 = vmatmul.bf16.vlgmr.msrb.gmra.mxu3 %v6264_v48  ;;  %v6148_v62 = vpop.f32.mrf.mxu0 }
 0x5eb   :  { %v6162_v51 = vadd.f32 %v6161_v55, %v6148_v62 }
 0x5ed   :  { %v5624_v1 = vpop.f32.mrf.mxu3  ;;  %v6174_v5 = vpop.f32.mrf.mxu1 }
 0x5ee   :  { %v5625_v63 = vadd.f32 %v5624_v1, %v5612_v21  ;;  %v6175_v12 = vadd.f32 %v6174_v5, %v6162_v51  ;;  %v10491_v5 = vld [vmem:[#allocation14] ss:$0 sm:$0xff] }
 0x5f0   :  { %v5629_v39 = vadd.f32 %v5625_v63, %v12217_v38  ;;  %v9950_v38 = vld [vmem:[%s12280_s6 + $0x30] sm:$0xff]  ;;  %s10688_s6 = smov [#allocation15]  }
 0x5f1   :  { %v6163_v58 = vpop.f32.mrf.mxu2  ;;  %6901 = vmatpush.bf16.msrb.mxu0 %v9950_v38  ;;  %s6933_s13 = sshll.u32 %s10688_s6, 4  ;;  %s6934_s13 = int_to_ptr.vmem [resolvable:$true] %s6933_s13 }
 0x5f2   :  { %v6150_v15 = vpop.f32.mrf.mxu0 }
 0x5f5   :  { %v5626_v42 = vpop.f32.mrf.mxu3  ;;  %v6176_v44 = vpop.f32.mrf.mxu1  ;;  %6902 = vmatpush.bf16.msrb.mxu0 %v9949_v54 }
 0x5f9   :  { %6903 = vmatpush.bf16.msrb.mxu0 %v9948_v34 }
 0x5fd   :  { %6904 = vmatpush.bf16.msrb.mxu0 %v9947_v17 }
 0x601   :  { %6905 = vmatpush.bf16.msrb.mxu0 %v9946_v43 }
 0x605   :  { %6906 = vmatpush.bf16.msrb.mxu0 %v9945_v60 }
 0x609   :  { %v6672_v57 = vpop.f32.mrf.mxu2  ;;  %6907 = vmatpush.bf16.msrb.mxu0 %v9944_v20 }
 0x60d   :  { %v6135_v50 = vpop.f32.mrf.mxu3 }
 0x60e   :  { %v6136_v0 = vadd.f32 %v6135_v50, %v6123_v25  ;;  %v6659_v41 = vpop.f32.mrf.mxu0 }
 0x60f   :  { %v6685_v11 = vpop.f32.mrf.mxu1  ;;  %v6673_v7 = vadd.f32 %v6672_v57, %v6659_v41 }
 0x610   :  { %v6191_v30 = vadd.f32 %v6136_v0, %v5628_v35 }
 0x611   :  { %v6674_v48 = vpop.f32.mrf.mxu2  ;;  %v6686_v14 = vadd.f32 %v6685_v11, %v6673_v7 }
 0x615   :  { %v6137_v24 = vpop.f32.mrf.mxu3 }
 0x616   :  { %v6661_v47 = vpop.f32.mrf.mxu0 }
 0x617   :  { %v6687_v52 = vpop.f32.mrf.mxu1 }
 0x629   :  { %v6724_v21 = vpop.f32.mrf.mxu2 }
 0x62a   :  { %v6711_v33 = vpop.f32.mrf.mxu0 }
 0x62b   :  { %v6725_v6 = vadd.f32 %v6724_v21, %v6711_v33 }
 0x62d   :  { %v6187_v19 = vpop.f32.mrf.mxu3  ;;  %v6737_v29 = vpop.f32.mrf.mxu1 }
 0x62e   :  { %v6188_v56 = vadd.f32 %v6187_v19, %v6175_v12  ;;  %v6738_v40 = vadd.f32 %v6737_v29, %v6725_v6 }
 0x630   :  { %v6192_v9 = vadd.f32 %v6188_v56, %v5629_v39  ;;  %v6759_v39 = vperm.slane %v6756_v2, 1 }
 0x631   :  { %v6726_v4 = vpop.f32.mrf.mxu2 }
 0x632   :  { %v6713_v37 = vpop.f32.mrf.mxu0 }
 0x635   :  { %v6189_v8 = vpop.f32.mrf.mxu3  ;;  %v6739_v61 = vpop.f32.mrf.mxu1 }
 0x64d   :  { %v6698_v35 = vpop.f32.mrf.mxu3 }
 0x64e   :  { %v6699_v26 = vadd.f32 %v6698_v35, %v6686_v14 }
 0x650   :  { %v6754_v27 = vadd.f32 %v6699_v26, %v6191_v30 }
 0x652   :  { %v6762_v16 = vadd.f32 %v6758_v23, %v6754_v27 }
 0x654   :  { %v6764_v36 = vmax.f32 %v6762_v16, 0.0 }
 0x655   :  { %v6700_v13 = vpop.f32.mrf.mxu3 }
 0x656   :  { %v6766_v1 = vpack.c.bf16 %v6764_v36, %v6764_v36 }
 0x658   :  { %6908 = vmatmul.bf16.vlgmr.msrb.gmra.mxu0 %v6766_v1 }
 0x66d   :  { %v6750_v63 = vpop.f32.mrf.mxu3 }
 0x66e   :  { %v6751_v25 = vadd.f32 %v6750_v63, %v6738_v40 }
 0x670   :  { %v6755_v46 = vadd.f32 %v6751_v25, %v6192_v9 }
 0x672   :  { %v6763_v31 = vadd.f32 %v6759_v39, %v6755_v46 }
 0x674   :  { %v6765_v42 = vmax.f32 %v6763_v31, 0.0 }
 0x675   :  { %v6752_v28 = vpop.f32.mrf.mxu3 }
 0x676   :  { %v6767_v55 = vpack.c.bf16 %v6765_v42, %v6765_v42 }
 0x678   :  { %6921 = vmatmul.bf16.vlgmr.msrb.gmra.mxu2 %v6767_v55 }
 0x6d5   :  { %v6909_v62 = vpop.f32.mrf.mxu0 }
 0x6d6   :  { %v6910_v12 = vadd.f32 %v10491_v5, %v6909_v62 }
 0x6dd   :  { %v6911_v51 = vpop.f32.mrf.mxu0 }
 0x6fb   :  { %v6922_v58 = vpop.f32.mrf.mxu2 }
 0x6fc   :  { %v6923_v15 = vadd.f32 %v6922_v58, %v6910_v12 }
 0x6fe   :  { %6927 = vst.msk [vmem:[#allocation15] sm:$0x3] %vm6926_vm15, %v6923_v15 }
 0x6ff   :  { %6938 = dma.vmem_to_hbm [thread:$0]  %s6934_s13, 32, %s6936_s7, [#allocation8]  }
 0x703   :  { %v6924_v44 = vpop.f32.mrf.mxu2 }
 0x704   :  { %10668 = dma.done.wait [#allocation8], 32  }
 0x705   :  { %10669 = vsyncadd [#allocation8], 4294967264 }
 0x706   :  { %6943 = vsyncpa [#allocation7], 1 }
 0x707   :  { %6944 = vsyncpa [#allocation10], 1 }
 0x708   :  { %6945 = vsyncpa [#allocation13], 1 }
 0x709   :  { %6946 = vsyncpa [#allocation8], 1 }
 0x70a   :  { %6947 = vsyncmov [#allocation5] }
 0x70d   :  { %s6948_s23 = vpop.sfrf %6947 }
 0x70e   :  { %p9393_p0 = scmp.ne.s32.totalorder %s6948_s23, 0 }
 0x710   :  { %6952 = shalt.err (%p9393_p0)  }

</bundles_post_ra>
